<compile_context>
chip_gen: v5e
topology: v5e:2x2
jax: 0.10.0
libtpu: 0.0.40
codegen_flags: <defaults>
</compile_context>

<pallas_src>
import functools

import jax
import jax.numpy as jnp
from jax.experimental import pallas as pl
from jax.experimental.pallas import tpu as pltpu


def _round_up(v, m):
    return (v + m - 1) // m * m


def _deep_head_kernel(x_ref, w1_ref, b1_ref, w2_ref, b2_ref, w3_ref, b3_ref,
                      w4_ref, b4_ref, o_ref, p1, p2, *, H, W, Wp):
    """Fused head for one batch element.

    x_ref : (H+2, Wp, Cin)  row-padded input; data cols [0:W), zeros elsewhere
    wN_ref: (3, 3, Cin, Cout) conv weights (HWIO); w4 is (Cm, Cout) 1x1
    b1..b3: (1, C) biases; b4: (Cout, 1)
    o_ref : (Cout, H*W)     lane-dense output tile
    p1, p2: VMEM scratch (H+2, Wp, Cm) padded intermediates (ping-pong)
    """
    HWp = H * Wp

    def conv3x3(src_ref, w_ref, b_ref):
        # SAME 3x3 conv as 9 full-width matmuls; dx realignment via roll.
        co = w_ref.shape[-1]
        acc = jnp.zeros((HWp, co), jnp.float32)
        for dy in range(3):
            rows = src_ref[dy:dy + H, :, :].reshape(HWp, -1)  # aligned (Wp%8==0)
            for dx in range(3):
                y = jnp.dot(rows, w_ref[dy, dx],
                            preferred_element_type=jnp.float32)
                shift = (1 - dx) % HWp          # realign tap offset dx-1
                if shift:
                    y = pltpu.roll(y, shift, axis=0)  # XLU sublane rotate
                acc = acc + y
        # Wrapped/padded columns are only ever fed zeros, so cols [0:W) are the
        # exact SAME-conv result; drop the rest with an aligned slice.
        return acc.reshape(H, Wp, co)[:, :W, :] + b_ref[...]

    def store_padded(dst, val):
        # Write the buffer exactly once per step, in aligned pieces:
        # zero border rows, zero right strip, then the data block.
        c = dst.shape[-1]
        dst[0] = jnp.zeros((Wp, c), jnp.float32)
        dst[H + 1] = jnp.zeros((Wp, c), jnp.float32)
        dst[1:1 + H, W:Wp, :] = jnp.zeros((H, Wp - W, c), jnp.float32)
        dst[1:1 + H, 0:W, :] = val

    h1 = jnp.maximum(conv3x3(x_ref, w1_ref, b1_ref), 0.0)
    store_padded(p1, h1)

    h2 = jnp.maximum(conv3x3(p1, w2_ref, b2_ref), 0.0)
    store_padded(p2, h2)

    # h3 is consumed directly by the 1x1 conv — no third padded buffer.
    h3 = jnp.maximum(conv3x3(p2, w3_ref, b3_ref), 0.0)          # (H, W, Cm)
    feat = h3.reshape(H * W, h3.shape[-1])                      # (HW, Cm)
    y = jnp.dot(feat, w4_ref[...], preferred_element_type=jnp.float32)  # (HW, Cout)
    # Lane-dense store: (Cout, HW) with HW a multiple of 128.
    o_ref[...] = jnp.transpose(y) + b4_ref[...]


def deep_head_module(x_nchw, params):
    """Forward pass of DeepHeadModule. x_nchw: (N, Cin, H, W) float32."""
    w1, b1, w2, b2, w3, b3, w4, b4 = params
    N, Cin, H, W = x_nchw.shape
    Cm = w1.shape[-1]
    Cout = w4.shape[-1]
    HW = H * W
    Wp = _round_up(W + 1, 8)   # >= W+1 zero columns on the right, sublane-aligned

    # Glue: NCHW -> NHWC, pad rows by 1 on each side, pad columns on the right
    # only (left SAME-padding is handled in-kernel via wrap into zero columns).
    x = jnp.transpose(x_nchw, (0, 2, 3, 1)).astype(jnp.float32)
    x_pad = jnp.pad(x, ((0, 0), (1, 1), (0, Wp - W), (0, 0)))

    b1r, b2r, b3r = (b.reshape(1, -1).astype(jnp.float32) for b in (b1, b2, b3))
    b4c = b4.reshape(-1, 1).astype(jnp.float32)

    kernel = functools.partial(_deep_head_kernel, H=H, W=W, Wp=Wp)

    # Explicit VMEM budget (double-buffered IO + weights + 2 scratch + live acts).
    vmem_est = 4 * (
        2 * (H + 2) * Wp * Cin
        + 2 * (9 * Cin * Cm + 2 * 9 * Cm * Cm + Cm * Cout + 3 * Cm + Cout)
        + 2 * Cout * HW
        + 2 * (H + 2) * Wp * Cm
        + 3 * H * Wp * Cm
    )
    vmem_limit = int(min(max(2 * vmem_est, 32 << 20), 64 << 20))

    out = pl.pallas_call(
        kernel,
        out_shape=jax.ShapeDtypeStruct((N, Cout, HW), jnp.float32),
        grid_spec=pltpu.PrefetchScalarGridSpec(
            num_scalar_prefetch=0,
            grid=(N,),
            in_specs=[
                pl.BlockSpec((None, H + 2, Wp, Cin), lambda n: (n, 0, 0, 0)),
                pl.BlockSpec((3, 3, Cin, Cm), lambda n: (0, 0, 0, 0)),
                pl.BlockSpec((1, Cm), lambda n: (0, 0)),
                pl.BlockSpec((3, 3, Cm, Cm), lambda n: (0, 0, 0, 0)),
                pl.BlockSpec((1, Cm), lambda n: (0, 0)),
                pl.BlockSpec((3, 3, Cm, Cm), lambda n: (0, 0, 0, 0)),
                pl.BlockSpec((1, Cm), lambda n: (0, 0)),
                pl.BlockSpec((Cm, Cout), lambda n: (0, 0)),
                pl.BlockSpec((Cout, 1), lambda n: (0, 0)),
            ],
            out_specs=pl.BlockSpec((None, Cout, HW), lambda n: (n, 0, 0)),
            scratch_shapes=[
                pltpu.VMEM((H + 2, Wp, Cm), jnp.float32),
                pltpu.VMEM((H + 2, Wp, Cm), jnp.float32),
            ],
        ),
        compiler_params=pltpu.CompilerParams(
            dimension_semantics=("parallel",),
            vmem_limit_bytes=vmem_limit),
    )(x_pad, w1, b1r, w2, b2r, w3, b3r, w4, b4c)

    # (N, Cout, H*W) -> NCHW is a pure reshape: no output transpose needed.
    return out.reshape(N, Cout, H, W)


def init_params(key, input_channels, output_channels):
    """Deterministic synthetic init. Weights are HWIO (kh, kw, Cin, Cout)."""
    mid = min(input_channels, 256)
    ks = jax.random.split(key, 8)
    scale = 0.1
    w1 = scale * jax.random.normal(ks[0], (3, 3, input_channels, mid), jnp.float32)
    b1 = scale * jax.random.normal(ks[1], (mid,), jnp.float32)
    w2 = scale * jax.random.normal(ks[2], (3, 3, mid, mid), jnp.float32)
    b2 = scale * jax.random.normal(ks[3], (mid,), jnp.float32)
    w3 = scale * jax.random.normal(ks[4], (3, 3, mid, mid), jnp.float32)
    b3 = scale * jax.random.normal(ks[5], (mid,), jnp.float32)
    w4 = scale * jax.random.normal(ks[6], (mid, output_channels), jnp.float32)
    b4 = scale * jax.random.normal(ks[7], (output_channels,), jnp.float32)
    return (w1, b1, w2, b2, w3, b3, w4, b4)


def _reference(x_nchw, params):
    """Pure-JAX reference using lax.conv (NHWC/HWIO)."""
    w1, b1, w2, b2, w3, b3, w4, b4 = params
    x = jnp.transpose(x_nchw, (0, 2, 3, 1))

    def conv(x, w, b, pad):
        y = jax.lax.conv_general_dilated(
            x, w, window_strides=(1, 1), padding=pad,
            dimension_numbers=("NHWC", "HWIO", "NHWC"))
        return y + b

    h = jax.nn.relu(conv(x, w1, b1, "SAME"))
    h = jax.nn.relu(conv(h, w2, b2, "SAME"))
    h = jax.nn.relu(conv(h, w3, b3, "SAME"))
    h = conv(h, w4[None, None], b4, "VALID")
    return jnp.transpose(h, (0, 3, 1, 2))


if __name__ == "__main__":
    key = jax.random.PRNGKey(0)
    k_x, k_p = jax.random.split(key)

    N, Cin, H, W = 2, 8, 16, 16
    Cout = 12

    x = jax.random.normal(k_x, (N, Cin, H, W), jnp.float32)
    params = init_params(k_p, Cin, Cout)

    out = jax.block_until_ready(deep_head_module(x, params))
    ref = jax.block_until_ready(_reference(x, params))

    assert out.shape == (N, Cout, H, W), out.shape
    assert jnp.allclose(out, ref, rtol=1e-3, atol=1e-3), float(
        jnp.max(jnp.abs(out - ref)))
    print("KERNEL_OK")
</pallas_src>

<mosaic_0001>
module attributes {stable_mosaic.version = 11 : i64} {
  func.func @_deep_head_kernel(%arg0: i32, %arg1: memref<1x18x24x8xf32, #tpu.memory_space<vmem>>, %arg2: memref<3x3x8x8xf32, #tpu.memory_space<vmem>>, %arg3: memref<1x8xf32, #tpu.memory_space<vmem>>, %arg4: memref<3x3x8x8xf32, #tpu.memory_space<vmem>>, %arg5: memref<1x8xf32, #tpu.memory_space<vmem>>, %arg6: memref<3x3x8x8xf32, #tpu.memory_space<vmem>>, %arg7: memref<1x8xf32, #tpu.memory_space<vmem>>, %arg8: memref<8x12xf32, #tpu.memory_space<vmem>>, %arg9: memref<12x1xf32, #tpu.memory_space<vmem>>, %arg10: memref<1x12x256xf32, #tpu.memory_space<vmem>>, %arg11: memref<18x24x8xf32, #tpu.memory_space<vmem>>, %arg12: memref<18x24x8xf32, #tpu.memory_space<vmem>>) attributes {dimension_semantics = [#tpu.dimension_semantics<parallel>], iteration_bounds = array<i64: 2>, scalar_prefetch = 0 : i64, scratch_operands = 2 : i64, tpu.core_type = #tpu.core_type<tc>, window_params = [{transform_indices = @transform_0, window_bounds = array<i64: 1, 18, 24, 8>}, {pipeline_mode = #tpu.pipeline_mode<synchronous>, transform_indices = @transform_1, window_bounds = array<i64: 3, 3, 8, 8>}, {pipeline_mode = #tpu.pipeline_mode<synchronous>, transform_indices = @transform_2, window_bounds = array<i64: 1, 8>}, {pipeline_mode = #tpu.pipeline_mode<synchronous>, transform_indices = @transform_3, window_bounds = array<i64: 3, 3, 8, 8>}, {pipeline_mode = #tpu.pipeline_mode<synchronous>, transform_indices = @transform_4, window_bounds = array<i64: 1, 8>}, {pipeline_mode = #tpu.pipeline_mode<synchronous>, transform_indices = @transform_5, window_bounds = array<i64: 3, 3, 8, 8>}, {pipeline_mode = #tpu.pipeline_mode<synchronous>, transform_indices = @transform_6, window_bounds = array<i64: 1, 8>}, {pipeline_mode = #tpu.pipeline_mode<synchronous>, transform_indices = @transform_7, window_bounds = array<i64: 8, 12>}, {pipeline_mode = #tpu.pipeline_mode<synchronous>, transform_indices = @transform_8, window_bounds = array<i64: 12, 1>}, {transform_indices = @transform_9, window_bounds = array<i64: 1, 12, 256>}]} {
    %cst = arith.constant 0.000000e+00 : f32
    %0 = vector.broadcast %cst : f32 to vector<384x8xf32>
    %c0 = arith.constant 0 : index
    %c0_0 = arith.constant 0 : index
    %c0_1 = arith.constant 0 : index
    %c0_2 = arith.constant 0 : index
    %1 = vector.load %arg1[%c0, %c0_0, %c0_1, %c0_2] : memref<1x18x24x8xf32, #tpu.memory_space<vmem>>, vector<1x16x24x8xf32>
    %2 = vector.shape_cast %1 : vector<1x16x24x8xf32> to vector<16x24x8xf32>
    %3 = vector.shape_cast %2 : vector<16x24x8xf32> to vector<384x8xf32>
    %c0_3 = arith.constant 0 : index
    %c0_4 = arith.constant 0 : index
    %c0_5 = arith.constant 0 : index
    %c0_6 = arith.constant 0 : index
    %4 = vector.load %arg2[%c0_3, %c0_4, %c0_5, %c0_6] : memref<3x3x8x8xf32, #tpu.memory_space<vmem>>, vector<1x1x8x8xf32>
    %5 = vector.shape_cast %4 : vector<1x1x8x8xf32> to vector<8x8xf32>
    %cst_7 = arith.constant dense<0.000000e+00> : vector<384x8xf32>
    %6 = tpu.matmul %3, %5, %cst_7 {dimension_numbers = #tpu.dot_dimension_numbers<[1], [0], [0], [1], [0, 0, 1, 1], [], []>} : vector<384x8xf32>, vector<8x8xf32>, vector<384x8xf32> -> vector<384x8xf32>
    %c1_i32 = arith.constant 1 : i32
    %7 = tpu.dynamic_rotate %6 by %c1_i32 dim 0 : vector<384x8xf32>, i32 -> vector<384x8xf32>
    %8 = arith.addf %0, %7 : vector<384x8xf32>
    %c0_8 = arith.constant 0 : index
    %c1 = arith.constant 1 : index
    %c0_9 = arith.constant 0 : index
    %c0_10 = arith.constant 0 : index
    %9 = vector.load %arg2[%c0_8, %c1, %c0_9, %c0_10] : memref<3x3x8x8xf32, #tpu.memory_space<vmem>>, vector<1x1x8x8xf32>
    %10 = vector.shape_cast %9 : vector<1x1x8x8xf32> to vector<8x8xf32>
    %cst_11 = arith.constant dense<0.000000e+00> : vector<384x8xf32>
    %11 = tpu.matmul %3, %10, %cst_11 {dimension_numbers = #tpu.dot_dimension_numbers<[1], [0], [0], [1], [0, 0, 1, 1], [], []>} : vector<384x8xf32>, vector<8x8xf32>, vector<384x8xf32> -> vector<384x8xf32>
    %12 = arith.addf %8, %11 : vector<384x8xf32>
    %c0_12 = arith.constant 0 : index
    %c2 = arith.constant 2 : index
    %c0_13 = arith.constant 0 : index
    %c0_14 = arith.constant 0 : index
    %13 = vector.load %arg2[%c0_12, %c2, %c0_13, %c0_14] : memref<3x3x8x8xf32, #tpu.memory_space<vmem>>, vector<1x1x8x8xf32>
    %14 = vector.shape_cast %13 : vector<1x1x8x8xf32> to vector<8x8xf32>
    %cst_15 = arith.constant dense<0.000000e+00> : vector<384x8xf32>
    %15 = tpu.matmul %3, %14, %cst_15 {dimension_numbers = #tpu.dot_dimension_numbers<[1], [0], [0], [1], [0, 0, 1, 1], [], []>} : vector<384x8xf32>, vector<8x8xf32>, vector<384x8xf32> -> vector<384x8xf32>
    %c383_i32 = arith.constant 383 : i32
    %16 = tpu.dynamic_rotate %15 by %c383_i32 dim 0 : vector<384x8xf32>, i32 -> vector<384x8xf32>
    %17 = arith.addf %12, %16 : vector<384x8xf32>
    %c0_16 = arith.constant 0 : index
    %c1_17 = arith.constant 1 : index
    %c0_18 = arith.constant 0 : index
    %c0_19 = arith.constant 0 : index
    %18 = vector.load %arg1[%c0_16, %c1_17, %c0_18, %c0_19] : memref<1x18x24x8xf32, #tpu.memory_space<vmem>>, vector<1x16x24x8xf32>
    %19 = vector.shape_cast %18 : vector<1x16x24x8xf32> to vector<16x24x8xf32>
    %20 = vector.shape_cast %19 : vector<16x24x8xf32> to vector<384x8xf32>
    %c1_20 = arith.constant 1 : index
    %c0_21 = arith.constant 0 : index
    %c0_22 = arith.constant 0 : index
    %c0_23 = arith.constant 0 : index
    %21 = vector.load %arg2[%c1_20, %c0_21, %c0_22, %c0_23] : memref<3x3x8x8xf32, #tpu.memory_space<vmem>>, vector<1x1x8x8xf32>
    %22 = vector.shape_cast %21 : vector<1x1x8x8xf32> to vector<8x8xf32>
    %cst_24 = arith.constant dense<0.000000e+00> : vector<384x8xf32>
    %23 = tpu.matmul %20, %22, %cst_24 {dimension_numbers = #tpu.dot_dimension_numbers<[1], [0], [0], [1], [0, 0, 1, 1], [], []>} : vector<384x8xf32>, vector<8x8xf32>, vector<384x8xf32> -> vector<384x8xf32>
    %c1_i32_25 = arith.constant 1 : i32
    %24 = tpu.dynamic_rotate %23 by %c1_i32_25 dim 0 : vector<384x8xf32>, i32 -> vector<384x8xf32>
    %25 = arith.addf %17, %24 : vector<384x8xf32>
    %c1_26 = arith.constant 1 : index
    %c1_27 = arith.constant 1 : index
    %c0_28 = arith.constant 0 : index
    %c0_29 = arith.constant 0 : index
    %26 = vector.load %arg2[%c1_26, %c1_27, %c0_28, %c0_29] : memref<3x3x8x8xf32, #tpu.memory_space<vmem>>, vector<1x1x8x8xf32>
    %27 = vector.shape_cast %26 : vector<1x1x8x8xf32> to vector<8x8xf32>
    %cst_30 = arith.constant dense<0.000000e+00> : vector<384x8xf32>
    %28 = tpu.matmul %20, %27, %cst_30 {dimension_numbers = #tpu.dot_dimension_numbers<[1], [0], [0], [1], [0, 0, 1, 1], [], []>} : vector<384x8xf32>, vector<8x8xf32>, vector<384x8xf32> -> vector<384x8xf32>
    %29 = arith.addf %25, %28 : vector<384x8xf32>
    %c1_31 = arith.constant 1 : index
    %c2_32 = arith.constant 2 : index
    %c0_33 = arith.constant 0 : index
    %c0_34 = arith.constant 0 : index
    %30 = vector.load %arg2[%c1_31, %c2_32, %c0_33, %c0_34] : memref<3x3x8x8xf32, #tpu.memory_space<vmem>>, vector<1x1x8x8xf32>
    %31 = vector.shape_cast %30 : vector<1x1x8x8xf32> to vector<8x8xf32>
    %cst_35 = arith.constant dense<0.000000e+00> : vector<384x8xf32>
    %32 = tpu.matmul %20, %31, %cst_35 {dimension_numbers = #tpu.dot_dimension_numbers<[1], [0], [0], [1], [0, 0, 1, 1], [], []>} : vector<384x8xf32>, vector<8x8xf32>, vector<384x8xf32> -> vector<384x8xf32>
    %c383_i32_36 = arith.constant 383 : i32
    %33 = tpu.dynamic_rotate %32 by %c383_i32_36 dim 0 : vector<384x8xf32>, i32 -> vector<384x8xf32>
    %34 = arith.addf %29, %33 : vector<384x8xf32>
    %c0_37 = arith.constant 0 : index
    %c2_38 = arith.constant 2 : index
    %c0_39 = arith.constant 0 : index
    %c0_40 = arith.constant 0 : index
    %35 = vector.load %arg1[%c0_37, %c2_38, %c0_39, %c0_40] : memref<1x18x24x8xf32, #tpu.memory_space<vmem>>, vector<1x16x24x8xf32>
    %36 = vector.shape_cast %35 : vector<1x16x24x8xf32> to vector<16x24x8xf32>
    %37 = vector.shape_cast %36 : vector<16x24x8xf32> to vector<384x8xf32>
    %c2_41 = arith.constant 2 : index
    %c0_42 = arith.constant 0 : index
    %c0_43 = arith.constant 0 : index
    %c0_44 = arith.constant 0 : index
    %38 = vector.load %arg2[%c2_41, %c0_42, %c0_43, %c0_44] : memref<3x3x8x8xf32, #tpu.memory_space<vmem>>, vector<1x1x8x8xf32>
    %39 = vector.shape_cast %38 : vector<1x1x8x8xf32> to vector<8x8xf32>
    %cst_45 = arith.constant dense<0.000000e+00> : vector<384x8xf32>
    %40 = tpu.matmul %37, %39, %cst_45 {dimension_numbers = #tpu.dot_dimension_numbers<[1], [0], [0], [1], [0, 0, 1, 1], [], []>} : vector<384x8xf32>, vector<8x8xf32>, vector<384x8xf32> -> vector<384x8xf32>
    %c1_i32_46 = arith.constant 1 : i32
    %41 = tpu.dynamic_rotate %40 by %c1_i32_46 dim 0 : vector<384x8xf32>, i32 -> vector<384x8xf32>
    %42 = arith.addf %34, %41 : vector<384x8xf32>
    %c2_47 = arith.constant 2 : index
    %c1_48 = arith.constant 1 : index
    %c0_49 = arith.constant 0 : index
    %c0_50 = arith.constant 0 : index
    %43 = vector.load %arg2[%c2_47, %c1_48, %c0_49, %c0_50] : memref<3x3x8x8xf32, #tpu.memory_space<vmem>>, vector<1x1x8x8xf32>
    %44 = vector.shape_cast %43 : vector<1x1x8x8xf32> to vector<8x8xf32>
    %cst_51 = arith.constant dense<0.000000e+00> : vector<384x8xf32>
    %45 = tpu.matmul %37, %44, %cst_51 {dimension_numbers = #tpu.dot_dimension_numbers<[1], [0], [0], [1], [0, 0, 1, 1], [], []>} : vector<384x8xf32>, vector<8x8xf32>, vector<384x8xf32> -> vector<384x8xf32>
    %46 = arith.addf %42, %45 : vector<384x8xf32>
    %c2_52 = arith.constant 2 : index
    %c2_53 = arith.constant 2 : index
    %c0_54 = arith.constant 0 : index
    %c0_55 = arith.constant 0 : index
    %47 = vector.load %arg2[%c2_52, %c2_53, %c0_54, %c0_55] : memref<3x3x8x8xf32, #tpu.memory_space<vmem>>, vector<1x1x8x8xf32>
    %48 = vector.shape_cast %47 : vector<1x1x8x8xf32> to vector<8x8xf32>
    %cst_56 = arith.constant dense<0.000000e+00> : vector<384x8xf32>
    %49 = tpu.matmul %37, %48, %cst_56 {dimension_numbers = #tpu.dot_dimension_numbers<[1], [0], [0], [1], [0, 0, 1, 1], [], []>} : vector<384x8xf32>, vector<8x8xf32>, vector<384x8xf32> -> vector<384x8xf32>
    %c383_i32_57 = arith.constant 383 : i32
    %50 = tpu.dynamic_rotate %49 by %c383_i32_57 dim 0 : vector<384x8xf32>, i32 -> vector<384x8xf32>
    %51 = arith.addf %46, %50 : vector<384x8xf32>
    %52 = vector.shape_cast %51 : vector<384x8xf32> to vector<16x24x8xf32>
    %53 = vector.extract_strided_slice %52 {offsets = [0, 0, 0], sizes = [16, 16, 8], strides = [1, 1, 1]} : vector<16x24x8xf32> to vector<16x16x8xf32>
    %c0_58 = arith.constant 0 : index
    %c0_59 = arith.constant 0 : index
    %54 = vector.load %arg3[%c0_58, %c0_59] : memref<1x8xf32, #tpu.memory_space<vmem>>, vector<1x8xf32>
    %55 = vector.shape_cast %54 : vector<1x8xf32> to vector<1x1x8xf32>
    %56 = vector.broadcast %55 : vector<1x1x8xf32> to vector<16x16x8xf32>
    %57 = arith.addf %53, %56 : vector<16x16x8xf32>
    %cst_60 = arith.constant 0.000000e+00 : f32
    %58 = vector.broadcast %cst_60 : f32 to vector<16x16x8xf32>
    %59 = arith.maximumf %57, %58 : vector<16x16x8xf32>
    %cst_61 = arith.constant 0.000000e+00 : f32
    %60 = vector.broadcast %cst_61 : f32 to vector<24x8xf32>
    %c0_62 = arith.constant 0 : index
    %c0_63 = arith.constant 0 : index
    %c0_64 = arith.constant 0 : index
    %61 = vector.load %arg11[%c0_62, %c0_63, %c0_64] : memref<18x24x8xf32, #tpu.memory_space<vmem>>, vector<1x24x8xf32>
    %62 = vector.shape_cast %61 : vector<1x24x8xf32> to vector<24x8xf32>
    %63 = vector.shape_cast %60 : vector<24x8xf32> to vector<1x24x8xf32>
    tpu.vector_store %arg11[%c0_62, %c0_63, %c0_64], %63 {strides = array<i32>} : memref<18x24x8xf32, #tpu.memory_space<vmem>>, vector<1x24x8xf32>,
    %cst_65 = arith.constant 0.000000e+00 : f32
    %64 = vector.broadcast %cst_65 : f32 to vector<24x8xf32>
    %c17 = arith.constant 17 : index
    %c0_66 = arith.constant 0 : index
    %c0_67 = arith.constant 0 : index
    %65 = vector.load %arg11[%c17, %c0_66, %c0_67] : memref<18x24x8xf32, #tpu.memory_space<vmem>>, vector<1x24x8xf32>
    %66 = vector.shape_cast %65 : vector<1x24x8xf32> to vector<24x8xf32>
    %67 = vector.shape_cast %64 : vector<24x8xf32> to vector<1x24x8xf32>
    tpu.vector_store %arg11[%c17, %c0_66, %c0_67], %67 {strides = array<i32>} : memref<18x24x8xf32, #tpu.memory_space<vmem>>, vector<1x24x8xf32>,
    %cst_68 = arith.constant 0.000000e+00 : f32
    %68 = vector.broadcast %cst_68 : f32 to vector<16x8x8xf32>
    %c1_69 = arith.constant 1 : index
    %c16 = arith.constant 16 : index
    %c0_70 = arith.constant 0 : index
    %69 = vector.load %arg11[%c1_69, %c16, %c0_70] : memref<18x24x8xf32, #tpu.memory_space<vmem>>, vector<16x8x8xf32>
    tpu.vector_store %arg11[%c1_69, %c16, %c0_70], %68 {strides = array<i32>} : memref<18x24x8xf32, #tpu.memory_space<vmem>>, vector<16x8x8xf32>,
    %c1_71 = arith.constant 1 : index
    %c0_72 = arith.constant 0 : index
    %c0_73 = arith.constant 0 : index
    %70 = vector.load %arg11[%c1_71, %c0_72, %c0_73] : memref<18x24x8xf32, #tpu.memory_space<vmem>>, vector<16x16x8xf32>
    tpu.vector_store %arg11[%c1_71, %c0_72, %c0_73], %59 {strides = array<i32>} : memref<18x24x8xf32, #tpu.memory_space<vmem>>, vector<16x16x8xf32>,
    %cst_74 = arith.constant 0.000000e+00 : f32
    %71 = vector.broadcast %cst_74 : f32 to vector<384x8xf32>
    %c0_75 = arith.constant 0 : index
    %c0_76 = arith.constant 0 : index
    %c0_77 = arith.constant 0 : index
    %72 = vector.load %arg11[%c0_75, %c0_76, %c0_77] : memref<18x24x8xf32, #tpu.memory_space<vmem>>, vector<16x24x8xf32>
    %73 = vector.shape_cast %72 : vector<16x24x8xf32> to vector<384x8xf32>
    %c0_78 = arith.constant 0 : index
    %c0_79 = arith.constant 0 : index
    %c0_80 = arith.constant 0 : index
    %c0_81 = arith.constant 0 : index
    %74 = vector.load %arg4[%c0_78, %c0_79, %c0_80, %c0_81] : memref<3x3x8x8xf32, #tpu.memory_space<vmem>>, vector<1x1x8x8xf32>
    %75 = vector.shape_cast %74 : vector<1x1x8x8xf32> to vector<8x8xf32>
    %cst_82 = arith.constant dense<0.000000e+00> : vector<384x8xf32>
    %76 = tpu.matmul %73, %75, %cst_82 {dimension_numbers = #tpu.dot_dimension_numbers<[1], [0], [0], [1], [0, 0, 1, 1], [], []>} : vector<384x8xf32>, vector<8x8xf32>, vector<384x8xf32> -> vector<384x8xf32>
    %c1_i32_83 = arith.constant 1 : i32
    %77 = tpu.dynamic_rotate %76 by %c1_i32_83 dim 0 : vector<384x8xf32>, i32 -> vector<384x8xf32>
    %78 = arith.addf %71, %77 : vector<384x8xf32>
    %c0_84 = arith.constant 0 : index
    %c1_85 = arith.constant 1 : index
    %c0_86 = arith.constant 0 : index
    %c0_87 = arith.constant 0 : index
    %79 = vector.load %arg4[%c0_84, %c1_85, %c0_86, %c0_87] : memref<3x3x8x8xf32, #tpu.memory_space<vmem>>, vector<1x1x8x8xf32>
    %80 = vector.shape_cast %79 : vector<1x1x8x8xf32> to vector<8x8xf32>
    %cst_88 = arith.constant dense<0.000000e+00> : vector<384x8xf32>
    %81 = tpu.matmul %73, %80, %cst_88 {dimension_numbers = #tpu.dot_dimension_numbers<[1], [0], [0], [1], [0, 0, 1, 1], [], []>} : vector<384x8xf32>, vector<8x8xf32>, vector<384x8xf32> -> vector<384x8xf32>
    %82 = arith.addf %78, %81 : vector<384x8xf32>
    %c0_89 = arith.constant 0 : index
    %c2_90 = arith.constant 2 : index
    %c0_91 = arith.constant 0 : index
    %c0_92 = arith.constant 0 : index
    %83 = vector.load %arg4[%c0_89, %c2_90, %c0_91, %c0_92] : memref<3x3x8x8xf32, #tpu.memory_space<vmem>>, vector<1x1x8x8xf32>
    %84 = vector.shape_cast %83 : vector<1x1x8x8xf32> to vector<8x8xf32>
    %cst_93 = arith.constant dense<0.000000e+00> : vector<384x8xf32>
    %85 = tpu.matmul %73, %84, %cst_93 {dimension_numbers = #tpu.dot_dimension_numbers<[1], [0], [0], [1], [0, 0, 1, 1], [], []>} : vector<384x8xf32>, vector<8x8xf32>, vector<384x8xf32> -> vector<384x8xf32>
    %c383_i32_94 = arith.constant 383 : i32
    %86 = tpu.dynamic_rotate %85 by %c383_i32_94 dim 0 : vector<384x8xf32>, i32 -> vector<384x8xf32>
    %87 = arith.addf %82, %86 : vector<384x8xf32>
    %c1_95 = arith.constant 1 : index
    %c0_96 = arith.constant 0 : index
    %c0_97 = arith.constant 0 : index
    %88 = vector.load %arg11[%c1_95, %c0_96, %c0_97] : memref<18x24x8xf32, #tpu.memory_space<vmem>>, vector<16x24x8xf32>
    %89 = vector.shape_cast %88 : vector<16x24x8xf32> to vector<384x8xf32>
    %c1_98 = arith.constant 1 : index
    %c0_99 = arith.constant 0 : index
    %c0_100 = arith.constant 0 : index
    %c0_101 = arith.constant 0 : index
    %90 = vector.load %arg4[%c1_98, %c0_99, %c0_100, %c0_101] : memref<3x3x8x8xf32, #tpu.memory_space<vmem>>, vector<1x1x8x8xf32>
    %91 = vector.shape_cast %90 : vector<1x1x8x8xf32> to vector<8x8xf32>
    %cst_102 = arith.constant dense<0.000000e+00> : vector<384x8xf32>
    %92 = tpu.matmul %89, %91, %cst_102 {dimension_numbers = #tpu.dot_dimension_numbers<[1], [0], [0], [1], [0, 0, 1, 1], [], []>} : vector<384x8xf32>, vector<8x8xf32>, vector<384x8xf32> -> vector<384x8xf32>
    %c1_i32_103 = arith.constant 1 : i32
    %93 = tpu.dynamic_rotate %92 by %c1_i32_103 dim 0 : vector<384x8xf32>, i32 -> vector<384x8xf32>
    %94 = arith.addf %87, %93 : vector<384x8xf32>
    %c1_104 = arith.constant 1 : index
    %c1_105 = arith.constant 1 : index
    %c0_106 = arith.constant 0 : index
    %c0_107 = arith.constant 0 : index
    %95 = vector.load %arg4[%c1_104, %c1_105, %c0_106, %c0_107] : memref<3x3x8x8xf32, #tpu.memory_space<vmem>>, vector<1x1x8x8xf32>
    %96 = vector.shape_cast %95 : vector<1x1x8x8xf32> to vector<8x8xf32>
    %cst_108 = arith.constant dense<0.000000e+00> : vector<384x8xf32>
    %97 = tpu.matmul %89, %96, %cst_108 {dimension_numbers = #tpu.dot_dimension_numbers<[1], [0], [0], [1], [0, 0, 1, 1], [], []>} : vector<384x8xf32>, vector<8x8xf32>, vector<384x8xf32> -> vector<384x8xf32>
    %98 = arith.addf %94, %97 : vector<384x8xf32>
    %c1_109 = arith.constant 1 : index
    %c2_110 = arith.constant 2 : index
    %c0_111 = arith.constant 0 : index
    %c0_112 = arith.constant 0 : index
    %99 = vector.load %arg4[%c1_109, %c2_110, %c0_111, %c0_112] : memref<3x3x8x8xf32, #tpu.memory_space<vmem>>, vector<1x1x8x8xf32>
    %100 = vector.shape_cast %99 : vector<1x1x8x8xf32> to vector<8x8xf32>
    %cst_113 = arith.constant dense<0.000000e+00> : vector<384x8xf32>
    %101 = tpu.matmul %89, %100, %cst_113 {dimension_numbers = #tpu.dot_dimension_numbers<[1], [0], [0], [1], [0, 0, 1, 1], [], []>} : vector<384x8xf32>, vector<8x8xf32>, vector<384x8xf32> -> vector<384x8xf32>
    %c383_i32_114 = arith.constant 383 : i32
    %102 = tpu.dynamic_rotate %101 by %c383_i32_114 dim 0 : vector<384x8xf32>, i32 -> vector<384x8xf32>
    %103 = arith.addf %98, %102 : vector<384x8xf32>
    %c2_115 = arith.constant 2 : index
    %c0_116 = arith.constant 0 : index
    %c0_117 = arith.constant 0 : index
    %104 = vector.load %arg11[%c2_115, %c0_116, %c0_117] : memref<18x24x8xf32, #tpu.memory_space<vmem>>, vector<16x24x8xf32>
    %105 = vector.shape_cast %104 : vector<16x24x8xf32> to vector<384x8xf32>
    %c2_118 = arith.constant 2 : index
    %c0_119 = arith.constant 0 : index
    %c0_120 = arith.constant 0 : index
    %c0_121 = arith.constant 0 : index
    %106 = vector.load %arg4[%c2_118, %c0_119, %c0_120, %c0_121] : memref<3x3x8x8xf32, #tpu.memory_space<vmem>>, vector<1x1x8x8xf32>
    %107 = vector.shape_cast %106 : vector<1x1x8x8xf32> to vector<8x8xf32>
    %cst_122 = arith.constant dense<0.000000e+00> : vector<384x8xf32>
    %108 = tpu.matmul %105, %107, %cst_122 {dimension_numbers = #tpu.dot_dimension_numbers<[1], [0], [0], [1], [0, 0, 1, 1], [], []>} : vector<384x8xf32>, vector<8x8xf32>, vector<384x8xf32> -> vector<384x8xf32>
    %c1_i32_123 = arith.constant 1 : i32
    %109 = tpu.dynamic_rotate %108 by %c1_i32_123 dim 0 : vector<384x8xf32>, i32 -> vector<384x8xf32>
    %110 = arith.addf %103, %109 : vector<384x8xf32>
    %c2_124 = arith.constant 2 : index
    %c1_125 = arith.constant 1 : index
    %c0_126 = arith.constant 0 : index
    %c0_127 = arith.constant 0 : index
    %111 = vector.load %arg4[%c2_124, %c1_125, %c0_126, %c0_127] : memref<3x3x8x8xf32, #tpu.memory_space<vmem>>, vector<1x1x8x8xf32>
    %112 = vector.shape_cast %111 : vector<1x1x8x8xf32> to vector<8x8xf32>
    %cst_128 = arith.constant dense<0.000000e+00> : vector<384x8xf32>
    %113 = tpu.matmul %105, %112, %cst_128 {dimension_numbers = #tpu.dot_dimension_numbers<[1], [0], [0], [1], [0, 0, 1, 1], [], []>} : vector<384x8xf32>, vector<8x8xf32>, vector<384x8xf32> -> vector<384x8xf32>
    %114 = arith.addf %110, %113 : vector<384x8xf32>
    %c2_129 = arith.constant 2 : index
    %c2_130 = arith.constant 2 : index
    %c0_131 = arith.constant 0 : index
    %c0_132 = arith.constant 0 : index
    %115 = vector.load %arg4[%c2_129, %c2_130, %c0_131, %c0_132] : memref<3x3x8x8xf32, #tpu.memory_space<vmem>>, vector<1x1x8x8xf32>
    %116 = vector.shape_cast %115 : vector<1x1x8x8xf32> to vector<8x8xf32>
    %cst_133 = arith.constant dense<0.000000e+00> : vector<384x8xf32>
    %117 = tpu.matmul %105, %116, %cst_133 {dimension_numbers = #tpu.dot_dimension_numbers<[1], [0], [0], [1], [0, 0, 1, 1], [], []>} : vector<384x8xf32>, vector<8x8xf32>, vector<384x8xf32> -> vector<384x8xf32>
    %c383_i32_134 = arith.constant 383 : i32
    %118 = tpu.dynamic_rotate %117 by %c383_i32_134 dim 0 : vector<384x8xf32>, i32 -> vector<384x8xf32>
    %119 = arith.addf %114, %118 : vector<384x8xf32>
    %120 = vector.shape_cast %119 : vector<384x8xf32> to vector<16x24x8xf32>
    %121 = vector.extract_strided_slice %120 {offsets = [0, 0, 0], sizes = [16, 16, 8], strides = [1, 1, 1]} : vector<16x24x8xf32> to vector<16x16x8xf32>
    %c0_135 = arith.constant 0 : index
    %c0_136 = arith.constant 0 : index
    %122 = vector.load %arg5[%c0_135, %c0_136] : memref<1x8xf32, #tpu.memory_space<vmem>>, vector<1x8xf32>
    %123 = vector.shape_cast %122 : vector<1x8xf32> to vector<1x1x8xf32>
    %124 = vector.broadcast %123 : vector<1x1x8xf32> to vector<16x16x8xf32>
    %125 = arith.addf %121, %124 : vector<16x16x8xf32>
    %cst_137 = arith.constant 0.000000e+00 : f32
    %126 = vector.broadcast %cst_137 : f32 to vector<16x16x8xf32>
    %127 = arith.maximumf %125, %126 : vector<16x16x8xf32>
    %cst_138 = arith.constant 0.000000e+00 : f32
    %128 = vector.broadcast %cst_138 : f32 to vector<24x8xf32>
    %c0_139 = arith.constant 0 : index
    %c0_140 = arith.constant 0 : index
    %c0_141 = arith.constant 0 : index
    %129 = vector.load %arg12[%c0_139, %c0_140, %c0_141] : memref<18x24x8xf32, #tpu.memory_space<vmem>>, vector<1x24x8xf32>
    %130 = vector.shape_cast %129 : vector<1x24x8xf32> to vector<24x8xf32>
    %131 = vector.shape_cast %128 : vector<24x8xf32> to vector<1x24x8xf32>
    tpu.vector_store %arg12[%c0_139, %c0_140, %c0_141], %131 {strides = array<i32>} : memref<18x24x8xf32, #tpu.memory_space<vmem>>, vector<1x24x8xf32>,
    %cst_142 = arith.constant 0.000000e+00 : f32
    %132 = vector.broadcast %cst_142 : f32 to vector<24x8xf32>
    %c17_143 = arith.constant 17 : index
    %c0_144 = arith.constant 0 : index
    %c0_145 = arith.constant 0 : index
    %133 = vector.load %arg12[%c17_143, %c0_144, %c0_145] : memref<18x24x8xf32, #tpu.memory_space<vmem>>, vector<1x24x8xf32>
    %134 = vector.shape_cast %133 : vector<1x24x8xf32> to vector<24x8xf32>
    %135 = vector.shape_cast %132 : vector<24x8xf32> to vector<1x24x8xf32>
    tpu.vector_store %arg12[%c17_143, %c0_144, %c0_145], %135 {strides = array<i32>} : memref<18x24x8xf32, #tpu.memory_space<vmem>>, vector<1x24x8xf32>,
    %cst_146 = arith.constant 0.000000e+00 : f32
    %136 = vector.broadcast %cst_146 : f32 to vector<16x8x8xf32>
    %c1_147 = arith.constant 1 : index
    %c16_148 = arith.constant 16 : index
    %c0_149 = arith.constant 0 : index
    %137 = vector.load %arg12[%c1_147, %c16_148, %c0_149] : memref<18x24x8xf32, #tpu.memory_space<vmem>>, vector<16x8x8xf32>
    tpu.vector_store %arg12[%c1_147, %c16_148, %c0_149], %136 {strides = array<i32>} : memref<18x24x8xf32, #tpu.memory_space<vmem>>, vector<16x8x8xf32>,
    %c1_150 = arith.constant 1 : index
    %c0_151 = arith.constant 0 : index
    %c0_152 = arith.constant 0 : index
    %138 = vector.load %arg12[%c1_150, %c0_151, %c0_152] : memref<18x24x8xf32, #tpu.memory_space<vmem>>, vector<16x16x8xf32>
    tpu.vector_store %arg12[%c1_150, %c0_151, %c0_152], %127 {strides = array<i32>} : memref<18x24x8xf32, #tpu.memory_space<vmem>>, vector<16x16x8xf32>,
    %cst_153 = arith.constant 0.000000e+00 : f32
    %139 = vector.broadcast %cst_153 : f32 to vector<384x8xf32>
    %c0_154 = arith.constant 0 : index
    %c0_155 = arith.constant 0 : index
    %c0_156 = arith.constant 0 : index
    %140 = vector.load %arg12[%c0_154, %c0_155, %c0_156] : memref<18x24x8xf32, #tpu.memory_space<vmem>>, vector<16x24x8xf32>
    %141 = vector.shape_cast %140 : vector<16x24x8xf32> to vector<384x8xf32>
    %c0_157 = arith.constant 0 : index
    %c0_158 = arith.constant 0 : index
    %c0_159 = arith.constant 0 : index
    %c0_160 = arith.constant 0 : index
    %142 = vector.load %arg6[%c0_157, %c0_158, %c0_159, %c0_160] : memref<3x3x8x8xf32, #tpu.memory_space<vmem>>, vector<1x1x8x8xf32>
    %143 = vector.shape_cast %142 : vector<1x1x8x8xf32> to vector<8x8xf32>
    %cst_161 = arith.constant dense<0.000000e+00> : vector<384x8xf32>
    %144 = tpu.matmul %141, %143, %cst_161 {dimension_numbers = #tpu.dot_dimension_numbers<[1], [0], [0], [1], [0, 0, 1, 1], [], []>} : vector<384x8xf32>, vector<8x8xf32>, vector<384x8xf32> -> vector<384x8xf32>
    %c1_i32_162 = arith.constant 1 : i32
    %145 = tpu.dynamic_rotate %144 by %c1_i32_162 dim 0 : vector<384x8xf32>, i32 -> vector<384x8xf32>
    %146 = arith.addf %139, %145 : vector<384x8xf32>
    %c0_163 = arith.constant 0 : index
    %c1_164 = arith.constant 1 : index
    %c0_165 = arith.constant 0 : index
    %c0_166 = arith.constant 0 : index
    %147 = vector.load %arg6[%c0_163, %c1_164, %c0_165, %c0_166] : memref<3x3x8x8xf32, #tpu.memory_space<vmem>>, vector<1x1x8x8xf32>
    %148 = vector.shape_cast %147 : vector<1x1x8x8xf32> to vector<8x8xf32>
    %cst_167 = arith.constant dense<0.000000e+00> : vector<384x8xf32>
    %149 = tpu.matmul %141, %148, %cst_167 {dimension_numbers = #tpu.dot_dimension_numbers<[1], [0], [0], [1], [0, 0, 1, 1], [], []>} : vector<384x8xf32>, vector<8x8xf32>, vector<384x8xf32> -> vector<384x8xf32>
    %150 = arith.addf %146, %149 : vector<384x8xf32>
    %c0_168 = arith.constant 0 : index
    %c2_169 = arith.constant 2 : index
    %c0_170 = arith.constant 0 : index
    %c0_171 = arith.constant 0 : index
    %151 = vector.load %arg6[%c0_168, %c2_169, %c0_170, %c0_171] : memref<3x3x8x8xf32, #tpu.memory_space<vmem>>, vector<1x1x8x8xf32>
    %152 = vector.shape_cast %151 : vector<1x1x8x8xf32> to vector<8x8xf32>
    %cst_172 = arith.constant dense<0.000000e+00> : vector<384x8xf32>
    %153 = tpu.matmul %141, %152, %cst_172 {dimension_numbers = #tpu.dot_dimension_numbers<[1], [0], [0], [1], [0, 0, 1, 1], [], []>} : vector<384x8xf32>, vector<8x8xf32>, vector<384x8xf32> -> vector<384x8xf32>
    %c383_i32_173 = arith.constant 383 : i32
    %154 = tpu.dynamic_rotate %153 by %c383_i32_173 dim 0 : vector<384x8xf32>, i32 -> vector<384x8xf32>
    %155 = arith.addf %150, %154 : vector<384x8xf32>
    %c1_174 = arith.constant 1 : index
    %c0_175 = arith.constant 0 : index
    %c0_176 = arith.constant 0 : index
    %156 = vector.load %arg12[%c1_174, %c0_175, %c0_176] : memref<18x24x8xf32, #tpu.memory_space<vmem>>, vector<16x24x8xf32>
    %157 = vector.shape_cast %156 : vector<16x24x8xf32> to vector<384x8xf32>
    %c1_177 = arith.constant 1 : index
    %c0_178 = arith.constant 0 : index
    %c0_179 = arith.constant 0 : index
    %c0_180 = arith.constant 0 : index
    %158 = vector.load %arg6[%c1_177, %c0_178, %c0_179, %c0_180] : memref<3x3x8x8xf32, #tpu.memory_space<vmem>>, vector<1x1x8x8xf32>
    %159 = vector.shape_cast %158 : vector<1x1x8x8xf32> to vector<8x8xf32>
    %cst_181 = arith.constant dense<0.000000e+00> : vector<384x8xf32>
    %160 = tpu.matmul %157, %159, %cst_181 {dimension_numbers = #tpu.dot_dimension_numbers<[1], [0], [0], [1], [0, 0, 1, 1], [], []>} : vector<384x8xf32>, vector<8x8xf32>, vector<384x8xf32> -> vector<384x8xf32>
    %c1_i32_182 = arith.constant 1 : i32
    %161 = tpu.dynamic_rotate %160 by %c1_i32_182 dim 0 : vector<384x8xf32>, i32 -> vector<384x8xf32>
    %162 = arith.addf %155, %161 : vector<384x8xf32>
    %c1_183 = arith.constant 1 : index
    %c1_184 = arith.constant 1 : index
    %c0_185 = arith.constant 0 : index
    %c0_186 = arith.constant 0 : index
    %163 = vector.load %arg6[%c1_183, %c1_184, %c0_185, %c0_186] : memref<3x3x8x8xf32, #tpu.memory_space<vmem>>, vector<1x1x8x8xf32>
    %164 = vector.shape_cast %163 : vector<1x1x8x8xf32> to vector<8x8xf32>
    %cst_187 = arith.constant dense<0.000000e+00> : vector<384x8xf32>
    %165 = tpu.matmul %157, %164, %cst_187 {dimension_numbers = #tpu.dot_dimension_numbers<[1], [0], [0], [1], [0, 0, 1, 1], [], []>} : vector<384x8xf32>, vector<8x8xf32>, vector<384x8xf32> -> vector<384x8xf32>
    %166 = arith.addf %162, %165 : vector<384x8xf32>
    %c1_188 = arith.constant 1 : index
    %c2_189 = arith.constant 2 : index
    %c0_190 = arith.constant 0 : index
    %c0_191 = arith.constant 0 : index
    %167 = vector.load %arg6[%c1_188, %c2_189, %c0_190, %c0_191] : memref<3x3x8x8xf32, #tpu.memory_space<vmem>>, vector<1x1x8x8xf32>
    %168 = vector.shape_cast %167 : vector<1x1x8x8xf32> to vector<8x8xf32>
    %cst_192 = arith.constant dense<0.000000e+00> : vector<384x8xf32>
    %169 = tpu.matmul %157, %168, %cst_192 {dimension_numbers = #tpu.dot_dimension_numbers<[1], [0], [0], [1], [0, 0, 1, 1], [], []>} : vector<384x8xf32>, vector<8x8xf32>, vector<384x8xf32> -> vector<384x8xf32>
    %c383_i32_193 = arith.constant 383 : i32
    %170 = tpu.dynamic_rotate %169 by %c383_i32_193 dim 0 : vector<384x8xf32>, i32 -> vector<384x8xf32>
    %171 = arith.addf %166, %170 : vector<384x8xf32>
    %c2_194 = arith.constant 2 : index
    %c0_195 = arith.constant 0 : index
    %c0_196 = arith.constant 0 : index
    %172 = vector.load %arg12[%c2_194, %c0_195, %c0_196] : memref<18x24x8xf32, #tpu.memory_space<vmem>>, vector<16x24x8xf32>
    %173 = vector.shape_cast %172 : vector<16x24x8xf32> to vector<384x8xf32>
    %c2_197 = arith.constant 2 : index
    %c0_198 = arith.constant 0 : index
    %c0_199 = arith.constant 0 : index
    %c0_200 = arith.constant 0 : index
    %174 = vector.load %arg6[%c2_197, %c0_198, %c0_199, %c0_200] : memref<3x3x8x8xf32, #tpu.memory_space<vmem>>, vector<1x1x8x8xf32>
    %175 = vector.shape_cast %174 : vector<1x1x8x8xf32> to vector<8x8xf32>
    %cst_201 = arith.constant dense<0.000000e+00> : vector<384x8xf32>
    %176 = tpu.matmul %173, %175, %cst_201 {dimension_numbers = #tpu.dot_dimension_numbers<[1], [0], [0], [1], [0, 0, 1, 1], [], []>} : vector<384x8xf32>, vector<8x8xf32>, vector<384x8xf32> -> vector<384x8xf32>
    %c1_i32_202 = arith.constant 1 : i32
    %177 = tpu.dynamic_rotate %176 by %c1_i32_202 dim 0 : vector<384x8xf32>, i32 -> vector<384x8xf32>
    %178 = arith.addf %171, %177 : vector<384x8xf32>
    %c2_203 = arith.constant 2 : index
    %c1_204 = arith.constant 1 : index
    %c0_205 = arith.constant 0 : index
    %c0_206 = arith.constant 0 : index
    %179 = vector.load %arg6[%c2_203, %c1_204, %c0_205, %c0_206] : memref<3x3x8x8xf32, #tpu.memory_space<vmem>>, vector<1x1x8x8xf32>
    %180 = vector.shape_cast %179 : vector<1x1x8x8xf32> to vector<8x8xf32>
    %cst_207 = arith.constant dense<0.000000e+00> : vector<384x8xf32>
    %181 = tpu.matmul %173, %180, %cst_207 {dimension_numbers = #tpu.dot_dimension_numbers<[1], [0], [0], [1], [0, 0, 1, 1], [], []>} : vector<384x8xf32>, vector<8x8xf32>, vector<384x8xf32> -> vector<384x8xf32>
    %182 = arith.addf %178, %181 : vector<384x8xf32>
    %c2_208 = arith.constant 2 : index
    %c2_209 = arith.constant 2 : index
    %c0_210 = arith.constant 0 : index
    %c0_211 = arith.constant 0 : index
    %183 = vector.load %arg6[%c2_208, %c2_209, %c0_210, %c0_211] : memref<3x3x8x8xf32, #tpu.memory_space<vmem>>, vector<1x1x8x8xf32>
    %184 = vector.shape_cast %183 : vector<1x1x8x8xf32> to vector<8x8xf32>
    %cst_212 = arith.constant dense<0.000000e+00> : vector<384x8xf32>
    %185 = tpu.matmul %173, %184, %cst_212 {dimension_numbers = #tpu.dot_dimension_numbers<[1], [0], [0], [1], [0, 0, 1, 1], [], []>} : vector<384x8xf32>, vector<8x8xf32>, vector<384x8xf32> -> vector<384x8xf32>
    %c383_i32_213 = arith.constant 383 : i32
    %186 = tpu.dynamic_rotate %185 by %c383_i32_213 dim 0 : vector<384x8xf32>, i32 -> vector<384x8xf32>
    %187 = arith.addf %182, %186 : vector<384x8xf32>
    %188 = vector.shape_cast %187 : vector<384x8xf32> to vector<16x24x8xf32>
    %189 = vector.extract_strided_slice %188 {offsets = [0, 0, 0], sizes = [16, 16, 8], strides = [1, 1, 1]} : vector<16x24x8xf32> to vector<16x16x8xf32>
    %c0_214 = arith.constant 0 : index
    %c0_215 = arith.constant 0 : index
    %190 = vector.load %arg7[%c0_214, %c0_215] : memref<1x8xf32, #tpu.memory_space<vmem>>, vector<1x8xf32>
    %191 = vector.shape_cast %190 : vector<1x8xf32> to vector<1x1x8xf32>
    %192 = vector.broadcast %191 : vector<1x1x8xf32> to vector<16x16x8xf32>
    %193 = arith.addf %189, %192 : vector<16x16x8xf32>
    %cst_216 = arith.constant 0.000000e+00 : f32
    %194 = vector.broadcast %cst_216 : f32 to vector<16x16x8xf32>
    %195 = arith.maximumf %193, %194 : vector<16x16x8xf32>
    %196 = vector.shape_cast %195 : vector<16x16x8xf32> to vector<256x8xf32>
    %c0_217 = arith.constant 0 : index
    %c0_218 = arith.constant 0 : index
    %197 = vector.load %arg8[%c0_217, %c0_218] : memref<8x12xf32, #tpu.memory_space<vmem>>, vector<8x12xf32>
    %cst_219 = arith.constant dense<0.000000e+00> : vector<256x12xf32>
    %198 = tpu.matmul %196, %197, %cst_219 {dimension_numbers = #tpu.dot_dimension_numbers<[1], [0], [0], [1], [0, 0, 1, 1], [], []>} : vector<256x8xf32>, vector<8x12xf32>, vector<256x12xf32> -> vector<256x12xf32>
    %199 = tpu.transpose %198, [1, 0] : vector<256x12xf32> -> vector<12x256xf32>
    %c0_220 = arith.constant 0 : index
    %c0_221 = arith.constant 0 : index
    %200 = vector.load %arg9[%c0_220, %c0_221] : memref<12x1xf32, #tpu.memory_space<vmem>>, vector<12x1xf32>
    %201 = vector.broadcast %200 : vector<12x1xf32> to vector<12x256xf32>
    %202 = arith.addf %199, %201 : vector<12x256xf32>
    %c0_222 = arith.constant 0 : index
    %c0_223 = arith.constant 0 : index
    %c0_224 = arith.constant 0 : index
    %203 = vector.load %arg10[%c0_222, %c0_223, %c0_224] : memref<1x12x256xf32, #tpu.memory_space<vmem>>, vector<1x12x256xf32>
    %204 = vector.shape_cast %203 : vector<1x12x256xf32> to vector<12x256xf32>
    %205 = vector.shape_cast %202 : vector<12x256xf32> to vector<1x12x256xf32>
    tpu.vector_store %arg10[%c0_222, %c0_223, %c0_224], %205 {strides = array<i32>} : memref<1x12x256xf32, #tpu.memory_space<vmem>>, vector<1x12x256xf32>,
    return
  }
  func.func @transform_0(%arg0: i32) -> (i32, i32, i32, i32) {
    %c0_i32 = arith.constant 0 : i32
    %c0_i32_0 = arith.constant 0 : i32
    %c0_i32_1 = arith.constant 0 : i32
    %c0_i32_2 = arith.constant 0 : i32
    return %arg0, %c0_i32, %c0_i32_0, %c0_i32_1 : i32, i32, i32, i32
  }
  func.func @transform_1(%arg0: i32) -> (i32, i32, i32, i32) {
    %c0_i32 = arith.constant 0 : i32
    %c0_i32_0 = arith.constant 0 : i32
    %c0_i32_1 = arith.constant 0 : i32
    %c0_i32_2 = arith.constant 0 : i32
    %c0_i32_3 = arith.constant 0 : i32
    return %c0_i32, %c0_i32_0, %c0_i32_1, %c0_i32_2 : i32, i32, i32, i32
  }
  func.func @transform_2(%arg0: i32) -> (i32, i32) {
    %c0_i32 = arith.constant 0 : i32
    %c0_i32_0 = arith.constant 0 : i32
    %c0_i32_1 = arith.constant 0 : i32
    return %c0_i32, %c0_i32_0 : i32, i32
  }
  func.func @transform_3(%arg0: i32) -> (i32, i32, i32, i32) {
    %c0_i32 = arith.constant 0 : i32
    %c0_i32_0 = arith.constant 0 : i32
    %c0_i32_1 = arith.constant 0 : i32
    %c0_i32_2 = arith.constant 0 : i32
    %c0_i32_3 = arith.constant 0 : i32
    return %c0_i32, %c0_i32_0, %c0_i32_1, %c0_i32_2 : i32, i32, i32, i32
  }
  func.func @transform_4(%arg0: i32) -> (i32, i32) {
    %c0_i32 = arith.constant 0 : i32
    %c0_i32_0 = arith.constant 0 : i32
    %c0_i32_1 = arith.constant 0 : i32
    return %c0_i32, %c0_i32_0 : i32, i32
  }
  func.func @transform_5(%arg0: i32) -> (i32, i32, i32, i32) {
    %c0_i32 = arith.constant 0 : i32
    %c0_i32_0 = arith.constant 0 : i32
    %c0_i32_1 = arith.constant 0 : i32
    %c0_i32_2 = arith.constant 0 : i32
    %c0_i32_3 = arith.constant 0 : i32
    return %c0_i32, %c0_i32_0, %c0_i32_1, %c0_i32_2 : i32, i32, i32, i32
  }
  func.func @transform_6(%arg0: i32) -> (i32, i32) {
    %c0_i32 = arith.constant 0 : i32
    %c0_i32_0 = arith.constant 0 : i32
    %c0_i32_1 = arith.constant 0 : i32
    return %c0_i32, %c0_i32_0 : i32, i32
  }
  func.func @transform_7(%arg0: i32) -> (i32, i32) {
    %c0_i32 = arith.constant 0 : i32
    %c0_i32_0 = arith.constant 0 : i32
    %c0_i32_1 = arith.constant 0 : i32
    return %c0_i32, %c0_i32_0 : i32, i32
  }
  func.func @transform_8(%arg0: i32) -> (i32, i32) {
    %c0_i32 = arith.constant 0 : i32
    %c0_i32_0 = arith.constant 0 : i32
    %c0_i32_1 = arith.constant 0 : i32
    return %c0_i32, %c0_i32_0 : i32, i32
  }
  func.func @transform_9(%arg0: i32) -> (i32, i32, i32) {
    %c0_i32 = arith.constant 0 : i32
    %c0_i32_0 = arith.constant 0 : i32
    %c0_i32_1 = arith.constant 0 : i32
    return %arg0, %c0_i32, %c0_i32_0 : i32, i32, i32
  }
}

</mosaic_0001>

<bundles_post_ra>
// kernel: tpu_custom_call.1
= control target key start
LH: loop header
LB: loop body
LE: loop exit
PB: predicated region body
PF: predicated region fallthrough
CT: control target
= control target key end

     0   :  { %s11062_s30 = smov 0   ;;  %s17659_s0 = inlined_call_operand.vmem [shape: f32[2,18,24,8], index: 0, kind: input, shape index: {}]   ;;  %s17660_s1 = inlined_call_operand.vmem [shape: f32[3,3,8,8], index: 1, kind: input, shape index: {}]   ;;  %s17661_s2 = inlined_call_operand.vmem [shape: f32[1,8], index: 2, kind: input, shape index: {}]   ;;  %s17662_s3 = inlined_call_operand.vmem [shape: f32[3,3,8,8], index: 3, kind: input, shape index: {}]   ;;  %s17663_s4 = inlined_call_operand.vmem [shape: f32[1,8], index: 4, kind: input, shape index: {}]   ;;  %s17664_s5 = inlined_call_operand.vmem [shape: f32[3,3,8,8], index: 5, kind: input, shape index: {}]   ;;  %s17665_s6 = inlined_call_operand.vmem [shape: f32[1,8], index: 6, kind: input, shape index: {}]   ;;  %s17666_s7 = inlined_call_operand.vmem [shape: f32[8,12], index: 7, kind: input, shape index: {}]   ;;  %s17667_s8 = inlined_call_operand.vmem [shape: f32[12,1], index: 8, kind: input, shape index: {}]   ;;  %s17668_s9 = inlined_call_operand.vmem [shape: f32[2,12,256], index: 9, kind: output, shape index: {}]  }
   0x1 LB: > { %s9293_s10 = sadd.s32 4294967295, %s11008_s30   ;;  %p9297_p0 = scmp.ge.s32.totalorder %s11008_s30, 1  ;;  %s11008_s30 = sphi %s11062_s30, %s19_s30  }
   0x2   : > { %p287_p1 = scmp.lt.s32.totalorder %s11008_s30, 3 }
   0x4   : > { %p288_p2 = pnand %p9297_p0, %p287_p1 }
   0x6   : > { %291 = sbr.rel (%p288_p2) target bundleno = 3253 (0xcb5), region = 56 }
   0xb   : > { %v381_v0 = vld [vmem:[%s17660_s1] sm:$0xff]  ;;  %v9349_v1 = vld [vmem:[%s17660_s1 + $0x8] sm:$0xff]  ;;  %v9398_v2 = vld [vmem:[%s17660_s1 + $0x10] sm:$0xff]  ;;  %p323_p3 = scmp.lt.s32.totalorder %s9293_s10, 1  ;;  %vm382_vm0 = vcmask 64512   ;;  %v736_v34 = vlaneseq }
   0xc   : > { %542 = vmatpush.msra.mxu0 %v381_v0  ;;  %10752 = vmatpush.msra.mxu3 %v381_v0  ;;  %v9544_v3 = vld [vmem:[%s17660_s1 + $0x20] sm:$0xff]  ;;  %v9690_v4 = vld [vmem:[%s17660_s1 + $0x30] sm:$0xff]  ;;  %v9495_v14 = vld [vmem:[%s17660_s1 + $0x18] sm:$0xff] }
   0xd   : > { %820 = vmatpush.msra.mxu1 %v9349_v1  ;;  %999 = vmatpush.msra.mxu2 %v9398_v2  ;;  %s18390_s10 = smov (!%p323_p3, %s9293_s10), 1  ;;  %v9739_v19 = vld [vmem:[%s17660_s1 + $0x38] sm:$0xff]  ;;  %v9593_v24 = vld [vmem:[%s17660_s1 + $0x28] sm:$0xff]  ;;  %v11255_v37 = vshrl.u32 %v736_v34, 7 }
   0xe   : > { %1743 = vmatpush.msrb.mxu0 %v9544_v3  ;;  %10753 = vmatpush.msrb.mxu3 %v9349_v1  ;;  %s10755_s21 = smul.u32 432, %s18390_s10  ;;  %s10751_s29 = sshll.u32 %s18390_s10, 5 }
   0xf   : > { %2390 = vmatpush.msrb.mxu2 %v9690_v4  ;;  %1922 = vmatpush.msrb.mxu1 %v9593_v24  ;;  %vm1193_vm1 = vcmp.lt.s32.totalorder %v11255_v37, 7  ;;  %vm738_vm2 = vcmp.lt.s32.totalorder %v11255_v37, 1  ;;  %s332_s13 = scalar_lea.vmem %s17668_s9, %s10751_s29 }
  0x10   : > { %s11091_s24 = scalar_lea.vmem %s17659_s0, %s10755_s21 }
  0x11   : > { %v333_v5 = vld [vmem:[%s11091_s24] sm:$0xff]  ;;  %v334_v7 = vld [vmem:[%s11091_s24 + $0x8] sm:$0xff]  ;;  %v335_v9 = vld [vmem:[%s11091_s24 + $0x10] sm:$0xff] }
  0x12   : > { %v377_v6 = vld [vmem:[%s11091_s24 + $0x160] sm:$0xff]  ;;  %9301 = vmatmul.msk.f32.vlgmr.msra.gmra.mxu0 %vm382_vm0, %v333_v5  ;;  %9350 = vmatmul.msk.f32.vlgmr.msra.gmra.mxu1 %vm382_vm0, %v333_v5  ;;  %v378_v8 = vld [vmem:[%s11091_s24 + $0x168] sm:$0xff]  ;;  %v379_v10 = vld [vmem:[%s11091_s24 + $0x170] sm:$0xff] }
  0x13   : > { %9345 = vmatmul.msk.f32.vlgmr.msra.gmra.mxu3 %vm382_vm0, %v377_v6  ;;  %9399 = vmatmul.msk.f32.vlgmr.msra.gmra.mxu2 %vm382_vm0, %v333_v5  ;;  %v11112_v11 = vld [vmem:[%s11091_s24 + $0x18] sm:$0xff]  ;;  %v337_v13 = vld [vmem:[%s11091_s24 + $0x20] sm:$0xff]  ;;  %v338_v15 = vld [vmem:[%s11091_s24 + $0x28] sm:$0xff] }
  0x14   : > { %10754 = vmatpush.msra.mxu3 %v9398_v2  ;;  %v380_v12 = vld [vmem:[%s11091_s24 + $0x178] sm:$0xff]  ;;  %v11136_v16 = vld [vmem:[%s11091_s24 + $0x30] sm:$0xff]  ;;  %v341_v18 = vld [vmem:[%s11091_s24 + $0x40] sm:$0xff] }
  0x15   : > { %v11146_v17 = vld [vmem:[%s11091_s24 + $0x38] sm:$0xff]  ;;  %v11164_v20 = vld [vmem:[%s11091_s24 + $0x48] sm:$0xff]  ;;  %v11174_v21 = vld [vmem:[%s11091_s24 + $0x50] sm:$0xff] }
  0x16   : > { %v11184_v22 = vld [vmem:[%s11091_s24 + $0x58] sm:$0xff]  ;;  %v11194_v23 = vld [vmem:[%s11091_s24 + $0x60] sm:$0xff]  ;;  %v11208_v25 = vld [vmem:[%s11091_s24 + $0x68] sm:$0xff] }
  0x17   : > { %v11218_v26 = vld [vmem:[%s11091_s24 + $0x70] sm:$0xff]  ;;  %v11228_v27 = vld [vmem:[%s11091_s24 + $0x78] sm:$0xff]  ;;  %v11239_v29 = vld [vmem:[%s11091_s24 + $0x80] sm:$0xff] }
  0x18   : > { %v11250_v35 = vld [vmem:[%s11091_s24 + $0x88] sm:$0xff]  ;;  %v11264_v45 = vld [vmem:[%s11091_s24 + $0x90] sm:$0xff]  ;;  %v11281_v57 = vld [vmem:[%s11091_s24 + $0x98] sm:$0xff] }
  0x19   : > { %v11298_v3 = vld [vmem:[%s11091_s24 + $0xa0] sm:$0xff] }
  0x1a   : > { %9302 = vmatmul.msk.f32.gmra.mxu0 %vm382_vm0, %v334_v7  ;;  %9351 = vmatmul.msk.f32.gmra.mxu1 %vm382_vm0, %v334_v7 }
  0x1b   : > { %9346 = vmatmul.msk.f32.gmra.mxu3 %vm382_vm0, %v378_v8  ;;  %9400 = vmatmul.msk.f32.gmra.mxu2 %vm382_vm0, %v334_v7 }
  0x22   : > { %9303 = vmatmul.msk.f32.gmra.mxu0 %vm382_vm0, %v335_v9  ;;  %9352 = vmatmul.msk.f32.gmra.mxu1 %vm382_vm0, %v335_v9 }
  0x23   : > { %9347 = vmatmul.msk.f32.gmra.mxu3 %vm382_vm0, %v379_v10  ;;  %9401 = vmatmul.msk.f32.gmra.mxu2 %vm382_vm0, %v335_v9 }
  0x2a   : > { %9304 = vmatmul.msk.f32.gmra.mxu0 %vm382_vm0, %v11112_v11  ;;  %9353 = vmatmul.msk.f32.gmra.mxu1 %vm382_vm0, %v11112_v11 }
  0x2b   : > { %9348 = vmatmul.msk.f32.gmra.mxu3 %vm382_vm0, %v380_v12  ;;  %9402 = vmatmul.msk.f32.gmra.mxu2 %vm382_vm0, %v11112_v11 }
  0x32   : > { %9305 = vmatmul.msk.f32.gmra.mxu0 %vm382_vm0, %v337_v13  ;;  %9354 = vmatmul.msk.f32.gmra.mxu1 %vm382_vm0, %v337_v13 }
  0x33   : > { %9394 = vmatmul.msk.f32.vlgmr.msrb.gmra.mxu3 %vm382_vm0, %v377_v6  ;;  %9403 = vmatmul.msk.f32.gmra.mxu2 %vm382_vm0, %v337_v13 }
  0x34   : > { %1468 = vmatpush.msrb.mxu3 %v9495_v14 }
  0x3a   : > { %9306 = vmatmul.msk.f32.gmra.mxu0 %vm382_vm0, %v338_v15  ;;  %9355 = vmatmul.msk.f32.gmra.mxu1 %vm382_vm0, %v338_v15 }
  0x3b   : > { %9395 = vmatmul.msk.f32.gmra.mxu3 %vm382_vm0, %v378_v8  ;;  %9404 = vmatmul.msk.f32.gmra.mxu2 %vm382_vm0, %v338_v15 }
  0x42   : > { %9307 = vmatmul.msk.f32.gmra.mxu0 %vm382_vm0, %v11136_v16  ;;  %9356 = vmatmul.msk.f32.gmra.mxu1 %vm382_vm0, %v11136_v16 }
  0x43   : > { %9396 = vmatmul.msk.f32.gmra.mxu3 %vm382_vm0, %v379_v10  ;;  %9405 = vmatmul.msk.f32.gmra.mxu2 %vm382_vm0, %v11136_v16 }
  0x4a   : > { %9308 = vmatmul.msk.f32.gmra.mxu0 %vm382_vm0, %v11146_v17  ;;  %9357 = vmatmul.msk.f32.gmra.mxu1 %vm382_vm0, %v11146_v17 }
  0x4b   : > { %9397 = vmatmul.msk.f32.gmra.mxu3 %vm382_vm0, %v380_v12  ;;  %9406 = vmatmul.msk.f32.gmra.mxu2 %vm382_vm0, %v11146_v17 }
  0x52   : > { %9309 = vmatmul.msk.f32.gmra.mxu0 %vm382_vm0, %v341_v18  ;;  %9358 = vmatmul.msk.f32.gmra.mxu1 %vm382_vm0, %v341_v18 }
  0x53   : > { %9443 = vmatmul.msk.f32.vlgmr.msra.gmra.mxu3 %vm382_vm0, %v377_v6  ;;  %9407 = vmatmul.msk.f32.gmra.mxu2 %vm382_vm0, %v341_v18 }
  0x54   : > { %2665 = vmatpush.msra.mxu3 %v9739_v19  ;;  %v11315_v19 = vld [vmem:[%s11091_s24 + $0xa8] sm:$0xff] }
  0x5a   : > { %9310 = vmatmul.msk.f32.gmra.mxu0 %vm382_vm0, %v11164_v20  ;;  %9359 = vmatmul.msk.f32.gmra.mxu1 %vm382_vm0, %v11164_v20 }
  0x5b   : > { %9444 = vmatmul.msk.f32.gmra.mxu3 %vm382_vm0, %v378_v8  ;;  %9408 = vmatmul.msk.f32.gmra.mxu2 %vm382_vm0, %v11164_v20 }
  0x62   : > { %9311 = vmatmul.msk.f32.gmra.mxu0 %vm382_vm0, %v11174_v21  ;;  %9360 = vmatmul.msk.f32.gmra.mxu1 %vm382_vm0, %v11174_v21 }
  0x63   : > { %9445 = vmatmul.msk.f32.gmra.mxu3 %vm382_vm0, %v379_v10  ;;  %9409 = vmatmul.msk.f32.gmra.mxu2 %vm382_vm0, %v11174_v21 }
  0x6a   : > { %9312 = vmatmul.msk.f32.gmra.mxu0 %vm382_vm0, %v11184_v22  ;;  %9361 = vmatmul.msk.f32.gmra.mxu1 %vm382_vm0, %v11184_v22 }
  0x6b   : > { %9446 = vmatmul.msk.f32.gmra.mxu3 %vm382_vm0, %v380_v12  ;;  %9410 = vmatmul.msk.f32.gmra.mxu2 %vm382_vm0, %v11184_v22 }
  0x72   : > { %9313 = vmatmul.msk.f32.gmra.mxu0 %vm382_vm0, %v11194_v23  ;;  %9362 = vmatmul.msk.f32.gmra.mxu1 %vm382_vm0, %v11194_v23 }
  0x73   : > { %9496 = vmatmul.msk.f32.vlgmr.msrb.gmra.mxu3 %vm382_vm0, %v11112_v11  ;;  %9411 = vmatmul.msk.f32.gmra.mxu2 %vm382_vm0, %v11194_v23 }
  0x7a   : > { %9314 = vmatmul.msk.f32.gmra.mxu0 %vm382_vm0, %v11208_v25  ;;  %9363 = vmatmul.msk.f32.gmra.mxu1 %vm382_vm0, %v11208_v25 }
  0x7b   : > { %9497 = vmatmul.msk.f32.gmra.mxu3 %vm382_vm0, %v337_v13  ;;  %9412 = vmatmul.msk.f32.gmra.mxu2 %vm382_vm0, %v11208_v25 }
  0x82   : > { %9315 = vmatmul.msk.f32.gmra.mxu0 %vm382_vm0, %v11218_v26  ;;  %9364 = vmatmul.msk.f32.gmra.mxu1 %vm382_vm0, %v11218_v26 }
  0x83   : > { %9498 = vmatmul.msk.f32.gmra.mxu3 %vm382_vm0, %v338_v15  ;;  %9413 = vmatmul.msk.f32.gmra.mxu2 %vm382_vm0, %v11218_v26 }
  0x8a   : > { %9316 = vmatmul.msk.f32.gmra.mxu0 %vm382_vm0, %v11228_v27  ;;  %9365 = vmatmul.msk.f32.gmra.mxu1 %vm382_vm0, %v11228_v27 }
  0x8b   : > { %9499 = vmatmul.msk.f32.gmra.mxu3 %vm382_vm0, %v11136_v16  ;;  %9414 = vmatmul.msk.f32.gmra.mxu2 %vm382_vm0, %v11228_v27 }
  0x8f   : > { %v544_v28 = vpop.f32.mrf.mxu0  ;;  %v822_v30 = vpop.f32.mrf.mxu1 }
  0x90   : > { %v688_v50 = vrot.slane %v544_v28, 7 }
  0x92   : > { %9317 = vmatmul.msk.f32.gmra.mxu0 %vm382_vm0, %v11239_v29  ;;  %9366 = vmatmul.msk.f32.gmra.mxu1 %vm382_vm0, %v11239_v29 }
  0x93   : > { %9500 = vmatmul.msk.f32.gmra.mxu3 %vm382_vm0, %v11146_v17  ;;  %9415 = vmatmul.msk.f32.gmra.mxu2 %vm382_vm0, %v11239_v29 }
  0x96   : > { %v676_v31 = vpop.f32.mrf.mxu3  ;;  %v1001_v32 = vpop.f32.mrf.mxu2 }
  0x97   : > { %v547_v33 = vpop.f32.mrf.mxu0  ;;  %v825_v36 = vpop.f32.mrf.mxu1  ;;  %v732_v39 = vrot.slane %v676_v31, 7  ;;  %v1145_v42 = vrot.slane %v1001_v32, 1 }
  0x98   : > { %v689_v48 = vrot.slane %v547_v33, 7 }
  0x9a   : > { %9318 = vmatmul.msk.f32.gmra.mxu0 %vm382_vm0, %v11250_v35  ;;  %9367 = vmatmul.msk.f32.gmra.mxu1 %vm382_vm0, %v11250_v35  ;;  %v769_v51 = vsel %vm738_vm2, %v688_v50, %v689_v48 }
  0x9b   : > { %9501 = vmatmul.msk.f32.gmra.mxu3 %vm382_vm0, %v341_v18  ;;  %9416 = vmatmul.msk.f32.gmra.mxu2 %vm382_vm0, %v11250_v35  ;;  %v951_v58 = vadd.f32 %v825_v36, %v769_v51 }
  0x9e   : > { %v679_v38 = vpop.f32.mrf.mxu3  ;;  %v1004_v41 = vpop.f32.mrf.mxu2 }
  0x9f   : > { %v733_v40 = vrot.slane %v679_v38, 7  ;;  %v1146_v43 = vrot.slane %v1004_v41, 1  ;;  %v550_v44 = vpop.f32.mrf.mxu0  ;;  %v828_v46 = vpop.f32.mrf.mxu1  ;;  %v11334_v38 = vld [vmem:[%s11091_s24 + $0xb0] sm:$0xff] }
  0xa0   : > { %v690_v8 = vrot.slane %v550_v44, 7 }
  0xa1   : > { %v740_v47 = vsel %vm738_vm2, %v732_v39, %v733_v40  ;;  %v1225_v49 = vsel %vm1193_vm1, %v1145_v42, %v1146_v43 }
  0xa2   : > { %9319 = vmatmul.msk.f32.gmra.mxu0 %vm382_vm0, %v11264_v45  ;;  %9368 = vmatmul.msk.f32.gmra.mxu1 %vm382_vm0, %v11264_v45 }
  0xa3   : > { %9502 = vmatmul.msk.f32.gmra.mxu3 %vm382_vm0, %v11164_v20  ;;  %9417 = vmatmul.msk.f32.gmra.mxu2 %vm382_vm0, %v11264_v45 }
  0xa6   : > { %v682_v52 = vpop.f32.mrf.mxu3  ;;  %v1007_v54 = vpop.f32.mrf.mxu2 }
  0xa7   : > { %v734_v53 = vrot.slane %v682_v52, 7  ;;  %v1147_v55 = vrot.slane %v1007_v54, 1  ;;  %v553_v56 = vpop.f32.mrf.mxu0  ;;  %v830_v59 = vpop.f32.mrf.mxu1 }
  0xa8   : > { %v691_v6 = vrot.slane %v553_v56, 7  ;;  %v11364_v56 = vld [vmem:[%s11091_s24 + $0xc0] sm:$0xff] }
  0xa9   : > { %v739_v60 = vsel %vm738_vm2, %v733_v40, %v734_v53  ;;  %v1224_v61 = vsel %vm1193_vm1, %v1146_v43, %v1147_v55 }
  0xaa   : > { %9320 = vmatmul.msk.f32.gmra.mxu0 %vm382_vm0, %v11281_v57  ;;  %v11291_v62 = vadd.f32 %v1224_v61, %v951_v58  ;;  %9369 = vmatmul.msk.f32.gmra.mxu1 %vm382_vm0, %v11281_v57  ;;  %v768_v10 = vsel %vm738_vm2, %v690_v8, %v691_v6 }
  0xab   : > { %9503 = vmatmul.msk.f32.gmra.mxu3 %vm382_vm0, %v11174_v21  ;;  %9418 = vmatmul.msk.f32.gmra.mxu2 %vm382_vm0, %v11281_v57  ;;  %v952_v20 = vadd.f32 %v830_v59, %v768_v10 }
  0xae   : > { %v685_v63 = vpop.f32.mrf.mxu3  ;;  %v1010_v1 = vpop.f32.mrf.mxu2 }
  0xaf   : > { %v735_v0 = vrot.slane %v685_v63, 7  ;;  %v556_v2 = vpop.f32.mrf.mxu0  ;;  %v833_v5 = vpop.f32.mrf.mxu1  ;;  %v1148_v14 = vrot.slane %v1010_v1, 1 }
  0xb1   : > { %v770_v4 = vsel %vm738_vm2, %v735_v0, %v688_v50 }
  0xb2   : > { %v950_v7 = vadd.f32 %v822_v30, %v770_v4  ;;  %9321 = vmatmul.msk.f32.gmra.mxu0 %vm382_vm0, %v11298_v3  ;;  %9370 = vmatmul.msk.f32.gmra.mxu1 %vm382_vm0, %v11298_v3 }
  0xb3   : > { %9504 = vmatmul.msk.f32.gmra.mxu3 %vm382_vm0, %v11184_v22  ;;  %9419 = vmatmul.msk.f32.gmra.mxu2 %vm382_vm0, %v11298_v3  ;;  %v692_v22 = vrot.slane %v556_v2, 7 }
  0xb4   : > { %v11310_v9 = vadd.f32 %v1225_v49, %v950_v7 }
  0xb5   : > { %v767_v30 = vsel %vm738_vm2, %v691_v6, %v692_v22 }
  0xb6   : > { %v940_v12 = vpop.f32.mrf.mxu3  ;;  %v1013_v13 = vpop.f32.mrf.mxu2 }
  0xb7   : > { %v1149_v15 = vrot.slane %v1013_v13, 1  ;;  %v559_v18 = vpop.f32.mrf.mxu0  ;;  %v836_v21 = vpop.f32.mrf.mxu1 }
  0xb9   : > { %v1223_v24 = vsel %vm1193_vm1, %v1148_v14, %v1149_v15  ;;  %v11398_v14 = vld [vmem:[%s11091_s24 + $0xd0] sm:$0xff] }
  0xba   : > { %9322 = vmatmul.msk.f32.gmra.mxu0 %vm382_vm0, %v11315_v19  ;;  %v11323_v28 = vadd.f32 %v1223_v24, %v952_v20  ;;  %9371 = vmatmul.msk.f32.gmra.mxu1 %vm382_vm0, %v11315_v19 }
  0xbb   : > { %9505 = vmatmul.msk.f32.gmra.mxu3 %vm382_vm0, %v11194_v23  ;;  %9420 = vmatmul.msk.f32.gmra.mxu2 %vm382_vm0, %v11315_v19  ;;  %v953_v23 = vadd.f32 %v833_v5, %v767_v30  ;;  %v11383_v5 = vld [vmem:[%s11091_s24 + $0xc8] sm:$0xff] }
  0xbe   : > { %v942_v31 = vpop.f32.mrf.mxu3  ;;  %v1016_v33 = vpop.f32.mrf.mxu2 }
  0xbf   : > { %v11331_v32 = vadd.f32 %v942_v31, %v740_v47  ;;  %v1150_v34 = vrot.slane %v1016_v33, 1  ;;  %v562_v36 = vpop.f32.mrf.mxu0  ;;  %v838_v39 = vpop.f32.mrf.mxu1  ;;  %v11351_v47 = vld [vmem:[%s11091_s24 + $0xb8] sm:$0xff] }
  0xc0   : > { %v694_v49 = vrot.slane %v562_v36, 7  ;;  %v11411_v36 = vld [vmem:[%s11091_s24 + $0xd8] sm:$0xff] }
  0xc1   : > { %v1222_v40 = vsel %vm1193_vm1, %v1149_v15, %v1150_v34 }
  0xc2   : > { %9323 = vmatmul.msk.f32.gmra.mxu0 %vm382_vm0, %v11334_v38  ;;  %v11342_v41 = vadd.f32 %v1222_v40, %v953_v23  ;;  %9372 = vmatmul.msk.f32.gmra.mxu1 %vm382_vm0, %v11334_v38 }
  0xc3   : > { %9506 = vmatmul.msk.f32.gmra.mxu3 %vm382_vm0, %v11208_v25  ;;  %9421 = vmatmul.msk.f32.gmra.mxu2 %vm382_vm0, %v11334_v38  ;;  %v693_v25 = vrot.slane %v559_v18, 7 }
  0xc5   : > { %v766_v50 = vsel %vm738_vm2, %v693_v25, %v694_v49 }
  0xc6   : > { %v945_v42 = vpop.f32.mrf.mxu3  ;;  %v1019_v44 = vpop.f32.mrf.mxu2  ;;  %v954_v58 = vadd.f32 %v838_v39, %v766_v50 }
  0xc7   : > { %v11348_v43 = vadd.f32 %v945_v42, %v739_v60  ;;  %v565_v46 = vpop.f32.mrf.mxu0  ;;  %v841_v48 = vpop.f32.mrf.mxu1  ;;  %v1151_v53 = vrot.slane %v1019_v44, 1 }
  0xc8   : > { %v695_v59 = vrot.slane %v565_v46, 7 }
  0xca   : > { %9324 = vmatmul.msk.f32.gmra.mxu0 %vm382_vm0, %v11351_v47  ;;  %9373 = vmatmul.msk.f32.gmra.mxu1 %vm382_vm0, %v11351_v47  ;;  %v765_v63 = vsel %vm738_vm2, %v694_v49, %v695_v59 }
  0xcb   : > { %9507 = vmatmul.msk.f32.gmra.mxu3 %vm382_vm0, %v11218_v26  ;;  %9422 = vmatmul.msk.f32.gmra.mxu2 %vm382_vm0, %v11351_v47 }
  0xce   : > { %v948_v51 = vpop.f32.mrf.mxu3  ;;  %v1022_v52 = vpop.f32.mrf.mxu2 }
  0xcf   : > { %v1152_v54 = vrot.slane %v1022_v52, 1  ;;  %v568_v55 = vpop.f32.mrf.mxu0  ;;  %v844_v26 = vpop.f32.mrf.mxu1  ;;  %v11433_v52 = vld [vmem:[%s11091_s24 + $0xe0] sm:$0xff] }
  0xd1   : > { %v1221_v60 = vsel %vm1193_vm1, %v1151_v53, %v1152_v54 }
  0xd2   : > { %9325 = vmatmul.msk.f32.gmra.mxu0 %vm382_vm0, %v11364_v56  ;;  %v11372_v61 = vadd.f32 %v1221_v60, %v954_v58  ;;  %9374 = vmatmul.msk.f32.gmra.mxu1 %vm382_vm0, %v11364_v56 }
  0xd3   : > { %9508 = vmatmul.msk.f32.gmra.mxu3 %vm382_vm0, %v11228_v27  ;;  %9423 = vmatmul.msk.f32.gmra.mxu2 %vm382_vm0, %v11364_v56  ;;  %v955_v27 = vadd.f32 %v841_v48, %v765_v63 }
  0xd6   : > { %v11380_v0 = vpop.f32.mrf.mxu3  ;;  %v1025_v1 = vpop.f32.mrf.mxu2 }
  0xd7   : > { %v1153_v2 = vrot.slane %v1025_v1, 1  ;;  %v571_v4 = vpop.f32.mrf.mxu0  ;;  %v846_v6 = vpop.f32.mrf.mxu1 }
  0xd8   : > { %v697_v18 = vrot.slane %v571_v4, 7 }
  0xd9   : > { %v1220_v7 = vsel %vm1193_vm1, %v1152_v54, %v1153_v2 }
  0xda   : > { %9326 = vmatmul.msk.f32.gmra.mxu0 %vm382_vm0, %v11383_v5  ;;  %v11391_v8 = vadd.f32 %v1220_v7, %v955_v27  ;;  %9375 = vmatmul.msk.f32.gmra.mxu1 %vm382_vm0, %v11383_v5 }
  0xdb   : > { %9509 = vmatmul.msk.f32.gmra.mxu3 %vm382_vm0, %v11239_v29  ;;  %9424 = vmatmul.msk.f32.gmra.mxu2 %vm382_vm0, %v11383_v5  ;;  %v696_v29 = vrot.slane %v568_v55, 7 }
  0xdd   : > { %v764_v20 = vsel %vm738_vm2, %v696_v29, %v697_v18 }
  0xde   : > { %v1136_v10 = vpop.f32.mrf.mxu3  ;;  %v1028_v12 = vpop.f32.mrf.mxu2 }
  0xdf   : > { %v574_v13 = vpop.f32.mrf.mxu0  ;;  %v849_v15 = vpop.f32.mrf.mxu1  ;;  %v1190_v22 = vrot.slane %v1136_v10, 1  ;;  %v1154_v31 = vrot.slane %v1028_v12, 1 }
  0xe0   : > { %v698_v40 = vrot.slane %v574_v13, 7 }
  0xe2   : > { %9327 = vmatmul.msk.f32.gmra.mxu0 %vm382_vm0, %v11398_v14  ;;  %9376 = vmatmul.msk.f32.gmra.mxu1 %vm382_vm0, %v11398_v14  ;;  %v763_v48 = vsel %vm738_vm2, %v697_v18, %v698_v40  ;;  %v11469_v18 = vld [vmem:[%s11091_s24 + $0xf0] sm:$0xff] }
  0xe3   : > { %9510 = vmatmul.msk.f32.gmra.mxu3 %vm382_vm0, %v11250_v35  ;;  %9425 = vmatmul.msk.f32.gmra.mxu2 %vm382_vm0, %v11398_v14  ;;  %v956_v35 = vadd.f32 %v846_v6, %v764_v20 }
  0xe6   : > { %v1139_v21 = vpop.f32.mrf.mxu3  ;;  %v1031_v24 = vpop.f32.mrf.mxu2 }
  0xe7   : > { %v1191_v30 = vrot.slane %v1139_v21, 1  ;;  %v1155_v33 = vrot.slane %v1031_v24, 1  ;;  %v577_v34 = vpop.f32.mrf.mxu0  ;;  %v852_v39 = vpop.f32.mrf.mxu1 }
  0xe9   : > { %v1195_v23 = vsel %vm1193_vm1, %v1190_v22, %v1191_v30  ;;  %v1219_v42 = vsel %vm1193_vm1, %v1154_v31, %v1155_v33 }
  0xea   : > { %v11418_v44 = vadd.f32 %v1195_v23, %v11331_v32  ;;  %9328 = vmatmul.msk.f32.gmra.mxu0 %vm382_vm0, %v11411_v36  ;;  %v11424_v46 = vadd.f32 %v1219_v42, %v956_v35  ;;  %9377 = vmatmul.msk.f32.gmra.mxu1 %vm382_vm0, %v11411_v36  ;;  %v11493_v23 = vld [vmem:[%s11091_s24 + $0xf8] sm:$0xff] }
  0xeb   : > { %9511 = vmatmul.msk.f32.gmra.mxu3 %vm382_vm0, %v11264_v45  ;;  %9426 = vmatmul.msk.f32.gmra.mxu2 %vm382_vm0, %v11411_v36  ;;  %v957_v45 = vadd.f32 %v849_v15, %v763_v48 }
  0xee   : > { %v1142_v49 = vpop.f32.mrf.mxu3  ;;  %v1034_v32 = vpop.f32.mrf.mxu2 }
  0xef   : > { %v1192_v25 = vrot.slane %v1142_v49, 1  ;;  %v1156_v50 = vrot.slane %v1034_v32, 1  ;;  %v580_v51 = vpop.f32.mrf.mxu0  ;;  %v854_v54 = vpop.f32.mrf.mxu1 }
  0xf0   : > { %v700_v2 = vrot.slane %v580_v51, 7  ;;  %v11508_v51 = vld [vmem:[%s11091_s24 + $0x100] sm:$0xff] }
  0xf1   : > { %v1194_v53 = vsel %vm1193_vm1, %v1191_v30, %v1192_v25  ;;  %v1218_v55 = vsel %vm1193_vm1, %v1155_v33, %v1156_v50 }
  0xf2   : > { %v11440_v58 = vadd.f32 %v1194_v53, %v11348_v43  ;;  %9329 = vmatmul.msk.f32.gmra.mxu0 %vm382_vm0, %v11433_v52  ;;  %v11446_v26 = vadd.f32 %v1218_v55, %v957_v45  ;;  %9378 = vmatmul.msk.f32.gmra.mxu1 %vm382_vm0, %v11433_v52  ;;  %v11455_v43 = vld [vmem:[%s11091_s24 + $0xe8] sm:$0xff] }
  0xf3   : > { %9512 = vmatmul.msk.f32.gmra.mxu3 %vm382_vm0, %v11281_v57  ;;  %9427 = vmatmul.msk.f32.gmra.mxu2 %vm382_vm0, %v11433_v52  ;;  %v699_v57 = vrot.slane %v577_v34, 7 }
  0xf5   : > { %v762_v4 = vsel %vm738_vm2, %v699_v57, %v700_v2 }
  0xf6   : > { %v11452_v59 = vpop.f32.mrf.mxu3  ;;  %v1037_v60 = vpop.f32.mrf.mxu2 }
  0xf7   : > { %v583_v63 = vpop.f32.mrf.mxu0  ;;  %v857_v1 = vpop.f32.mrf.mxu1  ;;  %v17669_v6 = vrot.slane %v11452_v59, 7  ;;  %v1157_v12 = vrot.slane %v1037_v60, 1 }
  0xf8   : > { %v701_v21 = vrot.slane %v583_v63, 7 }
  0xfa   : > { %9330 = vmatmul.msk.f32.gmra.mxu0 %vm382_vm0, %v11455_v43  ;;  %9379 = vmatmul.msk.f32.gmra.mxu1 %vm382_vm0, %v11455_v43  ;;  %v761_v31 = vsel %vm738_vm2, %v700_v2, %v701_v21 }
  0xfb   : > { %9513 = vmatmul.msk.f32.gmra.mxu3 %vm382_vm0, %v11298_v3  ;;  %9428 = vmatmul.msk.f32.gmra.mxu2 %vm382_vm0, %v11455_v43  ;;  %v958_v3 = vadd.f32 %v854_v54, %v762_v4  ;;  %v959_v39 = vadd.f32 %v857_v1, %v761_v31  ;;  %v11548_v31 = vld [vmem:[%s11091_s24 + $0x110] sm:$0xff] }
  0xfe   : > { %v1473_v27 = vpop.f32.mrf.mxu3  ;;  %v1040_v7 = vpop.f32.mrf.mxu2 }
  0xff   : > { %v1615_v10 = vrot.slane %v1473_v27, 7  ;;  %v1158_v13 = vrot.slane %v1040_v7, 1  ;;  %v586_v15 = vpop.f32.mrf.mxu0  ;;  %v860_v29 = vpop.f32.mrf.mxu1  ;;  %v11526_v27 = vld [vmem:[%s11091_s24 + $0x108] sm:$0xff] }
 0x100   : > { %v702_v55 = vrot.slane %v586_v15, 7 }
 0x101   : > { %v1692_v20 = vsel %vm738_vm2, %v17669_v6, %v1615_v10  ;;  %v1217_v22 = vsel %vm1193_vm1, %v1157_v12, %v1158_v13 }
 0x102   : > { %v11478_v24 = vadd.f32 %v1692_v20, %v11291_v62  ;;  %9331 = vmatmul.msk.f32.gmra.mxu0 %vm382_vm0, %v11469_v18  ;;  %v11484_v30 = vadd.f32 %v1217_v22, %v958_v3  ;;  %9380 = vmatmul.msk.f32.gmra.mxu1 %vm382_vm0, %v11469_v18 }
 0x103   : > { %9514 = vmatmul.msk.f32.gmra.mxu3 %vm382_vm0, %v11315_v19  ;;  %9429 = vmatmul.msk.f32.gmra.mxu2 %vm382_vm0, %v11469_v18 }
 0x106   : > { %v1476_v33 = vpop.f32.mrf.mxu3  ;;  %v1043_v62 = vpop.f32.mrf.mxu2 }
 0x107   : > { %v1159_v34 = vrot.slane %v1043_v62, 1  ;;  %v589_v35 = vpop.f32.mrf.mxu0  ;;  %v862_v19 = vpop.f32.mrf.mxu1  ;;  %v1616_v49 = vrot.slane %v1476_v33, 7 }
 0x108   : > { %v703_v53 = vrot.slane %v589_v35, 7 }
 0x109   : > { %v1216_v40 = vsel %vm1193_vm1, %v1158_v13, %v1159_v34 }
 0x10a   : > { %9332 = vmatmul.msk.f32.gmra.mxu0 %vm382_vm0, %v11493_v23  ;;  %v11501_v42 = vadd.f32 %v1216_v40, %v959_v39  ;;  %9381 = vmatmul.msk.f32.gmra.mxu1 %vm382_vm0, %v11493_v23  ;;  %v760_v60 = vsel %vm738_vm2, %v702_v55, %v703_v53 }
 0x10b   : > { %9515 = vmatmul.msk.f32.gmra.mxu3 %vm382_vm0, %v11334_v38  ;;  %9430 = vmatmul.msk.f32.gmra.mxu2 %vm382_vm0, %v11493_v23  ;;  %v960_v7 = vadd.f32 %v862_v19, %v760_v60 }
 0x10e   : > { %v1479_v48 = vpop.f32.mrf.mxu3  ;;  %v1046_v32 = vpop.f32.mrf.mxu2 }
 0x10f   : > { %v1617_v25 = vrot.slane %v1479_v48, 7  ;;  %v592_v50 = vpop.f32.mrf.mxu0  ;;  %v865_v45 = vpop.f32.mrf.mxu1  ;;  %v1160_v2 = vrot.slane %v1046_v32, 1 }
 0x110   : > { %v704_v12 = vrot.slane %v592_v50, 7 }
 0x111   : > { %v1691_v38 = vsel %vm738_vm2, %v1616_v49, %v1617_v25  ;;  %v11563_v49 = vld [vmem:[%s11091_s24 + $0x118] sm:$0xff] }
 0x112   : > { %v11513_v54 = vadd.f32 %v1691_v38, %v11323_v28  ;;  %9333 = vmatmul.msk.f32.gmra.mxu0 %vm382_vm0, %v11508_v51  ;;  %9382 = vmatmul.msk.f32.gmra.mxu1 %vm382_vm0, %v11508_v51  ;;  %v759_v29 = vsel %vm738_vm2, %v703_v53, %v704_v12 }
 0x113   : > { %9516 = vmatmul.msk.f32.gmra.mxu3 %vm382_vm0, %v11351_v47  ;;  %9431 = vmatmul.msk.f32.gmra.mxu2 %vm382_vm0, %v11508_v51  ;;  %v961_v33 = vadd.f32 %v865_v45, %v759_v29 }
 0x116   : > { %v1482_v63 = vpop.f32.mrf.mxu3  ;;  %v1049_v1 = vpop.f32.mrf.mxu2 }
 0x117   : > { %v1618_v28 = vrot.slane %v1482_v63, 7  ;;  %v1161_v57 = vrot.slane %v1049_v1, 1  ;;  %v595_v4 = vpop.f32.mrf.mxu0  ;;  %v868_v47 = vpop.f32.mrf.mxu1 }
 0x118   : > { %v705_v45 = vrot.slane %v595_v4, 7 }
 0x119   : > { %v1690_v10 = vsel %vm738_vm2, %v1617_v25, %v1618_v28  ;;  %v1215_v13 = vsel %vm1193_vm1, %v1160_v2, %v1161_v57  ;;  %v11581_v28 = vld [vmem:[%s11091_s24 + $0x120] sm:$0xff] }
 0x11a   : > { %v11533_v15 = vadd.f32 %v1690_v10, %v11342_v41  ;;  %9334 = vmatmul.msk.f32.gmra.mxu0 %vm382_vm0, %v11526_v27  ;;  %v11539_v3 = vadd.f32 %v1215_v13, %v960_v7  ;;  %9383 = vmatmul.msk.f32.gmra.mxu1 %vm382_vm0, %v11526_v27 }
 0x11b   : > { %9517 = vmatmul.msk.f32.gmra.mxu3 %vm382_vm0, %v11364_v56  ;;  %9432 = vmatmul.msk.f32.gmra.mxu2 %vm382_vm0, %v11526_v27 }
 0x11e   : > { %v1485_v20 = vpop.f32.mrf.mxu3  ;;  %v1052_v41 = vpop.f32.mrf.mxu2 }
 0x11f   : > { %v1162_v21 = vrot.slane %v1052_v41, 1  ;;  %v598_v22 = vpop.f32.mrf.mxu0  ;;  %v870_v56 = vpop.f32.mrf.mxu1  ;;  %v1619_v39 = vrot.slane %v1485_v20, 7  ;;  %v11603_v41 = vld [vmem:[%s11091_s24 + $0x128] sm:$0xff] }
 0x120   : > { %v706_v25 = vrot.slane %v598_v22, 7 }
 0x121   : > { %v1214_v62 = vsel %vm1193_vm1, %v1161_v57, %v1162_v21 }
 0x122   : > { %9335 = vmatmul.msk.f32.gmra.mxu0 %vm382_vm0, %v11548_v31  ;;  %v11556_v34 = vadd.f32 %v1214_v62, %v961_v33  ;;  %9384 = vmatmul.msk.f32.gmra.mxu1 %vm382_vm0, %v11548_v31  ;;  %v758_v38 = vsel %vm738_vm2, %v705_v45, %v706_v25 }
 0x123   : > { %9518 = vmatmul.msk.f32.gmra.mxu3 %vm382_vm0, %v11383_v5  ;;  %9433 = vmatmul.msk.f32.gmra.mxu2 %vm382_vm0, %v11548_v31  ;;  %v962_v2 = vadd.f32 %v870_v56, %v758_v38 }
 0x126   : > { %v1488_v35 = vpop.f32.mrf.mxu3  ;;  %v1055_v19 = vpop.f32.mrf.mxu2 }
 0x127   : > { %v1620_v40 = vrot.slane %v1488_v35, 7  ;;  %v601_v48 = vpop.f32.mrf.mxu0  ;;  %v873_v32 = vpop.f32.mrf.mxu1  ;;  %v1163_v60 = vrot.slane %v1055_v19, 1 }
 0x128   : > { %v707_v4 = vrot.slane %v601_v48, 7 }
 0x129   : > { %v1689_v5 = vsel %vm738_vm2, %v1619_v39, %v1620_v40 }
 0x12a   : > { %v11568_v50 = vadd.f32 %v1689_v5, %v11372_v61  ;;  %9336 = vmatmul.msk.f32.gmra.mxu0 %vm382_vm0, %v11563_v49  ;;  %9385 = vmatmul.msk.f32.gmra.mxu1 %vm382_vm0, %v11563_v49  ;;  %v757_v12 = vsel %vm738_vm2, %v706_v25, %v707_v4 }
 0x12b   : > { %9519 = vmatmul.msk.f32.gmra.mxu3 %vm382_vm0, %v11398_v14  ;;  %9434 = vmatmul.msk.f32.gmra.mxu2 %vm382_vm0, %v11563_v49  ;;  %v963_v21 = vadd.f32 %v873_v32, %v757_v12 }
 0x12e   : > { %v1491_v53 = vpop.f32.mrf.mxu3  ;;  %v1058_v55 = vpop.f32.mrf.mxu2 }
 0x12f   : > { %v1621_v61 = vrot.slane %v1491_v53, 7  ;;  %v1164_v63 = vrot.slane %v1058_v55, 1  ;;  %v604_v1 = vpop.f32.mrf.mxu0  ;;  %v876_v14 = vpop.f32.mrf.mxu1 }
 0x130   : > { %v708_v25 = vrot.slane %v604_v1, 7 }
 0x131   : > { %v1688_v57 = vsel %vm738_vm2, %v1620_v40, %v1621_v61  ;;  %v1213_v7 = vsel %vm1193_vm1, %v1163_v60, %v1164_v63  ;;  %v11618_v40 = vld [vmem:[%s11091_s24 + $0x130] sm:$0xff] }
 0x132   : > { %v11588_v47 = vadd.f32 %v1688_v57, %v11391_v8  ;;  %9337 = vmatmul.msk.f32.gmra.mxu0 %vm382_vm0, %v11581_v28  ;;  %v11594_v10 = vadd.f32 %v1213_v7, %v962_v2  ;;  %9386 = vmatmul.msk.f32.gmra.mxu1 %vm382_vm0, %v11581_v28 }
 0x133   : > { %9520 = vmatmul.msk.f32.gmra.mxu3 %vm382_vm0, %v11411_v36  ;;  %9435 = vmatmul.msk.f32.gmra.mxu2 %vm382_vm0, %v11581_v28 }
 0x136   : > { %v1494_v13 = vpop.f32.mrf.mxu3  ;;  %v1061_v8 = vpop.f32.mrf.mxu2 }
 0x137   : > { %v1165_v29 = vrot.slane %v1061_v8, 1  ;;  %v607_v20 = vpop.f32.mrf.mxu0  ;;  %v878_v36 = vpop.f32.mrf.mxu1  ;;  %v1622_v62 = vrot.slane %v1494_v13, 7 }
 0x138   : > { %v709_v32 = vrot.slane %v607_v20, 7  ;;  %v11658_v20 = vld [vmem:[%s11091_s24 + $0x140] sm:$0xff] }
 0x139   : > { %v1212_v22 = vsel %vm1193_vm1, %v1164_v63, %v1165_v29  ;;  %v11636_v63 = vld [vmem:[%s11091_s24 + $0x138] sm:$0xff] }
 0x13a   : > { %9338 = vmatmul.msk.f32.gmra.mxu0 %vm382_vm0, %v11603_v41  ;;  %v11611_v33 = vadd.f32 %v1212_v22, %v963_v21  ;;  %9387 = vmatmul.msk.f32.gmra.mxu1 %vm382_vm0, %v11603_v41  ;;  %v756_v45 = vsel %vm738_vm2, %v708_v25, %v709_v32 }
 0x13b   : > { %9521 = vmatmul.msk.f32.gmra.mxu3 %vm382_vm0, %v11433_v52  ;;  %9436 = vmatmul.msk.f32.gmra.mxu2 %vm382_vm0, %v11603_v41  ;;  %v964_v2 = vadd.f32 %v878_v36, %v756_v45 }
 0x13e   : > { %v1497_v56 = vpop.f32.mrf.mxu3  ;;  %v1064_v35 = vpop.f32.mrf.mxu2 }
 0x13f   : > { %v1623_v39 = vrot.slane %v1497_v56, 7  ;;  %v610_v19 = vpop.f32.mrf.mxu0  ;;  %v881_v48 = vpop.f32.mrf.mxu1  ;;  %v1166_v55 = vrot.slane %v1064_v35, 1  ;;  %v9788_v56 = vld [vmem:[%s17660_s1 + $0x40] sm:$0xff] }
 0x140   : > { %v710_v14 = vrot.slane %v610_v19, 7  ;;  %2844 = vmatpush.msra.mxu0 %v9788_v56 }
 0x141   : > { %v1687_v52 = vsel %vm738_vm2, %v1622_v62, %v1623_v39 }
 0x142   : > { %v11623_v5 = vadd.f32 %v1687_v52, %v11424_v46  ;;  %9339 = vmatmul.msk.f32.gmra.mxu0 %vm382_vm0, %v11618_v40  ;;  %9388 = vmatmul.msk.f32.gmra.mxu1 %vm382_vm0, %v11618_v40  ;;  %v755_v12 = vsel %vm738_vm2, %v709_v32, %v710_v14  ;;  %v11676_v52 = vld [vmem:[%s11091_s24 + $0x148] sm:$0xff] }
 0x143   : > { %9522 = vmatmul.msk.f32.gmra.mxu3 %vm382_vm0, %v11455_v43  ;;  %9437 = vmatmul.msk.f32.gmra.mxu2 %vm382_vm0, %v11618_v40  ;;  %v965_v21 = vadd.f32 %v881_v48, %v755_v12 }
 0x146   : > { %v1500_v38 = vpop.f32.mrf.mxu3  ;;  %v1067_v53 = vpop.f32.mrf.mxu2 }
 0x147   : > { %v1624_v46 = vrot.slane %v1500_v38, 7  ;;  %v1167_v61 = vrot.slane %v1067_v53, 1  ;;  %v613_v60 = vpop.f32.mrf.mxu0  ;;  %v884_v43 = vpop.f32.mrf.mxu1 }
 0x148   : > { %v711_v38 = vrot.slane %v613_v60, 7 }
 0x149   : > { %v1686_v1 = vsel %vm738_vm2, %v1623_v39, %v1624_v46  ;;  %v1211_v57 = vsel %vm1193_vm1, %v1166_v55, %v1167_v61 }
 0x14a   : > { %v11643_v4 = vadd.f32 %v1686_v1, %v11446_v26  ;;  %9340 = vmatmul.msk.f32.gmra.mxu0 %vm382_vm0, %v11636_v63  ;;  %v11649_v7 = vadd.f32 %v1211_v57, %v964_v2  ;;  %9389 = vmatmul.msk.f32.gmra.mxu1 %vm382_vm0, %v11636_v63  ;;  %v11694_v1 = vld [vmem:[%s11091_s24 + $0x150] sm:$0xff] }
 0x14b   : > { %9523 = vmatmul.msk.f32.gmra.mxu3 %vm382_vm0, %v11469_v18  ;;  %9438 = vmatmul.msk.f32.gmra.mxu2 %vm382_vm0, %v11636_v63 }
 0x14e   : > { %v1503_v13 = vpop.f32.mrf.mxu3  ;;  %v1070_v26 = vpop.f32.mrf.mxu2 }
 0x14f   : > { %v1168_v8 = vrot.slane %v1070_v26, 1  ;;  %v616_v29 = vpop.f32.mrf.mxu0  ;;  %v886_v18 = vpop.f32.mrf.mxu1  ;;  %v1625_v35 = vrot.slane %v1503_v13, 7 }
 0x150   : > { %v712_v25 = vrot.slane %v616_v29, 7 }
 0x151   : > { %v1210_v36 = vsel %vm1193_vm1, %v1167_v61, %v1168_v8 }
 0x152   : > { %9341 = vmatmul.msk.f32.gmra.mxu0 %vm382_vm0, %v11658_v20  ;;  %v11666_v22 = vadd.f32 %v1210_v36, %v965_v21  ;;  %9390 = vmatmul.msk.f32.gmra.mxu1 %vm382_vm0, %v11658_v20  ;;  %v754_v53 = vsel %vm738_vm2, %v711_v38, %v712_v25  ;;  %v11716_v36 = vld [vmem:[%s11091_s24 + $0x158] sm:$0xff] }
 0x153   : > { %9524 = vmatmul.msk.f32.gmra.mxu3 %vm382_vm0, %v11493_v23  ;;  %9439 = vmatmul.msk.f32.gmra.mxu2 %vm382_vm0, %v11658_v20  ;;  %v966_v14 = vadd.f32 %v886_v18, %v754_v53 }
 0x156   : > { %v1506_v62 = vpop.f32.mrf.mxu3  ;;  %v1073_v39 = vpop.f32.mrf.mxu2 }
 0x157   : > { %v1626_v19 = vrot.slane %v1506_v62, 7  ;;  %v619_v48 = vpop.f32.mrf.mxu0  ;;  %v889_v23 = vpop.f32.mrf.mxu1  ;;  %v1169_v61 = vrot.slane %v1073_v39, 1 }
 0x158   : > { %v713_v57 = vrot.slane %v619_v48, 7 }
 0x159   : > { %v1685_v32 = vsel %vm738_vm2, %v1625_v35, %v1626_v19 }
 0x15a   : > { %v11681_v45 = vadd.f32 %v1685_v32, %v11484_v30  ;;  %9342 = vmatmul.msk.f32.gmra.mxu0 %vm382_vm0, %v11676_v52  ;;  %9391 = vmatmul.msk.f32.gmra.mxu1 %vm382_vm0, %v11676_v52  ;;  %v753_v8 = vsel %vm738_vm2, %v712_v25, %v713_v57 }
 0x15b   : > { %9525 = vmatmul.msk.f32.gmra.mxu3 %vm382_vm0, %v11508_v51  ;;  %9440 = vmatmul.msk.f32.gmra.mxu2 %vm382_vm0, %v11676_v52  ;;  %v967_v56 = vadd.f32 %v889_v23, %v753_v8  ;;  %v10772_v8 = vld [vmem:[%s11091_s24 + $0x20] sm:$0xff] }
 0x15e   : > { %v1509_v46 = vpop.f32.mrf.mxu3  ;;  %v1076_v55 = vpop.f32.mrf.mxu2 }
 0x15f   : > { %v1627_v30 = vrot.slane %v1509_v46, 7  ;;  %v1170_v2 = vrot.slane %v1076_v55, 1  ;;  %v622_v43 = vpop.f32.mrf.mxu0  ;;  %v892_v51 = vpop.f32.mrf.mxu1  ;;  %v10771_v55 = vld [vmem:[%s11091_s24 + $0x18] sm:$0xff] }
 0x160   : > { %v714_v46 = vrot.slane %v622_v43, 7 }
 0x161   : > { %v1684_v60 = vsel %vm738_vm2, %v1626_v19, %v1627_v30  ;;  %v1209_v12 = vsel %vm1193_vm1, %v1169_v61, %v1170_v2 }
 0x162   : > { %v11701_v13 = vadd.f32 %v1684_v60, %v11501_v42  ;;  %9343 = vmatmul.msk.f32.gmra.mxu0 %vm382_vm0, %v11694_v1  ;;  %v11707_v26 = vadd.f32 %v1209_v12, %v966_v14  ;;  %9392 = vmatmul.msk.f32.gmra.mxu1 %vm382_vm0, %v11694_v1 }
 0x163   : > { %9526 = vmatmul.msk.f32.gmra.mxu3 %vm382_vm0, %v11526_v27  ;;  %9441 = vmatmul.msk.f32.gmra.mxu2 %vm382_vm0, %v11694_v1 }
 0x166   : > { %v1512_v29 = vpop.f32.mrf.mxu3  ;;  %v1079_v42 = vpop.f32.mrf.mxu2 }
 0x167   : > { %v1171_v21 = vrot.slane %v1079_v42, 1  ;;  %v625_v18 = vpop.f32.mrf.mxu0  ;;  %v894_v62 = vpop.f32.mrf.mxu1  ;;  %v1628_v19 = vrot.slane %v1512_v29, 7 }
 0x168   : > { %v715_v53 = vrot.slane %v625_v18, 7 }
 0x169   : > { %v1208_v27 = vsel %vm1193_vm1, %v1170_v2, %v1171_v21 }
 0x16a   : > { %9344 = vmatmul.msk.f32.gmra.mxu0 %vm382_vm0, %v11716_v36  ;;  %v11724_v35 = vadd.f32 %v1208_v27, %v967_v56  ;;  %9393 = vmatmul.msk.f32.gmra.mxu1 %vm382_vm0, %v11716_v36  ;;  %v752_v30 = vsel %vm738_vm2, %v714_v46, %v715_v53  ;;  %v11764_v27 = vld [vmem:[%s11091_s24 + $0x40] sm:$0xff]  ;;  %v11778_v46 = vld [vmem:[%s11091_s24 + $0x48] sm:$0xff] }
 0x16b   : > { %9527 = vmatmul.msk.f32.gmra.mxu3 %vm382_vm0, %v11548_v31  ;;  %9442 = vmatmul.msk.f32.gmra.mxu2 %vm382_vm0, %v11716_v36  ;;  %v968_v60 = vadd.f32 %v894_v62, %v752_v30 }
 0x16e   : > { %v1515_v39 = vpop.f32.mrf.mxu3  ;;  %v1082_v48 = vpop.f32.mrf.mxu2 }
 0x16f   : > { %v1629_v23 = vrot.slane %v1515_v39, 7  ;;  %v628_v32 = vpop.f32.mrf.mxu0  ;;  %v897_v25 = vpop.f32.mrf.mxu1  ;;  %v1172_v14 = vrot.slane %v1082_v48, 1 }
 0x170   : > { %v716_v43 = vrot.slane %v628_v32, 7 }
 0x171   : > { %v1683_v38 = vsel %vm738_vm2, %v1628_v19, %v1629_v23  ;;  %v10773_v19 = vld [vmem:[%s11091_s24 + $0x28] sm:$0xff] }
 0x172   : > { %v11733_v31 = vadd.f32 %v1683_v38, %v11539_v3  ;;  %9545 = vmatmul.msk.f32.vlgmr.msrb.gmra.mxu0 %vm382_vm0, %v11112_v11  ;;  %9594 = vmatmul.msk.f32.vlgmr.msrb.gmra.mxu1 %vm382_vm0, %v10771_v55  ;;  %v751_v42 = vsel %vm738_vm2, %v715_v53, %v716_v43 }
 0x173   : > { %9528 = vmatmul.msk.f32.gmra.mxu3 %vm382_vm0, %v11563_v49  ;;  %9691 = vmatmul.msk.f32.vlgmr.msrb.gmra.mxu2 %vm382_vm0, %v11136_v16  ;;  %v969_v62 = vadd.f32 %v897_v25, %v751_v42 }
 0x176   : > { %v1518_v61 = vpop.f32.mrf.mxu3  ;;  %v1085_v3 = vpop.f32.mrf.mxu2 }
 0x177   : > { %v1630_v2 = vrot.slane %v1518_v61, 7  ;;  %v1173_v51 = vrot.slane %v1085_v3, 1  ;;  %v631_v49 = vpop.f32.mrf.mxu0  ;;  %v900_v57 = vpop.f32.mrf.mxu1  ;;  %v11788_v61 = vld [vmem:[%s11091_s24 + $0x30] sm:$0xff] }
 0x178   : > { %v717_v3 = vrot.slane %v631_v49, 7 }
 0x179   : > { %v1682_v11 = vsel %vm738_vm2, %v1629_v23, %v1630_v2  ;;  %v1207_v12 = vsel %vm1193_vm1, %v1172_v14, %v1173_v51 }
 0x17a   : > { %v11750_v16 = vadd.f32 %v1682_v11, %v11556_v34  ;;  %9546 = vmatmul.msk.f32.gmra.mxu0 %vm382_vm0, %v10772_v8  ;;  %v11756_v29 = vadd.f32 %v1207_v12, %v968_v60  ;;  %9595 = vmatmul.msk.f32.gmra.mxu1 %vm382_vm0, %v10772_v8  ;;  %v11799_v12 = vld [vmem:[%s11091_s24 + $0x50] sm:$0xff] }
 0x17b   : > { %9529 = vmatmul.msk.f32.gmra.mxu3 %vm382_vm0, %v11581_v28  ;;  %9692 = vmatmul.msk.f32.gmra.mxu2 %vm382_vm0, %v11146_v17 }
 0x17e   : > { %v1521_v21 = vpop.f32.mrf.mxu3  ;;  %v1088_v34 = vpop.f32.mrf.mxu2 }
 0x17f   : > { %v1174_v18 = vrot.slane %v1088_v34, 1  ;;  %v634_v56 = vpop.f32.mrf.mxu0  ;;  %v902_v28 = vpop.f32.mrf.mxu1  ;;  %v1631_v23 = vrot.slane %v1521_v21, 7  ;;  %v11811_v34 = vld [vmem:[%s11091_s24 + $0x38] sm:$0xff] }
 0x180   : > { %v718_v55 = vrot.slane %v634_v56, 7 }
 0x181   : > { %v1206_v39 = vsel %vm1193_vm1, %v1173_v51, %v1174_v18 }
 0x182   : > { %9547 = vmatmul.msk.f32.gmra.mxu0 %vm382_vm0, %v10773_v19  ;;  %v11772_v17 = vadd.f32 %v1206_v39, %v969_v62  ;;  %9596 = vmatmul.msk.f32.gmra.mxu1 %vm382_vm0, %v10773_v19 }
 0x183   : > { %9530 = vmatmul.msk.f32.gmra.mxu3 %vm382_vm0, %v11603_v41  ;;  %9693 = vmatmul.msk.f32.gmra.mxu2 %vm382_vm0, %v11764_v27 }
 0x186   : > { %v1524_v48 = vpop.f32.mrf.mxu3  ;;  %v1091_v32 = vpop.f32.mrf.mxu2 }
 0x187   : > { %v1632_v25 = vrot.slane %v1524_v48, 7  ;;  %v637_v38 = vpop.f32.mrf.mxu0  ;;  %v905_v53 = vpop.f32.mrf.mxu1  ;;  %v11824_v48 = vld [vmem:[%s11091_s24 + $0x58] sm:$0xff] }
 0x188   : > { %v719_v8 = vrot.slane %v637_v38, 7 }
 0x189   : > { %v1681_v41 = vsel %vm738_vm2, %v1631_v23, %v1632_v25 }
 0x18a   : > { %v11783_v30 = vadd.f32 %v1681_v41, %v11594_v10  ;;  %9548 = vmatmul.msk.f32.gmra.mxu0 %vm382_vm0, %v11788_v61  ;;  %9597 = vmatmul.msk.f32.gmra.mxu1 %vm382_vm0, %v11788_v61  ;;  %v750_v10 = vsel %vm738_vm2, %v717_v3, %v718_v55 }
 0x18b   : > { %9531 = vmatmul.msk.f32.gmra.mxu3 %vm382_vm0, %v11618_v40  ;;  %9694 = vmatmul.msk.f32.gmra.mxu2 %vm382_vm0, %v11778_v46  ;;  %v1175_v40 = vrot.slane %v1091_v32, 1  ;;  %v970_v11 = vadd.f32 %v902_v28, %v750_v10  ;;  %v10776_v32 = vld [vmem:[%s11091_s24 + $0x40] sm:$0xff] }
 0x18e   : > { %v1527_v2 = vpop.f32.mrf.mxu3  ;;  %v1094_v14 = vpop.f32.mrf.mxu2 }
 0x18f   : > { %v1633_v51 = vrot.slane %v1527_v2, 7  ;;  %v1176_v60 = vrot.slane %v1094_v14, 1  ;;  %v640_v57 = vpop.f32.mrf.mxu0  ;;  %v908_v43 = vpop.f32.mrf.mxu1  ;;  %v11838_v2 = vld [vmem:[%s11091_s24 + $0x60] sm:$0xff] }
 0x191   : > { %v1680_v49 = vsel %vm738_vm2, %v1632_v25, %v1633_v51  ;;  %v1205_v42 = vsel %vm1193_vm1, %v1175_v40, %v1176_v60  ;;  %v10777_v40 = vld [vmem:[%s11091_s24 + $0x48] sm:$0xff] }
 0x192   : > { %v11806_v21 = vadd.f32 %v1680_v49, %v11611_v33  ;;  %9549 = vmatmul.msk.f32.gmra.mxu0 %vm382_vm0, %v11811_v34  ;;  %v11815_v18 = vadd.f32 %v1205_v42, %v970_v11  ;;  %9598 = vmatmul.msk.f32.gmra.mxu1 %vm382_vm0, %v11811_v34  ;;  %v749_v33 = vsel %vm738_vm2, %v718_v55, %v719_v8 }
 0x193   : > { %9532 = vmatmul.msk.f32.gmra.mxu3 %vm382_vm0, %v11636_v63  ;;  %9695 = vmatmul.msk.f32.gmra.mxu2 %vm382_vm0, %v11799_v12  ;;  %v971_v39 = vadd.f32 %v905_v53, %v749_v33 }
 0x196   : > { %v1530_v56 = vpop.f32.mrf.mxu3  ;;  %v1097_v62 = vpop.f32.mrf.mxu2 }
 0x197   : > { %v1177_v63 = vrot.slane %v1097_v62, 1  ;;  %v643_v28 = vpop.f32.mrf.mxu0  ;;  %v910_v19 = vpop.f32.mrf.mxu1  ;;  %v1634_v53 = vrot.slane %v1530_v56, 7  ;;  %v11855_v62 = vld [vmem:[%s11091_s24 + $0x68] sm:$0xff] }
 0x198   : > { %v721_v14 = vrot.slane %v643_v28, 7 }
 0x199   : > { %v1204_v23 = vsel %vm1193_vm1, %v1176_v60, %v1177_v63  ;;  %v720_v60 = vrot.slane %v640_v57, 7 }
 0x19a   : > { %9550 = vmatmul.msk.f32.gmra.mxu0 %vm382_vm0, %v10776_v32  ;;  %v11832_v25 = vadd.f32 %v1204_v23, %v971_v39  ;;  %9599 = vmatmul.msk.f32.gmra.mxu1 %vm382_vm0, %v10776_v32  ;;  %v10778_v23 = vld [vmem:[%s11091_s24 + $0x50] sm:$0xff] }
 0x19b   : > { %9533 = vmatmul.msk.f32.gmra.mxu3 %vm382_vm0, %v11658_v20  ;;  %9696 = vmatmul.msk.f32.gmra.mxu2 %vm382_vm0, %v11824_v48  ;;  %v748_v11 = vsel %vm738_vm2, %v720_v60, %v721_v14 }
 0x19e   : > { %v1533_v38 = vpop.f32.mrf.mxu3  ;;  %v1100_v41 = vpop.f32.mrf.mxu2 }
 0x19f   : > { %v1635_v55 = vrot.slane %v1533_v38, 7  ;;  %v646_v3 = vpop.f32.mrf.mxu0  ;;  %v913_v10 = vpop.f32.mrf.mxu1  ;;  %v1178_v8 = vrot.slane %v1100_v41, 1 }
 0x1a0   : > { %v722_v63 = vrot.slane %v646_v3, 7  ;;  %v11876_v3 = vld [vmem:[%s11091_s24 + $0x70] sm:$0xff] }
 0x1a1   : > { %v1679_v20 = vsel %vm738_vm2, %v1634_v53, %v1635_v55 }
 0x1a2   : > { %v11843_v51 = vadd.f32 %v1679_v20, %v11649_v7  ;;  %9551 = vmatmul.msk.f32.gmra.mxu0 %vm382_vm0, %v10777_v40  ;;  %9600 = vmatmul.msk.f32.gmra.mxu1 %vm382_vm0, %v10777_v40  ;;  %v747_v32 = vsel %vm738_vm2, %v721_v14, %v722_v63  ;;  %v10779_v40 = vld [vmem:[%s11091_s24 + $0x58] sm:$0xff] }
 0x1a3   : > { %9534 = vmatmul.msk.f32.gmra.mxu3 %vm382_vm0, %v11676_v52  ;;  %9697 = vmatmul.msk.f32.gmra.mxu2 %vm382_vm0, %v11838_v2  ;;  %v972_v52 = vadd.f32 %v910_v19, %v748_v11 }
 0x1a6   : > { %v1536_v43 = vpop.f32.mrf.mxu3  ;;  %v1103_v7 = vpop.f32.mrf.mxu2 }
 0x1a7   : > { %v1636_v49 = vrot.slane %v1536_v43, 7  ;;  %v1179_v42 = vrot.slane %v1103_v7, 1  ;;  %v649_v33 = vpop.f32.mrf.mxu0  ;;  %v916_v56 = vpop.f32.mrf.mxu1 }
 0x1a8   : > { %v723_v63 = vrot.slane %v649_v33, 7  ;;  %v11913_v33 = vld [vmem:[%s11091_s24 + $0x80] sm:$0xff] }
 0x1a9   : > { %v1678_v57 = vsel %vm738_vm2, %v1635_v55, %v1636_v49  ;;  %v1203_v28 = vsel %vm1193_vm1, %v1178_v8, %v1179_v42  ;;  %v11890_v49 = vld [vmem:[%s11091_s24 + $0x160] sm:$0xff] }
 0x1aa   : > { %v11862_v39 = vadd.f32 %v1678_v57, %v11666_v22  ;;  %9552 = vmatmul.msk.f32.gmra.mxu0 %vm382_vm0, %v10778_v23  ;;  %v11868_v19 = vadd.f32 %v1203_v28, %v972_v52  ;;  %9601 = vmatmul.msk.f32.gmra.mxu1 %vm382_vm0, %v10778_v23  ;;  %v10780_v57 = vld [vmem:[%s11091_s24 + $0x60] sm:$0xff] }
 0x1ab   : > { %9535 = vmatmul.msk.f32.gmra.mxu3 %vm382_vm0, %v11694_v1  ;;  %9698 = vmatmul.msk.f32.gmra.mxu2 %vm382_vm0, %v11855_v62  ;;  %v973_v1 = vadd.f32 %v913_v10, %v747_v32 }
 0x1ac   : > { %17750 = vst [vmem:[#allocation4_spill] sm:$0xff] %v11862_v39  ;;  %v12045_v39 = vld [vmem:[%s11091_s24 + $0xb0] sm:$0xff] }
 0x1ae   : > { %v1539_v38 = vpop.f32.mrf.mxu3  ;;  %v1106_v22 = vpop.f32.mrf.mxu2 }
 0x1af   : > { %v1180_v53 = vrot.slane %v1106_v22, 1  ;;  %v652_v41 = vpop.f32.mrf.mxu0  ;;  %v918_v55 = vpop.f32.mrf.mxu1  ;;  %v1637_v60 = vrot.slane %v1539_v38, 7 }
 0x1b0   : > { %v724_v52 = vrot.slane %v652_v41, 7  ;;  %v11910_v41 = vld [vmem:[%s11091_s24 + $0x168] sm:$0xff] }
 0x1b1   : > { %v1202_v20 = vsel %vm1193_vm1, %v1179_v42, %v1180_v53  ;;  %17752 = vst [vmem:[#allocation6_spill] sm:$0xff] %v11910_v41 }
 0x1b2   : > { %9553 = vmatmul.msk.f32.gmra.mxu0 %vm382_vm0, %v10779_v40  ;;  %v11884_v14 = vadd.f32 %v1202_v20, %v973_v1  ;;  %9602 = vmatmul.msk.f32.gmra.mxu1 %vm382_vm0, %v10779_v40  ;;  %v746_v28 = vsel %vm738_vm2, %v723_v63, %v724_v52 }
 0x1b3   : > { %9536 = vmatmul.msk.f32.gmra.mxu3 %vm382_vm0, %v11716_v36  ;;  %9699 = vmatmul.msk.f32.gmra.mxu2 %vm382_vm0, %v11876_v3  ;;  %v11893_v36 = vld [vmem:[%s11091_s24 + $0x78] sm:$0xff]  ;;  %v974_v1 = vadd.f32 %v918_v55, %v746_v28  ;;  %v11934_v28 = vld [vmem:[%s11091_s24 + $0x170] sm:$0xff] }
 0x1b4   : > { %17754 = vst [vmem:[#allocation8_spill] sm:$0xff] %v11934_v28 }
 0x1b6   : > { %v1542_v10 = vpop.f32.mrf.mxu3  ;;  %v1109_v11 = vpop.f32.mrf.mxu2 }
 0x1b7   : > { %v1638_v43 = vrot.slane %v1542_v10, 7  ;;  %v655_v7 = vpop.f32.mrf.mxu0  ;;  %v921_v8 = vpop.f32.mrf.mxu1  ;;  %v1181_v38 = vrot.slane %v1109_v11, 1  ;;  %v10781_v11 = vld [vmem:[%s11091_s24 + $0x68] sm:$0xff] }
 0x1b8   : > { %v725_v10 = vrot.slane %v655_v7, 7 }
 0x1b9   : > { %v1677_v42 = vsel %vm738_vm2, %v1637_v60, %v1638_v43 }
 0x1ba   : > { %v11898_v56 = vadd.f32 %v1677_v42, %v11707_v26  ;;  %9554 = vmatmul.msk.f32.gmra.mxu0 %vm382_vm0, %v10780_v57  ;;  %9603 = vmatmul.msk.f32.gmra.mxu1 %vm382_vm0, %v10780_v57 }
 0x1bb   : > { %9537 = vmatmul.msk.f32.gmra.mxu3 %vm382_vm0, %v11890_v49  ;;  %9700 = vmatmul.msk.f32.gmra.mxu2 %vm382_vm0, %v11893_v36 }
 0x1bc   : > { %17751 = vst [vmem:[#allocation5_spill] sm:$0xff] %v11898_v56  ;;  %v11977_v56 = vld [vmem:[%s11091_s24 + $0x98] sm:$0xff] }
 0x1be   : > { %v1545_v23 = vpop.f32.mrf.mxu3  ;;  %v1112_v26 = vpop.f32.mrf.mxu2 }
 0x1bf   : > { %v1639_v32 = vrot.slane %v1545_v23, 7  ;;  %v1182_v22 = vrot.slane %v1112_v26, 1  ;;  %v658_v53 = vpop.f32.mrf.mxu0  ;;  %v924_v20 = vpop.f32.mrf.mxu1 }
 0x1c1   : > { %v1676_v40 = vsel %vm738_vm2, %v1638_v43, %v1639_v32  ;;  %v1201_v60 = vsel %vm1193_vm1, %v1181_v38, %v1182_v22  ;;  %v745_v43 = vsel %vm738_vm2, %v724_v52, %v725_v10  ;;  %v11937_v32 = vld [vmem:[%s11091_s24 + $0x88] sm:$0xff] }
 0x1c2   : > { %v11920_v42 = vadd.f32 %v1676_v40, %v11724_v35  ;;  %9555 = vmatmul.msk.f32.gmra.mxu0 %vm382_vm0, %v10781_v11  ;;  %v11926_v55 = vadd.f32 %v1201_v60, %v974_v1  ;;  %9604 = vmatmul.msk.f32.gmra.mxu1 %vm382_vm0, %v10781_v11  ;;  %v975_v23 = vadd.f32 %v921_v8, %v745_v43  ;;  %v10782_v1 = vld [vmem:[%s11091_s24 + $0x70] sm:$0xff] }
 0x1c3   : > { %9538 = vmatmul.msk.f32.gmra.mxu3 %vm382_vm0, %v11910_v41  ;;  %9701 = vmatmul.msk.f32.gmra.mxu2 %vm382_vm0, %v11913_v33  ;;  %v11954_v43 = vld [vmem:[%s11091_s24 + $0x90] sm:$0xff] }
 0x1c4   : > { %17753 = vst [vmem:[#allocation7_spill] sm:$0xff] %v11920_v42  ;;  %v11974_v42 = vld [vmem:[%s11091_s24 + $0x180] sm:$0xff] }
 0x1c5   : > { %17757 = vst [vmem:[#allocation11_spill] sm:$0xff] %v11974_v42 }
 0x1c6   : > { %v1548_v7 = vpop.f32.mrf.mxu3  ;;  %v1115_v35 = vpop.f32.mrf.mxu2 }
 0x1c7   : > { %v1183_v57 = vrot.slane %v1115_v35, 1  ;;  %v661_v63 = vpop.f32.mrf.mxu0  ;;  %v926_v26 = vpop.f32.mrf.mxu1  ;;  %v1640_v20 = vrot.slane %v1548_v7, 7  ;;  %v10783_v7 = vld [vmem:[%s11091_s24 + $0x78] sm:$0xff] }
 0x1c9   : > { %v1200_v38 = vsel %vm1193_vm1, %v1182_v22, %v1183_v57  ;;  %v11951_v22 = vld [vmem:[%s11091_s24 + $0x178] sm:$0xff]  ;;  %v727_v57 = vrot.slane %v661_v63, 7 }
 0x1ca   : > { %9556 = vmatmul.msk.f32.gmra.mxu0 %vm382_vm0, %v10782_v1  ;;  %v11945_v52 = vadd.f32 %v1200_v38, %v975_v23  ;;  %9605 = vmatmul.msk.f32.gmra.mxu1 %vm382_vm0, %v10782_v1  ;;  %17755 = vst [vmem:[#allocation9_spill] sm:$0xff] %v11951_v22  ;;  %v3274_v23 = vld [vmem:[%s17662_s3] sm:$0xff]  ;;  %v726_v1 = vrot.slane %v658_v53, 7 }
 0x1cb   : > { %9539 = vmatmul.msk.f32.gmra.mxu3 %vm382_vm0, %v11934_v28  ;;  %9702 = vmatmul.msk.f32.gmra.mxu2 %vm382_vm0, %v11937_v32 }
 0x1cc   : > { %3434 = vmatpush.msra.mxu1 %v3274_v23  ;;  %v744_v63 = vsel %vm738_vm2, %v726_v1, %v727_v57 }
 0x1ce   : > { %v1551_v8 = vpop.f32.mrf.mxu3  ;;  %v1118_v40 = vpop.f32.mrf.mxu2 }
 0x1cf   : > { %v1641_v10 = vrot.slane %v1551_v8, 7  ;;  %v664_v60 = vpop.f32.mrf.mxu0  ;;  %v929_v11 = vpop.f32.mrf.mxu1 }
 0x1d0   : > { %v728_v23 = vrot.slane %v664_v60, 7 }
 0x1d1   : > { %v1675_v35 = vsel %vm738_vm2, %v1640_v20, %v1641_v10 }
 0x1d2   : > { %v11962_v38 = vadd.f32 %v1675_v35, %v11756_v29  ;;  %9557 = vmatmul.msk.f32.gmra.mxu0 %vm382_vm0, %v10783_v7  ;;  %9606 = vmatmul.msk.f32.gmra.mxu1 %vm382_vm0, %v10783_v7  ;;  %v1184_v35 = vrot.slane %v1118_v40, 1  ;;  %v10784_v40 = vld [vmem:[%s11091_s24 + $0x80] sm:$0xff] }
 0x1d3   : > { %9540 = vmatmul.msk.f32.gmra.mxu3 %vm382_vm0, %v11951_v22  ;;  %9703 = vmatmul.msk.f32.gmra.mxu2 %vm382_vm0, %v11954_v43  ;;  %v976_v22 = vadd.f32 %v926_v26, %v744_v63 }
 0x1d4   : > { %17756 = vst [vmem:[#allocation10_spill] sm:$0xff] %v11962_v38 }
 0x1d6   : > { %v1554_v29 = vpop.f32.mrf.mxu3  ;;  %v1121_v8 = vpop.f32.mrf.mxu2 }
 0x1d7   : > { %v1642_v20 = vrot.slane %v1554_v29, 7  ;;  %v1185_v6 = vrot.slane %v1121_v8, 1  ;;  %v667_v38 = vpop.f32.mrf.mxu0  ;;  %v932_v53 = vpop.f32.mrf.mxu1 }
 0x1d8   : > { %v12004_v53 = vld [vmem:[%s11091_s24 + $0xa0] sm:$0xff] }
 0x1d9   : > { %v1674_v7 = vsel %vm738_vm2, %v1641_v10, %v1642_v20  ;;  %v1199_v1 = vsel %vm1193_vm1, %v1184_v35, %v1185_v6  ;;  %v743_v10 = vsel %vm738_vm2, %v727_v57, %v728_v23 }
 0x1da   : > { %v11984_v28 = vadd.f32 %v1674_v7, %v11772_v17  ;;  %9558 = vmatmul.msk.f32.gmra.mxu0 %vm382_vm0, %v10784_v40  ;;  %v11990_v26 = vadd.f32 %v1199_v1, %v976_v22  ;;  %9607 = vmatmul.msk.f32.gmra.mxu1 %vm382_vm0, %v10784_v40  ;;  %v9934_v17 = vld [vmem:[%s17662_s3 + $0x10] sm:$0xff]  ;;  %v12001_v22 = vld [vmem:[%s11091_s24 + $0x188] sm:$0xff]  ;;  %v977_v20 = vadd.f32 %v929_v11, %v743_v10 }
 0x1db   : > { %9541 = vmatmul.msk.f32.gmra.mxu3 %vm382_vm0, %v11974_v42  ;;  %9704 = vmatmul.msk.f32.gmra.mxu2 %vm382_vm0, %v11977_v56  ;;  %17759 = vst [vmem:[#allocation13_spill] sm:$0xff] %v12001_v22  ;;  %v10785_v1 = vld [vmem:[%s11091_s24 + $0x88] sm:$0xff] }
 0x1dc   : > { %17758 = vst [vmem:[#allocation12_spill] sm:$0xff] %v11984_v28  ;;  %3888 = vmatpush.msrb.mxu3 %v9934_v17 }
 0x1de   : > { %v1557_v60 = vpop.f32.mrf.mxu3  ;;  %v1124_v63 = vpop.f32.mrf.mxu2 }
 0x1df   : > { %v1186_v29 = vrot.slane %v1124_v63, 1  ;;  %v670_v8 = vpop.f32.mrf.mxu0  ;;  %v934_v35 = vpop.f32.mrf.mxu1  ;;  %v1643_v23 = vrot.slane %v1557_v60, 7  ;;  %v10786_v60 = vld [vmem:[%s11091_s24 + $0x90] sm:$0xff] }
 0x1e1   : > { %v1198_v7 = vsel %vm1193_vm1, %v1185_v6, %v1186_v29  ;;  %v12018_v6 = vld [vmem:[%s11091_s24 + $0x190] sm:$0xff]  ;;  %v12021_v29 = vld [vmem:[%s11091_s24 + $0xa8] sm:$0xff] }
 0x1e2   : > { %9559 = vmatmul.msk.f32.gmra.mxu0 %vm382_vm0, %v10785_v1  ;;  %v12012_v57 = vadd.f32 %v1198_v7, %v977_v20  ;;  %9608 = vmatmul.msk.f32.gmra.mxu1 %vm382_vm0, %v10785_v1  ;;  %17760 = vst [vmem:[#allocation14_spill] sm:$0xff] %v12018_v6  ;;  %v730_v7 = vrot.slane %v670_v8, 7 }
 0x1e3   : > { %9542 = vmatmul.msk.f32.gmra.mxu3 %vm382_vm0, %v12001_v22  ;;  %9705 = vmatmul.msk.f32.gmra.mxu2 %vm382_vm0, %v12004_v53 }
 0x1e6   : > { %v1560_v11 = vpop.f32.mrf.mxu3  ;;  %v1127_v40 = vpop.f32.mrf.mxu2 }
 0x1e7   : > { %v1644_v17 = vrot.slane %v1560_v11, 7  ;;  %v673_v10 = vpop.f32.mrf.mxu0  ;;  %v937_v63 = vpop.f32.mrf.mxu1  ;;  %v729_v11 = vrot.slane %v667_v38, 7 }
 0x1e8   : > { %v731_v28 = vrot.slane %v673_v10, 7 }
 0x1e9   : > { %v1673_v20 = vsel %vm738_vm2, %v1643_v23, %v1644_v17  ;;  %v742_v8 = vsel %vm738_vm2, %v729_v11, %v730_v7 }
 0x1ea   : > { %v12026_v1 = vadd.f32 %v1673_v20, %v11815_v18  ;;  %9560 = vmatmul.msk.f32.gmra.mxu0 %vm382_vm0, %v10786_v60  ;;  %9609 = vmatmul.msk.f32.gmra.mxu1 %vm382_vm0, %v10786_v60  ;;  %v741_v18 = vsel %vm738_vm2, %v730_v7, %v731_v28  ;;  %v978_v60 = vadd.f32 %v934_v35, %v742_v8  ;;  %v10787_v35 = vld [vmem:[%s11091_s24 + $0x98] sm:$0xff]  ;;  %v10788_v8 = vld [vmem:[%s11091_s24 + $0xa0] sm:$0xff] }
 0x1eb   : > { %9543 = vmatmul.msk.f32.gmra.mxu3 %vm382_vm0, %v12018_v6  ;;  %9706 = vmatmul.msk.f32.gmra.mxu2 %vm382_vm0, %v12021_v29  ;;  %v1187_v6 = vrot.slane %v1127_v40, 1  ;;  %v979_v42 = vadd.f32 %v937_v63, %v741_v18 }
 0x1ec   : > { %17761 = vst [vmem:[#allocation15_spill] sm:$0xff] %v12026_v1  ;;  %v1189_v1 = vrot.slane %v11380_v0, 1 }
 0x1ee   : > { %v1563_v23 = vpop.f32.mrf.mxu3  ;;  %v1130_v10 = vpop.f32.mrf.mxu2 }
 0x1ef   : > { %v1645_v20 = vrot.slane %v1563_v23, 7  ;;  %v1188_v22 = vrot.slane %v1130_v10, 1  ;;  %v12040_v38 = vpop.f32.mrf.mxu0  ;;  %v12042_v41 = vpop.f32.mrf.mxu1 }
 0x1f1   : > { %v1672_v28 = vsel %vm738_vm2, %v1644_v17, %v1645_v20  ;;  %v1196_v7 = vsel %vm1193_vm1, %v1188_v22, %v1189_v1  ;;  %v1197_v0 = vsel %vm1193_vm1, %v1187_v6, %v1188_v22  ;;  %v12072_v1 = vld [vmem:[%s11091_s24 + $0xb8] sm:$0xff] }
 0x1f2   : > { %v12054_v40 = vadd.f32 %v1672_v28, %v11832_v25  ;;  %9561 = vmatmul.msk.f32.gmra.mxu0 %vm382_vm0, %v10787_v35  ;;  %v12060_v63 = vadd.f32 %v1197_v0, %v978_v60  ;;  %v12062_v11 = vadd.f32 %v1196_v7, %v979_v42  ;;  %9610 = vmatmul.msk.f32.gmra.mxu1 %vm382_vm0, %v10787_v35  ;;  %v12084_v0 = vld [vmem:[%s11091_s24 + $0xc0] sm:$0xff] }
 0x1f3   : > { %9740 = vmatmul.msk.f32.vlgmr.msra.gmra.mxu3 %vm382_vm0, %v11788_v61  ;;  %9707 = vmatmul.msk.f32.gmra.mxu2 %vm382_vm0, %v12045_v39 }
 0x1f6   : > { %v1566_v17 = vpop.f32.mrf.mxu3  ;;  %v12067_v22 = vpop.f32.mrf.mxu2 }
 0x1f7   : > { %17762 = vst [vmem:[#allocation16_spill] sm:$0xff] %v12067_v22  ;;  %v1748_v25 = vpop.f32.mrf.mxu0  ;;  %v12069_v6 = vpop.f32.mrf.mxu1  ;;  %v1646_v42 = vrot.slane %v1566_v17, 7  ;;  %v17680_v10 = vrot.slane %v12067_v22, 7 }
 0x1f8   : > { %17763 = vst [vmem:[#allocation17_spill] sm:$0xff] %v12069_v6  ;;  %v17681_v20 = vrot.slane %v12069_v6, 1 }
 0x1fa   : > { %9562 = vmatmul.msk.f32.gmra.mxu0 %vm382_vm0, %v10788_v8  ;;  %9611 = vmatmul.msk.f32.gmra.mxu1 %vm382_vm0, %v10788_v8 }
 0x1fb   : > { %9741 = vmatmul.msk.f32.gmra.mxu3 %vm382_vm0, %v11811_v34  ;;  %9708 = vmatmul.msk.f32.gmra.mxu2 %vm382_vm0, %v12072_v1 }
 0x1fe   : > { %v1569_v61 = vpop.f32.mrf.mxu3  ;;  %v2395_v23 = vpop.f32.mrf.mxu2 }
 0x1ff   : > { %v1647_v18 = vrot.slane %v1569_v61, 7  ;;  %v2537_v60 = vrot.slane %v2395_v23, 7  ;;  %v1751_v28 = vpop.f32.mrf.mxu0  ;;  %v1930_v7 = vpop.f32.mrf.mxu1  ;;  %v1874_v61 = vadd.f32 %v1748_v25, %v11478_v24  ;;  %v10789_v23 = vld [vmem:[%s11091_s24 + $0xa8] sm:$0xff] }
 0x200   : > { %v2070_v35 = vrot.slane %v1930_v7, 1 }
 0x201   : > { %v1671_v34 = vsel %vm738_vm2, %v1646_v42, %v1647_v18  ;;  %v2614_v17 = vsel %vm738_vm2, %v17680_v10, %v2537_v60 }
 0x202   : > { %v12093_v8 = vadd.f32 %v1671_v34, %v11868_v19  ;;  %9563 = vmatmul.msk.f32.gmra.mxu0 %vm382_vm0, %v10789_v23  ;;  %v2146_v42 = vsel %vm1193_vm1, %v17681_v20, %v2070_v35  ;;  %9612 = vmatmul.msk.f32.gmra.mxu1 %vm382_vm0, %v10789_v23  ;;  %v10790_v23 = vld [vmem:[%s11091_s24 + $0xb0] sm:$0xff] }
 0x203   : > { %9742 = vmatmul.msk.f32.gmra.mxu3 %vm382_vm0, %v11764_v27  ;;  %9709 = vmatmul.msk.f32.gmra.mxu2 %vm382_vm0, %v12084_v0  ;;  %v2149_v19 = vadd.f32 %v2146_v42, %v1874_v61  ;;  %v12110_v27 = vld [vmem:[%s11091_s24 + $0xc8] sm:$0xff] }
 0x204   : > { %17764 = vst [vmem:[#allocation18_spill] sm:$0xff] %v12093_v8 }
 0x205   : > { %v12107_v28 = vadd.f32 %v2614_v17, %v2149_v19 }
 0x206   : > { %v1572_v60 = vpop.f32.mrf.mxu3  ;;  %v2398_v25 = vpop.f32.mrf.mxu2 }
 0x207   : > { %v1648_v24 = vrot.slane %v1572_v60, 7  ;;  %v1753_v7 = vpop.f32.mrf.mxu0  ;;  %v1933_v34 = vpop.f32.mrf.mxu1  ;;  %v2538_v42 = vrot.slane %v2398_v25, 7 }
 0x208   : > { %v2071_v19 = vrot.slane %v1933_v34, 1 }
 0x209   : > { %v1670_v10 = vsel %vm738_vm2, %v1647_v18, %v1648_v24 }
 0x20a   : > { %v12115_v35 = vadd.f32 %v1670_v10, %v11884_v14  ;;  %9564 = vmatmul.msk.f32.gmra.mxu0 %vm382_vm0, %v10790_v23  ;;  %9613 = vmatmul.msk.f32.gmra.mxu1 %vm382_vm0, %v10790_v23  ;;  %v12125_v10 = vld [vmem:[%s11091_s24 + $0xd0] sm:$0xff]  ;;  %v10791_v23 = vld [vmem:[%s11091_s24 + $0xb8] sm:$0xff] }
 0x20b   : > { %9743 = vmatmul.msk.f32.gmra.mxu3 %vm382_vm0, %v11778_v46  ;;  %9710 = vmatmul.msk.f32.gmra.mxu2 %vm382_vm0, %v12110_v27  ;;  %v1875_v46 = vadd.f32 %v1753_v7, %v11513_v54 }
 0x20c   : > { %17765 = vst [vmem:[#allocation19_spill] sm:$0xff] %v12115_v35 }
 0x20e   : > { %v1575_v17 = vpop.f32.mrf.mxu3  ;;  %v2401_v61 = vpop.f32.mrf.mxu2 }
 0x20f   : > { %v2539_v18 = vrot.slane %v2401_v61, 7  ;;  %v1756_v60 = vpop.f32.mrf.mxu0  ;;  %v1936_v14 = vpop.f32.mrf.mxu1 }
 0x210   : > { %v2072_v24 = vrot.slane %v1936_v14, 1 }
 0x211   : > { %v2613_v20 = vsel %vm738_vm2, %v2538_v42, %v2539_v18  ;;  %v1649_v42 = vrot.slane %v1575_v17, 7  ;;  %v1876_v17 = vadd.f32 %v1756_v60, %v11533_v15 }
 0x212   : > { %9565 = vmatmul.msk.f32.gmra.mxu0 %vm382_vm0, %v10791_v23  ;;  %v2145_v25 = vsel %vm1193_vm1, %v2071_v19, %v2072_v24  ;;  %9614 = vmatmul.msk.f32.gmra.mxu1 %vm382_vm0, %v10791_v23 }
 0x213   : > { %9744 = vmatmul.msk.f32.gmra.mxu3 %vm382_vm0, %v11799_v12  ;;  %9711 = vmatmul.msk.f32.gmra.mxu2 %vm382_vm0, %v12125_v10  ;;  %v2150_v34 = vadd.f32 %v2145_v25, %v1875_v46  ;;  %v12142_v12 = vld [vmem:[%s11091_s24 + $0xd8] sm:$0xff] }
 0x215   : > { %v12139_v14 = vadd.f32 %v2613_v20, %v2150_v34  ;;  %v10792_v20 = vld [vmem:[%s11091_s24 + $0xc0] sm:$0xff] }
 0x216   : > { %v1578_v61 = vpop.f32.mrf.mxu3  ;;  %v2404_v7 = vpop.f32.mrf.mxu2  ;;  %v12164_v34 = vld [vmem:[%s11091_s24 + $0xe0] sm:$0xff] }
 0x217   : > { %v1650_v54 = vrot.slane %v1578_v61, 7  ;;  %v2540_v35 = vrot.slane %v2404_v7, 7  ;;  %v1759_v8 = vpop.f32.mrf.mxu0  ;;  %v1939_v22 = vpop.f32.mrf.mxu1  ;;  %v10793_v61 = vld [vmem:[%s11091_s24 + $0xc8] sm:$0xff] }
 0x218   : > { %v2073_v23 = vrot.slane %v1939_v22, 1 }
 0x219   : > { %v1669_v19 = vsel %vm738_vm2, %v1649_v42, %v1650_v54  ;;  %v2612_v6 = vsel %vm738_vm2, %v2539_v18, %v2540_v35 }
 0x21a   : > { %v12149_v46 = vadd.f32 %v1669_v19, %v11926_v55  ;;  %9566 = vmatmul.msk.f32.gmra.mxu0 %vm382_vm0, %v10792_v20  ;;  %v2144_v8 = vsel %vm1193_vm1, %v2072_v24, %v2073_v23  ;;  %9615 = vmatmul.msk.f32.gmra.mxu1 %vm382_vm0, %v10792_v20 }
 0x21b   : > { %9745 = vmatmul.msk.f32.gmra.mxu3 %vm382_vm0, %v11824_v48  ;;  %9712 = vmatmul.msk.f32.gmra.mxu2 %vm382_vm0, %v12142_v12  ;;  %v2151_v22 = vadd.f32 %v2144_v8, %v1876_v17  ;;  %v12179_v17 = vld [vmem:[%s11091_s24 + $0xe8] sm:$0xff] }
 0x21d   : > { %v12161_v15 = vadd.f32 %v2612_v6, %v2151_v22  ;;  %v10794_v22 = vld [vmem:[%s11091_s24 + $0xd0] sm:$0xff] }
 0x21e   : > { %v1581_v55 = vpop.f32.mrf.mxu3  ;;  %v2407_v18 = vpop.f32.mrf.mxu2 }
 0x21f   : > { %v1651_v35 = vrot.slane %v1581_v55, 7  ;;  %v1761_v60 = vpop.f32.mrf.mxu0  ;;  %v1942_v25 = vpop.f32.mrf.mxu1  ;;  %v2541_v7 = vrot.slane %v2407_v18, 7 }
 0x220   : > { %v2074_v19 = vrot.slane %v1942_v25, 1 }
 0x221   : > { %v1668_v48 = vsel %vm738_vm2, %v1650_v54, %v1651_v35 }
 0x222   : > { %v12169_v24 = vadd.f32 %v1668_v48, %v11945_v52  ;;  %9567 = vmatmul.msk.f32.gmra.mxu0 %vm382_vm0, %v10793_v61  ;;  %9616 = vmatmul.msk.f32.gmra.mxu1 %vm382_vm0, %v10793_v61 }
 0x223   : > { %9746 = vmatmul.msk.f32.gmra.mxu3 %vm382_vm0, %v11838_v2  ;;  %9713 = vmatmul.msk.f32.gmra.mxu2 %vm382_vm0, %v12164_v34  ;;  %v1877_v2 = vadd.f32 %v1761_v60, %v11568_v50 }
 0x226   : > { %v1584_v6 = vpop.f32.mrf.mxu3  ;;  %v2410_v42 = vpop.f32.mrf.mxu2 }
 0x227   : > { %v2542_v54 = vrot.slane %v2410_v42, 7  ;;  %v1764_v23 = vpop.f32.mrf.mxu0  ;;  %v1945_v52 = vpop.f32.mrf.mxu1  ;;  %v1652_v25 = vrot.slane %v1584_v6, 7 }
 0x228   : > { %v2075_v20 = vrot.slane %v1945_v52, 1  ;;  %v1878_v6 = vadd.f32 %v1764_v23, %v11588_v47 }
 0x229   : > { %v2611_v8 = vsel %vm738_vm2, %v2541_v7, %v2542_v54 }
 0x22a   : > { %9568 = vmatmul.msk.f32.gmra.mxu0 %vm382_vm0, %v10794_v22  ;;  %v2143_v55 = vsel %vm1193_vm1, %v2074_v19, %v2075_v20  ;;  %9617 = vmatmul.msk.f32.gmra.mxu1 %vm382_vm0, %v10794_v22 }
 0x22b   : > { %9747 = vmatmul.msk.f32.gmra.mxu3 %vm382_vm0, %v11855_v62  ;;  %9714 = vmatmul.msk.f32.gmra.mxu2 %vm382_vm0, %v12179_v17  ;;  %v2152_v35 = vadd.f32 %v2143_v55, %v1877_v2  ;;  %v12196_v62 = vld [vmem:[%s11091_s24 + $0xf0] sm:$0xff] }
 0x22d   : > { %v12193_v48 = vadd.f32 %v2611_v8, %v2152_v35  ;;  %v10795_v8 = vld [vmem:[%s11091_s24 + $0xd8] sm:$0xff] }
 0x22e   : > { %v1587_v18 = vpop.f32.mrf.mxu3  ;;  %v2413_v60 = vpop.f32.mrf.mxu2 }
 0x22f   : > { %v1653_v50 = vrot.slane %v1587_v18, 7  ;;  %v2543_v61 = vrot.slane %v2413_v60, 7  ;;  %v1767_v42 = vpop.f32.mrf.mxu0  ;;  %v1948_v7 = vpop.f32.mrf.mxu1  ;;  %v12218_v60 = vld [vmem:[%s11091_s24 + $0xf8] sm:$0xff] }
 0x230   : > { %v2076_v52 = vrot.slane %v1948_v7, 1 }
 0x231   : > { %v1667_v19 = vsel %vm738_vm2, %v1652_v25, %v1653_v50  ;;  %v2610_v22 = vsel %vm738_vm2, %v2542_v54, %v2543_v61  ;;  %v10796_v61 = vld [vmem:[%s11091_s24 + $0xe0] sm:$0xff] }
 0x232   : > { %v12203_v2 = vadd.f32 %v1667_v19, %v11990_v26  ;;  %9569 = vmatmul.msk.f32.gmra.mxu0 %vm382_vm0, %v10795_v8  ;;  %v2142_v55 = vsel %vm1193_vm1, %v2075_v20, %v2076_v52  ;;  %9618 = vmatmul.msk.f32.gmra.mxu1 %vm382_vm0, %v10795_v8 }
 0x233   : > { %9748 = vmatmul.msk.f32.gmra.mxu3 %vm382_vm0, %v11876_v3  ;;  %9715 = vmatmul.msk.f32.gmra.mxu2 %vm382_vm0, %v12196_v62  ;;  %v2153_v54 = vadd.f32 %v2142_v55, %v1878_v6  ;;  %v12233_v6 = vld [vmem:[%s11091_s24 + $0x100] sm:$0xff] }
 0x235   : > { %v12215_v47 = vadd.f32 %v2610_v22, %v2153_v54  ;;  %v10797_v54 = vld [vmem:[%s11091_s24 + $0xe8] sm:$0xff] }
 0x236   : > { %v1590_v26 = vpop.f32.mrf.mxu3  ;;  %v2416_v18 = vpop.f32.mrf.mxu2 }
 0x237   : > { %v1654_v35 = vrot.slane %v1590_v26, 7  ;;  %v1769_v23 = vpop.f32.mrf.mxu0  ;;  %v1951_v25 = vpop.f32.mrf.mxu1  ;;  %v2544_v19 = vrot.slane %v2416_v18, 7 }
 0x238   : > { %v2077_v52 = vrot.slane %v1951_v25, 1 }
 0x239   : > { %v1666_v3 = vsel %vm738_vm2, %v1653_v50, %v1654_v35 }
 0x23a   : > { %v12223_v20 = vadd.f32 %v1666_v3, %v12012_v57  ;;  %9570 = vmatmul.msk.f32.gmra.mxu0 %vm382_vm0, %v10796_v61  ;;  %9619 = vmatmul.msk.f32.gmra.mxu1 %vm382_vm0, %v10796_v61 }
 0x23b   : > { %9749 = vmatmul.msk.f32.gmra.mxu3 %vm382_vm0, %v11893_v36  ;;  %9716 = vmatmul.msk.f32.gmra.mxu2 %vm382_vm0, %v12218_v60  ;;  %v1879_v36 = vadd.f32 %v1769_v23, %v11623_v5 }
 0x23e   : > { %v1593_v42 = vpop.f32.mrf.mxu3  ;;  %v2419_v7 = vpop.f32.mrf.mxu2 }
 0x23f   : > { %v2545_v50 = vrot.slane %v2419_v7, 7  ;;  %v1772_v22 = vpop.f32.mrf.mxu0  ;;  %v1954_v57 = vpop.f32.mrf.mxu1  ;;  %v1655_v25 = vrot.slane %v1593_v42, 7 }
 0x240   : > { %v2078_v8 = vrot.slane %v1954_v57, 1  ;;  %v1880_v42 = vadd.f32 %v1772_v22, %v11643_v4 }
 0x241   : > { %v2609_v55 = vsel %vm738_vm2, %v2544_v19, %v2545_v50 }
 0x242   : > { %9571 = vmatmul.msk.f32.gmra.mxu0 %vm382_vm0, %v10797_v54  ;;  %v2141_v26 = vsel %vm1193_vm1, %v2077_v52, %v2078_v8  ;;  %9620 = vmatmul.msk.f32.gmra.mxu1 %vm382_vm0, %v10797_v54 }
 0x243   : > { %9750 = vmatmul.msk.f32.gmra.mxu3 %vm382_vm0, %v11913_v33  ;;  %9717 = vmatmul.msk.f32.gmra.mxu2 %vm382_vm0, %v12233_v6  ;;  %v2154_v35 = vadd.f32 %v2141_v26, %v1879_v36  ;;  %v12250_v33 = vld [vmem:[%s11091_s24 + $0x108] sm:$0xff] }
 0x245   : > { %v12247_v3 = vadd.f32 %v2609_v55, %v2154_v35  ;;  %v10798_v55 = vld [vmem:[%s11091_s24 + $0xf0] sm:$0xff] }
 0x246   : > { %v1596_v18 = vpop.f32.mrf.mxu3  ;;  %v2422_v23 = vpop.f32.mrf.mxu2 }
 0x247   : > { %v1656_v5 = vrot.slane %v1596_v18, 7  ;;  %v2546_v61 = vrot.slane %v2422_v23, 7  ;;  %v1775_v7 = vpop.f32.mrf.mxu0  ;;  %v1957_v19 = vpop.f32.mrf.mxu1  ;;  %v12272_v23 = vld [vmem:[%s11091_s24 + $0x110] sm:$0xff] }
 0x248   : > { %v2079_v57 = vrot.slane %v1957_v19, 1 }
 0x249   : > { %v1665_v52 = vsel %vm738_vm2, %v1655_v25, %v1656_v5  ;;  %v2608_v54 = vsel %vm738_vm2, %v2545_v50, %v2546_v61  ;;  %v10799_v61 = vld [vmem:[%s11091_s24 + $0xf8] sm:$0xff] }
 0x24a   : > { %v12257_v36 = vadd.f32 %v1665_v52, %v12060_v63  ;;  %9572 = vmatmul.msk.f32.gmra.mxu0 %vm382_vm0, %v10798_v55  ;;  %v2140_v26 = vsel %vm1193_vm1, %v2078_v8, %v2079_v57  ;;  %9621 = vmatmul.msk.f32.gmra.mxu1 %vm382_vm0, %v10798_v55  ;;  %v12290_v55 = vld [vmem:[%s11091_s24 + $0x118] sm:$0xff] }
 0x24b   : > { %9751 = vmatmul.msk.f32.gmra.mxu3 %vm382_vm0, %v11937_v32  ;;  %9718 = vmatmul.msk.f32.gmra.mxu2 %vm382_vm0, %v12250_v33  ;;  %v2155_v50 = vadd.f32 %v2140_v26, %v1880_v42 }
 0x24c   : > { %17766 = vst [vmem:[#allocation20_spill] sm:$0xff] %v12257_v36  ;;  %v10824_v36 = vld [vmem:[%s11091_s24 + $0x178] sm:$0xff] }
 0x24d   : > { %v12269_v4 = vadd.f32 %v2608_v54, %v2155_v50 }
 0x24e   : > { %v1599_v63 = vpop.f32.mrf.mxu3  ;;  %v2425_v18 = vpop.f32.mrf.mxu2 }
 0x24f   : > { %v1657_v35 = vrot.slane %v1599_v63, 7  ;;  %v1777_v22 = vpop.f32.mrf.mxu0  ;;  %v1960_v25 = vpop.f32.mrf.mxu1  ;;  %v2547_v19 = vrot.slane %v2425_v18, 7  ;;  %v10800_v63 = vld [vmem:[%s11091_s24 + $0x100] sm:$0xff] }
 0x250   : > { %v2080_v52 = vrot.slane %v1960_v25, 1  ;;  %v1881_v50 = vadd.f32 %v1777_v22, %v11681_v45 }
 0x251   : > { %v1664_v32 = vsel %vm738_vm2, %v1656_v5, %v1657_v35  ;;  %v9885_v5 = vld [vmem:[%s17662_s3 + $0x8] sm:$0xff] }
 0x252   : > { %v12277_v8 = vadd.f32 %v1664_v32, %v12062_v11  ;;  %9573 = vmatmul.msk.f32.gmra.mxu0 %vm382_vm0, %v10799_v61  ;;  %9622 = vmatmul.msk.f32.gmra.mxu1 %vm382_vm0, %v10799_v61 }
 0x253   : > { %9752 = vmatmul.msk.f32.gmra.mxu3 %vm382_vm0, %v11954_v43  ;;  %9719 = vmatmul.msk.f32.gmra.mxu2 %vm382_vm0, %v12272_v23 }
 0x254   : > { %17767 = vst [vmem:[#allocation21_spill] sm:$0xff] %v12277_v8  ;;  %3709 = vmatpush.msra.mxu2 %v9885_v5 }
 0x256   : > { %v1602_v7 = vpop.f32.mrf.mxu3  ;;  %v2428_v11 = vpop.f32.mrf.mxu2 }
 0x257   : > { %v2548_v57 = vrot.slane %v2428_v11, 7  ;;  %v1780_v54 = vpop.f32.mrf.mxu0  ;;  %v1963_v42 = vpop.f32.mrf.mxu1  ;;  %v1658_v32 = vrot.slane %v1602_v7, 7 }
 0x258   : > { %v2081_v43 = vrot.slane %v1963_v42, 1  ;;  %v1882_v7 = vadd.f32 %v1780_v54, %v11701_v13 }
 0x259   : > { %v2607_v26 = vsel %vm738_vm2, %v2547_v19, %v2548_v57 }
 0x25a   : > { %9574 = vmatmul.msk.f32.gmra.mxu0 %vm382_vm0, %v10800_v63  ;;  %v2139_v35 = vsel %vm1193_vm1, %v2080_v52, %v2081_v43  ;;  %9623 = vmatmul.msk.f32.gmra.mxu1 %vm382_vm0, %v10800_v63 }
 0x25b   : > { %9753 = vmatmul.msk.f32.gmra.mxu3 %vm382_vm0, %v11977_v56  ;;  %9720 = vmatmul.msk.f32.gmra.mxu2 %vm382_vm0, %v12290_v55  ;;  %v2156_v18 = vadd.f32 %v2139_v35, %v1881_v50  ;;  %v12307_v56 = vld [vmem:[%s11091_s24 + $0x120] sm:$0xff] }
 0x25d   : > { %v12304_v61 = vadd.f32 %v2607_v26, %v2156_v18  ;;  %v10801_v26 = vld [vmem:[%s11091_s24 + $0x108] sm:$0xff] }
 0x25e   : > { %v1605_v25 = vpop.f32.mrf.mxu3  ;;  %v2431_v22 = vpop.f32.mrf.mxu2 }
 0x25f   : > { %v1659_v45 = vrot.slane %v1605_v25, 7  ;;  %v2549_v5 = vrot.slane %v2431_v22, 7  ;;  %v1783_v11 = vpop.f32.mrf.mxu0  ;;  %v1966_v19 = vpop.f32.mrf.mxu1  ;;  %v12329_v22 = vld [vmem:[%s11091_s24 + $0x128] sm:$0xff] }
 0x260   : > { %v2082_v42 = vrot.slane %v1966_v19, 1 }
 0x261   : > { %v1663_v52 = vsel %vm738_vm2, %v1658_v32, %v1659_v45  ;;  %v2606_v63 = vsel %vm738_vm2, %v2548_v57, %v2549_v5  ;;  %v10802_v5 = vld [vmem:[%s11091_s24 + $0x110] sm:$0xff] }
 0x262   : > { %v12314_v50 = vadd.f32 %v1663_v52, %v11418_v44  ;;  %9575 = vmatmul.msk.f32.gmra.mxu0 %vm382_vm0, %v10801_v26  ;;  %v2138_v35 = vsel %vm1193_vm1, %v2081_v43, %v2082_v42  ;;  %9624 = vmatmul.msk.f32.gmra.mxu1 %vm382_vm0, %v10801_v26 }
 0x263   : > { %9754 = vmatmul.msk.f32.gmra.mxu3 %vm382_vm0, %v12004_v53  ;;  %9721 = vmatmul.msk.f32.gmra.mxu2 %vm382_vm0, %v12307_v56  ;;  %v2157_v57 = vadd.f32 %v2138_v35, %v1882_v7  ;;  %v17770_v7 = vrot.slane %v11452_v59, 7 }
 0x264   : > { %17768 = vst [vmem:[#allocation22_spill] sm:$0xff] %v12314_v50 }
 0x265   : > { %v12326_v13 = vadd.f32 %v2606_v63, %v2157_v57 }
 0x266   : > { %v1608_v44 = vpop.f32.mrf.mxu3  ;;  %v2434_v25 = vpop.f32.mrf.mxu2 }
 0x267   : > { %v1660_v18 = vrot.slane %v1608_v44, 7  ;;  %v1785_v54 = vpop.f32.mrf.mxu0  ;;  %v1969_v32 = vpop.f32.mrf.mxu1 }
 0x268   : > { %v2083_v42 = vrot.slane %v1969_v32, 1  ;;  %v10803_v32 = vld [vmem:[%s11091_s24 + $0x118] sm:$0xff] }
 0x269   : > { %v1662_v53 = vsel %vm738_vm2, %v1659_v45, %v1660_v18  ;;  %v2550_v45 = vrot.slane %v2434_v25, 7  ;;  %v1883_v25 = vadd.f32 %v1785_v54, %v11733_v31 }
 0x26a   : > { %v12334_v43 = vadd.f32 %v1662_v53, %v11440_v58  ;;  %9576 = vmatmul.msk.f32.gmra.mxu0 %vm382_vm0, %v10802_v5  ;;  %9625 = vmatmul.msk.f32.gmra.mxu1 %vm382_vm0, %v10802_v5 }
 0x26b   : > { %9755 = vmatmul.msk.f32.gmra.mxu3 %vm382_vm0, %v12021_v29  ;;  %9722 = vmatmul.msk.f32.gmra.mxu2 %vm382_vm0, %v12329_v22  ;;  %v12348_v29 = vld [vmem:[%s11091_s24 + $0x130] sm:$0xff] }
 0x26c   : > { %17769 = vst [vmem:[#allocation23_spill] sm:$0xff] %v12334_v43 }
 0x26e   : > { %v1611_v11 = vpop.f32.mrf.mxu3  ;;  %v2437_v52 = vpop.f32.mrf.mxu2 }
 0x26f   : > { %v1661_v19 = vrot.slane %v1611_v11, 7  ;;  %v2551_v63 = vrot.slane %v2437_v52, 7  ;;  %v1788_v58 = vpop.f32.mrf.mxu0  ;;  %v1972_v35 = vpop.f32.mrf.mxu1  ;;  %v12370_v52 = vld [vmem:[%s11091_s24 + $0x138] sm:$0xff] }
 0x270   : > { %v2084_v44 = vrot.slane %v1972_v35, 1 }
 0x271   : > { %v1693_v26 = vsel %vm738_vm2, %v1661_v19, %v17770_v7  ;;  %v2605_v18 = vsel %vm738_vm2, %v2550_v45, %v2551_v63  ;;  %v10804_v7 = vld [vmem:[%s11091_s24 + $0x120] sm:$0xff] }
 0x272   : > { %v12351_v57 = vadd.f32 %v1693_v26, %v11310_v9  ;;  %9577 = vmatmul.msk.f32.gmra.mxu0 %vm382_vm0, %v10803_v32  ;;  %v2137_v59 = vsel %vm1193_vm1, %v2083_v42, %v2084_v44  ;;  %9626 = vmatmul.msk.f32.gmra.mxu1 %vm382_vm0, %v10803_v32  ;;  %v1884_v42 = vadd.f32 %v1788_v58, %v11750_v16 }
 0x273   : > { %9756 = vmatmul.msk.f32.gmra.mxu3 %vm382_vm0, %v12045_v39  ;;  %9723 = vmatmul.msk.f32.gmra.mxu2 %vm382_vm0, %v12348_v29  ;;  %v2158_v9 = vadd.f32 %v2137_v59, %v1883_v25  ;;  %v10805_v59 = vld [vmem:[%s11091_s24 + $0x128] sm:$0xff] }
 0x275   : > { %v12367_v31 = vadd.f32 %v2605_v18, %v2158_v9 }
 0x276   : > { %v12365_v53 = vpop.f32.mrf.mxu3  ;;  %v2440_v5 = vpop.f32.mrf.mxu2 }
 0x277   : > { %v2552_v54 = vrot.slane %v2440_v5, 7  ;;  %v1791_v11 = vpop.f32.mrf.mxu0  ;;  %v1975_v19 = vpop.f32.mrf.mxu1 }
 0x278   : > { %v2085_v39 = vrot.slane %v1975_v19, 1 }
 0x279   : > { %v2604_v45 = vsel %vm738_vm2, %v2551_v63, %v2552_v54 }
 0x27a   : > { %9578 = vmatmul.msk.f32.gmra.mxu0 %vm382_vm0, %v10804_v7  ;;  %v2136_v26 = vsel %vm1193_vm1, %v2084_v44, %v2085_v39  ;;  %9627 = vmatmul.msk.f32.gmra.mxu1 %vm382_vm0, %v10804_v7  ;;  %v12400_v39 = vld [vmem:[%s11091_s24 + $0x148] sm:$0xff]  ;;  %v10806_v7 = vld [vmem:[%s11091_s24 + $0x130] sm:$0xff] }
 0x27b   : > { %9757 = vmatmul.msk.f32.gmra.mxu3 %vm382_vm0, %v12072_v1  ;;  %9724 = vmatmul.msk.f32.gmra.mxu2 %vm382_vm0, %v12370_v52  ;;  %v2159_v35 = vadd.f32 %v2136_v26, %v1884_v42  ;;  %v12390_v1 = vld [vmem:[%s11091_s24 + $0x140] sm:$0xff] }
 0x27d   : > { %v12387_v16 = vadd.f32 %v2604_v45, %v2159_v35 }
 0x27e   : > { %v2670_v18 = vpop.f32.mrf.mxu3  ;;  %v2443_v63 = vpop.f32.mrf.mxu2 }
 0x27f   : > { %v12385_v25 = vadd.f32 %v2670_v18, %v12107_v28  ;;  %v1793_v58 = vpop.f32.mrf.mxu0  ;;  %v1978_v32 = vpop.f32.mrf.mxu1  ;;  %v2553_v9 = vrot.slane %v2443_v63, 7 }
 0x280   : > { %v2086_v5 = vrot.slane %v1978_v32, 1 }
 0x282   : > { %9579 = vmatmul.msk.f32.gmra.mxu0 %vm382_vm0, %v10805_v59  ;;  %9628 = vmatmul.msk.f32.gmra.mxu1 %vm382_vm0, %v10805_v59 }
 0x283   : > { %9758 = vmatmul.msk.f32.gmra.mxu3 %vm382_vm0, %v12084_v0  ;;  %9725 = vmatmul.msk.f32.gmra.mxu2 %vm382_vm0, %v12390_v1  ;;  %v1885_v0 = vadd.f32 %v1793_v58, %v11783_v30 }
 0x286   : > { %v2673_v28 = vpop.f32.mrf.mxu3  ;;  %v2446_v44 = vpop.f32.mrf.mxu2 }
 0x287   : > { %v2554_v54 = vrot.slane %v2446_v44, 7  ;;  %v1796_v11 = vpop.f32.mrf.mxu0  ;;  %v1981_v19 = vpop.f32.mrf.mxu1  ;;  %v12420_v28 = vld [vmem:[%s11091_s24 + $0x150] sm:$0xff] }
 0x288   : > { %v2087_v45 = vrot.slane %v1981_v19, 1  ;;  %v10807_v19 = vld [vmem:[%s11091_s24 + $0x138] sm:$0xff] }
 0x289   : > { %v2603_v42 = vsel %vm738_vm2, %v2553_v9, %v2554_v54 }
 0x28a   : > { %9580 = vmatmul.msk.f32.gmra.mxu0 %vm382_vm0, %v10806_v7  ;;  %v2135_v26 = vsel %vm1193_vm1, %v2086_v5, %v2087_v45  ;;  %9629 = vmatmul.msk.f32.gmra.mxu1 %vm382_vm0, %v10806_v7  ;;  %v1886_v5 = vadd.f32 %v1796_v11, %v11806_v21 }
 0x28b   : > { %9759 = vmatmul.msk.f32.gmra.mxu3 %vm382_vm0, %v12110_v27  ;;  %9726 = vmatmul.msk.f32.gmra.mxu2 %vm382_vm0, %v12400_v39  ;;  %v2160_v35 = vadd.f32 %v2135_v26, %v1885_v0 }
 0x28d   : > { %v12417_v58 = vadd.f32 %v2603_v42, %v2160_v35  ;;  %v12440_v35 = vld [vmem:[%s11091_s24 + $0x158] sm:$0xff] }
 0x28e   : > { %v2675_v18 = vpop.f32.mrf.mxu3  ;;  %v2449_v63 = vpop.f32.mrf.mxu2 }
 0x28f   : > { %v12415_v30 = vadd.f32 %v2675_v18, %v12139_v14  ;;  %v2555_v32 = vrot.slane %v2449_v63, 7  ;;  %v1799_v59 = vpop.f32.mrf.mxu0  ;;  %v1984_v27 = vpop.f32.mrf.mxu1 }
 0x290   : > { %v2088_v44 = vrot.slane %v1984_v27, 1 }
 0x291   : > { %v2602_v9 = vsel %vm738_vm2, %v2554_v54, %v2555_v32 }
 0x292   : > { %9581 = vmatmul.msk.f32.gmra.mxu0 %vm382_vm0, %v10807_v19  ;;  %v2134_v14 = vsel %vm1193_vm1, %v2087_v45, %v2088_v44  ;;  %9630 = vmatmul.msk.f32.gmra.mxu1 %vm382_vm0, %v10807_v19  ;;  %v10809_v19 = vld [vmem:[%s11091_s24 + $0x148] sm:$0xff] }
 0x293   : > { %9760 = vmatmul.msk.f32.gmra.mxu3 %vm382_vm0, %v12125_v10  ;;  %9727 = vmatmul.msk.f32.gmra.mxu2 %vm382_vm0, %v12420_v28  ;;  %v2161_v42 = vadd.f32 %v2134_v14, %v1886_v5  ;;  %v10808_v10 = vld [vmem:[%s11091_s24 + $0x140] sm:$0xff] }
 0x295   : > { %v12437_v21 = vadd.f32 %v2602_v9, %v2161_v42 }
 0x296   : > { %v2678_v0 = vpop.f32.mrf.mxu3  ;;  %v2452_v54 = vpop.f32.mrf.mxu2 }
 0x297   : > { %v12435_v7 = vadd.f32 %v2678_v0, %v12161_v15  ;;  %v1801_v11 = vpop.f32.mrf.mxu0  ;;  %v1987_v26 = vpop.f32.mrf.mxu1  ;;  %v2556_v18 = vrot.slane %v2452_v54, 7 }
 0x298   : > { %v2089_v63 = vrot.slane %v1987_v26, 1  ;;  %v1887_v5 = vadd.f32 %v1801_v11, %v11843_v51 }
 0x29a   : > { %9582 = vmatmul.msk.f32.gmra.mxu0 %vm382_vm0, %v10808_v10  ;;  %9631 = vmatmul.msk.f32.gmra.mxu1 %vm382_vm0, %v10808_v10 }
 0x29b   : > { %9761 = vmatmul.msk.f32.gmra.mxu3 %vm382_vm0, %v12142_v12  ;;  %9728 = vmatmul.msk.f32.gmra.mxu2 %vm382_vm0, %v12440_v35 }
 0x29e   : > { %v2681_v15 = vpop.f32.mrf.mxu3  ;;  %v2455_v45 = vpop.f32.mrf.mxu2 }
 0x29f   : > { %v2557_v32 = vrot.slane %v2455_v45, 7  ;;  %v1804_v59 = vpop.f32.mrf.mxu0  ;;  %v1990_v27 = vpop.f32.mrf.mxu1  ;;  %v17771_v45 = vld [vmem:[#allocation4_spill] sm:$0xff] }
 0x2a0   : > { %v2090_v44 = vrot.slane %v1990_v27, 1 }
 0x2a1   : > { %v2601_v9 = vsel %vm738_vm2, %v2556_v18, %v2557_v32  ;;  %v1888_v18 = vadd.f32 %v1804_v59, %v17771_v45 }
 0x2a2   : > { %9583 = vmatmul.msk.f32.gmra.mxu0 %vm382_vm0, %v10809_v19  ;;  %v2133_v12 = vsel %vm1193_vm1, %v2089_v63, %v2090_v44  ;;  %9632 = vmatmul.msk.f32.gmra.mxu1 %vm382_vm0, %v10809_v19  ;;  %v10810_v63 = vld [vmem:[%s11091_s24 + $0x150] sm:$0xff] }
 0x2a3   : > { %9762 = vmatmul.msk.f32.gmra.mxu3 %vm382_vm0, %v12164_v34  ;;  %9729 = vmatmul.msk.f32.gmra.mxu2 %vm382_vm0, %v11890_v49  ;;  %v2162_v14 = vadd.f32 %v2133_v12, %v1887_v5 }
 0x2a5   : > { %v12464_v54 = vadd.f32 %v2601_v9, %v2162_v14 }
 0x2a6   : > { %v2683_v42 = vpop.f32.mrf.mxu3  ;;  %v2458_v0 = vpop.f32.mrf.mxu2 }
 0x2a7   : > { %v12462_v51 = vadd.f32 %v2683_v42, %v12193_v48  ;;  %v2558_v11 = vrot.slane %v2458_v0, 7  ;;  %v1807_v26 = vpop.f32.mrf.mxu0  ;;  %v1993_v10 = vpop.f32.mrf.mxu1  ;;  %v17772_v48 = vld [vmem:[#allocation6_spill] sm:$0xff] }
 0x2a8   : > { %v2091_v34 = vrot.slane %v1993_v10, 1 }
 0x2a9   : > { %v2600_v15 = vsel %vm738_vm2, %v2557_v32, %v2558_v11 }
 0x2aa   : > { %9584 = vmatmul.msk.f32.gmra.mxu0 %vm382_vm0, %v10810_v63  ;;  %v2132_v49 = vsel %vm1193_vm1, %v2090_v44, %v2091_v34  ;;  %9633 = vmatmul.msk.f32.gmra.mxu1 %vm382_vm0, %v10810_v63  ;;  %v17773_v44 = vld [vmem:[#allocation8_spill] sm:$0xff]  ;;  %v17774_v34 = vld [vmem:[#allocation5_spill] sm:$0xff] }
 0x2ab   : > { %9763 = vmatmul.msk.f32.gmra.mxu3 %vm382_vm0, %v12179_v17  ;;  %9730 = vmatmul.msk.f32.gmra.mxu2 %vm382_vm0, %v17772_v48  ;;  %v2163_v27 = vadd.f32 %v2132_v49, %v1888_v18  ;;  %v10811_v17 = vld [vmem:[%s11091_s24 + $0x158] sm:$0xff]  ;;  %v17775_v63 = vld [vmem:[#allocation9_spill] sm:$0xff] }
 0x2ad   : > { %v12481_v59 = vadd.f32 %v2600_v15, %v2163_v27  ;;  %v12500_v15 = vld [vmem:[%s11091_s24 + $0x160] sm:$0xff] }
 0x2ae   : > { %v2686_v9 = vpop.f32.mrf.mxu3  ;;  %v2461_v5 = vpop.f32.mrf.mxu2 }
 0x2af   : > { %v12479_v32 = vadd.f32 %v2686_v9, %v12215_v47  ;;  %v1809_v19 = vpop.f32.mrf.mxu0  ;;  %v1996_v12 = vpop.f32.mrf.mxu1  ;;  %v2559_v45 = vrot.slane %v2461_v5, 7 }
 0x2b0   : > { %v2092_v47 = vrot.slane %v1996_v12, 1  ;;  %v12526_v12 = vld [vmem:[%s11091_s24 + $0x168] sm:$0xff] }
 0x2b2   : > { %9585 = vmatmul.msk.f32.gmra.mxu0 %vm382_vm0, %v10811_v17  ;;  %9634 = vmatmul.msk.f32.gmra.mxu1 %vm382_vm0, %v10811_v17  ;;  %v17777_v17 = vld [vmem:[#allocation11_spill] sm:$0xff] }
 0x2b3   : > { %9764 = vmatmul.msk.f32.gmra.mxu3 %vm382_vm0, %v12196_v62  ;;  %9731 = vmatmul.msk.f32.gmra.mxu2 %vm382_vm0, %v17773_v44  ;;  %v1889_v62 = vadd.f32 %v1809_v19, %v17774_v34  ;;  %v12544_v34 = vld [vmem:[%s11091_s24 + $0x170] sm:$0xff] }
 0x2b6   : > { %v2689_v14 = vpop.f32.mrf.mxu3  ;;  %v12490_v42 = vpop.f32.mrf.mxu2 }
 0x2b7   : > { %v12492_v0 = vpop.f32.mrf.mxu0  ;;  %v12494_v11 = vpop.f32.mrf.mxu1  ;;  %v17684_v26 = vrot.slane %v12490_v42, 7 }
 0x2b8   : > { %v17685_v10 = vrot.slane %v12494_v11, 1 }
 0x2ba   : > { %9586 = vmatmul.msk.f32.gmra.mxu0 %vm382_vm0, %v12500_v15  ;;  %v2131_v18 = vsel %vm1193_vm1, %v2092_v47, %v17685_v10  ;;  %9635 = vmatmul.msk.f32.gmra.mxu1 %vm382_vm0, %v12500_v15 }
 0x2bb   : > { %9765 = vmatmul.msk.f32.gmra.mxu3 %vm382_vm0, %v12218_v60  ;;  %9732 = vmatmul.msk.f32.gmra.mxu2 %vm382_vm0, %v17775_v63  ;;  %v2164_v49 = vadd.f32 %v2131_v18, %v1889_v62  ;;  %v2599_v60 = vsel %vm738_vm2, %v2559_v45, %v17684_v26 }
 0x2bd   : > { %v12523_v5 = vadd.f32 %v2599_v60, %v2164_v49 }
 0x2be   : > { %v2691_v48 = vpop.f32.mrf.mxu3  ;;  %v12518_v27 = vpop.f32.mrf.mxu2 }
 0x2bf   : > { %v12521_v9 = vadd.f32 %v2691_v48, %v12247_v3  ;;  %v1815_v19 = vpop.f32.mrf.mxu0 }
 0x2c0   : > { %v12572_v19 = vld [vmem:[%s11091_s24 + $0x198] sm:$0xff] }
 0x2c1   : > { %17776 = vst [vmem:[#allocation4_spill] sm:$0xff] %v12521_v9 }
 0x2c2   : > { %9587 = vmatmul.msk.f32.gmra.mxu0 %vm382_vm0, %v12526_v12  ;;  %9636 = vmatmul.msk.f32.gmra.mxu1 %vm382_vm0, %v12526_v12 }
 0x2c3   : > { %9766 = vmatmul.msk.f32.gmra.mxu3 %vm382_vm0, %v12233_v6  ;;  %9733 = vmatmul.msk.f32.gmra.mxu2 %vm382_vm0, %v17777_v17  ;;  %v17779_v6 = vld [vmem:[#allocation13_spill] sm:$0xff] }
 0x2c6   : > { %v2694_v44 = vpop.f32.mrf.mxu3  ;;  %v12536_v3 = vpop.f32.mrf.mxu2 }
 0x2c7   : > { %v12539_v14 = vadd.f32 %v2694_v44, %v12269_v4  ;;  %v12541_v47 = vpop.f32.mrf.mxu0 }
 0x2c9   : > { %17778 = vst [vmem:[#allocation6_spill] sm:$0xff] %v12539_v14 }
 0x2ca   : > { %9588 = vmatmul.msk.f32.gmra.mxu0 %vm382_vm0, %v12544_v34  ;;  %9637 = vmatmul.msk.f32.gmra.mxu1 %vm382_vm0, %v12544_v34 }
 0x2cb   : > { %9767 = vmatmul.msk.f32.gmra.mxu3 %vm382_vm0, %v12250_v33  ;;  %9734 = vmatmul.msk.f32.gmra.mxu2 %vm382_vm0, %v17779_v6  ;;  %v17780_v33 = vld [vmem:[#allocation14_spill] sm:$0xff] }
 0x2ce   : > { %v2697_v62 = vpop.f32.mrf.mxu3  ;;  %v12554_v4 = vpop.f32.mrf.mxu2 }
 0x2cf   : > { %v12556_v45 = vpop.f32.mrf.mxu0 }
 0x2d2   : > { %9589 = vmatmul.msk.f32.gmra.mxu0 %vm382_vm0, %v17775_v63  ;;  %9638 = vmatmul.msk.f32.gmra.mxu1 %vm382_vm0, %v17775_v63 }
 0x2d3   : > { %9768 = vmatmul.msk.f32.gmra.mxu3 %vm382_vm0, %v12272_v23  ;;  %9735 = vmatmul.msk.f32.gmra.mxu2 %vm382_vm0, %v17780_v33  ;;  %v9983_v23 = vld [vmem:[%s17662_s3 + $0x18] sm:$0xff] }
 0x2d4   : > { %4355 = vmatpush.msrb.mxu0 %v9983_v23 }
 0x2d6   : > { %v2699_v18 = vpop.f32.mrf.mxu3  ;;  %v12566_v49 = vpop.f32.mrf.mxu2 }
 0x2d7   : > { %v12569_v48 = vadd.f32 %v2699_v18, %v12304_v61  ;;  %v1823_v60 = vpop.f32.mrf.mxu0 }
 0x2d8   : > { %v12608_v60 = vld [vmem:[%s11091_s24 + $0x1a8] sm:$0xff] }
 0x2d9   : > { %17781 = vst [vmem:[#allocation8_spill] sm:$0xff] %v12569_v48 }
 0x2da   : > { %9590 = vmatmul.msk.f32.gmra.mxu0 %vm382_vm0, %v17777_v17  ;;  %9639 = vmatmul.msk.f32.gmra.mxu1 %vm382_vm0, %v17777_v17 }
 0x2db   : > { %9769 = vmatmul.msk.f32.gmra.mxu3 %vm382_vm0, %v12290_v55  ;;  %9736 = vmatmul.msk.f32.gmra.mxu2 %vm382_vm0, %v12572_v19  ;;  %v12593_v55 = vld [vmem:[%s11091_s24 + $0x1a0] sm:$0xff] }
 0x2de   : > { %v2702_v61 = vpop.f32.mrf.mxu3  ;;  %v12585_v63 = vpop.f32.mrf.mxu2 }
 0x2df   : > { %v12588_v44 = vadd.f32 %v2702_v61, %v12326_v13  ;;  %v12590_v62 = vpop.f32.mrf.mxu0 }
 0x2e1   : > { %17782 = vst [vmem:[#allocation5_spill] sm:$0xff] %v12588_v44 }
 0x2e2   : > { %9591 = vmatmul.msk.f32.gmra.mxu0 %vm382_vm0, %v17779_v6  ;;  %9640 = vmatmul.msk.f32.gmra.mxu1 %vm382_vm0, %v17779_v6 }
 0x2e3   : > { %9770 = vmatmul.msk.f32.gmra.mxu3 %vm382_vm0, %v12307_v56  ;;  %9737 = vmatmul.msk.f32.gmra.mxu2 %vm382_vm0, %v12593_v55 }
 0x2e6   : > { %v2705_v17 = vpop.f32.mrf.mxu3  ;;  %v12603_v13 = vpop.f32.mrf.mxu2 }
 0x2e7   : > { %v12605_v18 = vpop.f32.mrf.mxu0  ;;  %v10815_v17 = vld [vmem:[%s11091_s24 + $0x30] sm:$0xff] }
 0x2ea   : > { %9592 = vmatmul.msk.f32.gmra.mxu0 %vm382_vm0, %v17780_v33  ;;  %9641 = vmatmul.msk.f32.gmra.mxu1 %vm382_vm0, %v17780_v33 }
 0x2eb   : > { %9771 = vmatmul.msk.f32.gmra.mxu3 %vm382_vm0, %v12329_v22  ;;  %9738 = vmatmul.msk.f32.gmra.mxu2 %vm382_vm0, %v12608_v60 }
 0x2ee   : > { %v2707_v56 = vpop.f32.mrf.mxu3  ;;  %v12618_v6 = vpop.f32.mrf.mxu2 }
 0x2ef   : > { %v12621_v23 = vadd.f32 %v2707_v56, %v12367_v31  ;;  %v1831_v61 = vpop.f32.mrf.mxu0  ;;  %v10816_v31 = vld [vmem:[%s11091_s24 + $0x38] sm:$0xff] }
 0x2f1   : > { %17783 = vst [vmem:[#allocation9_spill] sm:$0xff] %v12621_v23 }
 0x2f2   : > { %9789 = vmatmul.msk.f32.vlgmr.msra.gmra.mxu0 %vm382_vm0, %v10815_v17  ;;  %v10817_v17 = vld [vmem:[%s11091_s24 + $0x40] sm:$0xff] }
 0x2f3   : > { %9772 = vmatmul.msk.f32.gmra.mxu3 %vm382_vm0, %v12348_v29 }
 0x2f6   : > { %v2710_v22 = vpop.f32.mrf.mxu3  ;;  %v12627_v26 = vpop.f32.mrf.mxu2 }
 0x2f7   : > { %v12630_v33 = vadd.f32 %v2710_v22, %v12387_v16  ;;  %v12632_v10 = vpop.f32.mrf.mxu0  ;;  %v2002_v16 = vpop.f32.mrf.mxu1 }
 0x2f9   : > { %17784 = vst [vmem:[#allocation11_spill] sm:$0xff] %v12630_v33 }
 0x2fa   : > { %9790 = vmatmul.msk.f32.gmra.mxu0 %vm382_vm0, %v10816_v31 }
 0x2fb   : > { %9773 = vmatmul.msk.f32.gmra.mxu3 %vm382_vm0, %v12370_v52 }
 0x2fe   : > { %v2713_v56 = vpop.f32.mrf.mxu3  ;;  %v12638_v29 = vpop.f32.mrf.mxu2 }
 0x2ff   : > { %v12640_v61 = vpop.f32.mrf.mxu0  ;;  %v10818_v56 = vld [vmem:[%s11091_s24 + $0x48] sm:$0xff]  ;;  %v12655_v23 = vpop.f32.mrf.mxu1 }
 0x302   : > { %9791 = vmatmul.msk.f32.gmra.mxu0 %vm382_vm0, %v10817_v17 }
 0x303   : > { %9774 = vmatmul.msk.f32.gmra.mxu3 %vm382_vm0, %v12390_v1 }
 0x306   : > { %v2715_v22 = vpop.f32.mrf.mxu3  ;;  %v12646_v33 = vpop.f32.mrf.mxu2 }
 0x307   : > { %v12649_v52 = vadd.f32 %v2715_v22, %v12417_v58  ;;  %v1839_v31 = vpop.f32.mrf.mxu0  ;;  %v10819_v58 = vld [vmem:[%s11091_s24 + $0x50] sm:$0xff] }
 0x309   : > { %17785 = vst [vmem:[#allocation13_spill] sm:$0xff] %v12649_v52  ;;  %v10821_v52 = vld [vmem:[%s11091_s24 + $0x60] sm:$0xff] }
 0x30a   : > { %9792 = vmatmul.msk.f32.gmra.mxu0 %vm382_vm0, %v10818_v56  ;;  %v12672_v56 = vpop.f32.mrf.mxu1 }
 0x30b   : > { %9775 = vmatmul.msk.f32.gmra.mxu3 %vm382_vm0, %v12400_v39 }
 0x30e   : > { %v2718_v1 = vpop.f32.mrf.mxu3  ;;  %v12657_v44 = vpop.f32.mrf.mxu2 }
 0x30f   : > { %v12660_v17 = vadd.f32 %v2718_v1, %v12437_v21  ;;  %v12662_v43 = vpop.f32.mrf.mxu0  ;;  %v10820_v21 = vld [vmem:[%s11091_s24 + $0x58] sm:$0xff] }
 0x311   : > { %17786 = vst [vmem:[#allocation14_spill] sm:$0xff] %v12660_v17 }
 0x312   : > { %9793 = vmatmul.msk.f32.gmra.mxu0 %vm382_vm0, %v10819_v58 }
 0x313   : > { %9776 = vmatmul.msk.f32.gmra.mxu3 %vm382_vm0, %v12420_v28 }
 0x316   : > { %v2721_v39 = vpop.f32.mrf.mxu3  ;;  %v12668_v22 = vpop.f32.mrf.mxu2 }
 0x317   : > { %v12670_v31 = vpop.f32.mrf.mxu0  ;;  %v12683_v39 = vpop.f32.mrf.mxu1 }
 0x31a   : > { %9794 = vmatmul.msk.f32.gmra.mxu0 %vm382_vm0, %v10820_v21 }
 0x31b   : > { %9777 = vmatmul.msk.f32.gmra.mxu3 %vm382_vm0, %v12440_v35 }
 0x31e   : > { %v2723_v1 = vpop.f32.mrf.mxu3  ;;  %v12678_v28 = vpop.f32.mrf.mxu2 }
 0x31f   : > { %v12681_v17 = vadd.f32 %v2723_v1, %v12464_v54  ;;  %v1847_v58 = vpop.f32.mrf.mxu0  ;;  %v10822_v54 = vld [vmem:[%s11091_s24 + $0x68] sm:$0xff]  ;;  %v12700_v1 = vpop.f32.mrf.mxu1 }
 0x321   : > { %17787 = vst [vmem:[#allocation24_spill] sm:$0xff] %v12681_v17  ;;  %v2094_v17 = vrot.slane %v2002_v16, 1 }
 0x322   : > { %9795 = vmatmul.msk.f32.gmra.mxu0 %vm382_vm0, %v10821_v52 }
 0x323   : > { %9778 = vmatmul.msk.f32.gmra.mxu3 %vm382_vm0, %v12500_v15 }
 0x326   : > { %v2726_v35 = vpop.f32.mrf.mxu3  ;;  %v12689_v48 = vpop.f32.mrf.mxu2 }
 0x327   : > { %v12692_v21 = vadd.f32 %v2726_v35, %v12481_v59  ;;  %v12694_v50 = vpop.f32.mrf.mxu0  ;;  %v10823_v59 = vld [vmem:[%s11091_s24 + $0x70] sm:$0xff]  ;;  %v12716_v14 = vpop.f32.mrf.mxu1 }
 0x329   : > { %17788 = vst [vmem:[#allocation25_spill] sm:$0xff] %v12692_v21 }
 0x32a   : > { %9796 = vmatmul.msk.f32.gmra.mxu0 %vm382_vm0, %v10822_v54 }
 0x32b   : > { %9779 = vmatmul.msk.f32.gmra.mxu3 %vm382_vm0, %v12526_v12  ;;  %v17789_v12 = vrot.slane %v12494_v11, 1  ;;  %v10825_v11 = vld [vmem:[%s11091_s24 + $0x78] sm:$0xff] }
 0x32d   : > { %v2130_v35 = vsel %vm1193_vm1, %v17789_v12, %v2094_v17 }
 0x32e   : > { %v2729_v15 = vpop.f32.mrf.mxu3  ;;  %v12702_v58 = vpop.f32.mrf.mxu2 }
 0x32f   : > { %v12704_v52 = vpop.f32.mrf.mxu0  ;;  %v17790_v15 = vld [vmem:[#allocation7_spill] sm:$0xff] }
 0x330   : > { %v1890_v21 = vadd.f32 %v12492_v0, %v17790_v15  ;;  %v17791_v0 = vrot.slane %v12490_v42, 7  ;;  %v2095_v42 = vrot.slane %v12655_v23, 1  ;;  %v10826_v15 = vld [vmem:[%s11091_s24 + $0x180] sm:$0xff] }
 0x332   : > { %9797 = vmatmul.msk.f32.gmra.mxu0 %vm382_vm0, %v10823_v59  ;;  %v2165_v59 = vadd.f32 %v2130_v35, %v1890_v21  ;;  %v11010_v21 = vmov 0.0   ;;  %v2096_v35 = vrot.slane %v12672_v56, 1 }
 0x333   : > { %9780 = vmatmul.msk.f32.gmra.mxu3 %vm382_vm0, %v12544_v34  ;;  %v2561_v34 = vrot.slane %v12518_v27, 7  ;;  %3170 = vst.msk [vmem:[#allocation2] sm:$0xff] %vm382_vm0, %v11010_v21 }
 0x334   : > { %3171 = vst.msk [vmem:[#allocation2 + $0x8] sm:$0xff] %vm382_vm0, %v11010_v21  ;;  %v2129_v23 = vsel %vm1193_vm1, %v2095_v42, %v2096_v35  ;;  %v2562_v42 = vrot.slane %v12536_v3, 7 }
 0x335   : > { %v2598_v17 = vsel %vm738_vm2, %v17791_v0, %v2561_v34  ;;  %3172 = vst.msk [vmem:[#allocation2 + $0x10] sm:$0xff] %vm382_vm0, %v11010_v21  ;;  %v10827_v34 = vld [vmem:[%s11091_s24 + $0x80] sm:$0xff] }
 0x336   : > { %v2731_v54 = vpop.f32.mrf.mxu3  ;;  %v12718_v8 = vpop.f32.mrf.mxu2  ;;  %v2633_v12 = vadd.f32 %v2598_v17, %v2165_v59  ;;  %3174 = vst.msk [vmem:[#allocation2 + $0x198] sm:$0xff] %vm382_vm0, %v11010_v21  ;;  %v17793_v59 = vld [vmem:[#allocation10_spill] sm:$0xff] }
 0x337   : > { %v12721_v16 = vadd.f32 %v2731_v54, %v12523_v5  ;;  %v1855_v9 = vpop.f32.mrf.mxu0  ;;  %3175 = vst.msk [vmem:[#allocation2 + $0x1a0] sm:$0xff] %vm382_vm0, %v11010_v21 }
 0x338   : > { %3176 = vst.msk [vmem:[#allocation2 + $0x1a8] sm:$0xff] %vm382_vm0, %v11010_v21 }
 0x339   : > { %3178 = vst.msk [vmem:[#allocation2 + $0x28] sm:$0xff] %vm382_vm0, %v11010_v21 }
 0x33a   : > { %9798 = vmatmul.msk.f32.gmra.mxu0 %vm382_vm0, %v10825_v11  ;;  %v1891_v11 = vadd.f32 %v12541_v47, %v17793_v59  ;;  %v12766_v17 = vld [vmem:[#allocation2] sm:$0xff]  ;;  %3179 = vst.msk [vmem:[#allocation2 + $0x40] sm:$0xff] %vm382_vm0, %v11010_v21 }
 0x33b   : > { %9781 = vmatmul.msk.f32.gmra.mxu3 %vm382_vm0, %v10824_v36  ;;  %v12740_v36 = vpop.f32.mrf.mxu1  ;;  %9886 = vmatmul.msk.f32.vlgmr.msra.gmra.mxu2 %vm382_vm0, %v12766_v17  ;;  %3180 = vst.msk [vmem:[#allocation2 + $0x58] sm:$0xff] %vm382_vm0, %v11010_v21 }
 0x33c   : > { %9837 = vmatmul.msk.f32.vlgmr.msra.gmra.mxu1 %vm382_vm0, %v12766_v17  ;;  %v2166_v47 = vadd.f32 %v2129_v23, %v1891_v11  ;;  %3181 = vst.msk [vmem:[#allocation2 + $0x70] sm:$0xff] %vm382_vm0, %v11010_v21  ;;  %v17794_v11 = vld [vmem:[#allocation12_spill] sm:$0xff] }
 0x33d   : > { %3182 = vst.msk [vmem:[#allocation2 + $0x88] sm:$0xff] %vm382_vm0, %v11010_v21 }
 0x33e   : > { %v2734_v5 = vpop.f32.mrf.mxu3  ;;  %v12732_v54 = vpop.f32.mrf.mxu2  ;;  %3183 = vst.msk [vmem:[#allocation2 + $0xa0] sm:$0xff] %vm382_vm0, %v11010_v21 }
 0x33f   : > { %v12734_v27 = vadd.f32 %v2734_v5, %v2633_v12  ;;  %v12736_v9 = vpop.f32.mrf.mxu0  ;;  %v2563_v12 = vrot.slane %v12554_v4, 7  ;;  %3184 = vst.msk [vmem:[#allocation2 + $0xb8] sm:$0xff] %vm382_vm0, %v11010_v21 }
 0x340   : > { %3185 = vst.msk [vmem:[#allocation2 + $0xd0] sm:$0xff] %vm382_vm0, %v11010_v21 }
 0x341   : > { %17792 = vst [vmem:[#allocation7_spill] sm:$0xff] %v12734_v27  ;;  %v2597_v23 = vsel %vm738_vm2, %v2562_v42, %v2563_v12 }
 0x342   : > { %9799 = vmatmul.msk.f32.gmra.mxu0 %vm382_vm0, %v10827_v34  ;;  %v10828_v34 = vld [vmem:[%s11091_s24 + $0x188] sm:$0xff]  ;;  %v2634_v3 = vadd.f32 %v2597_v23, %v2166_v47  ;;  %3186 = vst.msk [vmem:[#allocation2 + $0xe8] sm:$0xff] %vm382_vm0, %v11010_v21  ;;  %v10830_v23 = vld [vmem:[%s11091_s24 + $0x190] sm:$0xff] }
 0x343   : > { %9782 = vmatmul.msk.f32.gmra.mxu3 %vm382_vm0, %v10826_v15  ;;  %v2097_v15 = vrot.slane %v12683_v39, 1  ;;  %v12785_v4 = vpop.f32.mrf.mxu1  ;;  %3187 = vst.msk [vmem:[#allocation2 + $0x100] sm:$0xff] %vm382_vm0, %v11010_v21  ;;  %v12811_v47 = vld [vmem:[#allocation2 + $0x8] sm:$0xff] }
 0x344   : > { %3188 = vst.msk [vmem:[#allocation2 + $0x118] sm:$0xff] %vm382_vm0, %v11010_v21  ;;  %9887 = vmatmul.msk.f32.gmra.mxu2 %vm382_vm0, %v12811_v47  ;;  %9838 = vmatmul.msk.f32.gmra.mxu1 %vm382_vm0, %v12811_v47 }
 0x345   : > { %v2128_v39 = vsel %vm1193_vm1, %v2096_v35, %v2097_v15  ;;  %v2564_v35 = vrot.slane %v12566_v49, 7  ;;  %3189 = vst.msk [vmem:[#allocation2 + $0x130] sm:$0xff] %vm382_vm0, %v11010_v21  ;;  %v10831_v49 = vld [vmem:[%s11091_s24 + $0x90] sm:$0xff] }
 0x346   : > { %v2737_v56 = vpop.f32.mrf.mxu3  ;;  %v12764_v0 = vpop.f32.mrf.mxu2  ;;  %3190 = vst.msk [vmem:[#allocation2 + $0x148] sm:$0xff] %vm382_vm0, %v11010_v21 }
 0x347   : > { %v12771_v5 = vpop.f32.mrf.mxu0  ;;  %v10829_v56 = vld [vmem:[%s11091_s24 + $0x88] sm:$0xff]  ;;  %3191 = vst.msk [vmem:[#allocation2 + $0x160] sm:$0xff] %vm382_vm0, %v11010_v21 }
 0x348   : > { %3192 = vst.msk [vmem:[#allocation2 + $0x178] sm:$0xff] %vm382_vm0, %v11010_v21 }
 0x349   : > { %3193 = vst.msk [vmem:[#allocation2 + $0x190] sm:$0xff] %vm382_vm0, %v11010_v21 }
 0x34a   : > { %9800 = vmatmul.msk.f32.gmra.mxu0 %vm382_vm0, %v10829_v56  ;;  %6057 = vst.msk [vmem:[#allocation3] sm:$0xff] %vm382_vm0, %v11010_v21 }
 0x34b   : > { %9783 = vmatmul.msk.f32.gmra.mxu3 %vm382_vm0, %v10828_v34  ;;  %v1892_v34 = vadd.f32 %v12556_v45, %v17794_v11  ;;  %6058 = vst.msk [vmem:[#allocation3 + $0x8] sm:$0xff] %vm382_vm0, %v11010_v21 }
 0x34c   : > { %6059 = vst.msk [vmem:[#allocation3 + $0x10] sm:$0xff] %vm382_vm0, %v11010_v21 }
 0x34d   : > { %v2167_v45 = vadd.f32 %v2128_v39, %v1892_v34  ;;  %v2596_v39 = vsel %vm738_vm2, %v2563_v12, %v2564_v35  ;;  %6061 = vst.msk [vmem:[#allocation3 + $0x198] sm:$0xff] %vm382_vm0, %v11010_v21  ;;  %v2098_v35 = vrot.slane %v12700_v1, 1 }
 0x34e   : > { %v2739_v59 = vpop.f32.mrf.mxu3  ;;  %v12805_v42 = vpop.f32.mrf.mxu2  ;;  %6062 = vst.msk [vmem:[#allocation3 + $0x1a0] sm:$0xff] %vm382_vm0, %v11010_v21 }
 0x34f   : > { %v12807_v56 = vadd.f32 %v2739_v59, %v2634_v3  ;;  %v1863_v15 = vpop.f32.mrf.mxu0  ;;  %v10032_v3 = vld [vmem:[%s17662_s3 + $0x20] sm:$0xff]  ;;  %v12837_v59 = vpop.f32.mrf.mxu1  ;;  %v2635_v11 = vadd.f32 %v2596_v39, %v2167_v45  ;;  %v2099_v45 = vrot.slane %v12716_v14, 1  ;;  %6063 = vst.msk [vmem:[#allocation3 + $0x1a8] sm:$0xff] %vm382_vm0, %v11010_v21 }
 0x350   : > { %4630 = vmatpush.msrb.mxu1 %v10032_v3  ;;  %6065 = vst.msk [vmem:[#allocation3 + $0x28] sm:$0xff] %vm382_vm0, %v11010_v21 }
 0x351   : > { %17795 = vst [vmem:[#allocation10_spill] sm:$0xff] %v12807_v56  ;;  %v2127_v14 = vsel %vm1193_vm1, %v2098_v35, %v2099_v45  ;;  %v2101_v56 = vrot.slane %v12785_v4, 1 }
 0x352   : > { %9801 = vmatmul.msk.f32.gmra.mxu0 %vm382_vm0, %v10831_v49  ;;  %v10832_v49 = vld [vmem:[%s11091_s24 + $0x98] sm:$0xff]  ;;  %6066 = vst.msk [vmem:[#allocation3 + $0x40] sm:$0xff] %vm382_vm0, %v11010_v21 }
 0x353   : > { %9784 = vmatmul.msk.f32.gmra.mxu3 %vm382_vm0, %v10830_v23  ;;  %6067 = vst.msk [vmem:[#allocation3 + $0x58] sm:$0xff] %vm382_vm0, %v11010_v21 }
 0x354   : > { %6068 = vst.msk [vmem:[#allocation3 + $0x70] sm:$0xff] %vm382_vm0, %v11010_v21 }
 0x355   : > { %6069 = vst.msk [vmem:[#allocation3 + $0x88] sm:$0xff] %vm382_vm0, %v11010_v21 }
 0x356   : > { %v2742_v34 = vpop.f32.mrf.mxu3  ;;  %v12843_v15 = vpop.f32.mrf.mxu2  ;;  %6070 = vst.msk [vmem:[#allocation3 + $0xa0] sm:$0xff] %vm382_vm0, %v11010_v21 }
 0x357   : > { %v12845_v23 = vadd.f32 %v2742_v34, %v2635_v11  ;;  %v12849_v12 = vpop.f32.mrf.mxu0  ;;  %v12875_v39 = vpop.f32.mrf.mxu1  ;;  %v2566_v34 = vrot.slane %v12603_v13, 7  ;;  %6071 = vst.msk [vmem:[#allocation3 + $0xb8] sm:$0xff] %vm382_vm0, %v11010_v21  ;;  %v10130_v13 = vld [vmem:[%s17662_s3 + $0x30] sm:$0xff] }
 0x358   : > { %6072 = vst.msk [vmem:[#allocation3 + $0xd0] sm:$0xff] %vm382_vm0, %v11010_v21  ;;  %5277 = vmatpush.msra.mxu3 %v10130_v13 }
 0x359   : > { %17796 = vst [vmem:[#allocation12_spill] sm:$0xff] %v12845_v23 }
 0x35a   : > { %9802 = vmatmul.msk.f32.gmra.mxu0 %vm382_vm0, %v10832_v49  ;;  %6073 = vst.msk [vmem:[#allocation3 + $0xe8] sm:$0xff] %vm382_vm0, %v11010_v21 }
 0x35b   : > { %9785 = vmatmul.msk.f32.gmra.mxu3 %vm382_vm0, %v12572_v19  ;;  %v17797_v19 = vld [vmem:[#allocation15_spill] sm:$0xff]  ;;  %6074 = vst.msk [vmem:[#allocation3 + $0x100] sm:$0xff] %vm382_vm0, %v11010_v21 }
 0x35c   : > { %v1893_v3 = vadd.f32 %v12590_v62, %v17797_v19  ;;  %v2565_v62 = vrot.slane %v12585_v63, 7  ;;  %v12895_v19 = vld [vmem:[#allocation2 + $0x10] sm:$0xff]  ;;  %6075 = vst.msk [vmem:[#allocation3 + $0x118] sm:$0xff] %vm382_vm0, %v11010_v21 }
 0x35d   : > { %9839 = vmatmul.msk.f32.gmra.mxu1 %vm382_vm0, %v12895_v19  ;;  %9888 = vmatmul.msk.f32.gmra.mxu2 %vm382_vm0, %v12895_v19  ;;  %6076 = vst.msk [vmem:[#allocation3 + $0x130] sm:$0xff] %vm382_vm0, %v11010_v21 }
 0x35e   : > { %v2745_v1 = vpop.f32.mrf.mxu3  ;;  %v12877_v11 = vpop.f32.mrf.mxu2  ;;  %v2168_v35 = vadd.f32 %v2127_v14, %v1893_v3  ;;  %v10833_v14 = vld [vmem:[%s11091_s24 + $0xa0] sm:$0xff]  ;;  %v2595_v63 = vsel %vm738_vm2, %v2565_v62, %v2566_v34  ;;  %v1894_v62 = vadd.f32 %v12605_v18, %v12054_v40  ;;  %6077 = vst.msk [vmem:[#allocation3 + $0x148] sm:$0xff] %vm382_vm0, %v11010_v21  ;;  %v10834_v40 = vld [vmem:[%s11091_s24 + $0xa8] sm:$0xff]  ;;  %v2068_v18 = vrot.slane %v12042_v41, 1 }
 0x35f   : > { %v12882_v49 = vpop.f32.mrf.mxu0  ;;  %v2100_v1 = vrot.slane %v12740_v36, 1  ;;  %6078 = vst.msk [vmem:[#allocation3 + $0x160] sm:$0xff] %vm382_vm0, %v11010_v21 }
 0x360   : > { %v2636_v36 = vadd.f32 %v2595_v63, %v2168_v35  ;;  %6079 = vst.msk [vmem:[#allocation3 + $0x178] sm:$0xff] %vm382_vm0, %v11010_v21 }
 0x361   : > { %6080 = vst.msk [vmem:[#allocation3 + $0x190] sm:$0xff] %vm382_vm0, %v11010_v21  ;;  %v17799_v21 = vld [vmem:[#allocation17_spill] sm:$0xff] }
 0x362   : > { %9803 = vmatmul.msk.f32.gmra.mxu0 %vm382_vm0, %v10833_v14  ;;  %v2567_v14 = vrot.slane %v12618_v6, 7 }
 0x363   : > { %9786 = vmatmul.msk.f32.gmra.mxu3 %vm382_vm0, %v12593_v55  ;;  %v2126_v55 = vsel %vm1193_vm1, %v2099_v45, %v2100_v1  ;;  %v12928_v1 = vpop.f32.mrf.mxu1 }
 0x364   : > { %v2169_v63 = vadd.f32 %v2126_v55, %v1894_v62  ;;  %v2594_v6 = vsel %vm738_vm2, %v2566_v34, %v2567_v14  ;;  %v2102_v34 = vrot.slane %v12837_v59, 1  ;;  %v17801_v14 = vld [vmem:[#allocation16_spill] sm:$0xff]  ;;  %v17803_v59 = vld [vmem:[#allocation18_spill] sm:$0xff] }
 0x365   : > { %v17802_v27 = vrot.slane %v17801_v14, 7 }
 0x366   : > { %v2747_v3 = vpop.f32.mrf.mxu3  ;;  %v12919_v13 = vpop.f32.mrf.mxu2  ;;  %v2637_v55 = vadd.f32 %v2594_v6, %v2169_v63  ;;  %v10835_v6 = vld [vmem:[%s11091_s24 + $0xb0] sm:$0xff]  ;;  %v2125_v4 = vsel %vm1193_vm1, %v2101_v56, %v2102_v34  ;;  %v10836_v56 = vld [vmem:[%s11091_s24 + $0xb8] sm:$0xff] }
 0x367   : > { %v12921_v35 = vadd.f32 %v2747_v3, %v2636_v36  ;;  %v1871_v45 = vpop.f32.mrf.mxu0  ;;  %v1873_v36 = vadd.f32 %v12040_v38, %v12351_v57 }
 0x369   : > { %17798 = vst [vmem:[#allocation15_spill] sm:$0xff] %v12921_v35  ;;  %v17800_v35 = vrot.slane %v17799_v21, 1  ;;  %v2568_v21 = vrot.slane %v12627_v26, 7 }
 0x36a   : > { %9804 = vmatmul.msk.f32.gmra.mxu0 %vm382_vm0, %v10834_v40 }
 0x36b   : > { %9787 = vmatmul.msk.f32.gmra.mxu3 %vm382_vm0, %v12608_v60  ;;  %v2147_v60 = vsel %vm1193_vm1, %v2068_v18, %v17800_v35  ;;  %v12957_v57 = vpop.f32.mrf.mxu1  ;;  %v1895_v18 = vadd.f32 %v12632_v10, %v17803_v59 }
 0x36c   : > { %v2148_v41 = vadd.f32 %v2147_v60, %v1873_v36  ;;  %v2569_v36 = vrot.slane %v12638_v29, 7  ;;  %v2103_v60 = vrot.slane %v12875_v39, 1 }
 0x36e   : > { %v2750_v3 = vpop.f32.mrf.mxu3  ;;  %v2533_v62 = vpop.f32.mrf.mxu2  ;;  %v2593_v26 = vsel %vm738_vm2, %v2568_v21, %v2569_v36  ;;  %v2124_v39 = vsel %vm1193_vm1, %v2102_v34, %v2103_v60  ;;  %v10837_v34 = vld [vmem:[%s11091_s24 + $0xc0] sm:$0xff] }
 0x36f   : > { %v12945_v45 = vadd.f32 %v2750_v3, %v2637_v55  ;;  %v2583_v40 = vrot.slane %v2533_v62, 7  ;;  %v2846_v23 = vpop.f32.mrf.mxu0  ;;  %v2170_v62 = vadd.f32 %v2125_v4, %v1895_v18 }
 0x370   : > { %v2990_v55 = vrot.slane %v2846_v23, 1 }
 0x371   : > { %v2615_v38 = vsel %vm738_vm2, %v2583_v40, %v17802_v27  ;;  %v2638_v23 = vadd.f32 %v2593_v26, %v2170_v62 }
 0x372   : > { %v2616_v63 = vadd.f32 %v2615_v38, %v2148_v41  ;;  %9805 = vmatmul.msk.f32.gmra.mxu0 %vm382_vm0, %v10835_v6  ;;  %v17804_v38 = vld [vmem:[#allocation19_spill] sm:$0xff] }
 0x373   : > { %9935 = vmatmul.msk.f32.vlgmr.msrb.gmra.mxu3 %vm382_vm0, %v12766_v17  ;;  %v12974_v17 = vld [vmem:[%s17661_s2] ss:$0 sm:$0xff] }
 0x374   : > { %v2795_v40 = vadd.f32 %v12365_v53, %v2616_v63  ;;  %v2038_v53 = vpop.f32.mrf.mxu1  ;;  %v1896_v63 = vadd.f32 %v12640_v61, %v17804_v38 }
 0x376   : > { %v2753_v35 = vpop.f32.mrf.mxu3  ;;  %v2171_v18 = vadd.f32 %v2124_v39, %v1896_v63 }
 0x377   : > { %v2849_v27 = vpop.f32.mrf.mxu0 }
 0x378   : > { %v2991_v3 = vrot.slane %v2849_v27, 1 }
 0x37a   : > { %v3069_v10 = vsel %vm1193_vm1, %v2990_v55, %v2991_v3  ;;  %9806 = vmatmul.msk.f32.gmra.mxu0 %vm382_vm0, %v10836_v56 }
 0x37b   : > { %9936 = vmatmul.msk.f32.gmra.mxu3 %vm382_vm0, %v12811_v47  ;;  %v3070_v29 = vadd.f32 %v3069_v10, %v2795_v40  ;;  %v2570_v47 = vrot.slane %v12646_v33, 7 }
 0x37c   : > { %v13003_v60 = vpop.f32.mrf.mxu1 }
 0x37d   : > { %v3106_v41 = vadd.f32 %v12974_v17, %v3070_v29  ;;  %v2592_v33 = vsel %vm738_vm2, %v2569_v36, %v2570_v47  ;;  %v2104_v29 = vrot.slane %v12928_v1, 1  ;;  %v1897_v1 = vadd.f32 %v12662_v43, %v12149_v46  ;;  %v10839_v46 = vld [vmem:[%s11091_s24 + $0xd0] sm:$0xff] }
 0x37e   : > { %v2755_v14 = vpop.f32.mrf.mxu3  ;;  %v2639_v55 = vadd.f32 %v2592_v33, %v2171_v18  ;;  %v2571_v47 = vrot.slane %v12657_v44, 7  ;;  %v2573_v33 = vrot.slane %v12678_v28, 7 }
 0x37f   : > { %v12989_v6 = vadd.f32 %v2755_v14, %v2638_v23  ;;  %v3138_v4 = vmax.f32 %v3106_v41, 0.0  ;;  %v2852_v35 = vpop.f32.mrf.mxu0 }
 0x380   : > { %v2992_v59 = vrot.slane %v2852_v35, 1 }
 0x381   : > { %3194 = vst.msk [vmem:[#allocation2 + $0x18] sm:$0xff] %vm382_vm0, %v3138_v4  ;;  %v2106_v4 = vrot.slane %v2038_v53, 1 }
 0x382   : > { %v3068_v27 = vsel %vm1193_vm1, %v2991_v3, %v2992_v59  ;;  %9807 = vmatmul.msk.f32.gmra.mxu0 %vm382_vm0, %v10837_v34 }
 0x383   : > { %9937 = vmatmul.msk.f32.gmra.mxu3 %vm382_vm0, %v12895_v19  ;;  %v3071_v61 = vadd.f32 %v3068_v27, %v12385_v25  ;;  %v2105_v19 = vrot.slane %v12957_v57, 1  ;;  %v10838_v25 = vld [vmem:[%s11091_s24 + $0xc8] sm:$0xff]  ;;  %v2572_v57 = vrot.slane %v12668_v22, 7  ;;  %v1898_v27 = vadd.f32 %v12670_v31, %v12169_v24  ;;  %v10840_v24 = vld [vmem:[%s11091_s24 + $0xd8] sm:$0xff] }
 0x384   : > { %v13020_v39 = vpop.f32.mrf.mxu1 }
 0x385   : > { %v3107_v62 = vadd.f32 %v12974_v17, %v3071_v61  ;;  %v2123_v36 = vsel %vm1193_vm1, %v2104_v29, %v2105_v19  ;;  %v2591_v22 = vsel %vm738_vm2, %v2571_v47, %v2572_v57  ;;  %v2122_v44 = vsel %vm1193_vm1, %v2105_v19, %v2106_v4  ;;  %v3231_v61 = vld [vmem:[#allocation2 + $0x28] sm:$0xff] }
 0x386   : > { %v2758_v21 = vpop.f32.mrf.mxu3  ;;  %v2172_v63 = vadd.f32 %v2123_v36, %v1897_v1  ;;  %v2590_v28 = vsel %vm738_vm2, %v2572_v57, %v2573_v33 }
 0x387   : > { %v13005_v40 = vadd.f32 %v2758_v21, %v2639_v55  ;;  %v3139_v3 = vmax.f32 %v3107_v62, 0.0  ;;  %v2855_v10 = vpop.f32.mrf.mxu0  ;;  %v2173_v21 = vadd.f32 %v2122_v44, %v1898_v27  ;;  %v10842_v44 = vld [vmem:[%s11091_s24 + $0xe8] sm:$0xff]  ;;  %v1900_v27 = vadd.f32 %v12704_v52, %v12223_v20  ;;  %v10843_v20 = vld [vmem:[%s11091_s24 + $0xf0] sm:$0xff] }
 0x388   : > { %v3229_v56 = vld [vmem:[#allocation2 + $0x18] sm:$0xff]  ;;  %v2993_v41 = vrot.slane %v2855_v10, 1  ;;  %v2640_v59 = vadd.f32 %v2591_v22, %v2172_v63 }
 0x389   : > { %3195 = vst.msk [vmem:[#allocation2 + $0x20] sm:$0xff] %vm382_vm0, %v3139_v3  ;;  %9840 = vmatmul.msk.f32.gmra.mxu1 %vm382_vm0, %v3229_v56  ;;  %9889 = vmatmul.msk.f32.gmra.mxu2 %vm382_vm0, %v3229_v56 }
 0x38a   : > { %9808 = vmatmul.msk.f32.gmra.mxu0 %vm382_vm0, %v10838_v25 }
 0x38b   : > { %9938 = vmatmul.msk.f32.gmra.mxu3 %vm382_vm0, %v3229_v56  ;;  %v2641_v56 = vadd.f32 %v2590_v28, %v2173_v21 }
 0x38c   : > { %v2047_v3 = vpop.f32.mrf.mxu1 }
 0x38d   : > { %v2109_v22 = vrot.slane %v2047_v3, 1 }
 0x38e   : > { %v2761_v26 = vpop.f32.mrf.mxu3 }
 0x38f   : > { %v2858_v23 = vpop.f32.mrf.mxu0 }
 0x390   : > { %v2994_v14 = vrot.slane %v2858_v23, 1  ;;  %v3230_v38 = vld [vmem:[#allocation2 + $0x20] sm:$0xff]  ;;  %v2107_v23 = vrot.slane %v13003_v60, 1  ;;  %v1899_v60 = vadd.f32 %v12694_v50, %v12203_v2 }
 0x391   : > { %9841 = vmatmul.msk.f32.gmra.mxu1 %vm382_vm0, %v3230_v38  ;;  %9890 = vmatmul.msk.f32.gmra.mxu2 %vm382_vm0, %v3230_v38 }
 0x392   : > { %v3067_v35 = vsel %vm1193_vm1, %v2993_v41, %v2994_v14  ;;  %9809 = vmatmul.msk.f32.gmra.mxu0 %vm382_vm0, %v10839_v46  ;;  %v2108_v41 = vrot.slane %v13020_v39, 1  ;;  %v2575_v39 = vrot.slane %v12702_v58, 7 }
 0x393   : > { %9939 = vmatmul.msk.f32.gmra.mxu3 %vm382_vm0, %v3230_v38  ;;  %v3072_v43 = vadd.f32 %v3067_v35, %v12415_v30 }
 0x394   : > { %v2050_v57 = vpop.f32.mrf.mxu1 }
 0x395   : > { %v3108_v53 = vadd.f32 %v12974_v17, %v3072_v43  ;;  %v2574_v43 = vrot.slane %v12689_v48, 7  ;;  %v2120_v48 = vsel %vm1193_vm1, %v2108_v41, %v2109_v22 }
 0x396   : > { %v2763_v18 = vpop.f32.mrf.mxu3  ;;  %v2175_v3 = vadd.f32 %v2120_v48, %v1900_v27  ;;  %v17807_v48 = vld [vmem:[#allocation21_spill] sm:$0xff]  ;;  %v3237_v27 = vld [vmem:[#allocation2 + $0x58] sm:$0xff] }
 0x397   : > { %v13038_v34 = vadd.f32 %v2763_v18, %v2640_v59  ;;  %v3140_v30 = vmax.f32 %v3108_v53, 0.0  ;;  %v2861_v55 = vpop.f32.mrf.mxu0  ;;  %v2589_v50 = vsel %vm738_vm2, %v2574_v43, %v2575_v39 }
 0x398   : > { %v2995_v62 = vrot.slane %v2861_v55, 1 }
 0x399   : > { %3196 = vst.msk [vmem:[#allocation2 + $0x30] sm:$0xff] %vm382_vm0, %v3140_v30  ;;  %9842 = vmatmul.msk.f32.gmra.mxu1 %vm382_vm0, %v3231_v61  ;;  %9891 = vmatmul.msk.f32.gmra.mxu2 %vm382_vm0, %v3231_v61  ;;  %v3234_v30 = vld [vmem:[#allocation2 + $0x40] sm:$0xff] }
 0x39a   : > { %v3066_v10 = vsel %vm1193_vm1, %v2994_v14, %v2995_v62  ;;  %9810 = vmatmul.msk.f32.gmra.mxu0 %vm382_vm0, %v10840_v24  ;;  %v2121_v14 = vsel %vm1193_vm1, %v2107_v23, %v2108_v41 }
 0x39b   : > { %9940 = vmatmul.msk.f32.gmra.mxu3 %vm382_vm0, %v3231_v61  ;;  %v3073_v31 = vadd.f32 %v3066_v10, %v12435_v7  ;;  %v10841_v7 = vld [vmem:[%s11091_s24 + $0xe0] sm:$0xff]  ;;  %v2174_v46 = vadd.f32 %v2121_v14, %v1899_v60 }
 0x39c   : > { %v2053_v61 = vpop.f32.mrf.mxu1  ;;  %v17805_v14 = vld [vmem:[#allocation20_spill] sm:$0xff] }
 0x39d   : > { %v3109_v29 = vadd.f32 %v12974_v17, %v3073_v31  ;;  %v2642_v58 = vadd.f32 %v2589_v50, %v2174_v46  ;;  %v2111_v23 = vrot.slane %v2053_v61, 1  ;;  %v2579_v61 = vrot.slane %v12805_v42, 7 }
 0x39e   : > { %v2766_v19 = vpop.f32.mrf.mxu3 }
 0x39f   : > { %v13053_v25 = vadd.f32 %v2766_v19, %v2641_v56  ;;  %v3141_v36 = vmax.f32 %v3109_v29, 0.0  ;;  %v2864_v26 = vpop.f32.mrf.mxu0 }
 0x3a0   : > { %v3232_v1 = vld [vmem:[#allocation2 + $0x30] sm:$0xff]  ;;  %v2996_v47 = vrot.slane %v2864_v26, 1 }
 0x3a1   : > { %3197 = vst.msk [vmem:[#allocation2 + $0x38] sm:$0xff] %vm382_vm0, %v3141_v36  ;;  %9843 = vmatmul.msk.f32.gmra.mxu1 %vm382_vm0, %v3232_v1  ;;  %9892 = vmatmul.msk.f32.gmra.mxu2 %vm382_vm0, %v3232_v1 }
 0x3a2   : > { %9811 = vmatmul.msk.f32.gmra.mxu0 %vm382_vm0, %v10841_v7 }
 0x3a3   : > { %9941 = vmatmul.msk.f32.gmra.mxu3 %vm382_vm0, %v3232_v1  ;;  %v2110_v1 = vrot.slane %v2050_v57, 1  ;;  %v1901_v57 = vadd.f32 %v12736_v9, %v17805_v14  ;;  %v17806_v9 = vld [vmem:[#allocation4_spill] sm:$0xff] }
 0x3a4   : > { %v2056_v36 = vpop.f32.mrf.mxu1 }
 0x3a5   : > { %v2119_v41 = vsel %vm1193_vm1, %v2110_v1, %v2111_v23  ;;  %v2112_v46 = vrot.slane %v2056_v36, 1  ;;  %v10847_v1 = vld [vmem:[%s11091_s24 + $0x110] sm:$0xff] }
 0x3a6   : > { %v2769_v38 = vpop.f32.mrf.mxu3 }
 0x3a7   : > { %v2867_v63 = vpop.f32.mrf.mxu0  ;;  %v2578_v38 = vrot.slane %v12764_v0, 7 }
 0x3a8   : > { %v2997_v4 = vrot.slane %v2867_v63, 1  ;;  %v3233_v35 = vld [vmem:[#allocation2 + $0x38] sm:$0xff] }
 0x3a9   : > { %9844 = vmatmul.msk.f32.gmra.mxu1 %vm382_vm0, %v3233_v35  ;;  %9893 = vmatmul.msk.f32.gmra.mxu2 %vm382_vm0, %v3233_v35 }
 0x3aa   : > { %v3065_v59 = vsel %vm1193_vm1, %v2996_v47, %v2997_v4  ;;  %9812 = vmatmul.msk.f32.gmra.mxu0 %vm382_vm0, %v10842_v44 }
 0x3ab   : > { %9942 = vmatmul.msk.f32.gmra.mxu3 %vm382_vm0, %v3233_v35  ;;  %v3074_v2 = vadd.f32 %v3065_v59, %v12462_v51  ;;  %v2576_v51 = vrot.slane %v12718_v8, 7  ;;  %v2577_v35 = vrot.slane %v12732_v54, 7  ;;  %v10845_v59 = vld [vmem:[%s11091_s24 + $0x100] sm:$0xff] }
 0x3ac   : > { %v2059_v43 = vpop.f32.mrf.mxu1 }
 0x3ad   : > { %v3110_v53 = vadd.f32 %v12974_v17, %v3074_v2  ;;  %v2588_v52 = vsel %vm738_vm2, %v2575_v39, %v2576_v51  ;;  %v2587_v44 = vsel %vm738_vm2, %v2577_v35, %v2578_v38  ;;  %v2118_v2 = vsel %vm1193_vm1, %v2111_v23, %v2112_v46 }
 0x3ae   : > { %v2771_v18 = vpop.f32.mrf.mxu3  ;;  %v2643_v24 = vadd.f32 %v2588_v52, %v2175_v3  ;;  %v10846_v3 = vld [vmem:[%s11091_s24 + $0x108] sm:$0xff]  ;;  %v2113_v36 = vrot.slane %v2059_v43, 1  ;;  %v2580_v35 = vrot.slane %v12843_v15, 7 }
 0x3af   : > { %v13084_v33 = vadd.f32 %v2771_v18, %v2642_v58  ;;  %v3142_v55 = vmax.f32 %v3110_v53, 0.0  ;;  %v2870_v62 = vpop.f32.mrf.mxu0  ;;  %v1902_v53 = vadd.f32 %v12771_v5, %v17807_v48  ;;  %v17808_v5 = vld [vmem:[#allocation6_spill] sm:$0xff]  ;;  %v10081_v43 = vld [vmem:[%s17662_s3 + $0x28] sm:$0xff] }
 0x3b0   : > { %v2998_v21 = vrot.slane %v2870_v62, 1  ;;  %4809 = vmatpush.msrb.mxu2 %v10081_v43  ;;  %v3240_v48 = vld [vmem:[#allocation2 + $0x70] sm:$0xff] }
 0x3b1   : > { %3198 = vst.msk [vmem:[#allocation2 + $0x48] sm:$0xff] %vm382_vm0, %v3142_v55  ;;  %9845 = vmatmul.msk.f32.gmra.mxu1 %vm382_vm0, %v3234_v30  ;;  %9894 = vmatmul.msk.f32.gmra.mxu2 %vm382_vm0, %v3234_v30  ;;  %v2177_v62 = vadd.f32 %v2118_v2, %v1902_v53  ;;  %v17812_v2 = vld [vmem:[#allocation23_spill] sm:$0xff]  ;;  %v2582_v53 = vrot.slane %v12919_v13, 7  ;;  %v17813_v13 = vld [vmem:[#allocation5_spill] sm:$0xff] }
 0x3b2   : > { %v3064_v10 = vsel %vm1193_vm1, %v2997_v4, %v2998_v21  ;;  %9813 = vmatmul.msk.f32.gmra.mxu0 %vm382_vm0, %v10843_v20  ;;  %v2176_v4 = vadd.f32 %v2119_v41, %v1901_v57 }
 0x3b3   : > { %9943 = vmatmul.msk.f32.gmra.mxu3 %vm382_vm0, %v3234_v30  ;;  %v3075_v8 = vadd.f32 %v3064_v10, %v12479_v32  ;;  %v10844_v32 = vld [vmem:[%s11091_s24 + $0xf8] sm:$0xff]  ;;  %v2586_v10 = vsel %vm738_vm2, %v2578_v38, %v2579_v61  ;;  %v2581_v38 = vrot.slane %v12877_v11, 7 }
 0x3b4   : > { %v2644_v54 = vadd.f32 %v2587_v44, %v2176_v4  ;;  %v2062_v20 = vpop.f32.mrf.mxu1  ;;  %v10848_v11 = vld [vmem:[%s11091_s24 + $0x118] sm:$0xff] }
 0x3b5   : > { %v3111_v31 = vadd.f32 %v12974_v17, %v3075_v8  ;;  %v2645_v8 = vadd.f32 %v2586_v10, %v2177_v62  ;;  %v2585_v15 = vsel %vm738_vm2, %v2580_v35, %v2581_v38  ;;  %v10849_v62 = vld [vmem:[%s11091_s24 + $0x120] sm:$0xff] }
 0x3b6   : > { %v2774_v28 = vpop.f32.mrf.mxu3 }
 0x3b7   : > { %v13099_v56 = vadd.f32 %v2774_v28, %v2643_v24  ;;  %v3143_v29 = vmax.f32 %v3111_v31, 0.0  ;;  %v2873_v19 = vpop.f32.mrf.mxu0 }
 0x3b8   : > { %v3235_v26 = vld [vmem:[#allocation2 + $0x48] sm:$0xff]  ;;  %v2999_v39 = vrot.slane %v2873_v19, 1 }
 0x3b9   : > { %3199 = vst.msk [vmem:[#allocation2 + $0x50] sm:$0xff] %vm382_vm0, %v3143_v29  ;;  %9846 = vmatmul.msk.f32.gmra.mxu1 %vm382_vm0, %v3235_v26  ;;  %9895 = vmatmul.msk.f32.gmra.mxu2 %vm382_vm0, %v3235_v26 }
 0x3ba   : > { %9814 = vmatmul.msk.f32.gmra.mxu0 %vm382_vm0, %v10844_v32 }
 0x3bb   : > { %9944 = vmatmul.msk.f32.gmra.mxu3 %vm382_vm0, %v3235_v26  ;;  %v2114_v26 = vrot.slane %v2062_v20, 1 }
 0x3bc   : > { %v2065_v57 = vpop.f32.mrf.mxu1 }
 0x3bd   : > { %v2117_v23 = vsel %vm1193_vm1, %v2113_v36, %v2114_v26  ;;  %v2115_v46 = vrot.slane %v2065_v57, 1  ;;  %v17814_v57 = vld [vmem:[#allocation9_spill] sm:$0xff] }
 0x3be   : > { %v2777_v7 = vpop.f32.mrf.mxu3  ;;  %v13153_v41 = vpop.f32.mrf.mxu2 }
 0x3bf   : > { %v2876_v60 = vpop.f32.mrf.mxu0  ;;  %17809 = vst [vmem:[#allocation17_spill] sm:$0xff] %v13153_v41  ;;  %v17810_v7 = vld [vmem:[#allocation22_spill] sm:$0xff] }
 0x3c0   : > { %v3000_v63 = vrot.slane %v2876_v60, 1  ;;  %v3236_v47 = vld [vmem:[#allocation2 + $0x50] sm:$0xff]  ;;  %v1903_v14 = vadd.f32 %v12849_v12, %v17810_v7 }
 0x3c1   : > { %9847 = vmatmul.msk.f32.gmra.mxu1 %vm382_vm0, %v3236_v47  ;;  %9896 = vmatmul.msk.f32.gmra.mxu2 %vm382_vm0, %v3236_v47 }
 0x3c2   : > { %v3063_v22 = vsel %vm1193_vm1, %v2999_v39, %v3000_v63  ;;  %9815 = vmatmul.msk.f32.gmra.mxu0 %vm382_vm0, %v10845_v59  ;;  %v2178_v4 = vadd.f32 %v2117_v23, %v1903_v14  ;;  %v10851_v14 = vld [vmem:[%s11091_s24 + $0x130] sm:$0xff] }
 0x3c3   : > { %9945 = vmatmul.msk.f32.gmra.mxu3 %vm382_vm0, %v3236_v47  ;;  %v3076_v0 = vadd.f32 %v3063_v22, %v17806_v9  ;;  %v17811_v22 = vld [vmem:[#allocation8_spill] sm:$0xff] }
 0x3c4   : > { %v2646_v9 = vadd.f32 %v2585_v15, %v2178_v4 }
 0x3c5   : > { %v3112_v50 = vadd.f32 %v12974_v17, %v3076_v0  ;;  %v2116_v0 = vsel %vm1193_vm1, %v2114_v26, %v2115_v46 }
 0x3c6   : > { %v2779_v58 = vpop.f32.mrf.mxu3 }
 0x3c7   : > { %v13128_v18 = vadd.f32 %v2779_v58, %v2644_v54  ;;  %v3144_v30 = vmax.f32 %v3112_v50, 0.0  ;;  %v2879_v51 = vpop.f32.mrf.mxu0  ;;  %v1904_v50 = vadd.f32 %v12882_v49, %v17812_v2 }
 0x3c8   : > { %v3001_v55 = vrot.slane %v2879_v51, 1 }
 0x3c9   : > { %3200 = vst.msk [vmem:[#allocation2 + $0x60] sm:$0xff] %vm382_vm0, %v3144_v30  ;;  %9848 = vmatmul.msk.f32.gmra.mxu1 %vm382_vm0, %v3237_v27  ;;  %9897 = vmatmul.msk.f32.gmra.mxu2 %vm382_vm0, %v3237_v27  ;;  %v13180_v30 = vpop.f32.mrf.mxu2 }
 0x3ca   : > { %v3062_v21 = vsel %vm1193_vm1, %v3000_v63, %v3001_v55  ;;  %9816 = vmatmul.msk.f32.gmra.mxu0 %vm382_vm0, %v10846_v3  ;;  %v2179_v55 = vadd.f32 %v2116_v0, %v1904_v50  ;;  %v2584_v3 = vsel %vm738_vm2, %v2581_v38, %v2582_v53  ;;  %v10853_v53 = vld [vmem:[%s11091_s24 + $0x140] sm:$0xff] }
 0x3cb   : > { %9946 = vmatmul.msk.f32.gmra.mxu3 %vm382_vm0, %v3237_v27  ;;  %v3077_v42 = vadd.f32 %v3062_v21, %v17808_v5 }
 0x3cc   : > { %v2647_v5 = vadd.f32 %v2584_v3, %v2179_v55 }
 0x3cd   : > { %v3113_v52 = vadd.f32 %v12974_v17, %v3077_v42 }
 0x3ce   : > { %v2782_v24 = vpop.f32.mrf.mxu3 }
 0x3cf   : > { %v13143_v31 = vadd.f32 %v2782_v24, %v2645_v8  ;;  %v3145_v28 = vmax.f32 %v3113_v52, 0.0  ;;  %v2882_v29 = vpop.f32.mrf.mxu0 }
 0x3d0   : > { %v3238_v19 = vld [vmem:[#allocation2 + $0x60] sm:$0xff]  ;;  %v3002_v39 = vrot.slane %v2882_v29, 1  ;;  %v13199_v29 = vpop.f32.mrf.mxu1 }
 0x3d1   : > { %3201 = vst.msk [vmem:[#allocation2 + $0x68] sm:$0xff] %vm382_vm0, %v3145_v28  ;;  %9849 = vmatmul.msk.f32.gmra.mxu1 %vm382_vm0, %v3238_v19  ;;  %9898 = vmatmul.msk.f32.gmra.mxu2 %vm382_vm0, %v3238_v19 }
 0x3d2   : > { %9817 = vmatmul.msk.f32.gmra.mxu0 %vm382_vm0, %v10847_v1 }
 0x3d3   : > { %9947 = vmatmul.msk.f32.gmra.mxu3 %vm382_vm0, %v3238_v19  ;;  %v10850_v19 = vld [vmem:[%s11091_s24 + $0x128] sm:$0xff] }
 0x3d6   : > { %v2785_v32 = vpop.f32.mrf.mxu3 }
 0x3d7   : > { %v2885_v60 = vpop.f32.mrf.mxu0 }
 0x3d8   : > { %v3003_v63 = vrot.slane %v2885_v60, 1  ;;  %v3239_v47 = vld [vmem:[#allocation2 + $0x68] sm:$0xff]  ;;  %v13212_v60 = vpop.f32.mrf.mxu1 }
 0x3d9   : > { %9850 = vmatmul.msk.f32.gmra.mxu1 %vm382_vm0, %v3239_v47  ;;  %9899 = vmatmul.msk.f32.gmra.mxu2 %vm382_vm0, %v3239_v47 }
 0x3da   : > { %v3061_v12 = vsel %vm1193_vm1, %v3002_v39, %v3003_v63  ;;  %9818 = vmatmul.msk.f32.gmra.mxu0 %vm382_vm0, %v10848_v11  ;;  %v17815_v11 = vld [vmem:[#allocation11_spill] sm:$0xff] }
 0x3db   : > { %9948 = vmatmul.msk.f32.gmra.mxu3 %vm382_vm0, %v3239_v47  ;;  %v3078_v59 = vadd.f32 %v3061_v12, %v17811_v22  ;;  %v3243_v47 = vld [vmem:[#allocation2 + $0x88] sm:$0xff]  ;;  %v10852_v12 = vld [vmem:[%s11091_s24 + $0x138] sm:$0xff] }
 0x3dd   : > { %v3114_v44 = vadd.f32 %v12974_v17, %v3078_v59 }
 0x3de   : > { %v2787_v54 = vpop.f32.mrf.mxu3 }
 0x3df   : > { %v13177_v58 = vadd.f32 %v2787_v54, %v2646_v9  ;;  %v3146_v27 = vmax.f32 %v3114_v44, 0.0  ;;  %v2888_v61 = vpop.f32.mrf.mxu0 }
 0x3e0   : > { %v3004_v51 = vrot.slane %v2888_v61, 1  ;;  %v3717_v24 = vpop.f32.mrf.mxu2  ;;  %v3442_v59 = vpop.f32.mrf.mxu1 }
 0x3e1   : > { %3202 = vst.msk [vmem:[#allocation2 + $0x78] sm:$0xff] %vm382_vm0, %v3146_v27  ;;  %9851 = vmatmul.msk.f32.gmra.mxu1 %vm382_vm0, %v3240_v48  ;;  %9900 = vmatmul.msk.f32.gmra.mxu2 %vm382_vm0, %v3240_v48 }
 0x3e2   : > { %v3060_v49 = vsel %vm1193_vm1, %v3003_v63, %v3004_v51  ;;  %9819 = vmatmul.msk.f32.gmra.mxu0 %vm382_vm0, %v10849_v62 }
 0x3e3   : > { %9949 = vmatmul.msk.f32.gmra.mxu3 %vm382_vm0, %v3240_v48  ;;  %v3079_v21 = vadd.f32 %v3060_v49, %v17813_v13 }
 0x3e5   : > { %v3115_v42 = vadd.f32 %v12974_v17, %v3079_v21 }
 0x3e6   : > { %v2790_v10 = vpop.f32.mrf.mxu3 }
 0x3e7   : > { %v13194_v20 = vadd.f32 %v2790_v10, %v2647_v5  ;;  %v3147_v8 = vmax.f32 %v3115_v42, 0.0  ;;  %v2891_v52 = vpop.f32.mrf.mxu0  ;;  %v10854_v5 = vld [vmem:[%s11091_s24 + $0x148] sm:$0xff] }
 0x3e8   : > { %v3241_v28 = vld [vmem:[#allocation2 + $0x78] sm:$0xff]  ;;  %v3005_v1 = vrot.slane %v2891_v52, 1  ;;  %v17817_v42 = vld [vmem:[#allocation13_spill] sm:$0xff] }
 0x3e9   : > { %3203 = vst.msk [vmem:[#allocation2 + $0x80] sm:$0xff] %vm382_vm0, %v3147_v8  ;;  %9852 = vmatmul.msk.f32.gmra.mxu1 %vm382_vm0, %v3241_v28  ;;  %9901 = vmatmul.msk.f32.gmra.mxu2 %vm382_vm0, %v3241_v28 }
 0x3ea   : > { %9820 = vmatmul.msk.f32.gmra.mxu0 %vm382_vm0, %v10850_v19  ;;  %v3246_v19 = vld [vmem:[#allocation2 + $0xa0] sm:$0xff] }
 0x3eb   : > { %9950 = vmatmul.msk.f32.gmra.mxu3 %vm382_vm0, %v3241_v28 }
 0x3ee   : > { %v2793_v36 = vpop.f32.mrf.mxu3 }
 0x3ef   : > { %v2894_v26 = vpop.f32.mrf.mxu0 }
 0x3f0   : > { %v3006_v23 = vrot.slane %v2894_v26, 1  ;;  %v3242_v32 = vld [vmem:[#allocation2 + $0x80] sm:$0xff] }
 0x3f1   : > { %9853 = vmatmul.msk.f32.gmra.mxu1 %vm382_vm0, %v3242_v32  ;;  %9902 = vmatmul.msk.f32.gmra.mxu2 %vm382_vm0, %v3242_v32 }
 0x3f2   : > { %v3059_v7 = vsel %vm1193_vm1, %v3005_v1, %v3006_v23  ;;  %9821 = vmatmul.msk.f32.gmra.mxu0 %vm382_vm0, %v10851_v14  ;;  %v17818_v14 = vld [vmem:[#allocation14_spill] sm:$0xff] }
 0x3f3   : > { %9951 = vmatmul.msk.f32.gmra.mxu3 %vm382_vm0, %v3242_v32  ;;  %v3080_v38 = vadd.f32 %v3059_v7, %v17814_v57  ;;  %v10855_v7 = vld [vmem:[%s11091_s24 + $0x150] sm:$0xff] }
 0x3f5   : > { %v3116_v39 = vadd.f32 %v12974_v17, %v3080_v38  ;;  %v3582_v38 = vrot.slane %v3442_v59, 7 }
 0x3f6   : > { %v3890_v63 = vpop.f32.mrf.mxu3 }
 0x3f7   : > { %v3148_v4 = vmax.f32 %v3116_v39, 0.0  ;;  %v2897_v35 = vpop.f32.mrf.mxu0  ;;  %v4034_v0 = vrot.slane %v3890_v63, 1 }
 0x3f8   : > { %v3007_v46 = vrot.slane %v2897_v35, 1 }
 0x3f9   : > { %3204 = vst.msk [vmem:[#allocation2 + $0x90] sm:$0xff] %vm382_vm0, %v3148_v4  ;;  %9854 = vmatmul.msk.f32.gmra.mxu1 %vm382_vm0, %v3243_v47  ;;  %9903 = vmatmul.msk.f32.gmra.mxu2 %vm382_vm0, %v3243_v47 }
 0x3fa   : > { %v3058_v43 = vsel %vm1193_vm1, %v3006_v23, %v3007_v46  ;;  %9822 = vmatmul.msk.f32.gmra.mxu0 %vm382_vm0, %v10852_v12 }
 0x3fb   : > { %9952 = vmatmul.msk.f32.gmra.mxu3 %vm382_vm0, %v3243_v47  ;;  %v3081_v22 = vadd.f32 %v3058_v43, %v17815_v11 }
 0x3fd   : > { %v3117_v15 = vadd.f32 %v12974_v17, %v3081_v22 }
 0x3fe   : > { %v3893_v9 = vpop.f32.mrf.mxu3 }
 0x3ff   : > { %v4035_v44 = vrot.slane %v3893_v9, 1  ;;  %v3149_v54 = vmax.f32 %v3117_v15, 0.0  ;;  %v2900_v2 = vpop.f32.mrf.mxu0 }
 0x400   : > { %v3244_v48 = vld [vmem:[#allocation2 + $0x90] sm:$0xff]  ;;  %v3008_v49 = vrot.slane %v2900_v2, 1 }
 0x401   : > { %v13227_v50 = vsel %vm1193_vm1, %v4034_v0, %v4035_v44  ;;  %3205 = vst.msk [vmem:[#allocation2 + $0x98] sm:$0xff] %vm382_vm0, %v3149_v54  ;;  %9855 = vmatmul.msk.f32.gmra.mxu1 %vm382_vm0, %v3244_v48  ;;  %9904 = vmatmul.msk.f32.gmra.mxu2 %vm382_vm0, %v3244_v48 }
 0x402   : > { %17816 = vst [vmem:[#allocation16_spill] sm:$0xff] %v13227_v50  ;;  %9823 = vmatmul.msk.f32.gmra.mxu0 %vm382_vm0, %v10853_v53 }
 0x403   : > { %9953 = vmatmul.msk.f32.gmra.mxu3 %vm382_vm0, %v3244_v48 }
 0x406   : > { %v3896_v27 = vpop.f32.mrf.mxu3  ;;  %v3445_v51 = vpop.f32.mrf.mxu1 }
 0x407   : > { %v4036_v61 = vrot.slane %v3896_v27, 1  ;;  %v2903_v55 = vpop.f32.mrf.mxu0  ;;  %v3583_v23 = vrot.slane %v3445_v51, 7 }
 0x408   : > { %v3009_v13 = vrot.slane %v2903_v55, 1  ;;  %v3245_v21 = vld [vmem:[#allocation2 + $0x98] sm:$0xff] }
 0x409   : > { %v13237_v62 = vsel %vm1193_vm1, %v4035_v44, %v4036_v61  ;;  %9856 = vmatmul.msk.f32.gmra.mxu1 %vm382_vm0, %v3245_v21  ;;  %9905 = vmatmul.msk.f32.gmra.mxu2 %vm382_vm0, %v3245_v21  ;;  %v3657_v4 = vsel %vm738_vm2, %v3582_v38, %v3583_v23  ;;  %v10856_v44 = vld [vmem:[%s11091_s24 + $0x158] sm:$0xff] }
 0x40a   : > { %v3057_v3 = vsel %vm1193_vm1, %v3008_v49, %v3009_v13  ;;  %9824 = vmatmul.msk.f32.gmra.mxu0 %vm382_vm0, %v10854_v5 }
 0x40b   : > { %9954 = vmatmul.msk.f32.gmra.mxu3 %vm382_vm0, %v3245_v21  ;;  %v3082_v10 = vadd.f32 %v3057_v3, %v17817_v42  ;;  %v10857_v42 = vld [vmem:[%s11091_s24 + $0x160] sm:$0xff] }
 0x40c   : > { %v3719_v8 = vpop.f32.mrf.mxu2 }
 0x40d   : > { %v3118_v52 = vadd.f32 %v12974_v17, %v3082_v10  ;;  %v3841_v12 = vadd.f32 %v3719_v8, %v3657_v4  ;;  %v17819_v10 = vld [vmem:[#allocation24_spill] sm:$0xff] }
 0x40e   : > { %v3899_v24 = vpop.f32.mrf.mxu3  ;;  %v3448_v28 = vpop.f32.mrf.mxu1 }
 0x40f   : > { %v3150_v36 = vmax.f32 %v3118_v52, 0.0  ;;  %v2906_v26 = vpop.f32.mrf.mxu0  ;;  %v4037_v35 = vrot.slane %v3899_v24, 1  ;;  %v3584_v0 = vrot.slane %v3448_v28, 7 }
 0x410   : > { %v3010_v1 = vrot.slane %v2906_v26, 1 }
 0x411   : > { %3206 = vst.msk [vmem:[#allocation2 + $0xa8] sm:$0xff] %vm382_vm0, %v3150_v36  ;;  %9857 = vmatmul.msk.f32.gmra.mxu1 %vm382_vm0, %v3246_v19  ;;  %9906 = vmatmul.msk.f32.gmra.mxu2 %vm382_vm0, %v3246_v19  ;;  %v3656_v48 = vsel %vm738_vm2, %v3583_v23, %v3584_v0  ;;  %v3249_v36 = vld [vmem:[#allocation2 + $0xb8] sm:$0xff] }
 0x412   : > { %v3056_v32 = vsel %vm1193_vm1, %v3009_v13, %v3010_v1  ;;  %9825 = vmatmul.msk.f32.gmra.mxu0 %vm382_vm0, %v10855_v7 }
 0x413   : > { %9955 = vmatmul.msk.f32.gmra.mxu3 %vm382_vm0, %v3246_v19  ;;  %v3083_v57 = vadd.f32 %v3056_v32, %v17818_v14  ;;  %v10858_v14 = vld [vmem:[%s11091_s24 + $0x168] sm:$0xff] }
 0x414   : > { %v3722_v39 = vpop.f32.mrf.mxu2 }
 0x415   : > { %v3119_v63 = vadd.f32 %v12974_v17, %v3083_v57  ;;  %v3842_v61 = vadd.f32 %v3722_v39, %v3656_v48  ;;  %v17820_v57 = vld [vmem:[#allocation25_spill] sm:$0xff] }
 0x416   : > { %v3902_v47 = vpop.f32.mrf.mxu3  ;;  %v3451_v43 = vpop.f32.mrf.mxu1 }
 0x417   : > { %v4038_v46 = vrot.slane %v3902_v47, 1  ;;  %v3151_v11 = vmax.f32 %v3119_v63, 0.0  ;;  %v2909_v22 = vpop.f32.mrf.mxu0  ;;  %v3585_v39 = vrot.slane %v3451_v43, 7 }
 0x418   : > { %v3247_v9 = vld [vmem:[#allocation2 + $0xa8] sm:$0xff]  ;;  %v3011_v55 = vrot.slane %v2909_v22, 1 }
 0x419   : > { %v4111_v15 = vsel %vm1193_vm1, %v4037_v35, %v4038_v46  ;;  %3207 = vst.msk [vmem:[#allocation2 + $0xb0] sm:$0xff] %vm382_vm0, %v3151_v11  ;;  %9858 = vmatmul.msk.f32.gmra.mxu1 %vm382_vm0, %v3247_v9  ;;  %9907 = vmatmul.msk.f32.gmra.mxu2 %vm382_vm0, %v3247_v9 }
 0x41a   : > { %v13265_v59 = vadd.f32 %v4111_v15, %v3841_v12  ;;  %9826 = vmatmul.msk.f32.gmra.mxu0 %vm382_vm0, %v10856_v44 }
 0x41b   : > { %9956 = vmatmul.msk.f32.gmra.mxu3 %vm382_vm0, %v3247_v9 }
 0x41c   : > { %v3725_v54 = vpop.f32.mrf.mxu2 }
 0x41e   : > { %v3905_v2 = vpop.f32.mrf.mxu3  ;;  %v3454_v27 = vpop.f32.mrf.mxu1 }
 0x41f   : > { %v4039_v53 = vrot.slane %v3905_v2, 1  ;;  %v2912_v51 = vpop.f32.mrf.mxu0  ;;  %v3586_v32 = vrot.slane %v3454_v27, 7  ;;  %v10859_v2 = vld [vmem:[%s11091_s24 + $0x170] sm:$0xff] }
 0x420   : > { %v3012_v13 = vrot.slane %v2912_v51, 1  ;;  %v3248_v21 = vld [vmem:[#allocation2 + $0xb0] sm:$0xff] }
 0x421   : > { %v4110_v49 = vsel %vm1193_vm1, %v4038_v46, %v4039_v53  ;;  %9859 = vmatmul.msk.f32.gmra.mxu1 %vm382_vm0, %v3248_v21  ;;  %9908 = vmatmul.msk.f32.gmra.mxu2 %vm382_vm0, %v3248_v21  ;;  %v3655_v35 = vsel %vm738_vm2, %v3585_v39, %v3586_v32 }
 0x422   : > { %v13276_v3 = vadd.f32 %v4110_v49, %v3842_v61  ;;  %v3055_v5 = vsel %vm1193_vm1, %v3011_v55, %v3012_v13  ;;  %9827 = vmatmul.msk.f32.gmra.mxu0 %vm382_vm0, %v10857_v42 }
 0x423   : > { %9957 = vmatmul.msk.f32.gmra.mxu3 %vm382_vm0, %v3248_v21  ;;  %v3084_v8 = vadd.f32 %v3055_v5, %v17819_v10 }
 0x424   : > { %v3727_v52 = vpop.f32.mrf.mxu2 }
 0x425   : > { %v3120_v24 = vadd.f32 %v12974_v17, %v3084_v8  ;;  %v3843_v22 = vadd.f32 %v3727_v52, %v3655_v35  ;;  %v10860_v52 = vld [vmem:[%s11091_s24 + $0x178] sm:$0xff] }
 0x426   : > { %v3908_v28 = vpop.f32.mrf.mxu3  ;;  %v3457_v19 = vpop.f32.mrf.mxu1 }
 0x427   : > { %v3152_v26 = vmax.f32 %v3120_v24, 0.0  ;;  %v2915_v1 = vpop.f32.mrf.mxu0  ;;  %v4040_v46 = vrot.slane %v3908_v28, 1  ;;  %v3587_v54 = vrot.slane %v3457_v19, 7 }
 0x428   : > { %v3013_v23 = vrot.slane %v2915_v1, 1  ;;  %v3252_v1 = vld [vmem:[#allocation2 + $0xd0] sm:$0xff] }
 0x429   : > { %3208 = vst.msk [vmem:[#allocation2 + $0xc0] sm:$0xff] %vm382_vm0, %v3152_v26  ;;  %9860 = vmatmul.msk.f32.gmra.mxu1 %vm382_vm0, %v3249_v36  ;;  %9909 = vmatmul.msk.f32.gmra.mxu2 %vm382_vm0, %v3249_v36  ;;  %v3654_v27 = vsel %vm738_vm2, %v3586_v32, %v3587_v54 }
 0x42a   : > { %v3054_v7 = vsel %vm1193_vm1, %v3012_v13, %v3013_v23  ;;  %9828 = vmatmul.msk.f32.gmra.mxu0 %vm382_vm0, %v10858_v14 }
 0x42b   : > { %9958 = vmatmul.msk.f32.gmra.mxu3 %vm382_vm0, %v3249_v36  ;;  %v3085_v38 = vadd.f32 %v3054_v7, %v17820_v57 }
 0x42c   : > { %v3730_v63 = vpop.f32.mrf.mxu2 }
 0x42d   : > { %v3121_v47 = vadd.f32 %v12974_v17, %v3085_v38  ;;  %v3844_v55 = vadd.f32 %v3730_v63, %v3654_v27  ;;  %v17822_v38 = vld [vmem:[#allocation7_spill] sm:$0xff] }
 0x42e   : > { %v3911_v4 = vpop.f32.mrf.mxu3  ;;  %v3460_v11 = vpop.f32.mrf.mxu1 }
 0x42f   : > { %v4041_v12 = vrot.slane %v3911_v4, 1  ;;  %v3153_v15 = vmax.f32 %v3121_v47, 0.0  ;;  %v2918_v9 = vpop.f32.mrf.mxu0  ;;  %v3588_v63 = vrot.slane %v3460_v11, 7 }
 0x430   : > { %v3250_v44 = vld [vmem:[#allocation2 + $0xc0] sm:$0xff]  ;;  %v3014_v13 = vrot.slane %v2918_v9, 1 }
 0x431   : > { %v4109_v0 = vsel %vm1193_vm1, %v4040_v46, %v4041_v12  ;;  %3209 = vst.msk [vmem:[#allocation2 + $0xc8] sm:$0xff] %vm382_vm0, %v3153_v15  ;;  %9861 = vmatmul.msk.f32.gmra.mxu1 %vm382_vm0, %v3250_v44  ;;  %9910 = vmatmul.msk.f32.gmra.mxu2 %vm382_vm0, %v3250_v44 }
 0x432   : > { %v13302_v43 = vadd.f32 %v4109_v0, %v3843_v22  ;;  %9829 = vmatmul.msk.f32.gmra.mxu0 %vm382_vm0, %v10859_v2 }
 0x433   : > { %9959 = vmatmul.msk.f32.gmra.mxu3 %vm382_vm0, %v3250_v44 }
 0x434   : > { %v3733_v48 = vpop.f32.mrf.mxu2 }
 0x436   : > { %v3914_v53 = vpop.f32.mrf.mxu3  ;;  %v3463_v51 = vpop.f32.mrf.mxu1 }
 0x437   : > { %v4042_v61 = vrot.slane %v3914_v53, 1  ;;  %v2921_v49 = vpop.f32.mrf.mxu0  ;;  %v3589_v14 = vrot.slane %v3463_v51, 7  ;;  %v10862_v53 = vld [vmem:[%s11091_s24 + $0x188] sm:$0xff] }
 0x438   : > { %v3015_v5 = vrot.slane %v2921_v49, 1  ;;  %v3251_v42 = vld [vmem:[#allocation2 + $0xc8] sm:$0xff] }
 0x439   : > { %v4108_v21 = vsel %vm1193_vm1, %v4041_v12, %v4042_v61  ;;  %9862 = vmatmul.msk.f32.gmra.mxu1 %vm382_vm0, %v3251_v42  ;;  %9911 = vmatmul.msk.f32.gmra.mxu2 %vm382_vm0, %v3251_v42  ;;  %v3653_v46 = vsel %vm738_vm2, %v3588_v63, %v3589_v14 }
 0x43a   : > { %v13313_v10 = vadd.f32 %v4108_v21, %v3844_v55  ;;  %v3053_v8 = vsel %vm1193_vm1, %v3014_v13, %v3015_v5  ;;  %9830 = vmatmul.msk.f32.gmra.mxu0 %vm382_vm0, %v10860_v52 }
 0x43b   : > { %9960 = vmatmul.msk.f32.gmra.mxu3 %vm382_vm0, %v3251_v42  ;;  %v3086_v24 = vadd.f32 %v3053_v8, %v12721_v16  ;;  %v10861_v16 = vld [vmem:[%s11091_s24 + $0x180] sm:$0xff] }
 0x43c   : > { %17821 = vst [vmem:[#allocation18_spill] sm:$0xff] %v13313_v10  ;;  %v3735_v28 = vpop.f32.mrf.mxu2 }
 0x43d   : > { %v3122_v19 = vadd.f32 %v12974_v17, %v3086_v24  ;;  %v3845_v9 = vadd.f32 %v3735_v28, %v3653_v46 }
 0x43e   : > { %v3917_v36 = vpop.f32.mrf.mxu3  ;;  %v3466_v26 = vpop.f32.mrf.mxu1 }
 0x43f   : > { %v3154_v23 = vmax.f32 %v3122_v19, 0.0  ;;  %v2924_v32 = vpop.f32.mrf.mxu0  ;;  %v4043_v12 = vrot.slane %v3917_v36, 1  ;;  %v3590_v48 = vrot.slane %v3466_v26, 7  ;;  %v10863_v19 = vld [vmem:[%s11091_s24 + $0x190] sm:$0xff] }
 0x440   : > { %v3016_v7 = vrot.slane %v2924_v32, 1  ;;  %v17825_v36 = vld [vmem:[#allocation10_spill] sm:$0xff] }
 0x441   : > { %3210 = vst.msk [vmem:[#allocation2 + $0xd8] sm:$0xff] %vm382_vm0, %v3154_v23  ;;  %9863 = vmatmul.msk.f32.gmra.mxu1 %vm382_vm0, %v3252_v1  ;;  %9912 = vmatmul.msk.f32.gmra.mxu2 %vm382_vm0, %v3252_v1  ;;  %v3652_v51 = vsel %vm738_vm2, %v3589_v14, %v3590_v48  ;;  %v13369_v14 = vld [vmem:[#allocation2 + $0xe8] sm:$0xff] }
 0x442   : > { %v3052_v57 = vsel %vm1193_vm1, %v3015_v5, %v3016_v7  ;;  %9831 = vmatmul.msk.f32.gmra.mxu0 %vm382_vm0, %v10861_v16 }
 0x443   : > { %9961 = vmatmul.msk.f32.gmra.mxu3 %vm382_vm0, %v3252_v1  ;;  %v3087_v39 = vadd.f32 %v3052_v57, %v17822_v38 }
 0x444   : > { %v3738_v47 = vpop.f32.mrf.mxu2 }
 0x445   : > { %v3123_v4 = vadd.f32 %v12974_v17, %v3087_v39  ;;  %v3846_v13 = vadd.f32 %v3738_v47, %v3652_v51  ;;  %v10864_v47 = vld [vmem:[%s11091_s24 + $0x198] sm:$0xff] }
 0x446   : > { %v3920_v35 = vpop.f32.mrf.mxu3  ;;  %v3469_v15 = vpop.f32.mrf.mxu1 }
 0x447   : > { %v4044_v22 = vrot.slane %v3920_v35, 1  ;;  %v3155_v0 = vmax.f32 %v3123_v4, 0.0  ;;  %v2927_v44 = vpop.f32.mrf.mxu0  ;;  %v10179_v4 = vld [vmem:[%s17662_s3 + $0x38] sm:$0xff]  ;;  %v17826_v35 = vld [vmem:[#allocation12_spill] sm:$0xff] }
 0x448   : > { %v13336_v2 = vld [vmem:[#allocation2 + $0xd8] sm:$0xff]  ;;  %v3017_v5 = vrot.slane %v2927_v44, 1  ;;  %5552 = vmatpush.msra.mxu0 %v10179_v4 }
 0x449   : > { %v4107_v54 = vsel %vm1193_vm1, %v4043_v12, %v4044_v22  ;;  %3211 = vst.msk [vmem:[#allocation2 + $0xe0] sm:$0xff] %vm382_vm0, %v3155_v0  ;;  %9864 = vmatmul.msk.f32.gmra.mxu1 %vm382_vm0, %v13336_v2  ;;  %9913 = vmatmul.msk.f32.gmra.mxu2 %vm382_vm0, %v13336_v2  ;;  %v3591_v12 = vrot.slane %v3469_v15, 7 }
 0x44a   : > { %v13343_v11 = vadd.f32 %v4107_v54, %v3845_v9  ;;  %9832 = vmatmul.msk.f32.gmra.mxu0 %vm382_vm0, %v10862_v53 }
 0x44b   : > { %9962 = vmatmul.msk.f32.gmra.mxu3 %vm382_vm0, %v13336_v2 }
 0x44c   : > { %17823 = vst [vmem:[#allocation19_spill] sm:$0xff] %v13343_v11  ;;  %v3741_v27 = vpop.f32.mrf.mxu2 }
 0x44e   : > { %v3923_v61 = vpop.f32.mrf.mxu3  ;;  %v3472_v49 = vpop.f32.mrf.mxu1 }
 0x44f   : > { %v4045_v55 = vrot.slane %v3923_v61, 1  ;;  %v2930_v21 = vpop.f32.mrf.mxu0  ;;  %v3592_v39 = vrot.slane %v3472_v49, 7 }
 0x450   : > { %v3018_v8 = vrot.slane %v2930_v21, 1  ;;  %v13353_v52 = vld [vmem:[#allocation2 + $0xe0] sm:$0xff] }
 0x451   : > { %v4106_v42 = vsel %vm1193_vm1, %v4044_v22, %v4045_v55  ;;  %9865 = vmatmul.msk.f32.gmra.mxu1 %vm382_vm0, %v13353_v52  ;;  %9914 = vmatmul.msk.f32.gmra.mxu2 %vm382_vm0, %v13353_v52  ;;  %v3651_v44 = vsel %vm738_vm2, %v3591_v12, %v3592_v39  ;;  %v13429_v12 = vld [vmem:[#allocation2 + $0x100] sm:$0xff] }
 0x452   : > { %v13359_v24 = vadd.f32 %v4106_v42, %v3846_v13  ;;  %v3051_v28 = vsel %vm1193_vm1, %v3017_v5, %v3018_v8  ;;  %9833 = vmatmul.msk.f32.gmra.mxu0 %vm382_vm0, %v10863_v19  ;;  %v10865_v13 = vld [vmem:[%s11091_s24 + $0x1a0] sm:$0xff] }
 0x453   : > { %9963 = vmatmul.msk.f32.gmra.mxu3 %vm382_vm0, %v13353_v52  ;;  %v3088_v26 = vadd.f32 %v3051_v28, %v17825_v36 }
 0x454   : > { %17824 = vst [vmem:[#allocation20_spill] sm:$0xff] %v13359_v24  ;;  %v3743_v1 = vpop.f32.mrf.mxu2 }
 0x455   : > { %v3124_v23 = vadd.f32 %v12974_v17, %v3088_v26  ;;  %v3847_v27 = vadd.f32 %v3743_v1, %v3651_v44 }
 0x456   : > { %v3926_v32 = vpop.f32.mrf.mxu3  ;;  %v3475_v7 = vpop.f32.mrf.mxu1 }
 0x457   : > { %v3156_v57 = vmax.f32 %v3124_v23, 0.0  ;;  %v2933_v16 = vpop.f32.mrf.mxu0  ;;  %v4046_v54 = vrot.slane %v3926_v32, 1  ;;  %v3593_v15 = vrot.slane %v3475_v7, 7 }
 0x458   : > { %v3019_v38 = vrot.slane %v2933_v16, 1  ;;  %v10866_v16 = vld [vmem:[%s11091_s24 + $0x1a8] sm:$0xff] }
 0x459   : > { %3212 = vst.msk [vmem:[#allocation2 + $0xf0] sm:$0xff] %vm382_vm0, %v3156_v57  ;;  %9866 = vmatmul.msk.f32.gmra.mxu1 %vm382_vm0, %v13369_v14  ;;  %9915 = vmatmul.msk.f32.gmra.mxu2 %vm382_vm0, %v13369_v14  ;;  %v3650_v42 = vsel %vm738_vm2, %v3592_v39, %v3593_v15 }
 0x45a   : > { %v3050_v63 = vsel %vm1193_vm1, %v3018_v8, %v3019_v38  ;;  %9834 = vmatmul.msk.f32.gmra.mxu0 %vm382_vm0, %v10864_v47  ;;  %v17829_v38 = vld [vmem:[#allocation15_spill] sm:$0xff]  ;;  %v13426_v47 = vld [vmem:[%s17661_s2] ss:$0 sm:$0xff] }
 0x45b   : > { %9964 = vmatmul.msk.f32.gmra.mxu3 %vm382_vm0, %v13369_v14  ;;  %v3089_v46 = vadd.f32 %v3050_v63, %v17826_v35 }
 0x45c   : > { %v3746_v22 = vpop.f32.mrf.mxu2 }
 0x45d   : > { %v3125_v9 = vadd.f32 %v12974_v17, %v3089_v46  ;;  %v3848_v19 = vadd.f32 %v3746_v22, %v3650_v42 }
 0x45e   : > { %v3929_v0 = vpop.f32.mrf.mxu3  ;;  %v3478_v53 = vpop.f32.mrf.mxu1 }
 0x45f   : > { %v4047_v48 = vrot.slane %v3929_v0, 1  ;;  %v3157_v61 = vmax.f32 %v3125_v9, 0.0  ;;  %v2936_v51 = vpop.f32.mrf.mxu0 }
 0x460   : > { %v13391_v49 = vld [vmem:[#allocation2 + $0xf0] sm:$0xff]  ;;  %v3020_v26 = vrot.slane %v2936_v51, 1 }
 0x461   : > { %v4105_v55 = vsel %vm1193_vm1, %v4046_v54, %v4047_v48  ;;  %3213 = vst.msk [vmem:[#allocation2 + $0xf8] sm:$0xff] %vm382_vm0, %v3157_v61  ;;  %9867 = vmatmul.msk.f32.gmra.mxu1 %vm382_vm0, %v13391_v49  ;;  %9916 = vmatmul.msk.f32.gmra.mxu2 %vm382_vm0, %v13391_v49  ;;  %v3594_v61 = vrot.slane %v3478_v53, 7 }
 0x462   : > { %v13398_v17 = vadd.f32 %v4105_v55, %v3847_v27  ;;  %9835 = vmatmul.msk.f32.gmra.mxu0 %vm382_vm0, %v10865_v13 }
 0x463   : > { %9965 = vmatmul.msk.f32.gmra.mxu3 %vm382_vm0, %v13391_v49 }
 0x464   : > { %17827 = vst [vmem:[#allocation4_spill] sm:$0xff] %v13398_v17  ;;  %v3749_v21 = vpop.f32.mrf.mxu2 }
 0x466   : > { %v3932_v5 = vpop.f32.mrf.mxu3  ;;  %v3481_v28 = vpop.f32.mrf.mxu1 }
 0x467   : > { %v4048_v8 = vrot.slane %v3932_v5, 1  ;;  %v2939_v36 = vpop.f32.mrf.mxu0  ;;  %v3595_v44 = vrot.slane %v3481_v28, 7 }
 0x468   : > { %v3021_v23 = vrot.slane %v2939_v36, 1  ;;  %v13408_v32 = vld [vmem:[#allocation2 + $0xf8] sm:$0xff] }
 0x469   : > { %v4104_v1 = vsel %vm1193_vm1, %v4047_v48, %v4048_v8  ;;  %9868 = vmatmul.msk.f32.gmra.mxu1 %vm382_vm0, %v13408_v32  ;;  %9917 = vmatmul.msk.f32.gmra.mxu2 %vm382_vm0, %v13408_v32  ;;  %v13440_v48 = vld [vmem:[#allocation2 + $0x18] sm:$0xff]  ;;  %v3649_v13 = vsel %vm738_vm2, %v3594_v61, %v3595_v44 }
 0x46a   : > { %v13414_v7 = vadd.f32 %v4104_v1, %v3848_v19  ;;  %v3049_v57 = vsel %vm1193_vm1, %v3020_v26, %v3021_v23  ;;  %9836 = vmatmul.msk.f32.gmra.mxu0 %vm382_vm0, %v10866_v16  ;;  %v13461_v1 = vld [vmem:[#allocation2 + $0x20] sm:$0xff] }
 0x46b   : > { %9966 = vmatmul.msk.f32.gmra.mxu3 %vm382_vm0, %v13408_v32  ;;  %v3090_v39 = vadd.f32 %v3049_v57, %v17829_v38 }
 0x46c   : > { %17828 = vst [vmem:[#allocation21_spill] sm:$0xff] %v13414_v7  ;;  %v3751_v63 = vpop.f32.mrf.mxu2 }
 0x46d   : > { %v3126_v4 = vadd.f32 %v13426_v47, %v3090_v39  ;;  %v3849_v8 = vadd.f32 %v3751_v63, %v3649_v13  ;;  %v13487_v13 = vld [vmem:[#allocation2 + $0x118] sm:$0xff] }
 0x46e   : > { %v3935_v35 = vpop.f32.mrf.mxu3  ;;  %v3484_v46 = vpop.f32.mrf.mxu1 }
 0x46f   : > { %v3158_v22 = vmax.f32 %v3126_v4, 0.0  ;;  %v2942_v9 = vpop.f32.mrf.mxu0  ;;  %v4049_v21 = vrot.slane %v3935_v35, 1  ;;  %v3596_v53 = vrot.slane %v3484_v46, 7 }
 0x470   : > { %v3022_v0 = vrot.slane %v2942_v9, 1 }
 0x471   : > { %3214 = vst.msk [vmem:[#allocation2 + $0x108] sm:$0xff] %vm382_vm0, %v3158_v22  ;;  %9869 = vmatmul.msk.f32.gmra.mxu1 %vm382_vm0, %v13429_v12  ;;  %9918 = vmatmul.msk.f32.gmra.mxu2 %vm382_vm0, %v13429_v12  ;;  %v3648_v16 = vsel %vm738_vm2, %v3595_v44, %v3596_v53 }
 0x472   : > { %v3048_v54 = vsel %vm1193_vm1, %v3021_v23, %v3022_v0  ;;  %9984 = vmatmul.msk.f32.vlgmr.msrb.gmra.mxu0 %vm382_vm0, %v13440_v48 }
 0x473   : > { %9967 = vmatmul.msk.f32.gmra.mxu3 %vm382_vm0, %v13429_v12  ;;  %v3091_v27 = vadd.f32 %v3048_v54, %v12945_v45  ;;  %v13481_v54 = vld [vmem:[#allocation2 + $0x28] sm:$0xff] }
 0x474   : > { %v3754_v51 = vpop.f32.mrf.mxu2 }
 0x475   : > { %v3127_v55 = vadd.f32 %v13426_v47, %v3091_v27  ;;  %v3850_v63 = vadd.f32 %v3754_v51, %v3648_v16 }
 0x476   : > { %v3938_v15 = vpop.f32.mrf.mxu3  ;;  %v3487_v42 = vpop.f32.mrf.mxu1 }
 0x477   : > { %v4050_v5 = vrot.slane %v3938_v15, 1  ;;  %v3159_v28 = vmax.f32 %v3127_v55, 0.0  ;;  %v2945_v19 = vpop.f32.mrf.mxu0  ;;  %v3597_v53 = vrot.slane %v3487_v42, 7 }
 0x478   : > { %v13450_v26 = vld [vmem:[#allocation2 + $0x108] sm:$0xff]  ;;  %v3023_v35 = vrot.slane %v2945_v19, 1  ;;  %v13498_v19 = vld [vmem:[#allocation2 + $0x30] sm:$0xff] }
 0x479   : > { %v4103_v36 = vsel %vm1193_vm1, %v4049_v21, %v4050_v5  ;;  %3215 = vst.msk [vmem:[#allocation2 + $0x110] sm:$0xff] %vm382_vm0, %v3159_v28  ;;  %9870 = vmatmul.msk.f32.gmra.mxu1 %vm382_vm0, %v13450_v26  ;;  %9919 = vmatmul.msk.f32.gmra.mxu2 %vm382_vm0, %v13450_v26 }
 0x47a   : > { %v13457_v45 = vadd.f32 %v4103_v36, %v3849_v8  ;;  %9985 = vmatmul.msk.f32.gmra.mxu0 %vm382_vm0, %v13461_v1 }
 0x47b   : > { %9968 = vmatmul.msk.f32.gmra.mxu3 %vm382_vm0, %v13450_v26 }
 0x47c   : > { %17830 = vst [vmem:[#allocation6_spill] sm:$0xff] %v13457_v45  ;;  %v3757_v23 = vpop.f32.mrf.mxu2 }
 0x47e   : > { %v3941_v57 = vpop.f32.mrf.mxu3  ;;  %v3490_v39 = vpop.f32.mrf.mxu1 }
 0x47f   : > { %v4051_v38 = vrot.slane %v3941_v57, 1  ;;  %v2948_v4 = vpop.f32.mrf.mxu0  ;;  %v3598_v28 = vrot.slane %v3490_v39, 7 }
 0x480   : > { %v3024_v22 = vrot.slane %v2948_v4, 1  ;;  %v13469_v9 = vld [vmem:[#allocation2 + $0x110] sm:$0xff] }
 0x481   : > { %v4102_v46 = vsel %vm1193_vm1, %v4050_v5, %v4051_v38  ;;  %9871 = vmatmul.msk.f32.gmra.mxu1 %vm382_vm0, %v13469_v9  ;;  %9920 = vmatmul.msk.f32.gmra.mxu2 %vm382_vm0, %v13469_v9  ;;  %v3647_v38 = vsel %vm738_vm2, %v3597_v53, %v3598_v28 }
 0x482   : > { %v13475_v0 = vadd.f32 %v4102_v46, %v3850_v63  ;;  %v3047_v44 = vsel %vm1193_vm1, %v3023_v35, %v3024_v22  ;;  %9986 = vmatmul.msk.f32.gmra.mxu0 %vm382_vm0, %v13481_v54 }
 0x483   : > { %9969 = vmatmul.msk.f32.gmra.mxu3 %vm382_vm0, %v13469_v9  ;;  %v3092_v27 = vadd.f32 %v3047_v44, %v12989_v6 }
 0x484   : > { %17831 = vst [vmem:[#allocation22_spill] sm:$0xff] %v13475_v0  ;;  %v3759_v61 = vpop.f32.mrf.mxu2 }
 0x485   : > { %v3128_v51 = vadd.f32 %v13426_v47, %v3092_v27  ;;  %v3851_v35 = vadd.f32 %v3759_v61, %v3647_v38  ;;  %v13519_v61 = vld [vmem:[#allocation2 + $0x38] sm:$0xff] }
 0x486   : > { %v3944_v55 = vpop.f32.mrf.mxu3  ;;  %v3493_v15 = vpop.f32.mrf.mxu1 }
 0x487   : > { %v3160_v21 = vmax.f32 %v3128_v51, 0.0  ;;  %v2951_v5 = vpop.f32.mrf.mxu0  ;;  %v4052_v39 = vrot.slane %v3944_v55, 1  ;;  %v3599_v42 = vrot.slane %v3493_v15, 7 }
 0x488   : > { %v3025_v8 = vrot.slane %v2951_v5, 1 }
 0x489   : > { %3216 = vst.msk [vmem:[#allocation2 + $0x120] sm:$0xff] %vm382_vm0, %v3160_v21  ;;  %9872 = vmatmul.msk.f32.gmra.mxu1 %vm382_vm0, %v13487_v13  ;;  %9921 = vmatmul.msk.f32.gmra.mxu2 %vm382_vm0, %v13487_v13  ;;  %v3646_v21 = vsel %vm738_vm2, %v3598_v28, %v3599_v42 }
 0x48a   : > { %v3046_v6 = vsel %vm1193_vm1, %v3024_v22, %v3025_v8  ;;  %9987 = vmatmul.msk.f32.gmra.mxu0 %vm382_vm0, %v13498_v19 }
 0x48b   : > { %9970 = vmatmul.msk.f32.gmra.mxu3 %vm382_vm0, %v13487_v13  ;;  %v3093_v36 = vadd.f32 %v3046_v6, %v13005_v40 }
 0x48c   : > { %v3762_v23 = vpop.f32.mrf.mxu2 }
 0x48d   : > { %v3129_v57 = vadd.f32 %v13426_v47, %v3093_v36  ;;  %v3852_v6 = vadd.f32 %v3762_v23, %v3646_v21  ;;  %v13539_v23 = vld [vmem:[#allocation2 + $0x40] sm:$0xff] }
 0x48e   : > { %v3947_v16 = vpop.f32.mrf.mxu3  ;;  %v3496_v4 = vpop.f32.mrf.mxu1 }
 0x48f   : > { %v4053_v63 = vrot.slane %v3947_v16, 1  ;;  %v3161_v46 = vmax.f32 %v3129_v57, 0.0  ;;  %v2954_v22 = vpop.f32.mrf.mxu0 }
 0x490   : > { %v13508_v27 = vld [vmem:[#allocation2 + $0x120] sm:$0xff]  ;;  %v3026_v53 = vrot.slane %v2954_v22, 1 }
 0x491   : > { %v4101_v44 = vsel %vm1193_vm1, %v4052_v39, %v4053_v63  ;;  %3217 = vst.msk [vmem:[#allocation2 + $0x128] sm:$0xff] %vm382_vm0, %v3161_v46  ;;  %9873 = vmatmul.msk.f32.gmra.mxu1 %vm382_vm0, %v13508_v27  ;;  %9922 = vmatmul.msk.f32.gmra.mxu2 %vm382_vm0, %v13508_v27 }
 0x492   : > { %v13515_v40 = vadd.f32 %v4101_v44, %v3851_v35  ;;  %9988 = vmatmul.msk.f32.gmra.mxu0 %vm382_vm0, %v13519_v61  ;;  %v13545_v44 = vld [vmem:[#allocation2 + $0x130] sm:$0xff] }
 0x493   : > { %9971 = vmatmul.msk.f32.gmra.mxu3 %vm382_vm0, %v13508_v27 }
 0x494   : > { %17832 = vst [vmem:[#allocation8_spill] sm:$0xff] %v13515_v40  ;;  %v3765_v51 = vpop.f32.mrf.mxu2 }
 0x496   : > { %v3950_v55 = vpop.f32.mrf.mxu3  ;;  %v3499_v8 = vpop.f32.mrf.mxu1 }
 0x497   : > { %v4054_v5 = vrot.slane %v3950_v55, 1  ;;  %v2957_v36 = vpop.f32.mrf.mxu0  ;;  %v3601_v21 = vrot.slane %v3499_v8, 7 }
 0x498   : > { %v3027_v57 = vrot.slane %v2957_v36, 1  ;;  %v13527_v16 = vld [vmem:[#allocation2 + $0x128] sm:$0xff]  ;;  %v3600_v36 = vrot.slane %v3496_v4, 7 }
 0x499   : > { %v4100_v15 = vsel %vm1193_vm1, %v4053_v63, %v4054_v5  ;;  %9874 = vmatmul.msk.f32.gmra.mxu1 %vm382_vm0, %v13527_v16  ;;  %9923 = vmatmul.msk.f32.gmra.mxu2 %vm382_vm0, %v13527_v16  ;;  %v13556_v5 = vld [vmem:[#allocation2 + $0x48] sm:$0xff] }
 0x49a   : > { %v13533_v38 = vadd.f32 %v4100_v15, %v3852_v6  ;;  %v3045_v28 = vsel %vm1193_vm1, %v3026_v53, %v3027_v57  ;;  %9989 = vmatmul.msk.f32.gmra.mxu0 %vm382_vm0, %v13539_v23  ;;  %v3645_v8 = vsel %vm738_vm2, %v3600_v36, %v3601_v21 }
 0x49b   : > { %9972 = vmatmul.msk.f32.gmra.mxu3 %vm382_vm0, %v13527_v16  ;;  %v3094_v39 = vadd.f32 %v3045_v28, %v13038_v34 }
 0x49c   : > { %17833 = vst [vmem:[#allocation23_spill] sm:$0xff] %v13533_v38  ;;  %v3767_v63 = vpop.f32.mrf.mxu2 }
 0x49d   : > { %v3130_v35 = vadd.f32 %v13426_v47, %v3094_v39 }
 0x49e   : > { %v3953_v46 = vpop.f32.mrf.mxu3  ;;  %v3502_v22 = vpop.f32.mrf.mxu1 }
 0x49f   : > { %v3162_v42 = vmax.f32 %v3130_v35, 0.0  ;;  %v2960_v51 = vpop.f32.mrf.mxu0  ;;  %v4055_v39 = vrot.slane %v3953_v46, 1  ;;  %v3602_v4 = vrot.slane %v3502_v22, 7 }
 0x4a0   : > { %v3028_v55 = vrot.slane %v2960_v51, 1 }
 0x4a1   : > { %3218 = vst.msk [vmem:[#allocation2 + $0x138] sm:$0xff] %vm382_vm0, %v3162_v42  ;;  %9875 = vmatmul.msk.f32.gmra.mxu1 %vm382_vm0, %v13545_v44  ;;  %9924 = vmatmul.msk.f32.gmra.mxu2 %vm382_vm0, %v13545_v44  ;;  %v3853_v42 = vadd.f32 %v3767_v63, %v3645_v8  ;;  %v13577_v63 = vld [vmem:[#allocation2 + $0x50] sm:$0xff] }
 0x4a2   : > { %v3044_v34 = vsel %vm1193_vm1, %v3027_v57, %v3028_v55  ;;  %9990 = vmatmul.msk.f32.gmra.mxu0 %vm382_vm0, %v13556_v5 }
 0x4a3   : > { %9973 = vmatmul.msk.f32.gmra.mxu3 %vm382_vm0, %v13545_v44  ;;  %v3095_v6 = vadd.f32 %v3044_v34, %v13053_v25 }
 0x4a4   : > { %v3770_v53 = vpop.f32.mrf.mxu2 }
 0x4a5   : > { %v3131_v15 = vadd.f32 %v13426_v47, %v3095_v6  ;;  %v3644_v6 = vsel %vm738_vm2, %v3601_v21, %v3602_v4 }
 0x4a6   : > { %v3956_v28 = vpop.f32.mrf.mxu3  ;;  %v3505_v35 = vpop.f32.mrf.mxu1 }
 0x4a7   : > { %v4056_v57 = vrot.slane %v3956_v28, 1  ;;  %v3163_v51 = vmax.f32 %v3131_v15, 0.0  ;;  %v2963_v55 = vpop.f32.mrf.mxu0  ;;  %v3854_v28 = vadd.f32 %v3770_v53, %v3644_v6  ;;  %v13597_v53 = vld [vmem:[#allocation2 + $0x58] sm:$0xff]  ;;  %v13603_v6 = vld [vmem:[#allocation2 + $0x148] sm:$0xff] }
 0x4a8   : > { %v13566_v41 = vld [vmem:[#allocation2 + $0x138] sm:$0xff] }
 0x4a9   : > { %v4099_v50 = vsel %vm1193_vm1, %v4055_v39, %v4056_v57  ;;  %3219 = vst.msk [vmem:[#allocation2 + $0x140] sm:$0xff] %vm382_vm0, %v3163_v51  ;;  %9876 = vmatmul.msk.f32.gmra.mxu1 %vm382_vm0, %v13566_v41  ;;  %9925 = vmatmul.msk.f32.gmra.mxu2 %vm382_vm0, %v13566_v41 }
 0x4aa   : > { %v13573_v25 = vadd.f32 %v4099_v50, %v3853_v42  ;;  %9991 = vmatmul.msk.f32.gmra.mxu0 %vm382_vm0, %v13577_v63  ;;  %v3029_v50 = vrot.slane %v2963_v55, 1 }
 0x4ab   : > { %9974 = vmatmul.msk.f32.gmra.mxu3 %vm382_vm0, %v13566_v41 }
 0x4ac   : > { %17834 = vst [vmem:[#allocation5_spill] sm:$0xff] %v13573_v25  ;;  %v3773_v46 = vpop.f32.mrf.mxu2 }
 0x4ae   : > { %v3959_v34 = vpop.f32.mrf.mxu3  ;;  %v3508_v15 = vpop.f32.mrf.mxu1 }
 0x4af   : > { %v4057_v36 = vrot.slane %v3959_v34, 1  ;;  %v2966_v8 = vpop.f32.mrf.mxu0 }
 0x4b0   : > { %v3030_v39 = vrot.slane %v2966_v8, 1  ;;  %v13585_v42 = vld [vmem:[#allocation2 + $0x140] sm:$0xff] }
 0x4b1   : > { %v4098_v22 = vsel %vm1193_vm1, %v4056_v57, %v4057_v36  ;;  %9877 = vmatmul.msk.f32.gmra.mxu1 %vm382_vm0, %v13585_v42  ;;  %9926 = vmatmul.msk.f32.gmra.mxu2 %vm382_vm0, %v13585_v42 }
 0x4b2   : > { %v13591_v51 = vadd.f32 %v4098_v22, %v3854_v28  ;;  %v3043_v21 = vsel %vm1193_vm1, %v3029_v50, %v3030_v39  ;;  %9992 = vmatmul.msk.f32.gmra.mxu0 %vm382_vm0, %v13597_v53  ;;  %v3604_v50 = vrot.slane %v3508_v15, 7  ;;  %v13614_v22 = vld [vmem:[#allocation2 + $0x60] sm:$0xff] }
 0x4b3   : > { %9975 = vmatmul.msk.f32.gmra.mxu3 %vm382_vm0, %v13585_v42  ;;  %v3096_v57 = vadd.f32 %v3043_v21, %v13084_v33 }
 0x4b4   : > { %17835 = vst [vmem:[#allocation9_spill] sm:$0xff] %v13591_v51  ;;  %v3775_v55 = vpop.f32.mrf.mxu2 }
 0x4b5   : > { %v3132_v4 = vadd.f32 %v13426_v47, %v3096_v57  ;;  %v3603_v57 = vrot.slane %v3505_v35, 7 }
 0x4b6   : > { %v3962_v46 = vpop.f32.mrf.mxu3  ;;  %v3511_v34 = vpop.f32.mrf.mxu1 }
 0x4b7   : > { %v3164_v36 = vmax.f32 %v3132_v4, 0.0  ;;  %v2969_v28 = vpop.f32.mrf.mxu0  ;;  %v3643_v15 = vsel %vm738_vm2, %v3603_v57, %v3604_v50  ;;  %v4058_v51 = vrot.slane %v3962_v46, 1  ;;  %v3605_v35 = vrot.slane %v3511_v34, 7 }
 0x4b8   : > { %v3031_v8 = vrot.slane %v2969_v28, 1  ;;  %v3855_v25 = vadd.f32 %v3775_v55, %v3643_v15  ;;  %v13635_v55 = vld [vmem:[#allocation2 + $0x68] sm:$0xff] }
 0x4b9   : > { %3220 = vst.msk [vmem:[#allocation2 + $0x150] sm:$0xff] %vm382_vm0, %v3164_v36  ;;  %9878 = vmatmul.msk.f32.gmra.mxu1 %vm382_vm0, %v13603_v6  ;;  %9927 = vmatmul.msk.f32.gmra.mxu2 %vm382_vm0, %v13603_v6 }
 0x4ba   : > { %v3042_v33 = vsel %vm1193_vm1, %v3030_v39, %v3031_v8  ;;  %9993 = vmatmul.msk.f32.gmra.mxu0 %vm382_vm0, %v13614_v22 }
 0x4bb   : > { %9976 = vmatmul.msk.f32.gmra.mxu3 %vm382_vm0, %v13603_v6  ;;  %v3097_v21 = vadd.f32 %v3042_v33, %v13099_v56 }
 0x4bc   : > { %v3778_v4 = vpop.f32.mrf.mxu2 }
 0x4bd   : > { %v3133_v36 = vadd.f32 %v13426_v47, %v3097_v21 }
 0x4be   : > { %v3965_v28 = vpop.f32.mrf.mxu3  ;;  %v3514_v8 = vpop.f32.mrf.mxu1 }
 0x4bf   : > { %v4059_v39 = vrot.slane %v3965_v28, 1  ;;  %v3165_v38 = vmax.f32 %v3133_v36, 0.0  ;;  %v2972_v40 = vpop.f32.mrf.mxu0 }
 0x4c0   : > { %v13624_v45 = vld [vmem:[#allocation2 + $0x150] sm:$0xff] }
 0x4c1   : > { %v4097_v0 = vsel %vm1193_vm1, %v4058_v51, %v4059_v39  ;;  %3221 = vst.msk [vmem:[#allocation2 + $0x158] sm:$0xff] %vm382_vm0, %v3165_v38  ;;  %9879 = vmatmul.msk.f32.gmra.mxu1 %vm382_vm0, %v13624_v45  ;;  %9928 = vmatmul.msk.f32.gmra.mxu2 %vm382_vm0, %v13624_v45  ;;  %v3642_v38 = vsel %vm738_vm2, %v3604_v50, %v3605_v35 }
 0x4c2   : > { %v13631_v56 = vadd.f32 %v4097_v0, %v3855_v25  ;;  %9994 = vmatmul.msk.f32.gmra.mxu0 %vm382_vm0, %v13635_v55  ;;  %v3856_v57 = vadd.f32 %v3778_v4, %v3642_v38  ;;  %v3032_v0 = vrot.slane %v2972_v40, 1  ;;  %v13655_v40 = vld [vmem:[#allocation2 + $0x70] sm:$0xff]  ;;  %v13661_v38 = vld [vmem:[#allocation2 + $0x160] sm:$0xff] }
 0x4c3   : > { %9977 = vmatmul.msk.f32.gmra.mxu3 %vm382_vm0, %v13624_v45  ;;  %17839 = vst [vmem:[#allocation24_spill] sm:$0xff] %v13661_v38 }
 0x4c4   : > { %17836 = vst [vmem:[#allocation11_spill] sm:$0xff] %v13631_v56  ;;  %v3781_v51 = vpop.f32.mrf.mxu2 }
 0x4c6   : > { %v3968_v46 = vpop.f32.mrf.mxu3  ;;  %v3517_v21 = vpop.f32.mrf.mxu1 }
 0x4c7   : > { %v4060_v33 = vrot.slane %v3968_v46, 1  ;;  %v2975_v36 = vpop.f32.mrf.mxu0 }
 0x4c8   : > { %v3033_v34 = vrot.slane %v2975_v36, 1  ;;  %v13643_v28 = vld [vmem:[#allocation2 + $0x158] sm:$0xff] }
 0x4c9   : > { %v4096_v25 = vsel %vm1193_vm1, %v4059_v39, %v4060_v33  ;;  %17837 = vst [vmem:[#allocation13_spill] sm:$0xff] %v13643_v28  ;;  %9880 = vmatmul.msk.f32.gmra.mxu1 %vm382_vm0, %v13643_v28  ;;  %9929 = vmatmul.msk.f32.gmra.mxu2 %vm382_vm0, %v13643_v28 }
 0x4ca   : > { %v13649_v15 = vadd.f32 %v4096_v25, %v3856_v57  ;;  %v3041_v50 = vsel %vm1193_vm1, %v3032_v0, %v3033_v34  ;;  %9995 = vmatmul.msk.f32.gmra.mxu0 %vm382_vm0, %v13655_v40  ;;  %v13668_v0 = vld [vmem:[#allocation2 + $0x78] sm:$0xff]  ;;  %v3607_v25 = vrot.slane %v3517_v21, 7 }
 0x4cb   : > { %9978 = vmatmul.msk.f32.gmra.mxu3 %vm382_vm0, %v13643_v28  ;;  %v3098_v4 = vadd.f32 %v3041_v50, %v13128_v18  ;;  %v10228_v18 = vld [vmem:[%s17662_s3 + $0x40] sm:$0xff] }
 0x4cc   : > { %17838 = vst [vmem:[#allocation14_spill] sm:$0xff] %v13649_v15  ;;  %v3783_v39 = vpop.f32.mrf.mxu2  ;;  %5731 = vmatpush.msra.mxu1 %v10228_v18 }
 0x4cd   : > { %v3134_v35 = vadd.f32 %v13426_v47, %v3098_v4 }
 0x4ce   : > { %v3971_v51 = vpop.f32.mrf.mxu3  ;;  %v3520_v46 = vpop.f32.mrf.mxu1 }
 0x4cf   : > { %v3166_v33 = vmax.f32 %v3134_v35, 0.0  ;;  %v2978_v57 = vpop.f32.mrf.mxu0  ;;  %v3606_v35 = vrot.slane %v3514_v8, 7  ;;  %v4061_v56 = vrot.slane %v3971_v51, 1 }
 0x4d0   : > { %v3034_v36 = vrot.slane %v2978_v57, 1 }
 0x4d1   : > { %3222 = vst.msk [vmem:[#allocation2 + $0x168] sm:$0xff] %vm382_vm0, %v3166_v33  ;;  %9881 = vmatmul.msk.f32.gmra.mxu1 %vm382_vm0, %v13661_v38  ;;  %9930 = vmatmul.msk.f32.gmra.mxu2 %vm382_vm0, %v13661_v38  ;;  %v3641_v21 = vsel %vm738_vm2, %v3606_v35, %v3607_v25 }
 0x4d2   : > { %v3040_v50 = vsel %vm1193_vm1, %v3033_v34, %v3034_v36  ;;  %9996 = vmatmul.msk.f32.gmra.mxu0 %vm382_vm0, %v13668_v0  ;;  %v3857_v36 = vadd.f32 %v3783_v39, %v3641_v21 }
 0x4d3   : > { %9979 = vmatmul.msk.f32.gmra.mxu3 %vm382_vm0, %v13661_v38  ;;  %v3099_v4 = vadd.f32 %v3040_v50, %v13143_v31  ;;  %v13692_v31 = vld [vmem:[#allocation2 + $0x80] sm:$0xff] }
 0x4d4   : > { %v3786_v33 = vpop.f32.mrf.mxu2 }
 0x4d5   : > { %v3135_v57 = vadd.f32 %v13426_v47, %v3099_v4 }
 0x4d6   : > { %v3974_v15 = vpop.f32.mrf.mxu3  ;;  %v3523_v34 = vpop.f32.mrf.mxu1 }
 0x4d7   : > { %v4062_v7 = vrot.slane %v3974_v15, 1  ;;  %v3167_v17 = vmax.f32 %v3135_v57, 0.0  ;;  %v2981_v24 = vpop.f32.mrf.mxu0  ;;  %v3608_v15 = vrot.slane %v3520_v46, 7  ;;  %v13702_v57 = vld [vmem:[#allocation2 + $0x88] sm:$0xff] }
 0x4d8   : > { %v13685_v38 = vld [vmem:[#allocation2 + $0x168] sm:$0xff]  ;;  %v3035_v51 = vrot.slane %v2981_v24, 1 }
 0x4d9   : > { %v4095_v11 = vsel %vm1193_vm1, %v4061_v56, %v4062_v7  ;;  %17840 = vst [vmem:[#allocation25_spill] sm:$0xff] %v13685_v38  ;;  %9882 = vmatmul.msk.f32.gmra.mxu1 %vm382_vm0, %v13685_v38  ;;  %9931 = vmatmul.msk.f32.gmra.mxu2 %vm382_vm0, %v13685_v38 }
 0x4da   : > { %3223 = vst.msk [vmem:[#allocation2 + $0x170] sm:$0xff] %vm382_vm0, %v3167_v17  ;;  %v13694_v8 = vadd.f32 %v4095_v11, %v3857_v36  ;;  %9997 = vmatmul.msk.f32.gmra.mxu0 %vm382_vm0, %v13692_v31  ;;  %v3640_v17 = vsel %vm738_vm2, %v3607_v25, %v3608_v15 }
 0x4db   : > { %9980 = vmatmul.msk.f32.gmra.mxu3 %vm382_vm0, %v13685_v38  ;;  %v3858_v4 = vadd.f32 %v3786_v33, %v3640_v17 }
 0x4dc   : > { %17841 = vst [vmem:[#allocation7_spill] sm:$0xff] %v13694_v8  ;;  %v3789_v56 = vpop.f32.mrf.mxu2 }
 0x4de   : > { %v3977_v39 = vpop.f32.mrf.mxu3  ;;  %v3526_v50 = vpop.f32.mrf.mxu1 }
 0x4df   : > { %v4063_v18 = vrot.slane %v3977_v39, 1  ;;  %v2984_v35 = vpop.f32.mrf.mxu0  ;;  %v13722_v39 = vld [vmem:[#allocation2 + $0x178] sm:$0xff] }
 0x4e0   : > { %v3036_v46 = vrot.slane %v2984_v35, 1  ;;  %17844 = vst [vmem:[#allocation15_spill] sm:$0xff] %v13722_v39 }
 0x4e1   : > { %v4094_v11 = vsel %vm1193_vm1, %v4062_v7, %v4063_v18  ;;  %v13706_v21 = vld [vmem:[#allocation2 + $0x170] sm:$0xff] }
 0x4e2   : > { %17842 = vst [vmem:[#allocation10_spill] sm:$0xff] %v13706_v21  ;;  %9883 = vmatmul.msk.f32.gmra.mxu1 %vm382_vm0, %v13706_v21  ;;  %9932 = vmatmul.msk.f32.gmra.mxu2 %vm382_vm0, %v13706_v21  ;;  %v13712_v25 = vadd.f32 %v4094_v11, %v3858_v4  ;;  %v3039_v24 = vsel %vm1193_vm1, %v3035_v51, %v3036_v46  ;;  %v13729_v51 = vld [vmem:[#allocation2 + $0x90] sm:$0xff] }
 0x4e3   : > { %9981 = vmatmul.msk.f32.gmra.mxu3 %vm382_vm0, %v13706_v21  ;;  %9998 = vmatmul.msk.f32.gmra.mxu0 %vm382_vm0, %v13702_v57  ;;  %v3100_v7 = vadd.f32 %v3039_v24, %v13177_v58  ;;  %v3610_v58 = vrot.slane %v3526_v50, 7  ;;  %v3609_v24 = vrot.slane %v3523_v34, 7 }
 0x4e4   : > { %17843 = vst [vmem:[#allocation12_spill] sm:$0xff] %v13712_v25  ;;  %v3791_v33 = vpop.f32.mrf.mxu2 }
 0x4e5   : > { %v3136_v36 = vadd.f32 %v13426_v47, %v3100_v7 }
 0x4e6   : > { %v3980_v15 = vpop.f32.mrf.mxu3  ;;  %v3529_v56 = vpop.f32.mrf.mxu1 }
 0x4e7   : > { %v3168_v17 = vmax.f32 %v3136_v36, 0.0  ;;  %v2987_v18 = vpop.f32.mrf.mxu0  ;;  %v4064_v50 = vrot.slane %v3980_v15, 1 }
 0x4e8   : > { %v3037_v4 = vrot.slane %v2987_v18, 1  ;;  %v3639_v18 = vsel %vm738_vm2, %v3609_v24, %v3610_v58 }
 0x4e9   : > { %3224 = vst.msk [vmem:[#allocation2 + $0x180] sm:$0xff] %vm382_vm0, %v3168_v17 }
 0x4ea   : > { %9884 = vmatmul.msk.f32.gmra.mxu1 %vm382_vm0, %v13722_v39  ;;  %9933 = vmatmul.msk.f32.gmra.mxu2 %vm382_vm0, %v13722_v39  ;;  %v3038_v35 = vsel %vm1193_vm1, %v3036_v46, %v3037_v4  ;;  %v3859_v46 = vadd.f32 %v3791_v33, %v3639_v18  ;;  %v3611_v33 = vrot.slane %v3529_v56, 7  ;;  %v13764_v18 = vld [vmem:[#allocation2 + $0xa0] sm:$0xff] }
 0x4eb   : > { %9982 = vmatmul.msk.f32.gmra.mxu3 %vm382_vm0, %v13722_v39  ;;  %9999 = vmatmul.msk.f32.gmra.mxu0 %vm382_vm0, %v13729_v51  ;;  %v3101_v11 = vadd.f32 %v3038_v35, %v13194_v20  ;;  %v13750_v20 = vld [vmem:[#allocation2 + $0x98] sm:$0xff] }
 0x4ec   : > { %v3794_v7 = vpop.f32.mrf.mxu2 }
 0x4ed   : > { %v3137_v36 = vadd.f32 %v13426_v47, %v3101_v11  ;;  %v13752_v47 = vld [vmem:[#allocation2 + $0x30] sm:$0xff]  ;;  %v3638_v11 = vsel %vm738_vm2, %v3610_v58, %v3611_v33 }
 0x4ee   : > { %v3983_v17 = vpop.f32.mrf.mxu3  ;;  %v3532_v8 = vpop.f32.mrf.mxu1  ;;  %17845 = vst [vmem:[#allocation26_spill] sm:$0xff] %v13752_v47 }
 0x4ef   : > { %v4065_v25 = vrot.slane %v3983_v17, 1  ;;  %v3169_v4 = vmax.f32 %v3137_v36, 0.0  ;;  %v13741_v21 = vpop.f32.mrf.mxu0  ;;  %v3860_v36 = vadd.f32 %v3794_v7, %v3638_v11 }
 0x4f1   : > { %v4093_v39 = vsel %vm1193_vm1, %v4064_v50, %v4065_v25  ;;  %3225 = vst.msk [vmem:[#allocation2 + $0x188] sm:$0xff] %vm382_vm0, %v3169_v4  ;;  %v13782_v4 = vld [vmem:[#allocation2 + $0x40] sm:$0xff] }
 0x4f2   : > { %10033 = vmatmul.msk.f32.vlgmr.msrb.gmra.mxu1 %vm382_vm0, %v13440_v48  ;;  %10082 = vmatmul.msk.f32.vlgmr.msrb.gmra.mxu2 %vm382_vm0, %v13440_v48  ;;  %v13754_v34 = vadd.f32 %v4093_v39, %v3859_v46  ;;  %v13772_v39 = vld [vmem:[#allocation2 + $0x38] sm:$0xff]  ;;  %17849 = vst [vmem:[#allocation30_spill] sm:$0xff] %v13782_v4 }
 0x4f3   : > { %10000 = vmatmul.msk.f32.gmra.mxu0 %vm382_vm0, %v13750_v20  ;;  %10131 = vmatmul.msk.f32.vlgmr.msra.gmra.mxu3 %vm382_vm0, %v13752_v47  ;;  %17847 = vst [vmem:[#allocation28_spill] sm:$0xff] %v13772_v39 }
 0x4f4   : > { %17846 = vst [vmem:[#allocation27_spill] sm:$0xff] %v13754_v34  ;;  %v3797_v15 = vpop.f32.mrf.mxu2 }
 0x4f5   : > { %v3612_v15 = vrot.slane %v3532_v8, 7  ;;  %v13804_v8 = vld [vmem:[#allocation2 + $0xb0] sm:$0xff] }
 0x4f6   : > { %v3986_v35 = vpop.f32.mrf.mxu3  ;;  %v3535_v48 = vpop.f32.mrf.mxu1 }
 0x4f7   : > { %v4066_v24 = vrot.slane %v3986_v35, 1  ;;  %v13762_v17 = vpop.f32.mrf.mxu0  ;;  %v3613_v33 = vrot.slane %v3535_v48, 7 }
 0x4f9   : > { %v4092_v56 = vsel %vm1193_vm1, %v4065_v25, %v4066_v24  ;;  %v3637_v24 = vsel %vm738_vm2, %v3612_v15, %v3613_v33 }
 0x4fa   : > { %10034 = vmatmul.msk.f32.gmra.mxu1 %vm382_vm0, %v13461_v1  ;;  %10083 = vmatmul.msk.f32.gmra.mxu2 %vm382_vm0, %v13461_v1  ;;  %v13774_v50 = vadd.f32 %v4092_v56, %v3860_v36  ;;  %v13788_v1 = vld [vmem:[#allocation2 + $0xa8] sm:$0xff] }
 0x4fb   : > { %10001 = vmatmul.msk.f32.gmra.mxu0 %vm382_vm0, %v13764_v18  ;;  %10132 = vmatmul.msk.f32.gmra.mxu3 %vm382_vm0, %v13772_v39 }
 0x4fc   : > { %17848 = vst [vmem:[#allocation29_spill] sm:$0xff] %v13774_v50  ;;  %v3799_v58 = vpop.f32.mrf.mxu2 }
 0x4fd   : > { %v3861_v34 = vadd.f32 %v3799_v58, %v3637_v24 }
 0x4fe   : > { %v3989_v7 = vpop.f32.mrf.mxu3  ;;  %v3538_v46 = vpop.f32.mrf.mxu1 }
 0x4ff   : > { %v13780_v25 = vpop.f32.mrf.mxu0  ;;  %v4067_v36 = vrot.slane %v3989_v7, 1  ;;  %v3614_v7 = vrot.slane %v3538_v46, 7  ;;  %v13824_v46 = vld [vmem:[#allocation2 + $0x50] sm:$0xff] }
 0x500   : > { %17852 = vst [vmem:[#allocation33_spill] sm:$0xff] %v13824_v46 }
 0x501   : > { %v3636_v24 = vsel %vm738_vm2, %v3613_v33, %v3614_v7 }
 0x502   : > { %10035 = vmatmul.msk.f32.gmra.mxu1 %vm382_vm0, %v13481_v54  ;;  %10084 = vmatmul.msk.f32.gmra.mxu2 %vm382_vm0, %v13481_v54 }
 0x503   : > { %10002 = vmatmul.msk.f32.gmra.mxu0 %vm382_vm0, %v13788_v1  ;;  %10133 = vmatmul.msk.f32.gmra.mxu3 %vm382_vm0, %v13782_v4  ;;  %v13806_v4 = vld [vmem:[#allocation2 + $0x48] sm:$0xff] }
 0x504   : > { %v3802_v35 = vpop.f32.mrf.mxu2  ;;  %17850 = vst [vmem:[#allocation31_spill] sm:$0xff] %v13806_v4 }
 0x505   : > { %v3862_v39 = vadd.f32 %v3802_v35, %v3636_v24 }
 0x506   : > { %v3992_v11 = vpop.f32.mrf.mxu3  ;;  %v3541_v50 = vpop.f32.mrf.mxu1 }
 0x507   : > { %v4068_v56 = vrot.slane %v3992_v11, 1  ;;  %v13796_v54 = vpop.f32.mrf.mxu0  ;;  %v3615_v24 = vrot.slane %v3541_v50, 7  ;;  %v13858_v50 = vld [vmem:[#allocation2 + $0x60] sm:$0xff] }
 0x508   : > { %17855 = vst [vmem:[#allocation36_spill] sm:$0xff] %v13858_v50 }
 0x509   : > { %v4091_v48 = vsel %vm1193_vm1, %v4067_v36, %v4068_v56 }
 0x50a   : > { %10036 = vmatmul.msk.f32.gmra.mxu1 %vm382_vm0, %v13498_v19  ;;  %10085 = vmatmul.msk.f32.gmra.mxu2 %vm382_vm0, %v13498_v19  ;;  %v13808_v15 = vadd.f32 %v4091_v48, %v3861_v34 }
 0x50b   : > { %10003 = vmatmul.msk.f32.gmra.mxu0 %vm382_vm0, %v13804_v8  ;;  %10134 = vmatmul.msk.f32.gmra.mxu3 %vm382_vm0, %v13806_v4 }
 0x50c   : > { %17851 = vst [vmem:[#allocation32_spill] sm:$0xff] %v13808_v15  ;;  %v3805_v58 = vpop.f32.mrf.mxu2 }
 0x50d   : > { %v13828_v58 = vld [vmem:[#allocation2 + $0xb8] sm:$0xff] }
 0x50e   : > { %v3995_v11 = vpop.f32.mrf.mxu3  ;;  %v3544_v19 = vpop.f32.mrf.mxu1 }
 0x50f   : > { %v4069_v36 = vrot.slane %v3995_v11, 1  ;;  %v13816_v47 = vpop.f32.mrf.mxu0  ;;  %v13836_v11 = vld [vmem:[#allocation2 + $0x58] sm:$0xff] }
 0x510   : > { %17854 = vst [vmem:[#allocation35_spill] sm:$0xff] %v13836_v11 }
 0x511   : > { %v4090_v34 = vsel %vm1193_vm1, %v4068_v56, %v4069_v36 }
 0x512   : > { %10037 = vmatmul.msk.f32.gmra.mxu1 %vm382_vm0, %v13519_v61  ;;  %10086 = vmatmul.msk.f32.gmra.mxu2 %vm382_vm0, %v13519_v61  ;;  %v13826_v48 = vadd.f32 %v4090_v34, %v3862_v39  ;;  %v3616_v61 = vrot.slane %v3544_v19, 7  ;;  %v13842_v39 = vld [vmem:[#allocation2 + $0xc0] sm:$0xff] }
 0x513   : > { %10004 = vmatmul.msk.f32.gmra.mxu0 %vm382_vm0, %v13828_v58  ;;  %10135 = vmatmul.msk.f32.gmra.mxu3 %vm382_vm0, %v13824_v46 }
 0x514   : > { %17853 = vst [vmem:[#allocation34_spill] sm:$0xff] %v13826_v48  ;;  %v3807_v33 = vpop.f32.mrf.mxu2  ;;  %v3635_v48 = vsel %vm738_vm2, %v3615_v24, %v3616_v61 }
 0x515   : > { %v3863_v38 = vadd.f32 %v3807_v33, %v3635_v48 }
 0x516   : > { %v3998_v35 = vpop.f32.mrf.mxu3  ;;  %v3547_v56 = vpop.f32.mrf.mxu1 }
 0x517   : > { %v13834_v7 = vpop.f32.mrf.mxu0  ;;  %v4070_v15 = vrot.slane %v3998_v35, 1  ;;  %v3617_v24 = vrot.slane %v3547_v56, 7  ;;  %v13862_v35 = vld [vmem:[#allocation2 + $0xc8] sm:$0xff] }
 0x518   : > { %v13878_v56 = vld [vmem:[#allocation2 + $0x68] sm:$0xff] }
 0x519   : > { %v3634_v33 = vsel %vm738_vm2, %v3616_v61, %v3617_v24  ;;  %17857 = vst [vmem:[#allocation38_spill] sm:$0xff] %v13878_v56 }
 0x51a   : > { %10038 = vmatmul.msk.f32.gmra.mxu1 %vm382_vm0, %v13539_v23  ;;  %10087 = vmatmul.msk.f32.gmra.mxu2 %vm382_vm0, %v13539_v23 }
 0x51b   : > { %10005 = vmatmul.msk.f32.gmra.mxu0 %vm382_vm0, %v13842_v39  ;;  %10136 = vmatmul.msk.f32.gmra.mxu3 %vm382_vm0, %v13836_v11 }
 0x51c   : > { %v3810_v36 = vpop.f32.mrf.mxu2 }
 0x51d   : > { %v3864_v10 = vadd.f32 %v3810_v36, %v3634_v33 }
 0x51e   : > { %v4001_v34 = vpop.f32.mrf.mxu3  ;;  %v3550_v4 = vpop.f32.mrf.mxu1 }
 0x51f   : > { %v4071_v46 = vrot.slane %v4001_v34, 1  ;;  %v13850_v23 = vpop.f32.mrf.mxu0 }
 0x521   : > { %v4089_v19 = vsel %vm1193_vm1, %v4070_v15, %v4071_v46 }
 0x522   : > { %10039 = vmatmul.msk.f32.gmra.mxu1 %vm382_vm0, %v13556_v5  ;;  %10088 = vmatmul.msk.f32.gmra.mxu2 %vm382_vm0, %v13556_v5  ;;  %v13860_v11 = vadd.f32 %v4089_v19, %v3863_v38 }
 0x523   : > { %10006 = vmatmul.msk.f32.gmra.mxu0 %vm382_vm0, %v13862_v35  ;;  %10137 = vmatmul.msk.f32.gmra.mxu3 %vm382_vm0, %v13858_v50 }
 0x524   : > { %17856 = vst [vmem:[#allocation37_spill] sm:$0xff] %v13860_v11  ;;  %v3813_v15 = vpop.f32.mrf.mxu2 }
 0x525   : > { %v13882_v15 = vld [vmem:[#allocation2 + $0xd0] sm:$0xff] }
 0x526   : > { %v4004_v48 = vpop.f32.mrf.mxu3  ;;  %v3553_v5 = vpop.f32.mrf.mxu1 }
 0x527   : > { %v4072_v34 = vrot.slane %v4004_v48, 1  ;;  %v13870_v28 = vpop.f32.mrf.mxu0  ;;  %v5076_v48 = vld [vmem:[#allocation2 + $0x70] sm:$0xff] }
 0x529   : > { %v4088_v38 = vsel %vm1193_vm1, %v4071_v46, %v4072_v34 }
 0x52a   : > { %10040 = vmatmul.msk.f32.gmra.mxu1 %vm382_vm0, %v13577_v63  ;;  %10089 = vmatmul.msk.f32.gmra.mxu2 %vm382_vm0, %v13577_v63  ;;  %v13880_v19 = vadd.f32 %v4088_v38, %v3864_v10  ;;  %v3619_v10 = vrot.slane %v3553_v5, 7  ;;  %v3618_v63 = vrot.slane %v3550_v4, 7 }
 0x52b   : > { %10007 = vmatmul.msk.f32.gmra.mxu0 %vm382_vm0, %v13882_v15  ;;  %10138 = vmatmul.msk.f32.gmra.mxu3 %vm382_vm0, %v13878_v56 }
 0x52c   : > { %17858 = vst [vmem:[#allocation39_spill] sm:$0xff] %v13880_v19  ;;  %v3815_v61 = vpop.f32.mrf.mxu2  ;;  %v3633_v38 = vsel %vm738_vm2, %v3618_v63, %v3619_v10 }
 0x52d   : > { %v3865_v50 = vadd.f32 %v3815_v61, %v3633_v38 }
 0x52e   : > { %v4007_v46 = vpop.f32.mrf.mxu3  ;;  %v3556_v36 = vpop.f32.mrf.mxu1 }
 0x52f   : > { %v13888_v24 = vpop.f32.mrf.mxu0  ;;  %v4073_v19 = vrot.slane %v4007_v46, 1  ;;  %v3620_v4 = vrot.slane %v3556_v36, 7 }
 0x530   : > { %17859 = vst [vmem:[#allocation40_spill] sm:$0xff] %v13888_v24 }
 0x532   : > { %10041 = vmatmul.msk.f32.gmra.mxu1 %vm382_vm0, %v13597_v53  ;;  %10090 = vmatmul.msk.f32.gmra.mxu2 %vm382_vm0, %v13597_v53 }
 0x533   : > { %10008 = vmatmul.msk.f32.gmra.mxu0 %vm382_vm0, %v13336_v2  ;;  %10139 = vmatmul.msk.f32.gmra.mxu3 %vm382_vm0, %v5076_v48 }
 0x534   : > { %v3818_v33 = vpop.f32.mrf.mxu2 }
 0x536   : > { %v4010_v34 = vpop.f32.mrf.mxu3  ;;  %v3559_v56 = vpop.f32.mrf.mxu1 }
 0x537   : > { %v4074_v11 = vrot.slane %v4010_v34, 1  ;;  %v13899_v24 = vpop.f32.mrf.mxu0 }
 0x539   : > { %v4087_v53 = vsel %vm1193_vm1, %v4073_v19, %v4074_v11  ;;  %v3632_v19 = vsel %vm738_vm2, %v3619_v10, %v3620_v4 }
 0x53a   : > { %10042 = vmatmul.msk.f32.gmra.mxu1 %vm382_vm0, %v13614_v22  ;;  %10091 = vmatmul.msk.f32.gmra.mxu2 %vm382_vm0, %v13614_v22  ;;  %v13907_v2 = vadd.f32 %v4087_v53, %v3865_v50  ;;  %v3866_v63 = vadd.f32 %v3818_v33, %v3632_v19 }
 0x53b   : > { %10009 = vmatmul.msk.f32.gmra.mxu0 %vm382_vm0, %v13353_v52  ;;  %10140 = vmatmul.msk.f32.gmra.mxu3 %vm382_vm0, %v13668_v0 }
 0x53c   : > { %17860 = vst [vmem:[#allocation41_spill] sm:$0xff] %v13907_v2  ;;  %v3821_v5 = vpop.f32.mrf.mxu2 }
 0x53e   : > { %v4013_v61 = vpop.f32.mrf.mxu3  ;;  %v3562_v48 = vpop.f32.mrf.mxu1 }
 0x53f   : > { %v4075_v46 = vrot.slane %v4013_v61, 1  ;;  %v13915_v34 = vpop.f32.mrf.mxu0 }
 0x541   : > { %v4086_v22 = vsel %vm1193_vm1, %v4074_v11, %v4075_v46 }
 0x542   : > { %10043 = vmatmul.msk.f32.gmra.mxu1 %vm382_vm0, %v13635_v55  ;;  %10092 = vmatmul.msk.f32.gmra.mxu2 %vm382_vm0, %v13635_v55  ;;  %v13923_v52 = vadd.f32 %v4086_v22, %v3866_v63  ;;  %v3622_v55 = vrot.slane %v3562_v48, 7 }
 0x543   : > { %10010 = vmatmul.msk.f32.gmra.mxu0 %vm382_vm0, %v13369_v14  ;;  %10141 = vmatmul.msk.f32.gmra.mxu3 %vm382_vm0, %v13692_v31  ;;  %v3621_v14 = vrot.slane %v3559_v56, 7 }
 0x544   : > { %17861 = vst [vmem:[#allocation42_spill] sm:$0xff] %v13923_v52  ;;  %v3823_v50 = vpop.f32.mrf.mxu2 }
 0x545   : > { %v3631_v53 = vsel %vm738_vm2, %v3621_v14, %v3622_v55 }
 0x546   : > { %v4016_v36 = vpop.f32.mrf.mxu3  ;;  %v3565_v10 = vpop.f32.mrf.mxu1  ;;  %v3867_v19 = vadd.f32 %v3823_v50, %v3631_v53 }
 0x547   : > { %v13929_v33 = vpop.f32.mrf.mxu0  ;;  %v4076_v4 = vrot.slane %v4016_v36, 1  ;;  %v3623_v48 = vrot.slane %v3565_v10, 7 }
 0x549   : > { %v3630_v50 = vsel %vm738_vm2, %v3622_v55, %v3623_v48 }
 0x54a   : > { %10044 = vmatmul.msk.f32.gmra.mxu1 %vm382_vm0, %v13655_v40  ;;  %10093 = vmatmul.msk.f32.gmra.mxu2 %vm382_vm0, %v13655_v40 }
 0x54b   : > { %10011 = vmatmul.msk.f32.gmra.mxu0 %vm382_vm0, %v13391_v49  ;;  %10142 = vmatmul.msk.f32.gmra.mxu3 %vm382_vm0, %v13702_v57  ;;  %v6161_v49 = vld [vmem:[%s17664_s5] sm:$0xff] }
 0x54c   : > { %v3826_v11 = vpop.f32.mrf.mxu2  ;;  %6321 = vmatpush.msra.mxu2 %v6161_v49 }
 0x54e   : > { %v4019_v38 = vpop.f32.mrf.mxu3  ;;  %v3568_v61 = vpop.f32.mrf.mxu1 }
 0x54f   : > { %v4077_v5 = vrot.slane %v4019_v38, 1  ;;  %v13941_v46 = vpop.f32.mrf.mxu0  ;;  %v3868_v38 = vadd.f32 %v3826_v11, %v3630_v50 }
 0x551   : > { %v4085_v40 = vsel %vm1193_vm1, %v4076_v4, %v4077_v5 }
 0x552   : > { %10045 = vmatmul.msk.f32.gmra.mxu1 %vm382_vm0, %v13668_v0  ;;  %10094 = vmatmul.msk.f32.gmra.mxu2 %vm382_vm0, %v13668_v0  ;;  %v13952_v56 = vadd.f32 %v4085_v40, %v3867_v19 }
 0x553   : > { %10012 = vmatmul.msk.f32.gmra.mxu0 %vm382_vm0, %v13408_v32  ;;  %10143 = vmatmul.msk.f32.gmra.mxu3 %vm382_vm0, %v13729_v51 }
 0x554   : > { %17862 = vst [vmem:[#allocation43_spill] sm:$0xff] %v13952_v56  ;;  %v3829_v63 = vpop.f32.mrf.mxu2 }
 0x556   : > { %v4022_v22 = vpop.f32.mrf.mxu3  ;;  %v3571_v14 = vpop.f32.mrf.mxu1 }
 0x557   : > { %v4078_v36 = vrot.slane %v4022_v22, 1  ;;  %v13960_v53 = vpop.f32.mrf.mxu0 }
 0x559   : > { %v4084_v0 = vsel %vm1193_vm1, %v4077_v5, %v4078_v36 }
 0x55a   : > { %10046 = vmatmul.msk.f32.gmra.mxu1 %vm382_vm0, %v13692_v31  ;;  %10095 = vmatmul.msk.f32.gmra.mxu2 %vm382_vm0, %v13692_v31  ;;  %v13968_v32 = vadd.f32 %v4084_v0, %v3868_v38  ;;  %v3625_v31 = vrot.slane %v3571_v14, 7 }
 0x55b   : > { %10013 = vmatmul.msk.f32.gmra.mxu0 %vm382_vm0, %v13429_v12  ;;  %10144 = vmatmul.msk.f32.gmra.mxu3 %vm382_vm0, %v13750_v20  ;;  %v3624_v12 = vrot.slane %v3568_v61, 7 }
 0x55c   : > { %17863 = vst [vmem:[#allocation44_spill] sm:$0xff] %v13968_v32  ;;  %v3831_v10 = vpop.f32.mrf.mxu2 }
 0x55d   : > { %v3629_v40 = vsel %vm738_vm2, %v3624_v12, %v3625_v31 }
 0x55e   : > { %v4025_v55 = vpop.f32.mrf.mxu3  ;;  %v3869_v22 = vadd.f32 %v3831_v10, %v3629_v40  ;;  %v14024_v40 = vld [vmem:[#allocation2 + $0xb8] sm:$0xff] }
 0x55f   : > { %v3574_v11 = vpop.f32.mrf.mxu1  ;;  %v4079_v49 = vrot.slane %v4025_v55, 1 }
 0x560   : > { %v13974_v4 = vpop.f32.mrf.mxu0  ;;  %v3626_v61 = vrot.slane %v3574_v11, 7 }
 0x562   : > { %10047 = vmatmul.msk.f32.gmra.mxu1 %vm382_vm0, %v13702_v57  ;;  %10096 = vmatmul.msk.f32.gmra.mxu2 %vm382_vm0, %v13702_v57  ;;  %v3628_v38 = vsel %vm738_vm2, %v3625_v31, %v3626_v61 }
 0x563   : > { %10014 = vmatmul.msk.f32.gmra.mxu0 %vm382_vm0, %v13450_v26  ;;  %10145 = vmatmul.msk.f32.gmra.mxu3 %vm382_vm0, %v13764_v18 }
 0x565   : > { %v3834_v5 = vpop.f32.mrf.mxu2 }
 0x566   : > { %v4028_v19 = vpop.f32.mrf.mxu3  ;;  %v3870_v55 = vadd.f32 %v3834_v5, %v3628_v38 }
 0x567   : > { %v4080_v48 = vrot.slane %v4028_v19, 1  ;;  %v13986_v63 = vpop.f32.mrf.mxu1 }
 0x568   : > { %v13988_v50 = vpop.f32.mrf.mxu0 }
 0x569   : > { %v4083_v57 = vsel %vm1193_vm1, %v4079_v49, %v4080_v48  ;;  %v17701_v49 = vrot.slane %v13199_v29, 7 }
 0x56a   : > { %10048 = vmatmul.msk.f32.gmra.mxu1 %vm382_vm0, %v13729_v51  ;;  %10097 = vmatmul.msk.f32.gmra.mxu2 %vm382_vm0, %v13729_v51  ;;  %v13996_v26 = vadd.f32 %v4083_v57, %v3869_v22 }
 0x56b   : > { %10015 = vmatmul.msk.f32.gmra.mxu0 %vm382_vm0, %v13469_v9  ;;  %10146 = vmatmul.msk.f32.gmra.mxu3 %vm382_vm0, %v13788_v1 }
 0x56c   : > { %17864 = vst [vmem:[#allocation45_spill] sm:$0xff] %v13996_v26 }
 0x56d   : > { %v3837_v36 = vpop.f32.mrf.mxu2 }
 0x56e   : > { %v4031_v14 = vpop.f32.mrf.mxu3 }
 0x56f   : > { %v4081_v0 = vrot.slane %v4031_v14, 1  ;;  %v14004_v10 = vpop.f32.mrf.mxu1 }
 0x570   : > { %v14006_v12 = vpop.f32.mrf.mxu0 }
 0x571   : > { %v4082_v51 = vsel %vm1193_vm1, %v4080_v48, %v4081_v0 }
 0x572   : > { %10049 = vmatmul.msk.f32.gmra.mxu1 %vm382_vm0, %v13750_v20  ;;  %10098 = vmatmul.msk.f32.gmra.mxu2 %vm382_vm0, %v13750_v20  ;;  %v14014_v9 = vadd.f32 %v4082_v51, %v3870_v55  ;;  %v3581_v20 = vrot.slane %v13212_v60, 7  ;;  %v4502_v60 = vrot.slane %v13762_v17, 7 }
 0x573   : > { %10016 = vmatmul.msk.f32.gmra.mxu0 %vm382_vm0, %v13487_v13  ;;  %10147 = vmatmul.msk.f32.gmra.mxu3 %vm382_vm0, %v13804_v8 }
 0x574   : > { %17865 = vst [vmem:[#allocation46_spill] sm:$0xff] %v14014_v9  ;;  %v3658_v48 = vsel %vm738_vm2, %v17701_v49, %v3581_v20 }
 0x575   : > { %v4811_v11 = vpop.f32.mrf.mxu2  ;;  %v3840_v55 = vadd.f32 %v13180_v30, %v3658_v48 }
 0x576   : > { %v14020_v31 = vpop.f32.mrf.mxu3  ;;  %v4955_v22 = vrot.slane %v4811_v11, 1  ;;  %v14062_v11 = vld [vmem:[#allocation2 + $0xc0] sm:$0xff] }
 0x577   : > { %v4635_v5 = vpop.f32.mrf.mxu1  ;;  %v17699_v36 = vrot.slane %v14020_v31, 7  ;;  %v4115_v30 = vadd.f32 %v13237_v62, %v3840_v55  ;;  %v14077_v62 = vld [vmem:[#allocation2 + $0xc8] sm:$0xff]  ;;  %v4504_v55 = vrot.slane %v13796_v54, 7 }
 0x578   : > { %v14022_v19 = vpop.f32.mrf.mxu0 }
 0x57a   : > { %10050 = vmatmul.msk.f32.gmra.mxu1 %vm382_vm0, %v13764_v18  ;;  %10099 = vmatmul.msk.f32.gmra.mxu2 %vm382_vm0, %v13764_v18 }
 0x57b   : > { %10017 = vmatmul.msk.f32.gmra.mxu0 %vm382_vm0, %v13508_v27  ;;  %10148 = vmatmul.msk.f32.gmra.mxu3 %vm382_vm0, %v14024_v40  ;;  %v17700_v27 = vrot.slane %v13741_v21, 7 }
 0x57d   : > { %v4814_v13 = vpop.f32.mrf.mxu2  ;;  %v4579_v51 = vsel %vm738_vm2, %v17700_v27, %v4502_v60 }
 0x57e   : > { %v4956_v57 = vrot.slane %v4814_v13, 1  ;;  %v5282_v61 = vpop.f32.mrf.mxu3  ;;  %v4582_v20 = vadd.f32 %v4579_v51, %v4115_v30 }
 0x57f   : > { %v5424_v18 = vrot.slane %v5282_v61, 7  ;;  %v4638_v14 = vpop.f32.mrf.mxu1 }
 0x580   : > { %v14045_v38 = vsel %vm1193_vm1, %v4955_v22, %v4956_v57  ;;  %v14047_v0 = vpop.f32.mrf.mxu0  ;;  %v4761_v22 = vadd.f32 %v4635_v5, %v4582_v20 }
 0x581   : > { %v5501_v17 = vsel %vm738_vm2, %v17699_v36, %v5424_v18 }
 0x582   : > { %10051 = vmatmul.msk.f32.gmra.mxu1 %vm382_vm0, %v13788_v1  ;;  %10100 = vmatmul.msk.f32.gmra.mxu2 %vm382_vm0, %v13788_v1 }
 0x583   : > { %10018 = vmatmul.msk.f32.gmra.mxu0 %vm382_vm0, %v13527_v16  ;;  %10149 = vmatmul.msk.f32.gmra.mxu3 %vm382_vm0, %v14062_v11 }
 0x585   : > { %v4817_v13 = vpop.f32.mrf.mxu2 }
 0x586   : > { %v4957_v48 = vrot.slane %v4817_v13, 1  ;;  %v5285_v60 = vpop.f32.mrf.mxu3 }
 0x587   : > { %v4640_v61 = vpop.f32.mrf.mxu1  ;;  %v5425_v30 = vrot.slane %v5285_v60, 7  ;;  %v4505_v60 = vrot.slane %v13816_v47, 7  ;;  %v14117_v47 = vld [vmem:[#allocation2 + $0xd8] sm:$0xff] }
 0x588   : > { %v5033_v18 = vsel %vm1193_vm1, %v4956_v57, %v4957_v48  ;;  %v14071_v1 = vpop.f32.mrf.mxu0  ;;  %v4503_v57 = vrot.slane %v13780_v25, 7  ;;  %v14089_v48 = vld [vmem:[#allocation2 + $0xd0] sm:$0xff] }
 0x589   : > { %v5036_v14 = vadd.f32 %v5033_v18, %v4761_v22 }
 0x58a   : > { %10052 = vmatmul.msk.f32.gmra.mxu1 %vm382_vm0, %v13804_v8  ;;  %10101 = vmatmul.msk.f32.gmra.mxu2 %vm382_vm0, %v13804_v8 }
 0x58b   : > { %10019 = vmatmul.msk.f32.gmra.mxu0 %vm382_vm0, %v13545_v44  ;;  %10150 = vmatmul.msk.f32.gmra.mxu3 %vm382_vm0, %v14077_v62  ;;  %v14083_v16 = vadd.f32 %v5501_v17, %v5036_v14  ;;  %v4578_v17 = vsel %vm738_vm2, %v4503_v57, %v4504_v55 }
 0x58c   : > { %v4583_v25 = vadd.f32 %v4578_v17, %v13265_v59  ;;  %v4577_v59 = vsel %vm738_vm2, %v4504_v55, %v4505_v60 }
 0x58d   : > { %v4820_v5 = vpop.f32.mrf.mxu2 }
 0x58e   : > { %v5288_v51 = vpop.f32.mrf.mxu3  ;;  %v4958_v22 = vrot.slane %v4820_v5, 1  ;;  %v4762_v57 = vadd.f32 %v4640_v61, %v4583_v25  ;;  %v4584_v5 = vadd.f32 %v4577_v59, %v13276_v3 }
 0x58f   : > { %v5426_v20 = vrot.slane %v5288_v51, 7  ;;  %v4643_v13 = vpop.f32.mrf.mxu1 }
 0x590   : > { %v14087_v8 = vpop.f32.mrf.mxu0  ;;  %v4763_v25 = vadd.f32 %v4643_v13, %v4584_v5 }
 0x591   : > { %v5500_v44 = vsel %vm738_vm2, %v5425_v30, %v5426_v20 }
 0x592   : > { %10053 = vmatmul.msk.f32.gmra.mxu1 %vm382_vm0, %v13828_v58  ;;  %10102 = vmatmul.msk.f32.gmra.mxu2 %vm382_vm0, %v13828_v58 }
 0x593   : > { %10020 = vmatmul.msk.f32.gmra.mxu0 %vm382_vm0, %v13566_v41  ;;  %10151 = vmatmul.msk.f32.gmra.mxu3 %vm382_vm0, %v14089_v48 }
 0x595   : > { %v4823_v54 = vpop.f32.mrf.mxu2 }
 0x596   : > { %v4959_v18 = vrot.slane %v4823_v54, 1  ;;  %v5291_v14 = vpop.f32.mrf.mxu3 }
 0x597   : > { %v5427_v51 = vrot.slane %v5291_v14, 7  ;;  %v4646_v30 = vpop.f32.mrf.mxu1 }
 0x598   : > { %v5032_v58 = vsel %vm1193_vm1, %v4958_v22, %v4959_v18  ;;  %v14107_v36 = vpop.f32.mrf.mxu0 }
 0x599   : > { %v5037_v41 = vadd.f32 %v5032_v58, %v4762_v57  ;;  %v5499_v27 = vsel %vm738_vm2, %v5426_v20, %v5427_v51  ;;  %v14146_v58 = vld [vmem:[#allocation2 + $0xe8] sm:$0xff] }
 0x59a   : > { %10054 = vmatmul.msk.f32.gmra.mxu1 %vm382_vm0, %v13842_v39  ;;  %10103 = vmatmul.msk.f32.gmra.mxu2 %vm382_vm0, %v13842_v39 }
 0x59b   : > { %10021 = vmatmul.msk.f32.gmra.mxu0 %vm382_vm0, %v13585_v42  ;;  %10152 = vmatmul.msk.f32.gmra.mxu3 %vm382_vm0, %v14117_v47  ;;  %v14123_v61 = vadd.f32 %v5500_v44, %v5037_v41  ;;  %v14134_v42 = vld [vmem:[#allocation2 + $0xe0] sm:$0xff]  ;;  %v4506_v44 = vrot.slane %v13834_v7, 7  ;;  %v4508_v41 = vrot.slane %v13870_v28, 7  ;;  %v14172_v28 = vld [vmem:[#allocation2 + $0xf0] sm:$0xff] }
 0x59d   : > { %v4826_v20 = vpop.f32.mrf.mxu2 }
 0x59e   : > { %v4960_v55 = vrot.slane %v4826_v20, 1  ;;  %v5294_v17 = vpop.f32.mrf.mxu3 }
 0x59f   : > { %v4648_v54 = vpop.f32.mrf.mxu1  ;;  %v5428_v57 = vrot.slane %v5294_v17, 7 }
 0x5a0   : > { %v5031_v39 = vsel %vm1193_vm1, %v4959_v18, %v4960_v55  ;;  %v14128_v60 = vpop.f32.mrf.mxu0  ;;  %v4507_v18 = vrot.slane %v13850_v23, 7 }
 0x5a1   : > { %v5038_v22 = vadd.f32 %v5031_v39, %v4763_v25 }
 0x5a2   : > { %10055 = vmatmul.msk.f32.gmra.mxu1 %vm382_vm0, %v13862_v35  ;;  %10104 = vmatmul.msk.f32.gmra.mxu2 %vm382_vm0, %v13862_v35 }
 0x5a3   : > { %10022 = vmatmul.msk.f32.gmra.mxu0 %vm382_vm0, %v13603_v6  ;;  %10153 = vmatmul.msk.f32.gmra.mxu3 %vm382_vm0, %v14134_v42  ;;  %v14140_v3 = vadd.f32 %v5499_v27, %v5038_v22  ;;  %v4576_v27 = vsel %vm738_vm2, %v4506_v44, %v4507_v18  ;;  %v10884_v44 = vld [vmem:[#allocation2 + $0xd8] sm:$0xff] }
 0x5a4   : > { %v4585_v7 = vadd.f32 %v4576_v27, %v13302_v43  ;;  %v4575_v43 = vsel %vm738_vm2, %v4507_v18, %v4508_v41 }
 0x5a5   : > { %v4829_v13 = vpop.f32.mrf.mxu2 }
 0x5a6   : > { %v5297_v14 = vpop.f32.mrf.mxu3  ;;  %v4961_v59 = vrot.slane %v4829_v13, 1  ;;  %v4764_v55 = vadd.f32 %v4648_v54, %v4585_v7  ;;  %v17867_v54 = vld [vmem:[#allocation13_spill] sm:$0xff] }
 0x5a7   : > { %v5429_v51 = vrot.slane %v5297_v14, 7  ;;  %v4651_v30 = vpop.f32.mrf.mxu1  ;;  %v17868_v14 = vld [vmem:[#allocation18_spill] sm:$0xff] }
 0x5a8   : > { %v14144_v35 = vpop.f32.mrf.mxu0 }
 0x5a9   : > { %v5498_v6 = vsel %vm738_vm2, %v5428_v57, %v5429_v51  ;;  %v4586_v57 = vadd.f32 %v4575_v43, %v17868_v14 }
 0x5aa   : > { %10056 = vmatmul.msk.f32.gmra.mxu1 %vm382_vm0, %v13882_v15  ;;  %10105 = vmatmul.msk.f32.gmra.mxu2 %vm382_vm0, %v13882_v15 }
 0x5ab   : > { %10023 = vmatmul.msk.f32.gmra.mxu0 %vm382_vm0, %v13624_v45  ;;  %10154 = vmatmul.msk.f32.gmra.mxu3 %vm382_vm0, %v14146_v58  ;;  %v4765_v7 = vadd.f32 %v4651_v30, %v4586_v57 }
 0x5ad   : > { %v4832_v23 = vpop.f32.mrf.mxu2 }
 0x5ae   : > { %v4962_v5 = vrot.slane %v4832_v23, 1  ;;  %v5300_v20 = vpop.f32.mrf.mxu3 }
 0x5af   : > { %v5430_v17 = vrot.slane %v5300_v20, 7  ;;  %v4654_v25 = vpop.f32.mrf.mxu1 }
 0x5b0   : > { %v5030_v15 = vsel %vm1193_vm1, %v4961_v59, %v4962_v5  ;;  %v14164_v39 = vpop.f32.mrf.mxu0 }
 0x5b1   : > { %17866 = vst [vmem:[#allocation47_spill] sm:$0xff] %v14164_v39  ;;  %v5039_v45 = vadd.f32 %v5030_v15, %v4764_v55  ;;  %v5497_v22 = vsel %vm738_vm2, %v5429_v51, %v5430_v17  ;;  %v10885_v55 = vld [vmem:[#allocation2 + $0xe0] sm:$0xff] }
 0x5b2   : > { %10057 = vmatmul.msk.f32.gmra.mxu1 %vm382_vm0, %v10884_v44  ;;  %10106 = vmatmul.msk.f32.gmra.mxu2 %vm382_vm0, %v10884_v44  ;;  %v17870_v17 = vld [vmem:[#allocation24_spill] sm:$0xff] }
 0x5b3   : > { %10024 = vmatmul.msk.f32.gmra.mxu0 %vm382_vm0, %v17867_v54  ;;  %10155 = vmatmul.msk.f32.gmra.mxu3 %vm382_vm0, %v14172_v28  ;;  %v14178_v13 = vadd.f32 %v5498_v6, %v5039_v45  ;;  %v14187_v6 = vld [vmem:[#allocation2 + $0xf8] sm:$0xff]  ;;  %v4510_v45 = vrot.slane %v13899_v24, 7  ;;  %v17873_v24 = vld [vmem:[#allocation25_spill] sm:$0xff] }
 0x5b5   : > { %v4835_v51 = vpop.f32.mrf.mxu2 }
 0x5b6   : > { %v4963_v27 = vrot.slane %v4835_v51, 1  ;;  %v5303_v18 = vpop.f32.mrf.mxu3  ;;  %v14199_v51 = vld [vmem:[#allocation2 + $0x100] sm:$0xff] }
 0x5b7   : > { %v4656_v23 = vpop.f32.mrf.mxu1  ;;  %v5431_v44 = vrot.slane %v5303_v18, 7  ;;  %v17874_v18 = vld [vmem:[#allocation19_spill] sm:$0xff] }
 0x5b8   : > { %v5029_v41 = vsel %vm1193_vm1, %v4962_v5, %v4963_v27  ;;  %v14183_v59 = vpop.f32.mrf.mxu0  ;;  %v17871_v5 = vld [vmem:[#allocation40_spill] sm:$0xff] }
 0x5b9   : > { %17869 = vst [vmem:[#allocation13_spill] sm:$0xff] %v14183_v59  ;;  %v5040_v20 = vadd.f32 %v5029_v41, %v4765_v7  ;;  %v4509_v15 = vrot.slane %v17871_v5, 7  ;;  %v10886_v7 = vld [vmem:[#allocation2 + $0xe8] sm:$0xff] }
 0x5ba   : > { %10058 = vmatmul.msk.f32.gmra.mxu1 %vm382_vm0, %v10885_v55  ;;  %10107 = vmatmul.msk.f32.gmra.mxu2 %vm382_vm0, %v10885_v55  ;;  %v4511_v55 = vrot.slane %v13915_v34, 7  ;;  %v14223_v34 = vld [vmem:[#allocation2 + $0x108] sm:$0xff] }
 0x5bb   : > { %10025 = vmatmul.msk.f32.gmra.mxu0 %vm382_vm0, %v17870_v17  ;;  %10156 = vmatmul.msk.f32.gmra.mxu3 %vm382_vm0, %v14187_v6  ;;  %v14193_v30 = vadd.f32 %v5497_v22, %v5040_v20  ;;  %v4574_v22 = vsel %vm738_vm2, %v4509_v15, %v4510_v45 }
 0x5bc   : > { %v4587_v41 = vadd.f32 %v4574_v22, %v17874_v18  ;;  %v4573_v22 = vsel %vm738_vm2, %v4510_v45, %v4511_v55  ;;  %v10887_v18 = vld [vmem:[#allocation2 + $0xf0] sm:$0xff] }
 0x5bd   : > { %v4838_v25 = vpop.f32.mrf.mxu2 }
 0x5be   : > { %v5306_v43 = vpop.f32.mrf.mxu3  ;;  %v4964_v17 = vrot.slane %v4838_v25, 1  ;;  %v4766_v15 = vadd.f32 %v4656_v23, %v4587_v41  ;;  %v17877_v25 = vld [vmem:[#allocation20_spill] sm:$0xff] }
 0x5bf   : > { %v5432_v54 = vrot.slane %v5306_v43, 7  ;;  %v4659_v14 = vpop.f32.mrf.mxu1 }
 0x5c0   : > { %v14197_v57 = vpop.f32.mrf.mxu0 }
 0x5c1   : > { %17872 = vst [vmem:[#allocation18_spill] sm:$0xff] %v14197_v57  ;;  %v5496_v27 = vsel %vm738_vm2, %v5431_v44, %v5432_v54 }
 0x5c2   : > { %10059 = vmatmul.msk.f32.gmra.mxu1 %vm382_vm0, %v10886_v7  ;;  %10108 = vmatmul.msk.f32.gmra.mxu2 %vm382_vm0, %v10886_v7 }
 0x5c3   : > { %10026 = vmatmul.msk.f32.gmra.mxu0 %vm382_vm0, %v17873_v24  ;;  %10157 = vmatmul.msk.f32.gmra.mxu3 %vm382_vm0, %v14199_v51 }
 0x5c5   : > { %v4841_v20 = vpop.f32.mrf.mxu2 }
 0x5c6   : > { %v4965_v5 = vrot.slane %v4841_v20, 1  ;;  %v5309_v43 = vpop.f32.mrf.mxu3 }
 0x5c7   : > { %v5433_v44 = vrot.slane %v5309_v43, 7  ;;  %v4662_v49 = vpop.f32.mrf.mxu1 }
 0x5c8   : > { %v5028_v7 = vsel %vm1193_vm1, %v4964_v17, %v4965_v5  ;;  %v14215_v9 = vpop.f32.mrf.mxu0  ;;  %v17876_v49 = vld [vmem:[#allocation10_spill] sm:$0xff] }
 0x5c9   : > { %17875 = vst [vmem:[#allocation24_spill] sm:$0xff] %v14215_v9  ;;  %v5041_v24 = vadd.f32 %v5028_v7, %v4766_v15  ;;  %v5495_v26 = vsel %vm738_vm2, %v5432_v54, %v5433_v44  ;;  %v4588_v54 = vadd.f32 %v4573_v22, %v17877_v25  ;;  %v10888_v7 = vld [vmem:[#allocation2 + $0xf8] sm:$0xff] }
 0x5ca   : > { %10060 = vmatmul.msk.f32.gmra.mxu1 %vm382_vm0, %v10887_v18  ;;  %10109 = vmatmul.msk.f32.gmra.mxu2 %vm382_vm0, %v10887_v18  ;;  %v4513_v18 = vrot.slane %v13941_v46, 7  ;;  %v10374_v46 = vld [vmem:[%s17664_s5 + $0x10] sm:$0xff] }
 0x5cb   : > { %10027 = vmatmul.msk.f32.gmra.mxu0 %vm382_vm0, %v17876_v49  ;;  %10158 = vmatmul.msk.f32.gmra.mxu3 %vm382_vm0, %v14223_v34  ;;  %v14229_v23 = vadd.f32 %v5496_v27, %v5041_v24  ;;  %v4767_v55 = vadd.f32 %v4659_v14, %v4588_v54  ;;  %v14238_v27 = vld [vmem:[#allocation2 + $0x110] sm:$0xff]  ;;  %v17879_v24 = vld [vmem:[#allocation15_spill] sm:$0xff] }
 0x5cc   : > { %6775 = vmatpush.msrb.mxu0 %v10374_v46 }
 0x5cd   : > { %v4844_v41 = vpop.f32.mrf.mxu2 }
 0x5ce   : > { %v4966_v20 = vrot.slane %v4844_v41, 1  ;;  %v5312_v45 = vpop.f32.mrf.mxu3 }
 0x5cf   : > { %v4664_v17 = vpop.f32.mrf.mxu1  ;;  %v5434_v25 = vrot.slane %v5312_v45, 7  ;;  %v17881_v45 = vld [vmem:[#allocation4_spill] sm:$0xff] }
 0x5d0   : > { %v5027_v43 = vsel %vm1193_vm1, %v4965_v5, %v4966_v20  ;;  %v14234_v15 = vpop.f32.mrf.mxu0  ;;  %v4512_v5 = vrot.slane %v13929_v33, 7  ;;  %v14258_v33 = vld [vmem:[#allocation2 + $0x180] sm:$0xff] }
 0x5d1   : > { %17878 = vst [vmem:[#allocation40_spill] sm:$0xff] %v14234_v15  ;;  %v5042_v44 = vadd.f32 %v5027_v43, %v4767_v55  ;;  %v14250_v55 = vld [vmem:[#allocation2 + $0x118] sm:$0xff] }
 0x5d2   : > { %10061 = vmatmul.msk.f32.gmra.mxu1 %vm382_vm0, %v10888_v7  ;;  %10110 = vmatmul.msk.f32.gmra.mxu2 %vm382_vm0, %v10888_v7 }
 0x5d3   : > { %10028 = vmatmul.msk.f32.gmra.mxu0 %vm382_vm0, %v17879_v24  ;;  %10159 = vmatmul.msk.f32.gmra.mxu3 %vm382_vm0, %v14238_v27  ;;  %v14244_v14 = vadd.f32 %v5495_v26, %v5042_v44  ;;  %v4572_v26 = vsel %vm738_vm2, %v4512_v5, %v4513_v18  ;;  %v10889_v44 = vld [vmem:[#allocation2 + $0x100] sm:$0xff]  ;;  %v4514_v5 = vrot.slane %v13960_v53, 7  ;;  %v14279_v53 = vld [vmem:[#allocation2 + $0x188] sm:$0xff] }
 0x5d4   : > { %v4589_v7 = vadd.f32 %v4572_v26, %v17881_v45  ;;  %v10890_v45 = vld [vmem:[#allocation2 + $0x108] sm:$0xff] }
 0x5d5   : > { %v4847_v22 = vpop.f32.mrf.mxu2  ;;  %v4571_v26 = vsel %vm738_vm2, %v4513_v18, %v4514_v5 }
 0x5d6   : > { %v5315_v49 = vpop.f32.mrf.mxu3  ;;  %v4768_v32 = vadd.f32 %v4664_v17, %v4589_v7 }
 0x5d7   : > { %v5435_v54 = vrot.slane %v5315_v49, 7  ;;  %v4667_v41 = vpop.f32.mrf.mxu1  ;;  %v4967_v49 = vrot.slane %v4847_v22, 1 }
 0x5d8   : > { %v14248_v20 = vpop.f32.mrf.mxu0 }
 0x5d9   : > { %17880 = vst [vmem:[#allocation25_spill] sm:$0xff] %v14248_v20  ;;  %v5494_v43 = vsel %vm738_vm2, %v5434_v25, %v5435_v54 }
 0x5da   : > { %10062 = vmatmul.msk.f32.gmra.mxu1 %vm382_vm0, %v10889_v44  ;;  %10111 = vmatmul.msk.f32.gmra.mxu2 %vm382_vm0, %v10889_v44 }
 0x5db   : > { %10029 = vmatmul.msk.f32.gmra.mxu0 %vm382_vm0, %v14258_v33  ;;  %10160 = vmatmul.msk.f32.gmra.mxu3 %vm382_vm0, %v14250_v55 }
 0x5dd   : > { %v4850_v24 = vpop.f32.mrf.mxu2 }
 0x5de   : > { %v4968_v25 = vrot.slane %v4850_v24, 1  ;;  %v5318_v44 = vpop.f32.mrf.mxu3 }
 0x5df   : > { %v5436_v56 = vrot.slane %v5318_v44, 7  ;;  %v4670_v52 = vpop.f32.mrf.mxu1 }
 0x5e0   : > { %v5026_v2 = vsel %vm1193_vm1, %v4967_v49, %v4968_v25  ;;  %v14271_v20 = vpop.f32.mrf.mxu0  ;;  %v14281_v52 = vld [vmem:[#allocation2 + $0x120] sm:$0xff]  ;;  %v14294_v49 = vld [vmem:[#allocation2 + $0x190] sm:$0xff] }
 0x5e1   : > { %17882 = vst [vmem:[#allocation19_spill] sm:$0xff] %v14271_v20  ;;  %v5043_v15 = vadd.f32 %v5026_v2, %v4768_v32  ;;  %v5493_v46 = vsel %vm738_vm2, %v5435_v54, %v5436_v56  ;;  %v17883_v56 = vld [vmem:[#allocation21_spill] sm:$0xff] }
 0x5e2   : > { %10063 = vmatmul.msk.f32.gmra.mxu1 %vm382_vm0, %v10890_v45  ;;  %10112 = vmatmul.msk.f32.gmra.mxu2 %vm382_vm0, %v10890_v45  ;;  %v4590_v32 = vadd.f32 %v4571_v26, %v17883_v56  ;;  %v10891_v45 = vld [vmem:[#allocation2 + $0x110] sm:$0xff]  ;;  %v4516_v26 = vrot.slane %v13988_v50, 7 }
 0x5e3   : > { %10030 = vmatmul.msk.f32.gmra.mxu0 %vm382_vm0, %v14279_v53  ;;  %10161 = vmatmul.msk.f32.gmra.mxu3 %vm382_vm0, %v14281_v52  ;;  %v14287_v2 = vadd.f32 %v5494_v43, %v5043_v15  ;;  %v14298_v15 = vld [vmem:[#allocation2 + $0x128] sm:$0xff]  ;;  %v17888_v50 = vld [vmem:[#allocation6_spill] sm:$0xff] }
 0x5e4   : > { %v4769_v54 = vadd.f32 %v4667_v41, %v4590_v32 }
 0x5e5   : > { %v4853_v17 = vpop.f32.mrf.mxu2 }
 0x5e6   : > { %v4969_v22 = vrot.slane %v4853_v17, 1  ;;  %v5321_v18 = vpop.f32.mrf.mxu3 }
 0x5e7   : > { %v4672_v7 = vpop.f32.mrf.mxu1  ;;  %v5437_v32 = vrot.slane %v5321_v18, 7 }
 0x5e8   : > { %v5025_v24 = vsel %vm1193_vm1, %v4968_v25, %v4969_v22  ;;  %v14292_v5 = vpop.f32.mrf.mxu0  ;;  %v4515_v25 = vrot.slane %v13974_v4, 7  ;;  %v17887_v4 = vld [vmem:[#allocation26_spill] sm:$0xff] }
 0x5e9   : > { %17884 = vst [vmem:[#allocation10_spill] sm:$0xff] %v14292_v5  ;;  %v5044_v44 = vadd.f32 %v5025_v24, %v4769_v54  ;;  %v14310_v24 = vld [vmem:[#allocation2 + $0x130] sm:$0xff] }
 0x5ea   : > { %10064 = vmatmul.msk.f32.gmra.mxu1 %vm382_vm0, %v10891_v45  ;;  %10113 = vmatmul.msk.f32.gmra.mxu2 %vm382_vm0, %v10891_v45 }
 0x5eb   : > { %10031 = vmatmul.msk.f32.gmra.mxu0 %vm382_vm0, %v14294_v49  ;;  %10162 = vmatmul.msk.f32.gmra.mxu3 %vm382_vm0, %v14298_v15  ;;  %v14304_v41 = vadd.f32 %v5493_v46, %v5044_v44  ;;  %v4570_v46 = vsel %vm738_vm2, %v4515_v25, %v4516_v26  ;;  %v10892_v44 = vld [vmem:[#allocation2 + $0x118] sm:$0xff] }
 0x5ec   : > { %v4591_v18 = vadd.f32 %v4570_v46, %v17888_v50  ;;  %v10893_v50 = vld [vmem:[#allocation2 + $0x120] sm:$0xff] }
 0x5ed   : > { %17885 = vst [vmem:[#allocation20_spill] sm:$0xff] %v14304_v41  ;;  %v4856_v43 = vpop.f32.mrf.mxu2 }
 0x5ee   : > { %v5324_v56 = vpop.f32.mrf.mxu3  ;;  %v4770_v25 = vadd.f32 %v4672_v7, %v4591_v18  ;;  %v17892_v7 = vld [vmem:[#allocation22_spill] sm:$0xff] }
 0x5ef   : > { %v5438_v17 = vrot.slane %v5324_v56, 7  ;;  %v4675_v22 = vpop.f32.mrf.mxu1 }
 0x5f0   : > { %v14308_v54 = vpop.f32.mrf.mxu0 }
 0x5f1   : > { %17886 = vst [vmem:[#allocation15_spill] sm:$0xff] %v14308_v54  ;;  %v5492_v45 = vsel %vm738_vm2, %v5437_v32, %v5438_v17  ;;  %v4517_v54 = vrot.slane %v14006_v12, 7  ;;  %v4970_v32 = vrot.slane %v4856_v43, 1  ;;  %v14334_v12 = vld [vmem:[#allocation2 + $0x138] sm:$0xff] }
 0x5f2   : > { %10065 = vmatmul.msk.f32.gmra.mxu1 %vm382_vm0, %v10892_v44  ;;  %10114 = vmatmul.msk.f32.gmra.mxu2 %vm382_vm0, %v10892_v44 }
 0x5f3   : > { %10163 = vmatmul.msk.f32.gmra.mxu3 %vm382_vm0, %v14310_v24  ;;  %10180 = vmatmul.msk.f32.vlgmr.msra.gmra.mxu0 %vm382_vm0, %v17887_v4  ;;  %v4569_v46 = vsel %vm738_vm2, %v4516_v26, %v4517_v54 }
 0x5f5   : > { %v4859_v56 = vpop.f32.mrf.mxu2 }
 0x5f6   : > { %v4971_v5 = vrot.slane %v4859_v56, 1  ;;  %v5327_v20 = vpop.f32.mrf.mxu3 }
 0x5f7   : > { %v5439_v9 = vrot.slane %v5327_v20, 7  ;;  %v4678_v57 = vpop.f32.mrf.mxu1 }
 0x5f8   : > { %v5024_v44 = vsel %vm1193_vm1, %v4970_v32, %v4971_v5  ;;  %v14326_v59 = vpop.f32.mrf.mxu0  ;;  %v17890_v57 = vld [vmem:[#allocation28_spill] sm:$0xff] }
 0x5f9   : > { %17889 = vst [vmem:[#allocation4_spill] sm:$0xff] %v14326_v59  ;;  %v5045_v41 = vadd.f32 %v5024_v44, %v4770_v25  ;;  %v5491_v4 = vsel %vm738_vm2, %v5438_v17, %v5439_v9  ;;  %v4592_v9 = vadd.f32 %v4569_v46, %v17892_v7  ;;  %v10894_v44 = vld [vmem:[#allocation2 + $0x128] sm:$0xff] }
 0x5fa   : > { %10066 = vmatmul.msk.f32.gmra.mxu1 %vm382_vm0, %v10893_v50  ;;  %10115 = vmatmul.msk.f32.gmra.mxu2 %vm382_vm0, %v10893_v50  ;;  %v4519_v50 = vrot.slane %v14047_v0, 7  ;;  %v17898_v0 = vld [vmem:[#allocation8_spill] sm:$0xff] }
 0x5fb   : > { %10164 = vmatmul.msk.f32.gmra.mxu3 %vm382_vm0, %v14334_v12  ;;  %10181 = vmatmul.msk.f32.gmra.mxu0 %vm382_vm0, %v17890_v57  ;;  %v14340_v20 = vadd.f32 %v5492_v45, %v5045_v41  ;;  %v4771_v54 = vadd.f32 %v4675_v22, %v4592_v9  ;;  %v14349_v41 = vld [vmem:[#allocation2 + $0x140] sm:$0xff]  ;;  %v17894_v45 = vld [vmem:[#allocation30_spill] sm:$0xff] }
 0x5fd   : > { %17891 = vst [vmem:[#allocation21_spill] sm:$0xff] %v14340_v20  ;;  %v4862_v43 = vpop.f32.mrf.mxu2 }
 0x5fe   : > { %v4972_v17 = vrot.slane %v4862_v43, 1  ;;  %v5330_v26 = vpop.f32.mrf.mxu3 }
 0x5ff   : > { %v4680_v18 = vpop.f32.mrf.mxu1  ;;  %v5440_v7 = vrot.slane %v5330_v26, 7 }
 0x600   : > { %v5023_v56 = vsel %vm1193_vm1, %v4971_v5, %v4972_v17  ;;  %v14345_v32 = vpop.f32.mrf.mxu0  ;;  %v4518_v5 = vrot.slane %v14022_v19, 7  ;;  %v17897_v19 = vld [vmem:[#allocation31_spill] sm:$0xff] }
 0x601   : > { %17893 = vst [vmem:[#allocation26_spill] sm:$0xff] %v14345_v32  ;;  %v5046_v25 = vadd.f32 %v5023_v56, %v4771_v54  ;;  %v14361_v54 = vld [vmem:[#allocation2 + $0x148] sm:$0xff] }
 0x602   : > { %10067 = vmatmul.msk.f32.gmra.mxu1 %vm382_vm0, %v10894_v44  ;;  %10116 = vmatmul.msk.f32.gmra.mxu2 %vm382_vm0, %v10894_v44 }
 0x603   : > { %10165 = vmatmul.msk.f32.gmra.mxu3 %vm382_vm0, %v14349_v41  ;;  %10182 = vmatmul.msk.f32.gmra.mxu0 %vm382_vm0, %v17894_v45  ;;  %v14355_v22 = vadd.f32 %v5491_v4, %v5046_v25  ;;  %v4568_v4 = vsel %vm738_vm2, %v4518_v5, %v4519_v50  ;;  %v10895_v25 = vld [vmem:[#allocation2 + $0x130] sm:$0xff]  ;;  %v4520_v45 = vrot.slane %v14071_v1, 7 }
 0x604   : > { %v4593_v26 = vadd.f32 %v4568_v4, %v17898_v0  ;;  %v10896_v0 = vld [vmem:[#allocation2 + $0x138] sm:$0xff]  ;;  %v14385_v1 = vld [vmem:[#allocation2 + $0x150] sm:$0xff] }
 0x605   : > { %17895 = vst [vmem:[#allocation6_spill] sm:$0xff] %v14355_v22  ;;  %v4865_v46 = vpop.f32.mrf.mxu2  ;;  %v4567_v4 = vsel %vm738_vm2, %v4519_v50, %v4520_v45 }
 0x606   : > { %v5333_v57 = vpop.f32.mrf.mxu3  ;;  %v4772_v5 = vadd.f32 %v4680_v18, %v4593_v26 }
 0x607   : > { %v5441_v9 = vrot.slane %v5333_v57, 7  ;;  %v4683_v43 = vpop.f32.mrf.mxu1  ;;  %v4973_v57 = vrot.slane %v4865_v46, 1  ;;  %v17902_v46 = vld [vmem:[#allocation23_spill] sm:$0xff] }
 0x608   : > { %v14359_v17 = vpop.f32.mrf.mxu0 }
 0x609   : > { %17896 = vst [vmem:[#allocation28_spill] sm:$0xff] %v14359_v17  ;;  %v5490_v56 = vsel %vm738_vm2, %v5440_v7, %v5441_v9 }
 0x60a   : > { %10068 = vmatmul.msk.f32.gmra.mxu1 %vm382_vm0, %v10895_v25  ;;  %10117 = vmatmul.msk.f32.gmra.mxu2 %vm382_vm0, %v10895_v25 }
 0x60b   : > { %10166 = vmatmul.msk.f32.gmra.mxu3 %vm382_vm0, %v14361_v54  ;;  %10183 = vmatmul.msk.f32.gmra.mxu0 %vm382_vm0, %v17897_v19 }
 0x60d   : > { %v4868_v44 = vpop.f32.mrf.mxu2 }
 0x60e   : > { %v4974_v7 = vrot.slane %v4868_v44, 1  ;;  %v5336_v17 = vpop.f32.mrf.mxu3 }
 0x60f   : > { %v5442_v32 = vrot.slane %v5336_v17, 7  ;;  %v4686_v59 = vpop.f32.mrf.mxu1 }
 0x610   : > { %v5022_v25 = vsel %vm1193_vm1, %v4973_v57, %v4974_v7  ;;  %v14377_v22 = vpop.f32.mrf.mxu0  ;;  %v17900_v59 = vld [vmem:[#allocation33_spill] sm:$0xff] }
 0x611   : > { %17899 = vst [vmem:[#allocation22_spill] sm:$0xff] %v14377_v22  ;;  %v5047_v20 = vadd.f32 %v5022_v25, %v4772_v5  ;;  %v5489_v19 = vsel %vm738_vm2, %v5441_v9, %v5442_v32  ;;  %v4594_v32 = vadd.f32 %v4567_v4, %v17902_v46  ;;  %v10897_v25 = vld [vmem:[#allocation2 + $0x140] sm:$0xff] }
 0x612   : > { %10069 = vmatmul.msk.f32.gmra.mxu1 %vm382_vm0, %v10896_v0  ;;  %10118 = vmatmul.msk.f32.gmra.mxu2 %vm382_vm0, %v10896_v0  ;;  %v4522_v0 = vrot.slane %v14107_v36, 7  ;;  %v17907_v36 = vld [vmem:[#allocation36_spill] sm:$0xff] }
 0x613   : > { %10167 = vmatmul.msk.f32.gmra.mxu3 %vm382_vm0, %v14385_v1  ;;  %10184 = vmatmul.msk.f32.gmra.mxu0 %vm382_vm0, %v17900_v59  ;;  %v14391_v18 = vadd.f32 %v5490_v56, %v5047_v20  ;;  %v4773_v26 = vadd.f32 %v4683_v43, %v4594_v32  ;;  %v14400_v20 = vld [vmem:[#allocation2 + $0x158] sm:$0xff] }
 0x614   : > { %v17904_v56 = vld [vmem:[#allocation35_spill] sm:$0xff] }
 0x615   : > { %17901 = vst [vmem:[#allocation30_spill] sm:$0xff] %v14391_v18  ;;  %v4871_v9 = vpop.f32.mrf.mxu2 }
 0x616   : > { %v4975_v17 = vrot.slane %v4871_v9, 1  ;;  %v5339_v50 = vpop.f32.mrf.mxu3 }
 0x617   : > { %v4688_v44 = vpop.f32.mrf.mxu1  ;;  %v5443_v46 = vrot.slane %v5339_v50, 7 }
 0x618   : > { %v5021_v45 = vsel %vm1193_vm1, %v4974_v7, %v4975_v17  ;;  %v14396_v57 = vpop.f32.mrf.mxu0  ;;  %v4521_v7 = vrot.slane %v14087_v8, 7  ;;  %v17908_v8 = vld [vmem:[#allocation5_spill] sm:$0xff] }
 0x619   : > { %17903 = vst [vmem:[#allocation31_spill] sm:$0xff] %v14396_v57  ;;  %v5048_v5 = vadd.f32 %v5021_v45, %v4773_v26  ;;  %v14412_v26 = vld [vmem:[#allocation2 + $0x160] sm:$0xff] }
 0x61a   : > { %10070 = vmatmul.msk.f32.gmra.mxu1 %vm382_vm0, %v10897_v25  ;;  %10119 = vmatmul.msk.f32.gmra.mxu2 %vm382_vm0, %v10897_v25 }
 0x61b   : > { %10168 = vmatmul.msk.f32.gmra.mxu3 %vm382_vm0, %v14400_v20  ;;  %10185 = vmatmul.msk.f32.gmra.mxu0 %vm382_vm0, %v17904_v56  ;;  %v14406_v43 = vadd.f32 %v5489_v19, %v5048_v5  ;;  %v4566_v19 = vsel %vm738_vm2, %v4521_v7, %v4522_v0  ;;  %v10898_v5 = vld [vmem:[#allocation2 + $0x148] sm:$0xff]  ;;  %v4523_v56 = vrot.slane %v14128_v60, 7 }
 0x61c   : > { %v4595_v50 = vadd.f32 %v4566_v19, %v17908_v8  ;;  %v10899_v8 = vld [vmem:[#allocation2 + $0x150] sm:$0xff]  ;;  %v14436_v60 = vld [vmem:[#allocation2 + $0x168] sm:$0xff] }
 0x61d   : > { %17905 = vst [vmem:[#allocation8_spill] sm:$0xff] %v14406_v43  ;;  %v4874_v4 = vpop.f32.mrf.mxu2  ;;  %v4565_v19 = vsel %vm738_vm2, %v4522_v0, %v4523_v56 }
 0x61e   : > { %v5342_v59 = vpop.f32.mrf.mxu3  ;;  %v4774_v7 = vadd.f32 %v4688_v44, %v4595_v50 }
 0x61f   : > { %v5444_v32 = vrot.slane %v5342_v59, 7  ;;  %v4691_v9 = vpop.f32.mrf.mxu1  ;;  %v4976_v59 = vrot.slane %v4874_v4, 1  ;;  %v17911_v4 = vld [vmem:[#allocation9_spill] sm:$0xff] }
 0x620   : > { %v14410_v17 = vpop.f32.mrf.mxu0 }
 0x621   : > { %17906 = vst [vmem:[#allocation33_spill] sm:$0xff] %v14410_v17  ;;  %v5488_v45 = vsel %vm738_vm2, %v5443_v46, %v5444_v32 }
 0x622   : > { %10071 = vmatmul.msk.f32.gmra.mxu1 %vm382_vm0, %v10898_v5  ;;  %10120 = vmatmul.msk.f32.gmra.mxu2 %vm382_vm0, %v10898_v5 }
 0x623   : > { %10169 = vmatmul.msk.f32.gmra.mxu3 %vm382_vm0, %v14412_v26  ;;  %10186 = vmatmul.msk.f32.gmra.mxu0 %vm382_vm0, %v17907_v36 }
 0x625   : > { %v4877_v25 = vpop.f32.mrf.mxu2 }
 0x626   : > { %v4977_v46 = vrot.slane %v4877_v25, 1  ;;  %v5345_v17 = vpop.f32.mrf.mxu3 }
 0x627   : > { %v5445_v57 = vrot.slane %v5345_v17, 7  ;;  %v4694_v22 = vpop.f32.mrf.mxu1 }
 0x628   : > { %v5020_v5 = vsel %vm1193_vm1, %v4976_v59, %v4977_v46  ;;  %v14428_v43 = vpop.f32.mrf.mxu0  ;;  %v17910_v22 = vld [vmem:[#allocation38_spill] sm:$0xff] }
 0x629   : > { %17909 = vst [vmem:[#allocation23_spill] sm:$0xff] %v14428_v43  ;;  %v5049_v18 = vadd.f32 %v5020_v5, %v4774_v7  ;;  %v5487_v36 = vsel %vm738_vm2, %v5444_v32, %v5445_v57  ;;  %v4596_v57 = vadd.f32 %v4565_v19, %v17911_v4  ;;  %v10900_v5 = vld [vmem:[#allocation2 + $0x158] sm:$0xff]  ;;  %v4524_v19 = vrot.slane %v14144_v35, 7 }
 0x62a   : > { %10072 = vmatmul.msk.f32.gmra.mxu1 %vm382_vm0, %v10899_v8  ;;  %10121 = vmatmul.msk.f32.gmra.mxu2 %vm382_vm0, %v10899_v8  ;;  %v17702_v8 = vrot.slane %v14164_v39, 7  ;;  %v14479_v35 = vld [vmem:[#allocation2 + $0x78] sm:$0xff] }
 0x62b   : > { %10170 = vmatmul.msk.f32.gmra.mxu3 %vm382_vm0, %v14436_v60  ;;  %10187 = vmatmul.msk.f32.gmra.mxu0 %vm382_vm0, %v17910_v22  ;;  %v14442_v44 = vadd.f32 %v5488_v45, %v5049_v18  ;;  %v4775_v50 = vadd.f32 %v4691_v9, %v4596_v57  ;;  %v14451_v18 = vld [vmem:[#allocation2 + $0x170] sm:$0xff] }
 0x62c   : > { %v14455_v45 = vld [vmem:[#allocation2 + $0x70] sm:$0xff] }
 0x62d   : > { %v4880_v32 = vpop.f32.mrf.mxu2 }
 0x62e   : > { %v4978_v17 = vrot.slane %v4880_v32, 1  ;;  %v5348_v0 = vpop.f32.mrf.mxu3  ;;  %v14469_v32 = vld [vmem:[#allocation2 + $0x178] sm:$0xff] }
 0x62f   : > { %v4696_v25 = vpop.f32.mrf.mxu1  ;;  %v5446_v43 = vrot.slane %v5348_v0, 7  ;;  %v14504_v0 = vld [vmem:[#allocation2 + $0x80] sm:$0xff] }
 0x630   : > { %v5019_v56 = vsel %vm1193_vm1, %v4977_v46, %v4978_v17  ;;  %v14447_v59 = vpop.f32.mrf.mxu0  ;;  %v4564_v17 = vsel %vm738_vm2, %v4524_v19, %v17702_v8 }
 0x631   : > { %17912 = vst [vmem:[#allocation35_spill] sm:$0xff] %v14447_v59  ;;  %v5050_v7 = vadd.f32 %v5019_v56, %v4775_v50  ;;  %v17916_v50 = vld [vmem:[#allocation11_spill] sm:$0xff] }
 0x632   : > { %10073 = vmatmul.msk.f32.gmra.mxu1 %vm382_vm0, %v10900_v5  ;;  %10122 = vmatmul.msk.f32.gmra.mxu2 %vm382_vm0, %v10900_v5  ;;  %v4597_v56 = vadd.f32 %v4564_v17, %v17916_v50  ;;  %v10904_v50 = vld [vmem:[#allocation2 + $0x168] sm:$0xff] }
 0x633   : > { %10171 = vmatmul.msk.f32.gmra.mxu3 %vm382_vm0, %v14451_v18  ;;  %10188 = vmatmul.msk.f32.gmra.mxu0 %vm382_vm0, %v14455_v45  ;;  %v14459_v9 = vadd.f32 %v5487_v36, %v5050_v7  ;;  %v10902_v36 = vld [vmem:[#allocation2 + $0x160] sm:$0xff] }
 0x635   : > { %v4883_v46 = vpop.f32.mrf.mxu2 }
 0x636   : > { %v14463_v22 = vpop.f32.mrf.mxu3  ;;  %v4979_v5 = vrot.slane %v4883_v46, 1 }
 0x637   : > { %17913 = vst [vmem:[#allocation36_spill] sm:$0xff] %v14463_v22  ;;  %v14465_v4 = vpop.f32.mrf.mxu1  ;;  %v17704_v19 = vrot.slane %v14463_v22, 7 }
 0x638   : > { %17914 = vst [vmem:[#allocation5_spill] sm:$0xff] %v14465_v4  ;;  %v14467_v57 = vpop.f32.mrf.mxu0 }
 0x639   : > { %17915 = vst [vmem:[#allocation38_spill] sm:$0xff] %v14467_v57 }
 0x63a   : > { %10074 = vmatmul.msk.f32.gmra.mxu1 %vm382_vm0, %v10902_v36  ;;  %10123 = vmatmul.msk.f32.gmra.mxu2 %vm382_vm0, %v10902_v36  ;;  %v4776_v36 = vadd.f32 %v4696_v25, %v4597_v56  ;;  %v5486_v25 = vsel %vm738_vm2, %v5446_v43, %v17704_v19  ;;  %v14520_v43 = vld [vmem:[#allocation2 + $0x88] sm:$0xff] }
 0x63b   : > { %10172 = vmatmul.msk.f32.gmra.mxu3 %vm382_vm0, %v14469_v32  ;;  %10189 = vmatmul.msk.f32.gmra.mxu0 %vm382_vm0, %v14479_v35 }
 0x63d   : > { %v14484_v7 = vpop.f32.mrf.mxu2 }
 0x63e   : > { %17917 = vst [vmem:[#allocation9_spill] sm:$0xff] %v14484_v7  ;;  %v17705_v8 = vrot.slane %v14484_v7, 1  ;;  %v14488_v57 = vpop.f32.mrf.mxu3 }
 0x63f   : > { %17918 = vst [vmem:[#allocation11_spill] sm:$0xff] %v14488_v57  ;;  %v4702_v59 = vpop.f32.mrf.mxu1  ;;  %v14585_v57 = vld [vmem:[#allocation2 + $0x1a8] sm:$0xff] }
 0x640   : > { %v5018_v4 = vsel %vm1193_vm1, %v4979_v5, %v17705_v8  ;;  %v14494_v39 = vpop.f32.mrf.mxu0  ;;  %v10906_v5 = vld [vmem:[#allocation2 + $0x170] sm:$0xff] }
 0x641   : > { %17919 = vst [vmem:[#allocation48_spill] sm:$0xff] %v14494_v39  ;;  %v5051_v17 = vadd.f32 %v5018_v4, %v4776_v36  ;;  %v14542_v39 = vld [vmem:[#allocation2 + $0x198] sm:$0xff] }
 0x642   : > { %10075 = vmatmul.msk.f32.gmra.mxu1 %vm382_vm0, %v10904_v50  ;;  %10124 = vmatmul.msk.f32.gmra.mxu2 %vm382_vm0, %v10904_v50 }
 0x643   : > { %10173 = vmatmul.msk.f32.gmra.mxu3 %vm382_vm0, %v14258_v33  ;;  %10190 = vmatmul.msk.f32.gmra.mxu0 %vm382_vm0, %v14504_v0  ;;  %v14508_v59 = vadd.f32 %v5486_v25, %v5051_v17  ;;  %v10908_v25 = vld [vmem:[#allocation2 + $0x178] sm:$0xff] }
 0x645   : > { %17920 = vst [vmem:[#allocation49_spill] sm:$0xff] %v14508_v59  ;;  %v17936_v59 = vld [vmem:[#allocation16_spill] sm:$0xff] }
 0x646   : > { %v14510_v46 = vpop.f32.mrf.mxu3 }
 0x647   : > { %17921 = vst [vmem:[#allocation50_spill] sm:$0xff] %v14510_v46  ;;  %v14512_v4 = vpop.f32.mrf.mxu1  ;;  %v14564_v46 = vld [vmem:[#allocation2 + $0x1a0] sm:$0xff] }
 0x648   : > { %17922 = vst [vmem:[#allocation51_spill] sm:$0xff] %v14512_v4  ;;  %v14514_v56 = vpop.f32.mrf.mxu0 }
 0x649   : > { %17923 = vst [vmem:[#allocation52_spill] sm:$0xff] %v14514_v56 }
 0x64a   : > { %10076 = vmatmul.msk.f32.gmra.mxu1 %vm382_vm0, %v10906_v5  ;;  %10125 = vmatmul.msk.f32.gmra.mxu2 %vm382_vm0, %v10906_v5  ;;  %v14534_v5 = vld [vmem:[#allocation2 + $0x90] sm:$0xff] }
 0x64b   : > { %10174 = vmatmul.msk.f32.gmra.mxu3 %vm382_vm0, %v14279_v53  ;;  %10191 = vmatmul.msk.f32.gmra.mxu0 %vm382_vm0, %v14520_v43 }
 0x64e   : > { %v14524_v36 = vpop.f32.mrf.mxu3 }
 0x64f   : > { %17924 = vst [vmem:[#allocation53_spill] sm:$0xff] %v14524_v36  ;;  %v14526_v17 = vpop.f32.mrf.mxu1 }
 0x650   : > { %17925 = vst [vmem:[#allocation54_spill] sm:$0xff] %v14526_v17  ;;  %v14528_v50 = vpop.f32.mrf.mxu0 }
 0x651   : > { %17926 = vst [vmem:[#allocation55_spill] sm:$0xff] %v14528_v50 }
 0x652   : > { %10077 = vmatmul.msk.f32.gmra.mxu1 %vm382_vm0, %v10908_v25  ;;  %10126 = vmatmul.msk.f32.gmra.mxu2 %vm382_vm0, %v10908_v25  ;;  %v14550_v25 = vld [vmem:[#allocation2 + $0x98] sm:$0xff] }
 0x653   : > { %10175 = vmatmul.msk.f32.gmra.mxu3 %vm382_vm0, %v14294_v49  ;;  %10192 = vmatmul.msk.f32.gmra.mxu0 %vm382_vm0, %v14534_v5 }
 0x656   : > { %v14538_v19 = vpop.f32.mrf.mxu3 }
 0x657   : > { %17927 = vst [vmem:[#allocation56_spill] sm:$0xff] %v14538_v19  ;;  %v4710_v8 = vpop.f32.mrf.mxu1  ;;  %v10325_v19 = vld [vmem:[%s17664_s5 + $0x8] sm:$0xff] }
 0x658   : > { %v14540_v56 = vpop.f32.mrf.mxu0  ;;  %v3627_v8 = vrot.slane %v13986_v63, 7  ;;  %6596 = vmatpush.msrb.mxu3 %v10325_v19  ;;  %v17933_v19 = vld [vmem:[#allocation17_spill] sm:$0xff] }
 0x659   : > { %17928 = vst [vmem:[#allocation57_spill] sm:$0xff] %v14540_v56 }
 0x65a   : > { %10078 = vmatmul.msk.f32.gmra.mxu1 %vm382_vm0, %v14258_v33  ;;  %10127 = vmatmul.msk.f32.gmra.mxu2 %vm382_vm0, %v14258_v33 }
 0x65b   : > { %10176 = vmatmul.msk.f32.gmra.mxu3 %vm382_vm0, %v14542_v39  ;;  %10193 = vmatmul.msk.f32.gmra.mxu0 %vm382_vm0, %v14550_v25 }
 0x65e   : > { %v14554_v50 = vpop.f32.mrf.mxu3 }
 0x65f   : > { %17929 = vst [vmem:[#allocation58_spill] sm:$0xff] %v14554_v50  ;;  %v14557_v56 = vpop.f32.mrf.mxu1  ;;  %v17932_v50 = vrot.slane %v13199_v29, 7 }
 0x660   : > { %17930 = vst [vmem:[#allocation59_spill] sm:$0xff] %v14557_v56  ;;  %v14562_v17 = vpop.f32.mrf.mxu0  ;;  %v14576_v56 = vld [vmem:[#allocation2 + $0xa0] sm:$0xff] }
 0x661   : > { %17931 = vst [vmem:[#allocation60_spill] sm:$0xff] %v14562_v17  ;;  %v3659_v63 = vsel %vm738_vm2, %v3627_v8, %v17932_v50  ;;  %v17937_v8 = vrot.slane %v13741_v21, 7 }
 0x662   : > { %10079 = vmatmul.msk.f32.gmra.mxu1 %vm382_vm0, %v14279_v53  ;;  %10128 = vmatmul.msk.f32.gmra.mxu2 %vm382_vm0, %v14279_v53  ;;  %v3839_v17 = vadd.f32 %v17933_v19, %v3659_v63  ;;  %v14598_v19 = vld [vmem:[#allocation2 + $0xa8] sm:$0xff] }
 0x663   : > { %10177 = vmatmul.msk.f32.gmra.mxu3 %vm382_vm0, %v14564_v46  ;;  %10194 = vmatmul.msk.f32.gmra.mxu0 %vm382_vm0, %v14576_v56 }
 0x664   : > { %v4114_v50 = vadd.f32 %v17936_v59, %v3839_v17 }
 0x666   : > { %v14581_v36 = vpop.f32.mrf.mxu3 }
 0x667   : > { %17934 = vst [vmem:[#allocation17_spill] sm:$0xff] %v14581_v36  ;;  %v14583_v4 = vpop.f32.mrf.mxu1 }
 0x668   : > { %17935 = vst [vmem:[#allocation61_spill] sm:$0xff] %v14583_v4  ;;  %v4498_v22 = vpop.f32.mrf.mxu0 }
 0x669   : > { %v4548_v29 = vrot.slane %v4498_v22, 7 }
 0x66a   : > { %10080 = vmatmul.msk.f32.gmra.mxu1 %vm382_vm0, %v14294_v49  ;;  %10129 = vmatmul.msk.f32.gmra.mxu2 %vm382_vm0, %v14294_v49 }
 0x66b   : > { %v4580_v63 = vsel %vm738_vm2, %v4548_v29, %v17937_v8  ;;  %10178 = vmatmul.msk.f32.gmra.mxu3 %vm382_vm0, %v14585_v57  ;;  %10195 = vmatmul.msk.f32.gmra.mxu0 %vm382_vm0, %v14598_v19  ;;  %v10913_v29 = vld [vmem:[#allocation2 + $0x30] sm:$0xff] }
 0x66c   : > { %v4581_v22 = vadd.f32 %v4580_v63, %v4114_v50  ;;  %v14611_v8 = vld [vmem:[#allocation2 + $0xb0] sm:$0xff] }
 0x66e   : > { %v4760_v59 = vadd.f32 %v14004_v10, %v4581_v22  ;;  %v14603_v17 = vpop.f32.mrf.mxu3 }
 0x66f   : > { %v4718_v4 = vpop.f32.mrf.mxu1 }
 0x670   : > { %v14605_v36 = vpop.f32.mrf.mxu0  ;;  %v14608_v21 = vadd.f32 %v14045_v38, %v4760_v59  ;;  %v10915_v4 = vld [vmem:[#allocation2 + $0x38] sm:$0xff]  ;;  %v10916_v59 = vld [vmem:[#allocation2 + $0x40] sm:$0xff] }
 0x672   : > { %10229 = vmatmul.msk.f32.vlgmr.msra.gmra.mxu1 %vm382_vm0, %v10913_v29 }
 0x673   : > { %10196 = vmatmul.msk.f32.gmra.mxu0 %vm382_vm0, %v14611_v8 }
 0x676   : > { %v14615_v7 = vpop.f32.mrf.mxu3 }
 0x677   : > { %17938 = vst [vmem:[#allocation16_spill] sm:$0xff] %v14615_v7  ;;  %v14617_v50 = vpop.f32.mrf.mxu1 }
 0x678   : > { %17939 = vst [vmem:[#allocation62_spill] sm:$0xff] %v14617_v50  ;;  %v14619_v10 = vpop.f32.mrf.mxu0 }
 0x67a   : > { %10230 = vmatmul.msk.f32.gmra.mxu1 %vm382_vm0, %v10915_v4  ;;  %v10917_v4 = vld [vmem:[#allocation2 + $0x48] sm:$0xff] }
 0x67b   : > { %10197 = vmatmul.msk.f32.gmra.mxu0 %vm382_vm0, %v14024_v40 }
 0x67e   : > { %v14624_v38 = vpop.f32.mrf.mxu3 }
 0x67f   : > { %17940 = vst [vmem:[#allocation63_spill] sm:$0xff] %v14624_v38  ;;  %v14626_v63 = vpop.f32.mrf.mxu1 }
 0x680   : > { %17941 = vst [vmem:[#allocation64_spill] sm:$0xff] %v14626_v63  ;;  %v5560_v22 = vpop.f32.mrf.mxu0 }
 0x682   : > { %10231 = vmatmul.msk.f32.gmra.mxu1 %vm382_vm0, %v10916_v59  ;;  %v10918_v59 = vld [vmem:[#allocation2 + $0x50] sm:$0xff] }
 0x683   : > { %10198 = vmatmul.msk.f32.gmra.mxu0 %vm382_vm0, %v14062_v11  ;;  %v14647_v11 = vpop.f32.mrf.mxu2 }
 0x686   : > { %v14631_v29 = vpop.f32.mrf.mxu3 }
 0x687   : > { %17942 = vst [vmem:[#allocation65_spill] sm:$0xff] %v14631_v29  ;;  %v4726_v7 = vpop.f32.mrf.mxu1 }
 0x688   : > { %v14633_v50 = vpop.f32.mrf.mxu0 }
 0x68a   : > { %10232 = vmatmul.msk.f32.gmra.mxu1 %vm382_vm0, %v10917_v4 }
 0x68b   : > { %10199 = vmatmul.msk.f32.gmra.mxu0 %vm382_vm0, %v14077_v62  ;;  %v10919_v62 = vld [vmem:[#allocation2 + $0x58] sm:$0xff] }
 0x68e   : > { %v14638_v40 = vpop.f32.mrf.mxu3 }
 0x68f   : > { %17943 = vst [vmem:[#allocation66_spill] sm:$0xff] %v14638_v40  ;;  %v14640_v22 = vpop.f32.mrf.mxu1 }
 0x690   : > { %17944 = vst [vmem:[#allocation67_spill] sm:$0xff] %v14640_v22  ;;  %v14642_v63 = vpop.f32.mrf.mxu0 }
 0x692   : > { %10233 = vmatmul.msk.f32.gmra.mxu1 %vm382_vm0, %v10918_v59  ;;  %v14658_v59 = vpop.f32.mrf.mxu2 }
 0x693   : > { %10200 = vmatmul.msk.f32.gmra.mxu0 %vm382_vm0, %v14089_v48  ;;  %v10920_v48 = vld [vmem:[#allocation2 + $0x60] sm:$0xff] }
 0x696   : > { %v14649_v7 = vpop.f32.mrf.mxu3 }
 0x697   : > { %17945 = vst [vmem:[#allocation68_spill] sm:$0xff] %v14649_v7  ;;  %v14651_v4 = vpop.f32.mrf.mxu1 }
 0x698   : > { %17946 = vst [vmem:[#allocation69_spill] sm:$0xff] %v14651_v4  ;;  %v5568_v29 = vpop.f32.mrf.mxu0 }
 0x69a   : > { %10234 = vmatmul.msk.f32.gmra.mxu1 %vm382_vm0, %v10919_v62 }
 0x69b   : > { %10201 = vmatmul.msk.f32.gmra.mxu0 %vm382_vm0, %v14117_v47  ;;  %v14671_v47 = vpop.f32.mrf.mxu2 }
 0x69e   : > { %v14656_v40 = vpop.f32.mrf.mxu3 }
 0x69f   : > { %17947 = vst [vmem:[#allocation70_spill] sm:$0xff] %v14656_v40  ;;  %v4734_v22 = vpop.f32.mrf.mxu1  ;;  %v10921_v40 = vld [vmem:[#allocation2 + $0x68] sm:$0xff] }
 0x6a0   : > { %v14660_v38 = vpop.f32.mrf.mxu0 }
 0x6a2   : > { %10235 = vmatmul.msk.f32.gmra.mxu1 %vm382_vm0, %v10920_v48 }
 0x6a3   : > { %10202 = vmatmul.msk.f32.gmra.mxu0 %vm382_vm0, %v14134_v42  ;;  %v14684_v42 = vpop.f32.mrf.mxu2 }
 0x6a6   : > { %v14665_v29 = vpop.f32.mrf.mxu3 }
 0x6a7   : > { %17948 = vst [vmem:[#allocation71_spill] sm:$0xff] %v14665_v29  ;;  %v14667_v4 = vpop.f32.mrf.mxu1 }
 0x6a8   : > { %17949 = vst [vmem:[#allocation72_spill] sm:$0xff] %v14667_v4  ;;  %v14669_v62 = vpop.f32.mrf.mxu0 }
 0x6aa   : > { %10236 = vmatmul.msk.f32.gmra.mxu1 %vm382_vm0, %v10921_v40 }
 0x6ab   : > { %10203 = vmatmul.msk.f32.gmra.mxu0 %vm382_vm0, %v14146_v58  ;;  %v14694_v58 = vpop.f32.mrf.mxu2 }
 0x6ae   : > { %v14676_v22 = vpop.f32.mrf.mxu3 }
 0x6af   : > { %17950 = vst [vmem:[#allocation73_spill] sm:$0xff] %v14676_v22  ;;  %v14678_v48 = vpop.f32.mrf.mxu1 }
 0x6b0   : > { %17951 = vst [vmem:[#allocation74_spill] sm:$0xff] %v14678_v48  ;;  %v5576_v7 = vpop.f32.mrf.mxu0  ;;  %v14712_v48 = vld [vmem:[#allocation3] sm:$0xff] }
 0x6b1   : > { %10277 = vmatmul.msk.f32.vlgmr.msra.gmra.mxu2 %vm382_vm0, %v14712_v48  ;;  %10326 = vmatmul.msk.f32.vlgmr.msrb.gmra.mxu3 %vm382_vm0, %v14712_v48 }
 0x6b2   : > { %10237 = vmatmul.msk.f32.gmra.mxu1 %vm382_vm0, %v14455_v45 }
 0x6b3   : > { %10204 = vmatmul.msk.f32.gmra.mxu0 %vm382_vm0, %v14172_v28 }
 0x6b6   : > { %v14686_v29 = vpop.f32.mrf.mxu3 }
 0x6b7   : > { %17952 = vst [vmem:[#allocation75_spill] sm:$0xff] %v14686_v29  ;;  %v4742_v4 = vpop.f32.mrf.mxu1  ;;  %v14710_v29 = vpop.f32.mrf.mxu2 }
 0x6b8   : > { %v14688_v40 = vpop.f32.mrf.mxu0 }
 0x6ba   : > { %10238 = vmatmul.msk.f32.gmra.mxu1 %vm382_vm0, %v14479_v35 }
 0x6bb   : > { %10205 = vmatmul.msk.f32.gmra.mxu0 %vm382_vm0, %v14187_v6 }
 0x6be   : > { %v14696_v7 = vpop.f32.mrf.mxu3 }
 0x6bf   : > { %17953 = vst [vmem:[#allocation76_spill] sm:$0xff] %v14696_v7  ;;  %v14698_v45 = vpop.f32.mrf.mxu1  ;;  %v14728_v7 = vpop.f32.mrf.mxu2 }
 0x6c0   : > { %17954 = vst [vmem:[#allocation77_spill] sm:$0xff] %v14698_v45  ;;  %v14700_v28 = vpop.f32.mrf.mxu0  ;;  %v14757_v45 = vld [vmem:[#allocation3 + $0x10] sm:$0xff] }
 0x6c2   : > { %10239 = vmatmul.msk.f32.gmra.mxu1 %vm382_vm0, %v14504_v0 }
 0x6c3   : > { %10206 = vmatmul.msk.f32.gmra.mxu0 %vm382_vm0, %v14199_v51 }
 0x6c6   : > { %v14706_v4 = vpop.f32.mrf.mxu3 }
 0x6c7   : > { %17955 = vst [vmem:[#allocation78_spill] sm:$0xff] %v14706_v4  ;;  %v14708_v35 = vpop.f32.mrf.mxu1 }
 0x6c8   : > { %17956 = vst [vmem:[#allocation79_spill] sm:$0xff] %v14708_v35  ;;  %v5584_v6 = vpop.f32.mrf.mxu0 }
 0x6c9   : > { %v14726_v6 = vld [vmem:[#allocation3 + $0x8] sm:$0xff] }
 0x6ca   : > { %10240 = vmatmul.msk.f32.gmra.mxu1 %vm382_vm0, %v14520_v43  ;;  %10278 = vmatmul.msk.f32.gmra.mxu2 %vm382_vm0, %v14726_v6 }
 0x6cb   : > { %10207 = vmatmul.msk.f32.gmra.mxu0 %vm382_vm0, %v14223_v34  ;;  %v10472_v34 = vld [vmem:[%s17664_s5 + $0x20] sm:$0xff]  ;;  %10327 = vmatmul.msk.f32.gmra.mxu3 %vm382_vm0, %v14726_v6 }
 0x6cc   : > { %7517 = vmatpush.msrb.mxu2 %v10472_v34 }
 0x6ce   : > { %v14722_v51 = vpop.f32.mrf.mxu3 }
 0x6cf   : > { %17957 = vst [vmem:[#allocation80_spill] sm:$0xff] %v14722_v51  ;;  %v4750_v0 = vpop.f32.mrf.mxu1 }
 0x6d0   : > { %v14724_v35 = vpop.f32.mrf.mxu0 }
 0x6d2   : > { %10241 = vmatmul.msk.f32.gmra.mxu1 %vm382_vm0, %v14534_v5  ;;  %v14751_v5 = vpop.f32.mrf.mxu2  ;;  %10279 = vmatmul.msk.f32.gmra.mxu2 %vm382_vm0, %v14757_v45 }
 0x6d3   : > { %10208 = vmatmul.msk.f32.gmra.mxu0 %vm382_vm0, %v14238_v27  ;;  %17960 = vst [vmem:[#allocation83_spill] sm:$0xff] %v14751_v5  ;;  %10328 = vmatmul.msk.f32.gmra.mxu3 %vm382_vm0, %v14757_v45 }
 0x6d6   : > { %v14741_v43 = vpop.f32.mrf.mxu3 }
 0x6d7   : > { %17958 = vst [vmem:[#allocation81_spill] sm:$0xff] %v14741_v43  ;;  %v14743_v0 = vpop.f32.mrf.mxu1 }
 0x6d8   : > { %17959 = vst [vmem:[#allocation82_spill] sm:$0xff] %v14743_v0  ;;  %v14745_v51 = vpop.f32.mrf.mxu0 }
 0x6da   : > { %10242 = vmatmul.msk.f32.gmra.mxu1 %vm382_vm0, %v14550_v25 }
 0x6db   : > { %10209 = vmatmul.msk.f32.gmra.mxu0 %vm382_vm0, %v14250_v55  ;;  %v14767_v55 = vpop.f32.mrf.mxu2 }
 0x6de   : > { %v14753_v4 = vpop.f32.mrf.mxu3 }
 0x6df   : > { %17961 = vst [vmem:[#allocation84_spill] sm:$0xff] %v14753_v4  ;;  %v14755_v27 = vpop.f32.mrf.mxu1 }
 0x6e0   : > { %17962 = vst [vmem:[#allocation85_spill] sm:$0xff] %v14755_v27  ;;  %v5592_v34 = vpop.f32.mrf.mxu0 }
 0x6e2   : > { %10243 = vmatmul.msk.f32.gmra.mxu1 %vm382_vm0, %v14576_v56  ;;  %v10423_v56 = vld [vmem:[%s17664_s5 + $0x18] sm:$0xff] }
 0x6e3   : > { %10210 = vmatmul.msk.f32.gmra.mxu0 %vm382_vm0, %v14281_v52  ;;  %7242 = vmatpush.msrb.mxu1 %v10423_v56  ;;  %v14780_v0 = vpop.f32.mrf.mxu2 }
 0x6e4   : > { %17964 = vst [vmem:[#allocation87_spill] sm:$0xff] %v14780_v0 }
 0x6e6   : > { %v14769_v25 = vpop.f32.mrf.mxu3 }
 0x6e7   : > { %17963 = vst [vmem:[#allocation86_spill] sm:$0xff] %v14769_v25  ;;  %v4758_v27 = vpop.f32.mrf.mxu1 }
 0x6e8   : > { %v14771_v34 = vpop.f32.mrf.mxu0  ;;  %v17965_v27 = vrot.slane %v14020_v31, 7  ;;  %v14797_v31 = vld [vmem:[%s17663_s4] ss:$0 sm:$0xff] }
 0x6ea   : > { %10244 = vmatmul.msk.f32.gmra.mxu1 %vm382_vm0, %v14598_v19 }
 0x6eb   : > { %10211 = vmatmul.msk.f32.gmra.mxu0 %vm382_vm0, %v14298_v15 }
 0x6ee   : > { %v5420_v52 = vpop.f32.mrf.mxu3 }
 0x6ef   : > { %v5470_v43 = vrot.slane %v5420_v52, 7  ;;  %v5733_v4 = vpop.f32.mrf.mxu1 }
 0x6f0   : > { %v14782_v25 = vpop.f32.mrf.mxu0  ;;  %v5877_v19 = vrot.slane %v5733_v4, 1 }
 0x6f1   : > { %v5502_v22 = vsel %vm738_vm2, %v5470_v43, %v17965_v27  ;;  %v14799_v43 = vpop.f32.mrf.mxu2 }
 0x6f2   : > { %v5503_v5 = vadd.f32 %v5502_v22, %v14608_v21  ;;  %10245 = vmatmul.msk.f32.gmra.mxu1 %vm382_vm0, %v14611_v8  ;;  %v10922_v8 = vld [vmem:[#allocation2 + $0xb8] sm:$0xff] }
 0x6f3   : > { %10212 = vmatmul.msk.f32.gmra.mxu0 %vm382_vm0, %v14310_v24 }
 0x6f4   : > { %v5682_v0 = vadd.f32 %v14605_v36, %v5503_v5 }
 0x6f7   : > { %v5736_v15 = vpop.f32.mrf.mxu1 }
 0x6f8   : > { %v5878_v56 = vrot.slane %v5736_v15, 1  ;;  %v5600_v52 = vpop.f32.mrf.mxu0  ;;  %v5683_v15 = vadd.f32 %v14619_v10, %v14083_v16  ;;  %v10924_v10 = vld [vmem:[#allocation2 + $0xc8] sm:$0xff] }
 0x6f9   : > { %v10923_v52 = vld [vmem:[#allocation2 + $0xc0] sm:$0xff] }
 0x6fa   : > { %v5956_v21 = vsel %vm1193_vm1, %v5877_v19, %v5878_v56  ;;  %10246 = vmatmul.msk.f32.gmra.mxu1 %vm382_vm0, %v10922_v8 }
 0x6fb   : > { %v5957_v24 = vadd.f32 %v5956_v21, %v5682_v0  ;;  %10213 = vmatmul.msk.f32.gmra.mxu0 %vm382_vm0, %v14334_v12  ;;  %v14817_v12 = vpop.f32.mrf.mxu2 }
 0x6fd   : > { %v5993_v22 = vadd.f32 %v14797_v31, %v5957_v24 }
 0x6ff   : > { %v6025_v36 = vmax.f32 %v5993_v22, 0.0  ;;  %v5739_v4 = vpop.f32.mrf.mxu1 }
 0x700   : > { %v5879_v5 = vrot.slane %v5739_v4, 1  ;;  %v14807_v27 = vpop.f32.mrf.mxu0 }
 0x701   : > { %6081 = vst.msk [vmem:[#allocation3 + $0x18] sm:$0xff] %vm382_vm0, %v6025_v36 }
 0x702   : > { %v5955_v19 = vsel %vm1193_vm1, %v5878_v56, %v5879_v5  ;;  %10247 = vmatmul.msk.f32.gmra.mxu1 %vm382_vm0, %v10923_v52  ;;  %v10925_v52 = vld [vmem:[#allocation2 + $0xd0] sm:$0xff] }
 0x703   : > { %v5958_v0 = vadd.f32 %v5955_v19, %v5683_v15  ;;  %10214 = vmatmul.msk.f32.gmra.mxu0 %vm382_vm0, %v14349_v41  ;;  %v14832_v41 = vpop.f32.mrf.mxu2  ;;  %v5684_v19 = vadd.f32 %v14633_v50, %v14123_v61 }
 0x705   : > { %v5994_v21 = vadd.f32 %v14797_v31, %v5958_v0 }
 0x707   : > { %v6026_v8 = vmax.f32 %v5994_v21, 0.0  ;;  %v5742_v24 = vpop.f32.mrf.mxu1 }
 0x708   : > { %v14820_v22 = vpop.f32.mrf.mxu0  ;;  %v14822_v16 = vld [vmem:[#allocation3 + $0x18] sm:$0xff]  ;;  %v5880_v36 = vrot.slane %v5742_v24, 1 }
 0x709   : > { %6082 = vst.msk [vmem:[#allocation3 + $0x20] sm:$0xff] %vm382_vm0, %v6026_v8  ;;  %10280 = vmatmul.msk.f32.gmra.mxu2 %vm382_vm0, %v14822_v16  ;;  %10329 = vmatmul.msk.f32.gmra.mxu3 %vm382_vm0, %v14822_v16  ;;  %v14848_v8 = vld [vmem:[#allocation3 + $0x28] sm:$0xff] }
 0x70a   : > { %10248 = vmatmul.msk.f32.gmra.mxu1 %vm382_vm0, %v10924_v10 }
 0x70b   : > { %10215 = vmatmul.msk.f32.gmra.mxu0 %vm382_vm0, %v14361_v54  ;;  %v14850_v24 = vpop.f32.mrf.mxu2 }
 0x70f   : > { %v5745_v56 = vpop.f32.mrf.mxu1 }
 0x710   : > { %v5881_v4 = vrot.slane %v5745_v56, 1  ;;  %v5608_v5 = vpop.f32.mrf.mxu0  ;;  %v14834_v15 = vld [vmem:[#allocation3 + $0x20] sm:$0xff] }
 0x711   : > { %10281 = vmatmul.msk.f32.gmra.mxu2 %vm382_vm0, %v14834_v15  ;;  %10330 = vmatmul.msk.f32.gmra.mxu3 %vm382_vm0, %v14834_v15  ;;  %v10926_v5 = vld [vmem:[#allocation2 + $0xd8] sm:$0xff] }
 0x712   : > { %v5954_v54 = vsel %vm1193_vm1, %v5880_v36, %v5881_v4  ;;  %10249 = vmatmul.msk.f32.gmra.mxu1 %vm382_vm0, %v10925_v52  ;;  %v5685_v36 = vadd.f32 %v14642_v63, %v14140_v3 }
 0x713   : > { %v5959_v0 = vadd.f32 %v5954_v54, %v5684_v19  ;;  %10216 = vmatmul.msk.f32.gmra.mxu0 %vm382_vm0, %v14385_v1 }
 0x715   : > { %v5995_v21 = vadd.f32 %v14797_v31, %v5959_v0 }
 0x717   : > { %v6027_v61 = vmax.f32 %v5995_v21, 0.0  ;;  %v5748_v50 = vpop.f32.mrf.mxu1  ;;  %v10927_v21 = vld [vmem:[#allocation2 + $0xe0] sm:$0xff] }
 0x718   : > { %v5882_v10 = vrot.slane %v5748_v50, 1  ;;  %v14852_v56 = vpop.f32.mrf.mxu0 }
 0x719   : > { %6083 = vst.msk [vmem:[#allocation3 + $0x30] sm:$0xff] %vm382_vm0, %v6027_v61  ;;  %10282 = vmatmul.msk.f32.gmra.mxu2 %vm382_vm0, %v14848_v8  ;;  %10331 = vmatmul.msk.f32.gmra.mxu3 %vm382_vm0, %v14848_v8 }
 0x71a   : > { %v5953_v1 = vsel %vm1193_vm1, %v5881_v4, %v5882_v10  ;;  %10250 = vmatmul.msk.f32.gmra.mxu1 %vm382_vm0, %v10926_v5  ;;  %v14876_v4 = vpop.f32.mrf.mxu2 }
 0x71b   : > { %v5960_v19 = vadd.f32 %v5953_v1, %v5685_v36  ;;  %10217 = vmatmul.msk.f32.gmra.mxu0 %vm382_vm0, %v14400_v20  ;;  %v5686_v1 = vadd.f32 %v14660_v38, %v14178_v13  ;;  %v14897_v38 = vld [vmem:[#allocation3 + $0x40] sm:$0xff] }
 0x71d   : > { %v5996_v3 = vadd.f32 %v14797_v31, %v5960_v19  ;;  %v10928_v19 = vld [vmem:[#allocation2 + $0xe8] sm:$0xff] }
 0x71f   : > { %v6028_v63 = vmax.f32 %v5996_v3, 0.0  ;;  %v5751_v54 = vpop.f32.mrf.mxu1 }
 0x720   : > { %v14867_v52 = vpop.f32.mrf.mxu0  ;;  %v14869_v0 = vld [vmem:[#allocation3 + $0x30] sm:$0xff]  ;;  %v5883_v61 = vrot.slane %v5751_v54, 1 }
 0x721   : > { %6084 = vst.msk [vmem:[#allocation3 + $0x38] sm:$0xff] %vm382_vm0, %v6028_v63  ;;  %10283 = vmatmul.msk.f32.gmra.mxu2 %vm382_vm0, %v14869_v0  ;;  %10332 = vmatmul.msk.f32.gmra.mxu3 %vm382_vm0, %v14869_v0 }
 0x722   : > { %10251 = vmatmul.msk.f32.gmra.mxu1 %vm382_vm0, %v10927_v21  ;;  %v14894_v3 = vpop.f32.mrf.mxu2 }
 0x723   : > { %10218 = vmatmul.msk.f32.gmra.mxu0 %vm382_vm0, %v14412_v26 }
 0x727   : > { %v5754_v20 = vpop.f32.mrf.mxu1 }
 0x728   : > { %v5884_v50 = vrot.slane %v5754_v20, 1  ;;  %v5616_v10 = vpop.f32.mrf.mxu0  ;;  %v14881_v36 = vld [vmem:[#allocation3 + $0x38] sm:$0xff] }
 0x729   : > { %10284 = vmatmul.msk.f32.gmra.mxu2 %vm382_vm0, %v14881_v36  ;;  %10333 = vmatmul.msk.f32.gmra.mxu3 %vm382_vm0, %v14881_v36  ;;  %v10929_v10 = vld [vmem:[#allocation2 + $0xf0] sm:$0xff] }
 0x72a   : > { %v5952_v5 = vsel %vm1193_vm1, %v5883_v61, %v5884_v50  ;;  %10252 = vmatmul.msk.f32.gmra.mxu1 %vm382_vm0, %v10928_v19  ;;  %v5687_v61 = vadd.f32 %v14669_v62, %v14193_v30  ;;  %v14914_v62 = vpop.f32.mrf.mxu2 }
 0x72b   : > { %v5961_v26 = vadd.f32 %v5952_v5, %v5686_v1  ;;  %10219 = vmatmul.msk.f32.gmra.mxu0 %vm382_vm0, %v14436_v60  ;;  %17966 = vst [vmem:[#allocation88_spill] sm:$0xff] %v14914_v62 }
 0x72d   : > { %v5997_v13 = vadd.f32 %v14797_v31, %v5961_v26 }
 0x72f   : > { %v6029_v63 = vmax.f32 %v5997_v13, 0.0  ;;  %v5757_v54 = vpop.f32.mrf.mxu1 }
 0x730   : > { %v5885_v21 = vrot.slane %v5757_v54, 1  ;;  %v14899_v20 = vpop.f32.mrf.mxu0 }
 0x731   : > { %6085 = vst.msk [vmem:[#allocation3 + $0x48] sm:$0xff] %vm382_vm0, %v6029_v63  ;;  %10285 = vmatmul.msk.f32.gmra.mxu2 %vm382_vm0, %v14897_v38  ;;  %10334 = vmatmul.msk.f32.gmra.mxu3 %vm382_vm0, %v14897_v38 }
 0x732   : > { %v5951_v60 = vsel %vm1193_vm1, %v5884_v50, %v5885_v21  ;;  %10253 = vmatmul.msk.f32.gmra.mxu1 %vm382_vm0, %v10929_v10  ;;  %v10930_v50 = vld [vmem:[#allocation2 + $0xf8] sm:$0xff]  ;;  %v14928_v63 = vpop.f32.mrf.mxu2  ;;  %v5688_v10 = vadd.f32 %v14688_v40, %v14229_v23 }
 0x733   : > { %v5962_v1 = vadd.f32 %v5951_v60, %v5687_v61  ;;  %10220 = vmatmul.msk.f32.gmra.mxu0 %vm382_vm0, %v14451_v18  ;;  %17967 = vst [vmem:[#allocation89_spill] sm:$0xff] %v14928_v63 }
 0x735   : > { %v5998_v30 = vadd.f32 %v14797_v31, %v5962_v1  ;;  %v10931_v1 = vld [vmem:[#allocation2 + $0x100] sm:$0xff] }
 0x737   : > { %v6030_v5 = vmax.f32 %v5998_v30, 0.0  ;;  %v5760_v19 = vpop.f32.mrf.mxu1 }
 0x738   : > { %v14916_v26 = vpop.f32.mrf.mxu0  ;;  %v14918_v13 = vld [vmem:[#allocation3 + $0x48] sm:$0xff]  ;;  %v5886_v54 = vrot.slane %v5760_v19, 1  ;;  %v14944_v19 = vld [vmem:[#allocation3 + $0x58] sm:$0xff] }
 0x739   : > { %6086 = vst.msk [vmem:[#allocation3 + $0x50] sm:$0xff] %vm382_vm0, %v6030_v5  ;;  %10286 = vmatmul.msk.f32.gmra.mxu2 %vm382_vm0, %v14918_v13  ;;  %10335 = vmatmul.msk.f32.gmra.mxu3 %vm382_vm0, %v14918_v13 }
 0x73a   : > { %10254 = vmatmul.msk.f32.gmra.mxu1 %vm382_vm0, %v10930_v50 }
 0x73b   : > { %10221 = vmatmul.msk.f32.gmra.mxu0 %vm382_vm0, %v14469_v32 }
 0x73f   : > { %v5763_v18 = vpop.f32.mrf.mxu1 }
 0x740   : > { %v5887_v21 = vrot.slane %v5763_v18, 1  ;;  %v5624_v61 = vpop.f32.mrf.mxu0  ;;  %v14930_v60 = vld [vmem:[#allocation3 + $0x50] sm:$0xff] }
 0x741   : > { %10287 = vmatmul.msk.f32.gmra.mxu2 %vm382_vm0, %v14930_v60  ;;  %10336 = vmatmul.msk.f32.gmra.mxu3 %vm382_vm0, %v14930_v60  ;;  %v5689_v61 = vadd.f32 %v14700_v28, %v14244_v14 }
 0x742   : > { %v5950_v32 = vsel %vm1193_vm1, %v5886_v54, %v5887_v21  ;;  %10255 = vmatmul.msk.f32.gmra.mxu1 %vm382_vm0, %v10931_v1 }
 0x743   : > { %v5963_v30 = vadd.f32 %v5950_v32, %v5688_v10  ;;  %10222 = vmatmul.msk.f32.gmra.mxu0 %vm382_vm0, %v14258_v33  ;;  %v14955_v33 = vpop.f32.mrf.mxu2  ;;  %v10932_v10 = vld [vmem:[#allocation2 + $0x108] sm:$0xff] }
 0x744   : > { %17968 = vst [vmem:[#allocation90_spill] sm:$0xff] %v14955_v33 }
 0x745   : > { %v5999_v5 = vadd.f32 %v14797_v31, %v5963_v30 }
 0x747   : > { %v6031_v23 = vmax.f32 %v5999_v5, 0.0  ;;  %v5766_v40 = vpop.f32.mrf.mxu1 }
 0x748   : > { %v5888_v50 = vrot.slane %v5766_v40, 1  ;;  %v14946_v18 = vpop.f32.mrf.mxu0 }
 0x749   : > { %6087 = vst.msk [vmem:[#allocation3 + $0x60] sm:$0xff] %vm382_vm0, %v6031_v23  ;;  %10288 = vmatmul.msk.f32.gmra.mxu2 %vm382_vm0, %v14944_v19  ;;  %10337 = vmatmul.msk.f32.gmra.mxu3 %vm382_vm0, %v14944_v19  ;;  %v14977_v23 = vpop.f32.mrf.mxu3 }
 0x74a   : > { %v5949_v54 = vsel %vm1193_vm1, %v5887_v21, %v5888_v50  ;;  %10256 = vmatmul.msk.f32.gmra.mxu1 %vm382_vm0, %v10932_v10  ;;  %v10933_v21 = vld [vmem:[#allocation2 + $0x110] sm:$0xff]  ;;  %17970 = vst [vmem:[#allocation92_spill] sm:$0xff] %v14977_v23 }
 0x74b   : > { %v5964_v32 = vadd.f32 %v5949_v54, %v5689_v61  ;;  %10223 = vmatmul.msk.f32.gmra.mxu0 %vm382_vm0, %v14279_v53  ;;  %v14975_v53 = vpop.f32.mrf.mxu2 }
 0x74c   : > { %17969 = vst [vmem:[#allocation91_spill] sm:$0xff] %v14975_v53 }
 0x74d   : > { %v6000_v14 = vadd.f32 %v14797_v31, %v5964_v32  ;;  %v5690_v32 = vadd.f32 %v14724_v35, %v14287_v2  ;;  %v14995_v2 = vld [vmem:[#allocation3 + $0x70] sm:$0xff] }
 0x74f   : > { %v6032_v28 = vmax.f32 %v6000_v14, 0.0  ;;  %v5769_v1 = vpop.f32.mrf.mxu1  ;;  %v10934_v14 = vld [vmem:[#allocation2 + $0x118] sm:$0xff] }
 0x750   : > { %v14963_v30 = vpop.f32.mrf.mxu0  ;;  %v14965_v5 = vld [vmem:[#allocation3 + $0x60] sm:$0xff]  ;;  %v5889_v50 = vrot.slane %v5769_v1, 1 }
 0x751   : > { %6088 = vst.msk [vmem:[#allocation3 + $0x68] sm:$0xff] %vm382_vm0, %v6032_v28  ;;  %10289 = vmatmul.msk.f32.gmra.mxu2 %vm382_vm0, %v14965_v5  ;;  %10338 = vmatmul.msk.f32.gmra.mxu3 %vm382_vm0, %v14965_v5  ;;  %v14997_v35 = vpop.f32.mrf.mxu3 }
 0x752   : > { %10257 = vmatmul.msk.f32.gmra.mxu1 %vm382_vm0, %v10933_v21  ;;  %17972 = vst [vmem:[#allocation94_spill] sm:$0xff] %v14997_v35 }
 0x753   : > { %10224 = vmatmul.msk.f32.gmra.mxu0 %vm382_vm0, %v14294_v49  ;;  %v14993_v21 = vpop.f32.mrf.mxu2 }
 0x754   : > { %17971 = vst [vmem:[#allocation93_spill] sm:$0xff] %v14993_v21 }
 0x757   : > { %v5772_v40 = vpop.f32.mrf.mxu1 }
 0x758   : > { %v5890_v61 = vrot.slane %v5772_v40, 1  ;;  %v5632_v54 = vpop.f32.mrf.mxu0  ;;  %v14979_v10 = vld [vmem:[#allocation3 + $0x68] sm:$0xff] }
 0x759   : > { %10290 = vmatmul.msk.f32.gmra.mxu2 %vm382_vm0, %v14979_v10  ;;  %10339 = vmatmul.msk.f32.gmra.mxu3 %vm382_vm0, %v14979_v10 }
 0x75a   : > { %v5948_v49 = vsel %vm1193_vm1, %v5889_v50, %v5890_v61  ;;  %10258 = vmatmul.msk.f32.gmra.mxu1 %vm382_vm0, %v10934_v14  ;;  %v17973_v50 = vld [vmem:[#allocation20_spill] sm:$0xff] }
 0x75b   : > { %v5965_v28 = vadd.f32 %v5948_v49, %v5690_v32  ;;  %10225 = vmatmul.msk.f32.gmra.mxu0 %vm382_vm0, %v14542_v39  ;;  %v5691_v14 = vadd.f32 %v14745_v51, %v17973_v50  ;;  %v10570_v39 = vld [vmem:[%s17664_s5 + $0x30] sm:$0xff]  ;;  %v10935_v49 = vld [vmem:[#allocation2 + $0x120] sm:$0xff]  ;;  %v15017_v50 = vpop.f32.mrf.mxu2 }
 0x75c   : > { %8164 = vmatpush.msra.mxu0 %v10570_v39  ;;  %17974 = vst [vmem:[#allocation20_spill] sm:$0xff] %v15017_v50 }
 0x75d   : > { %v6001_v1 = vadd.f32 %v14797_v31, %v5965_v28 }
 0x75f   : > { %v6033_v40 = vmax.f32 %v6001_v1, 0.0  ;;  %v5775_v54 = vpop.f32.mrf.mxu1  ;;  %v6604_v1 = vpop.f32.mrf.mxu3 }
 0x760   : > { %v5891_v23 = vrot.slane %v5775_v54, 1  ;;  %v14999_v53 = vpop.f32.mrf.mxu0  ;;  %v10937_v1 = vld [vmem:[#allocation2 + $0x130] sm:$0xff] }
 0x761   : > { %6089 = vst.msk [vmem:[#allocation3 + $0x78] sm:$0xff] %vm382_vm0, %v6033_v40  ;;  %10291 = vmatmul.msk.f32.gmra.mxu2 %vm382_vm0, %v14995_v2  ;;  %10340 = vmatmul.msk.f32.gmra.mxu3 %vm382_vm0, %v14995_v2 }
 0x762   : > { %v5947_v32 = vsel %vm1193_vm1, %v5890_v61, %v5891_v23  ;;  %10259 = vmatmul.msk.f32.gmra.mxu1 %vm382_vm0, %v10935_v49 }
 0x763   : > { %v5966_v51 = vadd.f32 %v5947_v32, %v5691_v14  ;;  %10226 = vmatmul.msk.f32.gmra.mxu0 %vm382_vm0, %v14564_v46  ;;  %v10936_v46 = vld [vmem:[#allocation2 + $0x128] sm:$0xff]  ;;  %v15031_v14 = vpop.f32.mrf.mxu2 }
 0x764   : > { %17975 = vst [vmem:[#allocation95_spill] sm:$0xff] %v15031_v14  ;;  %v17977_v14 = vld [vmem:[#allocation6_spill] sm:$0xff] }
 0x765   : > { %v6002_v28 = vadd.f32 %v14797_v31, %v5966_v51  ;;  %v17976_v51 = vld [vmem:[#allocation21_spill] sm:$0xff]  ;;  %v5693_v50 = vadd.f32 %v14782_v25, %v17977_v14 }
 0x767   : > { %v6034_v40 = vmax.f32 %v6002_v28, 0.0  ;;  %v5778_v54 = vpop.f32.mrf.mxu1  ;;  %v5692_v28 = vadd.f32 %v14771_v34, %v17976_v51 }
 0x768   : > { %v15019_v35 = vpop.f32.mrf.mxu0  ;;  %v15021_v21 = vld [vmem:[#allocation3 + $0x78] sm:$0xff]  ;;  %v5892_v61 = vrot.slane %v5778_v54, 1 }
 0x769   : > { %6090 = vst.msk [vmem:[#allocation3 + $0x80] sm:$0xff] %vm382_vm0, %v6034_v40  ;;  %10292 = vmatmul.msk.f32.gmra.mxu2 %vm382_vm0, %v15021_v21  ;;  %10341 = vmatmul.msk.f32.gmra.mxu3 %vm382_vm0, %v15021_v21 }
 0x76a   : > { %10260 = vmatmul.msk.f32.gmra.mxu1 %vm382_vm0, %v10936_v46  ;;  %v15047_v46 = vld [vmem:[#allocation3 + $0x88] sm:$0xff] }
 0x76b   : > { %10227 = vmatmul.msk.f32.gmra.mxu0 %vm382_vm0, %v14585_v57 }
 0x76f   : > { %v5781_v23 = vpop.f32.mrf.mxu1 }
 0x770   : > { %v5893_v39 = vrot.slane %v5781_v23, 1  ;;  %v5640_v32 = vpop.f32.mrf.mxu0  ;;  %v15033_v49 = vld [vmem:[#allocation3 + $0x80] sm:$0xff] }
 0x771   : > { %10293 = vmatmul.msk.f32.gmra.mxu2 %vm382_vm0, %v15033_v49  ;;  %10342 = vmatmul.msk.f32.gmra.mxu3 %vm382_vm0, %v15033_v49 }
 0x772   : > { %v5946_v57 = vsel %vm1193_vm1, %v5892_v61, %v5893_v39  ;;  %10261 = vmatmul.msk.f32.gmra.mxu1 %vm382_vm0, %v10937_v1 }
 0x773   : > { %v5967_v40 = vadd.f32 %v5946_v57, %v5692_v28  ;;  %10375 = vmatmul.msk.f32.vlgmr.msrb.gmra.mxu0 %vm382_vm0, %v14712_v48  ;;  %v15058_v48 = vpop.f32.mrf.mxu2  ;;  %v10938_v28 = vld [vmem:[#allocation2 + $0x138] sm:$0xff] }
 0x774   : > { %17978 = vst [vmem:[#allocation21_spill] sm:$0xff] %v15058_v48 }
 0x775   : > { %v6003_v54 = vadd.f32 %v14797_v31, %v5967_v40 }
 0x777   : > { %v6035_v34 = vmax.f32 %v6003_v54, 0.0  ;;  %v5784_v23 = vpop.f32.mrf.mxu1 }
 0x778   : > { %v5894_v32 = vrot.slane %v5784_v23, 1  ;;  %v15049_v51 = vpop.f32.mrf.mxu0 }
 0x779   : > { %6091 = vst.msk [vmem:[#allocation3 + $0x90] sm:$0xff] %vm382_vm0, %v6035_v34  ;;  %10294 = vmatmul.msk.f32.gmra.mxu2 %vm382_vm0, %v15047_v46  ;;  %10343 = vmatmul.msk.f32.gmra.mxu3 %vm382_vm0, %v15047_v46 }
 0x77a   : > { %v5945_v61 = vsel %vm1193_vm1, %v5893_v39, %v5894_v32  ;;  %10262 = vmatmul.msk.f32.gmra.mxu1 %vm382_vm0, %v10938_v28  ;;  %v17979_v28 = vld [vmem:[#allocation30_spill] sm:$0xff] }
 0x77b   : > { %v5968_v57 = vadd.f32 %v5945_v61, %v5693_v50  ;;  %10376 = vmatmul.msk.f32.gmra.mxu0 %vm382_vm0, %v14726_v6  ;;  %v10939_v50 = vld [vmem:[#allocation2 + $0x140] sm:$0xff]  ;;  %v6329_v6 = vpop.f32.mrf.mxu2 }
 0x77d   : > { %v6004_v25 = vadd.f32 %v14797_v31, %v5968_v57  ;;  %v5694_v57 = vadd.f32 %v14807_v27, %v17979_v28  ;;  %v15092_v28 = vld [vmem:[#allocation3 + $0xa0] sm:$0xff] }
 0x77f   : > { %v6036_v14 = vmax.f32 %v6004_v25, 0.0  ;;  %v5787_v1 = vpop.f32.mrf.mxu1 }
 0x780   : > { %v15066_v40 = vpop.f32.mrf.mxu0  ;;  %v15068_v54 = vld [vmem:[#allocation3 + $0x90] sm:$0xff]  ;;  %v5895_v34 = vrot.slane %v5787_v1, 1 }
 0x781   : > { %6092 = vst.msk [vmem:[#allocation3 + $0x98] sm:$0xff] %vm382_vm0, %v6036_v14  ;;  %10295 = vmatmul.msk.f32.gmra.mxu2 %vm382_vm0, %v15068_v54  ;;  %10344 = vmatmul.msk.f32.gmra.mxu3 %vm382_vm0, %v15068_v54  ;;  %v10940_v14 = vld [vmem:[#allocation2 + $0x148] sm:$0xff] }
 0x782   : > { %10263 = vmatmul.msk.f32.gmra.mxu1 %vm382_vm0, %v10939_v50 }
 0x783   : > { %10377 = vmatmul.msk.f32.gmra.mxu0 %vm382_vm0, %v14757_v45 }
 0x787   : > { %v5790_v39 = vpop.f32.mrf.mxu1 }
 0x788   : > { %v5896_v23 = vrot.slane %v5790_v39, 1  ;;  %v5648_v32 = vpop.f32.mrf.mxu0  ;;  %v15078_v61 = vld [vmem:[#allocation3 + $0x98] sm:$0xff]  ;;  %v6469_v39 = vrot.slane %v6329_v6, 7 }
 0x789   : > { %10296 = vmatmul.msk.f32.gmra.mxu2 %vm382_vm0, %v15078_v61  ;;  %10345 = vmatmul.msk.f32.gmra.mxu3 %vm382_vm0, %v15078_v61 }
 0x78a   : > { %v5944_v25 = vsel %vm1193_vm1, %v5895_v34, %v5896_v23  ;;  %10264 = vmatmul.msk.f32.gmra.mxu1 %vm382_vm0, %v10940_v14 }
 0x78b   : > { %v5969_v45 = vadd.f32 %v5944_v25, %v5694_v57  ;;  %10378 = vmatmul.msk.f32.gmra.mxu0 %vm382_vm0, %v14822_v16  ;;  %v17981_v25 = vld [vmem:[#allocation8_spill] sm:$0xff] }
 0x78c   : > { %v6332_v1 = vpop.f32.mrf.mxu2  ;;  %v6606_v50 = vpop.f32.mrf.mxu3  ;;  %v5695_v63 = vadd.f32 %v14820_v22, %v17981_v25 }
 0x78d   : > { %v6005_v27 = vadd.f32 %v14797_v31, %v5969_v45  ;;  %v6470_v32 = vrot.slane %v6332_v1, 7  ;;  %v10941_v45 = vld [vmem:[#allocation2 + $0x150] sm:$0xff] }
 0x78f   : > { %v6037_v48 = vmax.f32 %v6005_v27, 0.0  ;;  %v6544_v33 = vsel %vm738_vm2, %v6469_v39, %v6470_v32  ;;  %v5793_v34 = vpop.f32.mrf.mxu1 }
 0x790   : > { %v15096_v62 = vadd.f32 %v6606_v50, %v6544_v33  ;;  %v5897_v14 = vrot.slane %v5793_v34, 1  ;;  %v15098_v57 = vpop.f32.mrf.mxu0 }
 0x791   : > { %6093 = vst.msk [vmem:[#allocation3 + $0xa8] sm:$0xff] %vm382_vm0, %v6037_v48  ;;  %10297 = vmatmul.msk.f32.gmra.mxu2 %vm382_vm0, %v15092_v28  ;;  %10346 = vmatmul.msk.f32.gmra.mxu3 %vm382_vm0, %v15092_v28 }
 0x792   : > { %17980 = vst [vmem:[#allocation6_spill] sm:$0xff] %v15096_v62  ;;  %v5943_v6 = vsel %vm1193_vm1, %v5896_v23, %v5897_v14  ;;  %10265 = vmatmul.msk.f32.gmra.mxu1 %vm382_vm0, %v10941_v45 }
 0x793   : > { %v5970_v33 = vadd.f32 %v5943_v6, %v5695_v63  ;;  %10379 = vmatmul.msk.f32.gmra.mxu0 %vm382_vm0, %v14834_v15  ;;  %v10942_v63 = vld [vmem:[#allocation2 + $0x158] sm:$0xff] }
 0x794   : > { %v6335_v1 = vpop.f32.mrf.mxu2  ;;  %v6609_v22 = vpop.f32.mrf.mxu3 }
 0x795   : > { %v6006_v48 = vadd.f32 %v14797_v31, %v5970_v33  ;;  %v6471_v50 = vrot.slane %v6335_v1, 7 }
 0x797   : > { %v6038_v39 = vmax.f32 %v6006_v48, 0.0  ;;  %v6543_v27 = vsel %vm738_vm2, %v6470_v32, %v6471_v50  ;;  %v5796_v34 = vpop.f32.mrf.mxu1  ;;  %v5696_v50 = vadd.f32 %v14852_v56, %v14442_v44 }
 0x798   : > { %v15115_v25 = vadd.f32 %v6609_v22, %v6543_v27  ;;  %v15117_v23 = vpop.f32.mrf.mxu0  ;;  %v15119_v14 = vld [vmem:[#allocation3 + $0xa8] sm:$0xff]  ;;  %v5898_v33 = vrot.slane %v5796_v34, 1 }
 0x799   : > { %6094 = vst.msk [vmem:[#allocation3 + $0xb0] sm:$0xff] %vm382_vm0, %v6038_v39  ;;  %10298 = vmatmul.msk.f32.gmra.mxu2 %vm382_vm0, %v15119_v14  ;;  %10347 = vmatmul.msk.f32.gmra.mxu3 %vm382_vm0, %v15119_v14  ;;  %v10943_v39 = vld [vmem:[#allocation2 + $0x160] sm:$0xff] }
 0x79a   : > { %17982 = vst [vmem:[#allocation30_spill] sm:$0xff] %v15115_v25  ;;  %10266 = vmatmul.msk.f32.gmra.mxu1 %vm382_vm0, %v10942_v63 }
 0x79b   : > { %10380 = vmatmul.msk.f32.gmra.mxu0 %vm382_vm0, %v14848_v8 }
 0x79c   : > { %v6338_v32 = vpop.f32.mrf.mxu2  ;;  %v6612_v6 = vpop.f32.mrf.mxu3 }
 0x79d   : > { %v6472_v6 = vrot.slane %v6338_v32, 7 }
 0x79f   : > { %v5799_v45 = vpop.f32.mrf.mxu1 }
 0x7a0   : > { %v5899_v1 = vrot.slane %v5799_v45, 1  ;;  %v5656_v22 = vpop.f32.mrf.mxu0  ;;  %v15129_v48 = vld [vmem:[#allocation3 + $0xb0] sm:$0xff]  ;;  %v15143_v45 = vld [vmem:[#allocation3 + $0xb8] sm:$0xff] }
 0x7a1   : > { %10299 = vmatmul.msk.f32.gmra.mxu2 %vm382_vm0, %v15129_v48  ;;  %10348 = vmatmul.msk.f32.gmra.mxu3 %vm382_vm0, %v15129_v48 }
 0x7a2   : > { %v5942_v8 = vsel %vm1193_vm1, %v5898_v33, %v5899_v1  ;;  %10267 = vmatmul.msk.f32.gmra.mxu1 %vm382_vm0, %v10943_v39 }
 0x7a3   : > { %v5971_v27 = vadd.f32 %v5942_v8, %v5696_v50  ;;  %10381 = vmatmul.msk.f32.gmra.mxu0 %vm382_vm0, %v14869_v0  ;;  %v5697_v0 = vadd.f32 %v14867_v52, %v14459_v9  ;;  %v10944_v8 = vld [vmem:[#allocation2 + $0x168] sm:$0xff] }
 0x7a4   : > { %v6341_v34 = vpop.f32.mrf.mxu2  ;;  %v6614_v63 = vpop.f32.mrf.mxu3 }
 0x7a5   : > { %v6007_v44 = vadd.f32 %v14797_v31, %v5971_v27  ;;  %v6473_v56 = vrot.slane %v6341_v34, 7 }
 0x7a7   : > { %v6039_v22 = vmax.f32 %v6007_v44, 0.0  ;;  %v6542_v25 = vsel %vm738_vm2, %v6472_v6, %v6473_v56  ;;  %v5802_v33 = vpop.f32.mrf.mxu1 }
 0x7a8   : > { %v15147_v62 = vadd.f32 %v6614_v63, %v6542_v25  ;;  %v5900_v39 = vrot.slane %v5802_v33, 1  ;;  %v15149_v50 = vpop.f32.mrf.mxu0 }
 0x7a9   : > { %6095 = vst.msk [vmem:[#allocation3 + $0xc0] sm:$0xff] %vm382_vm0, %v6039_v22  ;;  %10300 = vmatmul.msk.f32.gmra.mxu2 %vm382_vm0, %v15143_v45  ;;  %10349 = vmatmul.msk.f32.gmra.mxu3 %vm382_vm0, %v15143_v45  ;;  %v17984_v22 = vld [vmem:[#allocation13_spill] sm:$0xff] }
 0x7aa   : > { %17983 = vst [vmem:[#allocation8_spill] sm:$0xff] %v15147_v62  ;;  %v5941_v32 = vsel %vm1193_vm1, %v5899_v1, %v5900_v39  ;;  %10268 = vmatmul.msk.f32.gmra.mxu1 %vm382_vm0, %v10944_v8  ;;  %v4526_v33 = vrot.slane %v17984_v22, 7 }
 0x7ab   : > { %v5972_v25 = vadd.f32 %v5941_v32, %v5697_v0  ;;  %10382 = vmatmul.msk.f32.gmra.mxu0 %vm382_vm0, %v14881_v36  ;;  %v10945_v36 = vld [vmem:[#allocation2 + $0x170] sm:$0xff] }
 0x7ac   : > { %v6344_v27 = vpop.f32.mrf.mxu2  ;;  %v6617_v9 = vpop.f32.mrf.mxu3 }
 0x7ad   : > { %v6008_v52 = vadd.f32 %v14797_v31, %v5972_v25  ;;  %v6474_v34 = vrot.slane %v6344_v27, 7  ;;  %v4981_v25 = vrot.slane %v14647_v11, 1 }
 0x7af   : > { %v6040_v63 = vmax.f32 %v6008_v52, 0.0  ;;  %v6541_v6 = vsel %vm738_vm2, %v6473_v56, %v6474_v34  ;;  %v5805_v44 = vpop.f32.mrf.mxu1  ;;  %v17988_v56 = vld [vmem:[#allocation47_spill] sm:$0xff]  ;;  %v17990_v52 = vld [vmem:[#allocation14_spill] sm:$0xff] }
 0x7b0   : > { %v15167_v1 = vadd.f32 %v6617_v9, %v6541_v6  ;;  %v15169_v39 = vpop.f32.mrf.mxu0  ;;  %v15171_v0 = vld [vmem:[#allocation3 + $0xc0] sm:$0xff]  ;;  %v17989_v32 = vrot.slane %v17988_v56, 7  ;;  %v17991_v6 = vld [vmem:[#allocation9_spill] sm:$0xff] }
 0x7b1   : > { %17986 = vst [vmem:[#allocation96_spill] sm:$0xff] %v15169_v39  ;;  %10301 = vmatmul.msk.f32.gmra.mxu2 %vm382_vm0, %v15171_v0  ;;  %10350 = vmatmul.msk.f32.gmra.mxu3 %vm382_vm0, %v15171_v0  ;;  %v17992_v22 = vrot.slane %v17991_v6, 1  ;;  %v17994_v56 = vld [vmem:[#allocation5_spill] sm:$0xff] }
 0x7b2   : > { %17985 = vst [vmem:[#allocation13_spill] sm:$0xff] %v15167_v1  ;;  %10269 = vmatmul.msk.f32.gmra.mxu1 %vm382_vm0, %v10945_v36  ;;  %v4563_v8 = vsel %vm738_vm2, %v17989_v32, %v4526_v33  ;;  %v5901_v1 = vrot.slane %v5805_v44, 1  ;;  %v17995_v33 = vld [vmem:[#allocation49_spill] sm:$0xff]  ;;  %v17996_v32 = vld [vmem:[#allocation11_spill] sm:$0xff] }
 0x7b3   : > { %17987 = vst [vmem:[#allocation97_spill] sm:$0xff] %v15171_v0  ;;  %10383 = vmatmul.msk.f32.gmra.mxu0 %vm382_vm0, %v14897_v38  ;;  %v4598_v34 = vadd.f32 %v4563_v8, %v17990_v52  ;;  %v5017_v36 = vsel %vm1193_vm1, %v17992_v22, %v4981_v25  ;;  %v5698_v11 = vadd.f32 %v14899_v20, %v17995_v33  ;;  %v5448_v8 = vrot.slane %v17996_v32, 7  ;;  %v10946_v25 = vld [vmem:[#allocation2 + $0x178] sm:$0xff] }
 0x7b4   : > { %6096 = vst.msk [vmem:[#allocation3 + $0xc8] sm:$0xff] %vm382_vm0, %v6040_v63  ;;  %v6347_v27 = vpop.f32.mrf.mxu2  ;;  %v6620_v9 = vpop.f32.mrf.mxu3 }
 0x7b5   : > { %v4777_v0 = vadd.f32 %v17994_v56, %v4598_v34 }
 0x7b7   : > { %v5808_v63 = vpop.f32.mrf.mxu1  ;;  %v5052_v9 = vadd.f32 %v5017_v36, %v4777_v0 }
 0x7b8   : > { %v5902_v62 = vrot.slane %v5808_v63, 1  ;;  %v5664_v38 = vpop.f32.mrf.mxu0  ;;  %v6475_v63 = vrot.slane %v6347_v27, 7 }
 0x7b9   : > { %v17997_v38 = vld [vmem:[#allocation36_spill] sm:$0xff] }
 0x7ba   : > { %v5940_v44 = vsel %vm1193_vm1, %v5901_v1, %v5902_v62  ;;  %10270 = vmatmul.msk.f32.gmra.mxu1 %vm382_vm0, %v10946_v25  ;;  %v17998_v56 = vrot.slane %v17997_v38, 7  ;;  %v15211_v1 = vld [vmem:[#allocation3 + $0xd0] sm:$0xff] }
 0x7bb   : > { %v15191_v39 = vld [vmem:[#allocation3 + $0xc8] sm:$0xff]  ;;  %v5973_v52 = vadd.f32 %v5940_v44, %v5698_v11  ;;  %10384 = vmatmul.msk.f32.gmra.mxu0 %vm382_vm0, %v14918_v13  ;;  %v17999_v13 = vld [vmem:[#allocation18_spill] sm:$0xff]  ;;  %v18000_v44 = vld [vmem:[#allocation24_spill] sm:$0xff] }
 0x7bc   : > { %17993 = vst [vmem:[#allocation47_spill] sm:$0xff] %v15191_v39  ;;  %10302 = vmatmul.msk.f32.gmra.mxu2 %vm382_vm0, %v15191_v39  ;;  %10351 = vmatmul.msk.f32.gmra.mxu3 %vm382_vm0, %v15191_v39  ;;  %v6350_v20 = vpop.f32.mrf.mxu2  ;;  %v6622_v34 = vpop.f32.mrf.mxu3  ;;  %v5485_v33 = vsel %vm738_vm2, %v17998_v56, %v5448_v8  ;;  %v4527_v11 = vrot.slane %v17999_v13, 7  ;;  %v4528_v27 = vrot.slane %v18000_v44, 7 }
 0x7bd   : > { %v6009_v6 = vadd.f32 %v14797_v31, %v5973_v52  ;;  %v6476_v22 = vrot.slane %v6350_v20, 7  ;;  %v5520_v32 = vadd.f32 %v5485_v33, %v5052_v9  ;;  %v10947_v9 = vld [vmem:[#allocation2 + $0x180] sm:$0xff] }
 0x7bf   : > { %v6041_v25 = vmax.f32 %v6009_v6, 0.0  ;;  %v6540_v0 = vsel %vm738_vm2, %v6475_v63, %v6476_v22  ;;  %v5811_v36 = vpop.f32.mrf.mxu1  ;;  %v5699_v38 = vadd.f32 %v14916_v26, %v5520_v32  ;;  %v4562_v26 = vsel %vm738_vm2, %v4527_v11, %v4528_v27 }
 0x7c0   : > { %v15217_v39 = vadd.f32 %v6622_v34, %v6540_v0  ;;  %v5903_v52 = vrot.slane %v5811_v36, 1  ;;  %v15219_v20 = vpop.f32.mrf.mxu0  ;;  %v4983_v63 = vrot.slane %v14671_v47, 1 }
 0x7c1   : > { %6097 = vst.msk [vmem:[#allocation3 + $0xd8] sm:$0xff] %vm382_vm0, %v6041_v25  ;;  %v4982_v25 = vrot.slane %v14658_v59, 1 }
 0x7c2   : > { %18001 = vst [vmem:[#allocation14_spill] sm:$0xff] %v15217_v39  ;;  %v5939_v8 = vsel %vm1193_vm1, %v5902_v62, %v5903_v52  ;;  %10271 = vmatmul.msk.f32.gmra.mxu1 %vm382_vm0, %v10947_v9  ;;  %v18002_v62 = vld [vmem:[#allocation7_spill] sm:$0xff] }
 0x7c3   : > { %v5974_v34 = vadd.f32 %v5939_v8, %v5699_v38  ;;  %10385 = vmatmul.msk.f32.gmra.mxu0 %vm382_vm0, %v14930_v60  ;;  %v4599_v0 = vadd.f32 %v4562_v26, %v18002_v62  ;;  %v18003_v60 = vld [vmem:[#allocation40_spill] sm:$0xff]  ;;  %v5016_v11 = vsel %vm1193_vm1, %v4982_v25, %v4983_v63  ;;  %v18005_v9 = vld [vmem:[#allocation51_spill] sm:$0xff]  ;;  %v10948_v26 = vld [vmem:[#allocation2 + $0x188] sm:$0xff]  ;;  %v4984_v25 = vrot.slane %v14684_v42, 1 }
 0x7c4   : > { %10303 = vmatmul.msk.f32.gmra.mxu2 %vm382_vm0, %v15211_v1  ;;  %10352 = vmatmul.msk.f32.gmra.mxu3 %vm382_vm0, %v15211_v1  ;;  %v6353_v6 = vpop.f32.mrf.mxu2  ;;  %v6625_v56 = vpop.f32.mrf.mxu3  ;;  %v4529_v52 = vrot.slane %v18003_v60, 7 }
 0x7c5   : > { %v6010_v33 = vadd.f32 %v14797_v31, %v5974_v34  ;;  %v6477_v32 = vrot.slane %v6353_v6, 7  ;;  %v4778_v59 = vadd.f32 %v18005_v9, %v4599_v0 }
 0x7c7   : > { %v6042_v36 = vmax.f32 %v6010_v33, 0.0  ;;  %v6539_v13 = vsel %vm738_vm2, %v6476_v22, %v6477_v32  ;;  %v5814_v44 = vpop.f32.mrf.mxu1  ;;  %v18006_v22 = vld [vmem:[#allocation53_spill] sm:$0xff]  ;;  %v5053_v6 = vadd.f32 %v5016_v11, %v4778_v59  ;;  %v4561_v32 = vsel %vm738_vm2, %v4528_v27, %v4529_v52  ;;  %v18009_v27 = vld [vmem:[#allocation54_spill] sm:$0xff] }
 0x7c8   : > { %v15243_v47 = vadd.f32 %v6625_v56, %v6539_v13  ;;  %v15245_v38 = vpop.f32.mrf.mxu0  ;;  %v15247_v8 = vld [vmem:[#allocation3 + $0xd8] sm:$0xff]  ;;  %v5450_v34 = vrot.slane %v18006_v22, 7  ;;  %v18007_v56 = vld [vmem:[#allocation50_spill] sm:$0xff]  ;;  %v18008_v13 = vld [vmem:[#allocation12_spill] sm:$0xff]  ;;  %v5015_v11 = vsel %vm1193_vm1, %v4983_v63, %v4984_v25 }
 0x7c9   : > { %6098 = vst.msk [vmem:[#allocation3 + $0xe0] sm:$0xff] %vm382_vm0, %v6042_v36  ;;  %v5449_v33 = vrot.slane %v18007_v56, 7  ;;  %v4600_v60 = vadd.f32 %v4561_v32, %v18008_v13 }
 0x7ca   : > { %18004 = vst [vmem:[#allocation9_spill] sm:$0xff] %v15243_v47  ;;  %10272 = vmatmul.msk.f32.gmra.mxu1 %vm382_vm0, %v10948_v26 }
 0x7cb   : > { %10386 = vmatmul.msk.f32.gmra.mxu0 %vm382_vm0, %v14944_v19  ;;  %v5484_v36 = vsel %vm738_vm2, %v5449_v33, %v5450_v34  ;;  %v5904_v19 = vrot.slane %v5814_v44, 1  ;;  %v4779_v52 = vadd.f32 %v18009_v27, %v4600_v60  ;;  %v10949_v44 = vld [vmem:[#allocation2 + $0x190] sm:$0xff] }
 0x7cc   : > { %10304 = vmatmul.msk.f32.gmra.mxu2 %vm382_vm0, %v15247_v8  ;;  %10353 = vmatmul.msk.f32.gmra.mxu3 %vm382_vm0, %v15247_v8  ;;  %v6356_v62 = vpop.f32.mrf.mxu2  ;;  %v6628_v0 = vpop.f32.mrf.mxu3  ;;  %v5521_v9 = vadd.f32 %v5484_v36, %v5053_v6  ;;  %v18010_v6 = vld [vmem:[#allocation56_spill] sm:$0xff] }
 0x7cd   : > { %v5451_v33 = vrot.slane %v18010_v6, 7  ;;  %v5054_v32 = vadd.f32 %v5015_v11, %v4779_v52  ;;  %v6478_v36 = vrot.slane %v6356_v62, 7  ;;  %v18011_v52 = vld [vmem:[#allocation25_spill] sm:$0xff] }
 0x7ce   : > { %v5700_v42 = vadd.f32 %v14946_v18, %v5521_v9 }
 0x7cf   : > { %v5817_v22 = vpop.f32.mrf.mxu1  ;;  %v5483_v9 = vsel %vm738_vm2, %v5450_v34, %v5451_v33  ;;  %v10950_v33 = vld [vmem:[#allocation2 + $0x198] sm:$0xff] }
 0x7d0   : > { %v5905_v59 = vrot.slane %v5817_v22, 1  ;;  %v5672_v26 = vpop.f32.mrf.mxu0  ;;  %v15268_v56 = vld [vmem:[#allocation3 + $0xe0] sm:$0xff]  ;;  %v15285_v22 = vld [vmem:[#allocation3 + $0xe8] sm:$0xff] }
 0x7d2   : > { %v5938_v63 = vsel %vm1193_vm1, %v5904_v19, %v5905_v59  ;;  %10273 = vmatmul.msk.f32.gmra.mxu1 %vm382_vm0, %v10949_v44  ;;  %v5522_v19 = vadd.f32 %v5483_v9, %v5054_v32 }
 0x7d3   : > { %v5975_v25 = vadd.f32 %v5938_v63, %v5700_v42  ;;  %10387 = vmatmul.msk.f32.gmra.mxu0 %vm382_vm0, %v14965_v5  ;;  %v4530_v42 = vrot.slane %v18011_v52, 7  ;;  %v18012_v5 = vld [vmem:[#allocation19_spill] sm:$0xff] }
 0x7d4   : > { %10305 = vmatmul.msk.f32.gmra.mxu2 %vm382_vm0, %v15268_v56  ;;  %10354 = vmatmul.msk.f32.gmra.mxu3 %vm382_vm0, %v15268_v56  ;;  %v6359_v18 = vpop.f32.mrf.mxu2  ;;  %v6630_v0 = vpop.f32.mrf.mxu3  ;;  %v4531_v6 = vrot.slane %v18012_v5, 7 }
 0x7d5   : > { %v6011_v13 = vadd.f32 %v14797_v31, %v5975_v25  ;;  %v6479_v60 = vrot.slane %v6359_v18, 7  ;;  %v5701_v25 = vadd.f32 %v14963_v30, %v5522_v19  ;;  %v4986_v18 = vrot.slane %v14710_v29, 1  ;;  %v18015_v29 = vld [vmem:[#allocation10_spill] sm:$0xff] }
 0x7d6   : > { %v4560_v30 = vsel %vm738_vm2, %v4530_v42, %v4531_v6  ;;  %v4985_v19 = vrot.slane %v14694_v58, 1  ;;  %v4532_v42 = vrot.slane %v18015_v29, 7  ;;  %v18017_v58 = vld [vmem:[#allocation59_spill] sm:$0xff] }
 0x7d7   : > { %v6043_v26 = vmax.f32 %v6011_v13, 0.0  ;;  %v6538_v11 = vsel %vm738_vm2, %v6478_v36, %v6479_v60  ;;  %v5820_v27 = vpop.f32.mrf.mxu1 }
 0x7d8   : > { %v15291_v63 = vadd.f32 %v6630_v0, %v6538_v11  ;;  %v5906_v62 = vrot.slane %v5820_v27, 1  ;;  %v15293_v44 = vpop.f32.mrf.mxu0  ;;  %v5014_v5 = vsel %vm1193_vm1, %v4985_v19, %v4986_v18 }
 0x7d9   : > { %6099 = vst.msk [vmem:[#allocation3 + $0xf0] sm:$0xff] %vm382_vm0, %v6043_v26  ;;  %v18014_v26 = vld [vmem:[#allocation27_spill] sm:$0xff] }
 0x7da   : > { %18013 = vst [vmem:[#allocation5_spill] sm:$0xff] %v15291_v63  ;;  %v5937_v34 = vsel %vm1193_vm1, %v5905_v59, %v5906_v62  ;;  %10274 = vmatmul.msk.f32.gmra.mxu1 %vm382_vm0, %v10950_v33  ;;  %v10521_v59 = vld [vmem:[%s17664_s5 + $0x28] sm:$0xff]  ;;  %v4601_v11 = vadd.f32 %v4560_v30, %v18014_v26  ;;  %v10951_v30 = vld [vmem:[#allocation2 + $0x1a0] sm:$0xff] }
 0x7db   : > { %v5976_v32 = vadd.f32 %v5937_v34, %v5701_v25  ;;  %10388 = vmatmul.msk.f32.gmra.mxu0 %vm382_vm0, %v14979_v10  ;;  %7696 = vmatpush.msra.mxu3 %v10521_v59  ;;  %v4987_v59 = vrot.slane %v14728_v7, 1 }
 0x7dc   : > { %10306 = vmatmul.msk.f32.gmra.mxu2 %vm382_vm0, %v15285_v22  ;;  %10355 = vmatmul.msk.f32.gmra.mxu3 %vm382_vm0, %v15285_v22  ;;  %v6362_v0 = vpop.f32.mrf.mxu2  ;;  %v6633_v36 = vpop.f32.mrf.mxu3  ;;  %v4780_v33 = vadd.f32 %v18017_v58, %v4601_v11 }
 0x7dd   : > { %v6012_v13 = vadd.f32 %v14797_v31, %v5976_v32  ;;  %v6480_v9 = vrot.slane %v6362_v0, 7 }
 0x7de   : > { %v5055_v0 = vadd.f32 %v5014_v5, %v4780_v33  ;;  %v5013_v5 = vsel %vm1193_vm1, %v4986_v18, %v4987_v59 }
 0x7df   : > { %v6044_v10 = vmax.f32 %v6012_v13, 0.0  ;;  %v6537_v27 = vsel %vm738_vm2, %v6479_v60, %v6480_v9  ;;  %v5823_v52 = vpop.f32.mrf.mxu1  ;;  %v18018_v60 = vld [vmem:[#allocation17_spill] sm:$0xff]  ;;  %v4559_v9 = vsel %vm738_vm2, %v4531_v6, %v4532_v42 }
 0x7e0   : > { %v15320_v62 = vadd.f32 %v6633_v36, %v6537_v27  ;;  %v15322_v25 = vpop.f32.mrf.mxu0  ;;  %v15324_v34 = vld [vmem:[#allocation3 + $0xf0] sm:$0xff]  ;;  %v5453_v32 = vrot.slane %v18018_v60, 7  ;;  %v18019_v36 = vld [vmem:[#allocation58_spill] sm:$0xff]  ;;  %v18021_v6 = vld [vmem:[#allocation61_spill] sm:$0xff] }
 0x7e1   : > { %6100 = vst.msk [vmem:[#allocation3 + $0xf8] sm:$0xff] %vm382_vm0, %v6044_v10  ;;  %v5452_v13 = vrot.slane %v18019_v36, 7  ;;  %v18020_v10 = vld [vmem:[#allocation29_spill] sm:$0xff] }
 0x7e2   : > { %18016 = vst [vmem:[#allocation49_spill] sm:$0xff] %v15320_v62  ;;  %10275 = vmatmul.msk.f32.gmra.mxu1 %vm382_vm0, %v10951_v30  ;;  %v4602_v27 = vadd.f32 %v4559_v9, %v18020_v10  ;;  %v15362_v10 = vld [vmem:[#allocation3 + $0x100] sm:$0xff] }
 0x7e3   : > { %10389 = vmatmul.msk.f32.gmra.mxu0 %vm382_vm0, %v14995_v2  ;;  %v5482_v11 = vsel %vm738_vm2, %v5452_v13, %v5453_v32  ;;  %v5907_v2 = vrot.slane %v5823_v52, 1  ;;  %v10952_v52 = vld [vmem:[#allocation2 + $0x1a8] sm:$0xff] }
 0x7e4   : > { %10307 = vmatmul.msk.f32.gmra.mxu2 %vm382_vm0, %v15324_v34  ;;  %10356 = vmatmul.msk.f32.gmra.mxu3 %vm382_vm0, %v15324_v34  ;;  %v6365_v19 = vpop.f32.mrf.mxu2  ;;  %v6636_v26 = vpop.f32.mrf.mxu3  ;;  %v5523_v29 = vadd.f32 %v5482_v11, %v5055_v0  ;;  %v4781_v42 = vadd.f32 %v18021_v6, %v4602_v27  ;;  %v5454_v0 = vrot.slane %v14603_v17, 7 }
 0x7e5   : > { %v6481_v59 = vrot.slane %v6365_v19, 7 }
 0x7e6   : > { %v5702_v7 = vadd.f32 %v14999_v53, %v5523_v29  ;;  %v5056_v36 = vadd.f32 %v5013_v5, %v4781_v42  ;;  %v5481_v17 = vsel %vm738_vm2, %v5453_v32, %v5454_v0 }
 0x7e7   : > { %v5826_v58 = vpop.f32.mrf.mxu1 }
 0x7e8   : > { %v5908_v33 = vrot.slane %v5826_v58, 1  ;;  %v5680_v60 = vpop.f32.mrf.mxu0  ;;  %v15345_v30 = vld [vmem:[#allocation3 + $0xf8] sm:$0xff]  ;;  %v5524_v27 = vadd.f32 %v5481_v17, %v5056_v36 }
 0x7ea   : > { %v5936_v18 = vsel %vm1193_vm1, %v5907_v2, %v5908_v33  ;;  %10276 = vmatmul.msk.f32.gmra.mxu1 %vm382_vm0, %v10952_v52  ;;  %v18022_v2 = vld [vmem:[#allocation15_spill] sm:$0xff] }
 0x7eb   : > { %v5977_v13 = vadd.f32 %v5936_v18, %v5702_v7  ;;  %10390 = vmatmul.msk.f32.gmra.mxu0 %vm382_vm0, %v15021_v21  ;;  %v4533_v60 = vrot.slane %v18022_v2, 7  ;;  %v18023_v21 = vld [vmem:[#allocation4_spill] sm:$0xff]  ;;  %v5703_v7 = vadd.f32 %v15019_v35, %v5524_v27  ;;  %v4989_v18 = vrot.slane %v14767_v55, 1  ;;  %v18028_v55 = vld [vmem:[#allocation26_spill] sm:$0xff] }
 0x7ec   : > { %10308 = vmatmul.msk.f32.gmra.mxu2 %vm382_vm0, %v15345_v30  ;;  %10357 = vmatmul.msk.f32.gmra.mxu3 %vm382_vm0, %v15345_v30  ;;  %v6368_v53 = vpop.f32.mrf.mxu2  ;;  %v6638_v9 = vpop.f32.mrf.mxu3  ;;  %v4534_v6 = vrot.slane %v18023_v21, 7  ;;  %v18030_v21 = vld [vmem:[#allocation62_spill] sm:$0xff] }
 0x7ed   : > { %v6013_v26 = vadd.f32 %v14797_v31, %v5977_v13  ;;  %v6482_v11 = vrot.slane %v6368_v53, 7  ;;  %v15390_v13 = vld [vmem:[%s17663_s4] ss:$0 sm:$0xff] }
 0x7ee   : > { %v4558_v35 = vsel %vm738_vm2, %v4533_v60, %v4534_v6 }
 0x7ef   : > { %v6045_v29 = vmax.f32 %v6013_v26, 0.0  ;;  %v6536_v58 = vsel %vm738_vm2, %v6481_v59, %v6482_v11  ;;  %v5829_v5 = vpop.f32.mrf.mxu1  ;;  %v18027_v59 = vld [vmem:[#allocation32_spill] sm:$0xff] }
 0x7f0   : > { %v15368_v42 = vadd.f32 %v6638_v9, %v6536_v58  ;;  %v5909_v19 = vrot.slane %v5829_v5, 1  ;;  %v15370_v31 = vpop.f32.mrf.mxu0  ;;  %v4603_v26 = vadd.f32 %v4558_v35, %v18027_v59  ;;  %v18034_v59 = vld [vmem:[#allocation34_spill] sm:$0xff] }
 0x7f1   : > { %18025 = vst [vmem:[#allocation36_spill] sm:$0xff] %v15370_v31 }
 0x7f2   : > { %18024 = vst [vmem:[#allocation11_spill] sm:$0xff] %v15368_v42  ;;  %v5935_v32 = vsel %vm1193_vm1, %v5908_v33, %v5909_v19  ;;  %10424 = vmatmul.msk.f32.vlgmr.msrb.gmra.mxu1 %vm382_vm0, %v14822_v16  ;;  %v18026_v16 = vld [vmem:[#allocation83_spill] sm:$0xff]  ;;  %v4782_v19 = vadd.f32 %v18030_v21, %v4603_v26 }
 0x7f3   : > { %6101 = vst.msk [vmem:[#allocation3 + $0x108] sm:$0xff] %vm382_vm0, %v6045_v29  ;;  %v5978_v0 = vadd.f32 %v5935_v32, %v5703_v7  ;;  %10391 = vmatmul.msk.f32.gmra.mxu0 %vm382_vm0, %v15033_v49  ;;  %v4988_v9 = vrot.slane %v18026_v16, 1  ;;  %v4535_v29 = vrot.slane %v18028_v55, 7 }
 0x7f4   : > { %10309 = vmatmul.msk.f32.gmra.mxu2 %vm382_vm0, %v15362_v10  ;;  %10358 = vmatmul.msk.f32.gmra.mxu3 %vm382_vm0, %v15362_v10  ;;  %v6371_v52 = vpop.f32.mrf.mxu2  ;;  %v6641_v36 = vpop.f32.mrf.mxu3 }
 0x7f5   : > { %v6014_v33 = vadd.f32 %v15390_v13, %v5978_v0  ;;  %v6483_v53 = vrot.slane %v6371_v52, 7  ;;  %v5012_v58 = vsel %vm1193_vm1, %v4988_v9, %v4989_v18  ;;  %v18032_v0 = vld [vmem:[#allocation16_spill] sm:$0xff]  ;;  %v4557_v52 = vsel %vm738_vm2, %v4534_v6, %v4535_v29 }
 0x7f6   : > { %v5057_v32 = vadd.f32 %v5012_v58, %v4782_v19  ;;  %v5455_v35 = vrot.slane %v18032_v0, 7  ;;  %v4604_v26 = vadd.f32 %v4557_v52, %v18034_v59  ;;  %v18035_v6 = vld [vmem:[#allocation64_spill] sm:$0xff]  ;;  %v15448_v59 = vld [vmem:[#allocation3 + $0x118] sm:$0xff] }
 0x7f7   : > { %v6046_v49 = vmax.f32 %v6014_v33, 0.0  ;;  %v6535_v17 = vsel %vm738_vm2, %v6482_v11, %v6483_v53  ;;  %v5832_v27 = vpop.f32.mrf.mxu1  ;;  %v18031_v11 = vld [vmem:[#allocation63_spill] sm:$0xff] }
 0x7f8   : > { %v15400_v5 = vadd.f32 %v6641_v36, %v6535_v17  ;;  %v15402_v2 = vpop.f32.mrf.mxu0  ;;  %v5456_v7 = vrot.slane %v18031_v11, 7  ;;  %v18033_v36 = vld [vmem:[#allocation87_spill] sm:$0xff]  ;;  %v4783_v29 = vadd.f32 %v18035_v6, %v4604_v26  ;;  %v18036_v11 = vld [vmem:[#allocation65_spill] sm:$0xff] }
 0x7f9   : > { %6102 = vst.msk [vmem:[#allocation3 + $0x110] sm:$0xff] %vm382_vm0, %v6046_v49  ;;  %v4990_v33 = vrot.slane %v18033_v36, 1 }
 0x7fa   : > { %18029 = vst [vmem:[#allocation18_spill] sm:$0xff] %v15400_v5  ;;  %v15404_v60 = vld [vmem:[#allocation3 + $0x108] sm:$0xff]  ;;  %10425 = vmatmul.msk.f32.gmra.mxu1 %vm382_vm0, %v14834_v15  ;;  %v5480_v9 = vsel %vm738_vm2, %v5455_v35, %v5456_v7 }
 0x7fb   : > { %10392 = vmatmul.msk.f32.gmra.mxu0 %vm382_vm0, %v15047_v46  ;;  %v5525_v49 = vadd.f32 %v5480_v9, %v5057_v32  ;;  %v5011_v17 = vsel %vm1193_vm1, %v4989_v18, %v4990_v33  ;;  %v5910_v46 = vrot.slane %v5832_v27, 1  ;;  %v5457_v32 = vrot.slane %v18036_v11, 7  ;;  %v15439_v27 = vld [vmem:[#allocation3 + $0x28] sm:$0xff] }
 0x7fc   : > { %10310 = vmatmul.msk.f32.gmra.mxu2 %vm382_vm0, %v15404_v60  ;;  %10359 = vmatmul.msk.f32.gmra.mxu3 %vm382_vm0, %v15404_v60  ;;  %v6374_v53 = vpop.f32.mrf.mxu2  ;;  %v6644_v16 = vpop.f32.mrf.mxu3  ;;  %v5058_v0 = vadd.f32 %v5011_v17, %v4783_v29 }
 0x7fd   : > { %v5704_v19 = vadd.f32 %v15049_v51, %v5525_v49  ;;  %v6484_v36 = vrot.slane %v6374_v53, 7  ;;  %v5479_v9 = vsel %vm738_vm2, %v5456_v7, %v5457_v32  ;;  %v15466_v32 = vld [vmem:[#allocation3 + $0x30] sm:$0xff] }
 0x7fe   : > { %v5526_v26 = vadd.f32 %v5479_v9, %v5058_v0  ;;  %v18040_v9 = vld [vmem:[#allocation37_spill] sm:$0xff] }
 0x7ff   : > { %v5835_v15 = vpop.f32.mrf.mxu1 }
 0x800   : > { %v5911_v55 = vrot.slane %v5835_v15, 1  ;;  %v15426_v58 = vpop.f32.mrf.mxu0  ;;  %v15428_v21 = vld [vmem:[#allocation3 + $0x110] sm:$0xff] }
 0x802   : > { %v5934_v18 = vsel %vm1193_vm1, %v5910_v46, %v5911_v55  ;;  %10426 = vmatmul.msk.f32.gmra.mxu1 %vm382_vm0, %v15439_v27  ;;  %v18037_v46 = vld [vmem:[#allocation28_spill] sm:$0xff] }
 0x803   : > { %v5979_v35 = vadd.f32 %v5934_v18, %v5704_v19  ;;  %10393 = vmatmul.msk.f32.gmra.mxu0 %vm382_vm0, %v15068_v54  ;;  %v4536_v6 = vrot.slane %v18037_v46, 7  ;;  %v18038_v54 = vld [vmem:[#allocation22_spill] sm:$0xff]  ;;  %v5705_v18 = vadd.f32 %v15066_v40, %v5526_v26 }
 0x804   : > { %10311 = vmatmul.msk.f32.gmra.mxu2 %vm382_vm0, %v15428_v21  ;;  %10360 = vmatmul.msk.f32.gmra.mxu3 %vm382_vm0, %v15428_v21  ;;  %v6377_v51 = vpop.f32.mrf.mxu2  ;;  %v6646_v52 = vpop.f32.mrf.mxu3  ;;  %v4537_v29 = vrot.slane %v18038_v54, 7 }
 0x805   : > { %v6015_v33 = vadd.f32 %v15390_v13, %v5979_v35  ;;  %v6485_v16 = vrot.slane %v6377_v51, 7  ;;  %v4992_v35 = vrot.slane %v14817_v12, 1 }
 0x806   : > { %v4556_v40 = vsel %vm738_vm2, %v4536_v6, %v4537_v29 }
 0x807   : > { %v6047_v49 = vmax.f32 %v6015_v33, 0.0  ;;  %v6534_v15 = vsel %vm738_vm2, %v6484_v36, %v6485_v16  ;;  %v5838_v17 = vpop.f32.mrf.mxu1  ;;  %v4605_v26 = vadd.f32 %v4556_v40, %v18040_v9 }
 0x808   : > { %v15454_v19 = vadd.f32 %v6646_v52, %v6534_v15  ;;  %v5912_v53 = vrot.slane %v5838_v17, 1  ;;  %v15456_v11 = vpop.f32.mrf.mxu0 }
 0x809   : > { %6103 = vst.msk [vmem:[#allocation3 + $0x120] sm:$0xff] %vm382_vm0, %v6047_v49 }
 0x80a   : > { %18039 = vst [vmem:[#allocation24_spill] sm:$0xff] %v15454_v19  ;;  %v5933_v7 = vsel %vm1193_vm1, %v5911_v55, %v5912_v53  ;;  %10427 = vmatmul.msk.f32.gmra.mxu1 %vm382_vm0, %v15466_v32  ;;  %v4991_v55 = vrot.slane %v14799_v43, 1 }
 0x80b   : > { %v5980_v0 = vadd.f32 %v5933_v7, %v5705_v18  ;;  %10394 = vmatmul.msk.f32.gmra.mxu0 %vm382_vm0, %v15078_v61  ;;  %v18041_v61 = vld [vmem:[#allocation31_spill] sm:$0xff] }
 0x80c   : > { %10312 = vmatmul.msk.f32.gmra.mxu2 %vm382_vm0, %v15448_v59  ;;  %10361 = vmatmul.msk.f32.gmra.mxu3 %vm382_vm0, %v15448_v59  ;;  %v6380_v51 = vpop.f32.mrf.mxu2  ;;  %v6649_v52 = vpop.f32.mrf.mxu3  ;;  %v4538_v46 = vrot.slane %v18041_v61, 7  ;;  %v5010_v6 = vsel %vm1193_vm1, %v4991_v55, %v4992_v35  ;;  %v18043_v18 = vld [vmem:[#allocation67_spill] sm:$0xff] }
 0x80d   : > { %v6016_v36 = vadd.f32 %v15390_v13, %v5980_v0  ;;  %v6486_v33 = vrot.slane %v6380_v51, 7  ;;  %v4784_v43 = vadd.f32 %v18043_v18, %v4605_v26  ;;  %v15496_v0 = vld [vmem:[#allocation3 + $0x38] sm:$0xff]  ;;  %v18045_v51 = vld [vmem:[#allocation66_spill] sm:$0xff] }
 0x80f   : > { %v6048_v49 = vmax.f32 %v6016_v36, 0.0  ;;  %v6533_v15 = vsel %vm738_vm2, %v6485_v16, %v6486_v33  ;;  %v5841_v17 = vpop.f32.mrf.mxu1  ;;  %v18044_v16 = vld [vmem:[#allocation68_spill] sm:$0xff]  ;;  %v5059_v40 = vadd.f32 %v5010_v6, %v4784_v43  ;;  %v4555_v36 = vsel %vm738_vm2, %v4537_v29, %v4538_v46  ;;  %v18047_v29 = vld [vmem:[#allocation69_spill] sm:$0xff] }
 0x810   : > { %v15483_v12 = vadd.f32 %v6649_v52, %v6533_v15  ;;  %v15485_v54 = vpop.f32.mrf.mxu0  ;;  %v15487_v53 = vld [vmem:[#allocation3 + $0x120] sm:$0xff]  ;;  %v5459_v7 = vrot.slane %v18044_v16, 7  ;;  %v5458_v52 = vrot.slane %v18045_v51, 7  ;;  %v4993_v33 = vrot.slane %v14832_v41, 1 }
 0x811   : > { %6104 = vst.msk [vmem:[#allocation3 + $0x128] sm:$0xff] %vm382_vm0, %v6048_v49  ;;  %v18046_v49 = vld [vmem:[#allocation39_spill] sm:$0xff] }
 0x812   : > { %18042 = vst [vmem:[#allocation7_spill] sm:$0xff] %v15483_v12  ;;  %10428 = vmatmul.msk.f32.gmra.mxu1 %vm382_vm0, %v15496_v0  ;;  %v5478_v26 = vsel %vm738_vm2, %v5458_v52, %v5459_v7  ;;  %v4606_v15 = vadd.f32 %v4555_v36, %v18046_v49  ;;  %v5009_v6 = vsel %vm1193_vm1, %v4992_v35, %v4993_v33 }
 0x813   : > { %10395 = vmatmul.msk.f32.gmra.mxu0 %vm382_vm0, %v15092_v28  ;;  %v5527_v61 = vadd.f32 %v5478_v26, %v5059_v40  ;;  %v5913_v28 = vrot.slane %v5841_v17, 1  ;;  %v18048_v40 = vld [vmem:[#allocation70_spill] sm:$0xff] }
 0x814   : > { %10313 = vmatmul.msk.f32.gmra.mxu2 %vm382_vm0, %v15487_v53  ;;  %10362 = vmatmul.msk.f32.gmra.mxu3 %vm382_vm0, %v15487_v53  ;;  %v6383_v55 = vpop.f32.mrf.mxu2  ;;  %v6652_v9 = vpop.f32.mrf.mxu3  ;;  %v4785_v41 = vadd.f32 %v18047_v29, %v4606_v15  ;;  %v5460_v52 = vrot.slane %v18048_v40, 7  ;;  %v15524_v17 = vld [vmem:[#allocation3 + $0x40] sm:$0xff] }
 0x815   : > { %v5706_v46 = vadd.f32 %v15098_v57, %v5527_v61  ;;  %v6487_v26 = vrot.slane %v6383_v55, 7 }
 0x816   : > { %v5060_v36 = vadd.f32 %v5009_v6, %v4785_v41  ;;  %v5477_v61 = vsel %vm738_vm2, %v5459_v7, %v5460_v52  ;;  %v15551_v52 = vld [vmem:[#allocation3 + $0x48] sm:$0xff] }
 0x817   : > { %v5844_v18 = vpop.f32.mrf.mxu1 }
 0x818   : > { %v5914_v43 = vrot.slane %v5844_v18, 1  ;;  %v15511_v16 = vpop.f32.mrf.mxu0  ;;  %v15513_v51 = vld [vmem:[#allocation3 + $0x128] sm:$0xff]  ;;  %v15533_v18 = vld [vmem:[#allocation3 + $0x130] sm:$0xff] }
 0x81a   : > { %v5932_v35 = vsel %vm1193_vm1, %v5913_v28, %v5914_v43  ;;  %10429 = vmatmul.msk.f32.gmra.mxu1 %vm382_vm0, %v15524_v17  ;;  %v5528_v28 = vadd.f32 %v5477_v61, %v5060_v36 }
 0x81b   : > { %v5981_v33 = vadd.f32 %v5932_v35, %v5706_v46  ;;  %10396 = vmatmul.msk.f32.gmra.mxu0 %vm382_vm0, %v15119_v14  ;;  %v18049_v46 = vld [vmem:[#allocation33_spill] sm:$0xff]  ;;  %v18050_v14 = vld [vmem:[#allocation23_spill] sm:$0xff] }
 0x81c   : > { %10314 = vmatmul.msk.f32.gmra.mxu2 %vm382_vm0, %v15513_v51  ;;  %10363 = vmatmul.msk.f32.gmra.mxu3 %vm382_vm0, %v15513_v51  ;;  %v6386_v57 = vpop.f32.mrf.mxu2  ;;  %v6654_v9 = vpop.f32.mrf.mxu3  ;;  %v4539_v40 = vrot.slane %v18049_v46, 7  ;;  %v4540_v35 = vrot.slane %v18050_v14, 7 }
 0x81d   : > { %v6017_v49 = vadd.f32 %v15390_v13, %v5981_v33  ;;  %v6488_v15 = vrot.slane %v6386_v57, 7  ;;  %v5707_v57 = vadd.f32 %v15117_v23, %v5528_v28 }
 0x81e   : > { %v4554_v23 = vsel %vm738_vm2, %v4539_v40, %v4540_v35 }
 0x81f   : > { %v6049_v29 = vmax.f32 %v6017_v49, 0.0  ;;  %v6532_v6 = vsel %vm738_vm2, %v6487_v26, %v6488_v15  ;;  %v5847_v41 = vpop.f32.mrf.mxu1 }
 0x820   : > { %v15539_v31 = vadd.f32 %v6654_v9, %v6532_v6  ;;  %v5915_v55 = vrot.slane %v5847_v41, 1  ;;  %v15541_v33 = vpop.f32.mrf.mxu0  ;;  %v4995_v9 = vrot.slane %v14876_v4, 1 }
 0x821   : > { %6105 = vst.msk [vmem:[#allocation3 + $0x138] sm:$0xff] %vm382_vm0, %v6049_v29  ;;  %v18052_v29 = vld [vmem:[#allocation41_spill] sm:$0xff] }
 0x822   : > { %18051 = vst [vmem:[#allocation40_spill] sm:$0xff] %v15539_v31  ;;  %v5931_v7 = vsel %vm1193_vm1, %v5914_v43, %v5915_v55  ;;  %10430 = vmatmul.msk.f32.gmra.mxu1 %vm382_vm0, %v15551_v52  ;;  %v4994_v43 = vrot.slane %v14850_v24, 1  ;;  %v4607_v6 = vadd.f32 %v4554_v23, %v18052_v29  ;;  %v4996_v29 = vrot.slane %v14894_v3, 1 }
 0x823   : > { %v5982_v36 = vadd.f32 %v5931_v7, %v5707_v57  ;;  %10397 = vmatmul.msk.f32.gmra.mxu0 %vm382_vm0, %v15129_v48  ;;  %v18053_v48 = vld [vmem:[#allocation35_spill] sm:$0xff] }
 0x824   : > { %10315 = vmatmul.msk.f32.gmra.mxu2 %vm382_vm0, %v15533_v18  ;;  %10364 = vmatmul.msk.f32.gmra.mxu3 %vm382_vm0, %v15533_v18  ;;  %v6389_v26 = vpop.f32.mrf.mxu2  ;;  %v6657_v49 = vpop.f32.mrf.mxu3  ;;  %v4541_v55 = vrot.slane %v18053_v48, 7  ;;  %v5008_v40 = vsel %vm1193_vm1, %v4994_v43, %v4995_v9  ;;  %v18058_v48 = vld [vmem:[#allocation42_spill] sm:$0xff] }
 0x825   : > { %v6018_v61 = vadd.f32 %v15390_v13, %v5982_v36  ;;  %v6489_v28 = vrot.slane %v6389_v26, 7  ;;  %v18055_v36 = vld [vmem:[#allocation72_spill] sm:$0xff] }
 0x826   : > { %v4786_v24 = vadd.f32 %v18055_v36, %v4607_v6  ;;  %v15581_v26 = vld [vmem:[#allocation3 + $0x50] sm:$0xff]  ;;  %v4553_v43 = vsel %vm738_vm2, %v4540_v35, %v4541_v55  ;;  %v18059_v35 = vld [vmem:[#allocation74_spill] sm:$0xff] }
 0x827   : > { %v6050_v41 = vmax.f32 %v6018_v61, 0.0  ;;  %v6531_v46 = vsel %vm738_vm2, %v6488_v15, %v6489_v28  ;;  %v5850_v14 = vpop.f32.mrf.mxu1  ;;  %v18056_v15 = vld [vmem:[#allocation73_spill] sm:$0xff]  ;;  %v18057_v61 = vld [vmem:[#allocation71_spill] sm:$0xff]  ;;  %v4608_v36 = vadd.f32 %v4553_v43, %v18058_v48 }
 0x828   : > { %v15568_v4 = vadd.f32 %v6657_v49, %v6531_v46  ;;  %v15570_v57 = vpop.f32.mrf.mxu0  ;;  %v15572_v7 = vld [vmem:[#allocation3 + $0x138] sm:$0xff]  ;;  %v5462_v23 = vrot.slane %v18056_v15, 7  ;;  %v5061_v49 = vadd.f32 %v5008_v40, %v4786_v24  ;;  %v5461_v28 = vrot.slane %v18057_v61, 7 }
 0x829   : > { %6106 = vst.msk [vmem:[#allocation3 + $0x140] sm:$0xff] %vm382_vm0, %v6050_v41  ;;  %v5007_v40 = vsel %vm1193_vm1, %v4995_v9, %v4996_v29  ;;  %v4787_v3 = vadd.f32 %v18059_v35, %v4608_v36  ;;  %v18061_v29 = vld [vmem:[#allocation97_spill] sm:$0xff] }
 0x82a   : > { %18054 = vst [vmem:[#allocation51_spill] sm:$0xff] %v15568_v4  ;;  %10431 = vmatmul.msk.f32.gmra.mxu1 %vm382_vm0, %v15581_v26  ;;  %v5476_v46 = vsel %vm738_vm2, %v5461_v28, %v5462_v23 }
 0x82b   : > { %10398 = vmatmul.msk.f32.gmra.mxu0 %vm382_vm0, %v15143_v45  ;;  %v5529_v15 = vadd.f32 %v5476_v46, %v5061_v49  ;;  %v5916_v45 = vrot.slane %v5850_v14, 1  ;;  %v18060_v49 = vld [vmem:[#allocation75_spill] sm:$0xff]  ;;  %v15609_v14 = vld [vmem:[#allocation3 + $0x58] sm:$0xff] }
 0x82c   : > { %10316 = vmatmul.msk.f32.gmra.mxu2 %vm382_vm0, %v15572_v7  ;;  %10365 = vmatmul.msk.f32.gmra.mxu3 %vm382_vm0, %v15572_v7  ;;  %v6392_v6 = vpop.f32.mrf.mxu2  ;;  %v6660_v41 = vpop.f32.mrf.mxu3  ;;  %v5463_v28 = vrot.slane %v18060_v49, 7 }
 0x82d   : > { %v5708_v55 = vadd.f32 %v15149_v50, %v5529_v15  ;;  %v6490_v46 = vrot.slane %v6392_v6, 7 }
 0x82e   : > { %v5475_v15 = vsel %vm738_vm2, %v5462_v23, %v5463_v28  ;;  %v15634_v23 = vld [vmem:[#allocation3 + $0x60] sm:$0xff] }
 0x82f   : > { %v5853_v4 = vpop.f32.mrf.mxu1 }
 0x830   : > { %v5917_v24 = vrot.slane %v5853_v4, 1  ;;  %v15596_v61 = vpop.f32.mrf.mxu0  ;;  %v15598_v31 = vld [vmem:[#allocation3 + $0x140] sm:$0xff]  ;;  %v5062_v4 = vadd.f32 %v5007_v40, %v4787_v3 }
 0x832   : > { %v5930_v9 = vsel %vm1193_vm1, %v5916_v45, %v5917_v24  ;;  %10432 = vmatmul.msk.f32.gmra.mxu1 %vm382_vm0, %v15609_v14  ;;  %v15618_v45 = vld [vmem:[#allocation3 + $0x148] sm:$0xff]  ;;  %v5530_v35 = vadd.f32 %v5475_v15, %v5062_v4 }
 0x833   : > { %v5983_v43 = vadd.f32 %v5930_v9, %v5708_v55  ;;  %10399 = vmatmul.msk.f32.gmra.mxu0 %vm382_vm0, %v18061_v29  ;;  %v18062_v55 = vld [vmem:[#allocation38_spill] sm:$0xff]  ;;  %v18063_v29 = vld [vmem:[#allocation48_spill] sm:$0xff] }
 0x834   : > { %10317 = vmatmul.msk.f32.gmra.mxu2 %vm382_vm0, %v15598_v31  ;;  %10366 = vmatmul.msk.f32.gmra.mxu3 %vm382_vm0, %v15598_v31  ;;  %v6395_v50 = vpop.f32.mrf.mxu2  ;;  %v6662_v41 = vpop.f32.mrf.mxu3  ;;  %v4542_v9 = vrot.slane %v18062_v55, 7  ;;  %v4543_v12 = vrot.slane %v18063_v29, 7  ;;  %v18068_v55 = vld [vmem:[#allocation88_spill] sm:$0xff] }
 0x835   : > { %v6019_v48 = vadd.f32 %v15390_v13, %v5983_v43  ;;  %v6491_v36 = vrot.slane %v6395_v50, 7  ;;  %v18065_v50 = vld [vmem:[#allocation96_spill] sm:$0xff]  ;;  %v4997_v29 = vrot.slane %v18068_v55, 1 }
 0x836   : > { %v5709_v5 = vadd.f32 %v18065_v50, %v5530_v35 }
 0x837   : > { %v6051_v49 = vmax.f32 %v6019_v48, 0.0  ;;  %v6530_v40 = vsel %vm738_vm2, %v6490_v46, %v6491_v36  ;;  %v5856_v3 = vpop.f32.mrf.mxu1  ;;  %v4552_v46 = vsel %vm738_vm2, %v4542_v9, %v4543_v12  ;;  %v18067_v48 = vld [vmem:[#allocation89_spill] sm:$0xff] }
 0x838   : > { %v15624_v19 = vadd.f32 %v6662_v41, %v6530_v40  ;;  %v5918_v6 = vrot.slane %v5856_v3, 1  ;;  %v15626_v43 = vpop.f32.mrf.mxu0  ;;  %v18066_v41 = vld [vmem:[#allocation47_spill] sm:$0xff]  ;;  %v4998_v15 = vrot.slane %v18067_v48, 1 }
 0x839   : > { %6107 = vst.msk [vmem:[#allocation3 + $0x150] sm:$0xff] %vm382_vm0, %v6051_v49 }
 0x83a   : > { %18064 = vst [vmem:[#allocation53_spill] sm:$0xff] %v15624_v19  ;;  %v5929_v28 = vsel %vm1193_vm1, %v5917_v24, %v5918_v6  ;;  %10433 = vmatmul.msk.f32.gmra.mxu1 %vm382_vm0, %v15634_v23  ;;  %v18069_v24 = vld [vmem:[#allocation43_spill] sm:$0xff]  ;;  %v5006_v9 = vsel %vm1193_vm1, %v4997_v29, %v4998_v15 }
 0x83b   : > { %v5984_v4 = vadd.f32 %v5929_v28, %v5709_v5  ;;  %10400 = vmatmul.msk.f32.gmra.mxu0 %vm382_vm0, %v18066_v41  ;;  %v4609_v6 = vadd.f32 %v4552_v46, %v18069_v24  ;;  %v18070_v41 = vld [vmem:[#allocation52_spill] sm:$0xff]  ;;  %v18073_v46 = vld [vmem:[#allocation78_spill] sm:$0xff] }
 0x83c   : > { %10318 = vmatmul.msk.f32.gmra.mxu2 %vm382_vm0, %v15618_v45  ;;  %10367 = vmatmul.msk.f32.gmra.mxu3 %vm382_vm0, %v15618_v45  ;;  %v4544_v19 = vrot.slane %v18070_v41, 7 }
 0x83d   : > { %v6020_v40 = vadd.f32 %v15390_v13, %v5984_v4 }
 0x83e   : > { %v4551_v24 = vsel %vm738_vm2, %v4543_v12, %v4544_v19  ;;  %v18078_v12 = vld [vmem:[#allocation79_spill] sm:$0xff] }
 0x83f   : > { %v6398_v35 = vpop.f32.mrf.mxu2  ;;  %v6665_v49 = vpop.f32.mrf.mxu3  ;;  %v6052_v50 = vmax.f32 %v6020_v40, 0.0  ;;  %v5465_v40 = vrot.slane %v18073_v46, 7  ;;  %v18076_v46 = vld [vmem:[#allocation44_spill] sm:$0xff] }
 0x840   : > { %v6492_v3 = vrot.slane %v6398_v35, 7  ;;  %v5859_v28 = vpop.f32.mrf.mxu1  ;;  %v15655_v42 = vpop.f32.mrf.mxu0  ;;  %v15657_v4 = vld [vmem:[#allocation3 + $0x150] sm:$0xff]  ;;  %v18072_v35 = vld [vmem:[#allocation77_spill] sm:$0xff] }
 0x841   : > { %v4788_v55 = vadd.f32 %v18072_v35, %v4609_v6  ;;  %6108 = vst.msk [vmem:[#allocation3 + $0x158] sm:$0xff] %vm382_vm0, %v6052_v50  ;;  %v18075_v6 = vld [vmem:[#allocation90_spill] sm:$0xff] }
 0x842   : > { %v6529_v5 = vsel %vm738_vm2, %v6491_v36, %v6492_v3  ;;  %v15665_v36 = vld [vmem:[#allocation3 + $0x68] sm:$0xff]  ;;  %v18074_v3 = vld [vmem:[#allocation76_spill] sm:$0xff]  ;;  %v4999_v50 = vrot.slane %v18075_v6, 1 }
 0x843   : > { %v15653_v48 = vadd.f32 %v6665_v49, %v6529_v5  ;;  %10434 = vmatmul.msk.f32.gmra.mxu1 %vm382_vm0, %v15665_v36  ;;  %v5063_v49 = vadd.f32 %v5006_v9, %v4788_v55  ;;  %10401 = vmatmul.msk.f32.gmra.mxu0 %vm382_vm0, %v15211_v1  ;;  %v5464_v29 = vrot.slane %v18074_v3, 7  ;;  %v15679_v9 = vld [vmem:[#allocation3 + $0x70] sm:$0xff]  ;;  %v5919_v55 = vrot.slane %v5859_v28, 1 }
 0x844   : > { %10319 = vmatmul.msk.f32.gmra.mxu2 %vm382_vm0, %v15657_v4  ;;  %10368 = vmatmul.msk.f32.gmra.mxu3 %vm382_vm0, %v15657_v4  ;;  %v5005_v1 = vsel %vm1193_vm1, %v4998_v15, %v4999_v50 }
 0x845   : > { %18071 = vst [vmem:[#allocation50_spill] sm:$0xff] %v15653_v48  ;;  %v5474_v35 = vsel %vm738_vm2, %v5464_v29, %v5465_v40  ;;  %v4610_v48 = vadd.f32 %v4551_v24, %v18076_v46  ;;  %v15703_v46 = vld [vmem:[#allocation3 + $0x160] sm:$0xff] }
 0x846   : > { %v5531_v62 = vadd.f32 %v5474_v35, %v5063_v49  ;;  %v18079_v49 = vld [vmem:[#allocation80_spill] sm:$0xff] }
 0x847   : > { %v6401_v5 = vpop.f32.mrf.mxu2  ;;  %v6668_v41 = vpop.f32.mrf.mxu3  ;;  %v4789_v6 = vadd.f32 %v18078_v12, %v4610_v48  ;;  %v5466_v29 = vrot.slane %v18079_v49, 7 }
 0x848   : > { %v5862_v63 = vpop.f32.mrf.mxu1  ;;  %v15683_v47 = vpop.f32.mrf.mxu0  ;;  %v15685_v19 = vld [vmem:[#allocation3 + $0x158] sm:$0xff]  ;;  %v5710_v41 = vadd.f32 %v15219_v20, %v5531_v62  ;;  %v6493_v48 = vrot.slane %v6401_v5, 7 }
 0x849   : > { %v5920_v3 = vrot.slane %v5862_v63, 1  ;;  %18077 = vst [vmem:[#allocation12_spill] sm:$0xff] %v15683_v47  ;;  %v5064_v63 = vadd.f32 %v5005_v1, %v4789_v6  ;;  %v5473_v35 = vsel %vm738_vm2, %v5465_v40, %v5466_v29  ;;  %v15719_v40 = vld [vmem:[#allocation3 + $0x78] sm:$0xff] }
 0x84b   : > { %v5928_v15 = vsel %vm1193_vm1, %v5919_v55, %v5920_v3  ;;  %10435 = vmatmul.msk.f32.gmra.mxu1 %vm382_vm0, %v15679_v9  ;;  %10402 = vmatmul.msk.f32.gmra.mxu0 %vm382_vm0, %v15247_v8  ;;  %v5532_v55 = vadd.f32 %v5473_v35, %v5064_v63  ;;  %v18081_v8 = vld [vmem:[#allocation57_spill] sm:$0xff] }
 0x84c   : > { %10320 = vmatmul.msk.f32.gmra.mxu2 %vm382_vm0, %v15685_v19  ;;  %10369 = vmatmul.msk.f32.gmra.mxu3 %vm382_vm0, %v15685_v19  ;;  %v5985_v28 = vadd.f32 %v5928_v15, %v5710_v41  ;;  %v18080_v41 = vld [vmem:[#allocation55_spill] sm:$0xff]  ;;  %v4546_v15 = vrot.slane %v18081_v8, 7 }
 0x84d   : > { %v4545_v49 = vrot.slane %v18080_v41, 7  ;;  %v18086_v41 = vld [vmem:[#allocation45_spill] sm:$0xff] }
 0x84e   : > { %v6021_v24 = vadd.f32 %v15390_v13, %v5985_v28 }
 0x84f   : > { %v6404_v20 = vpop.f32.mrf.mxu2  ;;  %v6670_v62 = vpop.f32.mrf.mxu3 }
 0x850   : > { %v6494_v50 = vrot.slane %v6404_v20, 7  ;;  %v6053_v12 = vmax.f32 %v6021_v24, 0.0  ;;  %v5865_v6 = vpop.f32.mrf.mxu1  ;;  %v15711_v28 = vpop.f32.mrf.mxu0  ;;  %v5711_v20 = vadd.f32 %v15245_v38, %v5532_v55  ;;  %v10668_v38 = vld [vmem:[%s17664_s5 + $0x40] sm:$0xff] }
 0x851   : > { %v5921_v5 = vrot.slane %v5865_v6, 1  ;;  %18083 = vst [vmem:[#allocation56_spill] sm:$0xff] %v15711_v28  ;;  %8618 = vmatpush.msra.mxu2 %v10668_v38 }
 0x852   : > { %v6528_v1 = vsel %vm738_vm2, %v6493_v48, %v6494_v50  ;;  %6109 = vst.msk [vmem:[#allocation3 + $0x168] sm:$0xff] %vm382_vm0, %v6053_v12  ;;  %v18084_v48 = vld [vmem:[#allocation93_spill] sm:$0xff] }
 0x853   : > { %v15709_v47 = vadd.f32 %v6670_v62, %v6528_v1  ;;  %v5927_v29 = vsel %vm1193_vm1, %v5920_v3, %v5921_v5  ;;  %10436 = vmatmul.msk.f32.gmra.mxu1 %vm382_vm0, %v15719_v40  ;;  %10403 = vmatmul.msk.f32.gmra.mxu0 %vm382_vm0, %v15268_v56  ;;  %v4550_v62 = vsel %vm738_vm2, %v4545_v49, %v4546_v15  ;;  %v5001_v24 = vrot.slane %v18084_v48, 1  ;;  %v18085_v1 = vld [vmem:[#allocation91_spill] sm:$0xff] }
 0x854   : > { %10321 = vmatmul.msk.f32.gmra.mxu2 %vm382_vm0, %v15703_v46  ;;  %10370 = vmatmul.msk.f32.gmra.mxu3 %vm382_vm0, %v15703_v46  ;;  %v5986_v63 = vadd.f32 %v5927_v29, %v5711_v20  ;;  %v5000_v6 = vrot.slane %v18085_v1, 1  ;;  %v4611_v8 = vadd.f32 %v4550_v62, %v18086_v41  ;;  %v18087_v29 = vld [vmem:[#allocation60_spill] sm:$0xff] }
 0x855   : > { %18082 = vst [vmem:[#allocation54_spill] sm:$0xff] %v15709_v47  ;;  %v4547_v47 = vrot.slane %v18087_v29, 7  ;;  %v18091_v62 = vld [vmem:[#allocation84_spill] sm:$0xff] }
 0x856   : > { %v6022_v3 = vadd.f32 %v15390_v13, %v5986_v63  ;;  %v5004_v49 = vsel %vm1193_vm1, %v5000_v6, %v5001_v24 }
 0x857   : > { %v6407_v35 = vpop.f32.mrf.mxu2  ;;  %v6673_v55 = vpop.f32.mrf.mxu3  ;;  %v4549_v41 = vsel %vm738_vm2, %v4546_v15, %v4547_v47  ;;  %v18096_v15 = vld [vmem:[#allocation85_spill] sm:$0xff] }
 0x858   : > { %v6495_v12 = vrot.slane %v6407_v35, 7  ;;  %v6054_v56 = vmax.f32 %v6022_v3, 0.0  ;;  %v5868_v20 = vpop.f32.mrf.mxu1  ;;  %v15743_v38 = vpop.f32.mrf.mxu0  ;;  %v18090_v35 = vld [vmem:[#allocation82_spill] sm:$0xff]  ;;  %v5468_v3 = vrot.slane %v18091_v62, 7 }
 0x859   : > { %18089 = vst [vmem:[#allocation19_spill] sm:$0xff] %v15743_v38  ;;  %v15745_v63 = vld [vmem:[#allocation3 + $0x168] sm:$0xff]  ;;  %v4790_v1 = vadd.f32 %v18090_v35, %v4611_v8  ;;  %v18093_v8 = vld [vmem:[#allocation20_spill] sm:$0xff]  ;;  %v5922_v62 = vrot.slane %v5868_v20, 1 }
 0x85a   : > { %v6527_v5 = vsel %vm738_vm2, %v6494_v50, %v6495_v12  ;;  %6110 = vst.msk [vmem:[#allocation3 + $0x170] sm:$0xff] %vm382_vm0, %v6054_v56  ;;  %v15753_v50 = vld [vmem:[#allocation3 + $0x80] sm:$0xff]  ;;  %v18092_v12 = vld [vmem:[#allocation81_spill] sm:$0xff]  ;;  %v5002_v56 = vrot.slane %v18093_v8, 1  ;;  %v10619_v20 = vld [vmem:[%s17664_s5 + $0x38] sm:$0xff] }
 0x85b   : > { %v15741_v48 = vadd.f32 %v6673_v55, %v6527_v5  ;;  %10437 = vmatmul.msk.f32.gmra.mxu1 %vm382_vm0, %v15753_v50  ;;  %v5065_v55 = vadd.f32 %v5004_v49, %v4790_v1  ;;  %10404 = vmatmul.msk.f32.gmra.mxu0 %vm382_vm0, %v15285_v22  ;;  %v5467_v6 = vrot.slane %v18092_v12, 7  ;;  %v15767_v1 = vld [vmem:[#allocation3 + $0x88] sm:$0xff] }
 0x85c   : > { %10322 = vmatmul.msk.f32.gmra.mxu2 %vm382_vm0, %v15745_v63  ;;  %10371 = vmatmul.msk.f32.gmra.mxu3 %vm382_vm0, %v15745_v63  ;;  %v5003_v22 = vsel %vm1193_vm1, %v5001_v24, %v5002_v56  ;;  %v18097_v24 = vld [vmem:[#allocation86_spill] sm:$0xff] }
 0x85d   : > { %18088 = vst [vmem:[#allocation25_spill] sm:$0xff] %v15741_v48  ;;  %v5472_v35 = vsel %vm738_vm2, %v5467_v6, %v5468_v3  ;;  %v18094_v48 = vld [vmem:[#allocation46_spill] sm:$0xff]  ;;  %8439 = vmatpush.msra.mxu1 %v10619_v20 }
 0x85e   : > { %v4612_v28 = vadd.f32 %v4549_v41, %v18094_v48  ;;  %v5533_v38 = vadd.f32 %v5472_v35, %v5065_v55  ;;  %v5469_v48 = vrot.slane %v18097_v24, 7 }
 0x85f   : > { %v6410_v5 = vpop.f32.mrf.mxu2  ;;  %v6676_v29 = vpop.f32.mrf.mxu3 }
 0x860   : > { %v5871_v49 = vpop.f32.mrf.mxu1  ;;  %v15771_v39 = vpop.f32.mrf.mxu0  ;;  %v4791_v8 = vadd.f32 %v18096_v15, %v4612_v28  ;;  %v5712_v29 = vadd.f32 %v15293_v44, %v5533_v38  ;;  %v6496_v41 = vrot.slane %v6410_v5, 7  ;;  %v15794_v15 = vld [vmem:[#allocation3 + $0x178] sm:$0xff] }
 0x861   : > { %v5923_v12 = vrot.slane %v5871_v49, 1  ;;  %18095 = vst [vmem:[#allocation27_spill] sm:$0xff] %v15771_v39  ;;  %v15773_v47 = vld [vmem:[#allocation3 + $0x170] sm:$0xff]  ;;  %v5471_v49 = vsel %vm738_vm2, %v5468_v3, %v5469_v48 }
 0x862   : > { %v5066_v28 = vadd.f32 %v5003_v22, %v4791_v8  ;;  %v15808_v3 = vld [vmem:[#allocation3 + $0x90] sm:$0xff] }
 0x863   : > { %v5926_v55 = vsel %vm1193_vm1, %v5922_v62, %v5923_v12  ;;  %10438 = vmatmul.msk.f32.gmra.mxu1 %vm382_vm0, %v15767_v1  ;;  %10405 = vmatmul.msk.f32.gmra.mxu0 %vm382_vm0, %v15324_v34  ;;  %v16008_v39 = vld [vmem:[#allocation3 + $0xf0] sm:$0xff] }
 0x864   : > { %10323 = vmatmul.msk.f32.gmra.mxu2 %vm382_vm0, %v15773_v47  ;;  %10372 = vmatmul.msk.f32.gmra.mxu3 %vm382_vm0, %v15773_v47  ;;  %v5987_v44 = vadd.f32 %v5926_v55, %v5712_v29  ;;  %v5534_v62 = vadd.f32 %v5471_v49, %v5066_v28  ;;  %18123 = vst [vmem:[#allocation39_spill] sm:$0xff] %v16008_v39 }
 0x866   : > { %v6023_v56 = vadd.f32 %v15390_v13, %v5987_v44  ;;  %v5713_v5 = vadd.f32 %v15322_v25, %v5534_v62  ;;  %v10961_v62 = vld [vmem:[#allocation3 + $0x18] sm:$0xff] }
 0x867   : > { %v6413_v38 = vpop.f32.mrf.mxu2  ;;  %v6678_v6 = vpop.f32.mrf.mxu3 }
 0x868   : > { %v6497_v35 = vrot.slane %v6413_v38, 7  ;;  %v6055_v24 = vmax.f32 %v6023_v56, 0.0  ;;  %v5874_v8 = vpop.f32.mrf.mxu1  ;;  %v15800_v20 = vpop.f32.mrf.mxu0 }
 0x869   : > { %v5924_v34 = vrot.slane %v5874_v8, 1  ;;  %18099 = vst [vmem:[#allocation59_spill] sm:$0xff] %v15800_v20 }
 0x86a   : > { %v6526_v22 = vsel %vm738_vm2, %v6496_v41, %v6497_v35  ;;  %6111 = vst.msk [vmem:[#allocation3 + $0x180] sm:$0xff] %vm382_vm0, %v6055_v24 }
 0x86b   : > { %v15798_v29 = vadd.f32 %v6678_v6, %v6526_v22  ;;  %v5925_v48 = vsel %vm1193_vm1, %v5923_v12, %v5924_v34  ;;  %10439 = vmatmul.msk.f32.gmra.mxu1 %vm382_vm0, %v15808_v3  ;;  %10406 = vmatmul.msk.f32.gmra.mxu0 %vm382_vm0, %v15345_v30  ;;  %v15828_v30 = vld [vmem:[#allocation3 + $0x98] sm:$0xff]  ;;  %v15836_v22 = vld [vmem:[#allocation3 + $0xa0] sm:$0xff] }
 0x86c   : > { %10324 = vmatmul.msk.f32.gmra.mxu2 %vm382_vm0, %v15794_v15  ;;  %10373 = vmatmul.msk.f32.gmra.mxu3 %vm382_vm0, %v15794_v15  ;;  %v5988_v55 = vadd.f32 %v5925_v48, %v5713_v5  ;;  %18102 = vst [vmem:[#allocation29_spill] sm:$0xff] %v15828_v30  ;;  %v10962_v34 = vld [vmem:[#allocation3 + $0x20] sm:$0xff] }
 0x86d   : > { %18098 = vst [vmem:[#allocation10_spill] sm:$0xff] %v15798_v29 }
 0x86e   : > { %v6024_v44 = vadd.f32 %v15390_v13, %v5988_v55  ;;  %18103 = vst [vmem:[#allocation61_spill] sm:$0xff] %v15836_v22 }
 0x86f   : > { %v6416_v25 = vpop.f32.mrf.mxu2  ;;  %v6681_v28 = vpop.f32.mrf.mxu3 }
 0x870   : > { %v6498_v38 = vrot.slane %v6416_v25, 7  ;;  %v6056_v6 = vmax.f32 %v6024_v44, 0.0  ;;  %v15819_v56 = vpop.f32.mrf.mxu1  ;;  %v15823_v12 = vpop.f32.mrf.mxu0 }
 0x871   : > { %18101 = vst [vmem:[#allocation58_spill] sm:$0xff] %v15823_v12 }
 0x872   : > { %v6525_v41 = vsel %vm738_vm2, %v6497_v35, %v6498_v38  ;;  %6112 = vst.msk [vmem:[#allocation3 + $0x188] sm:$0xff] %vm382_vm0, %v6056_v6 }
 0x873   : > { %v15821_v49 = vadd.f32 %v6681_v28, %v6525_v41  ;;  %10440 = vmatmul.msk.f32.gmra.mxu1 %vm382_vm0, %v15828_v30  ;;  %10407 = vmatmul.msk.f32.gmra.mxu0 %vm382_vm0, %v15362_v10 }
 0x874   : > { %10473 = vmatmul.msk.f32.vlgmr.msrb.gmra.mxu2 %vm382_vm0, %v10961_v62  ;;  %10522 = vmatmul.msk.f32.vlgmr.msra.gmra.mxu3 %vm382_vm0, %v10961_v62 }
 0x875   : > { %18100 = vst [vmem:[#allocation17_spill] sm:$0xff] %v15821_v49 }
 0x877   : > { %v6419_v13 = vpop.f32.mrf.mxu2  ;;  %v6684_v35 = vpop.f32.mrf.mxu3 }
 0x878   : > { %v15834_v24 = vpop.f32.mrf.mxu1  ;;  %v15838_v8 = vpop.f32.mrf.mxu0  ;;  %v6499_v48 = vrot.slane %v6419_v13, 7 }
 0x879   : > { %18104 = vst [vmem:[#allocation15_spill] sm:$0xff] %v15838_v8 }
 0x87b   : > { %10441 = vmatmul.msk.f32.gmra.mxu1 %vm382_vm0, %v15836_v22  ;;  %10408 = vmatmul.msk.f32.gmra.mxu0 %vm382_vm0, %v15404_v60  ;;  %v15858_v60 = vld [vmem:[#allocation3 + $0xa8] sm:$0xff] }
 0x87c   : > { %10474 = vmatmul.msk.f32.gmra.mxu2 %vm382_vm0, %v10962_v34  ;;  %10523 = vmatmul.msk.f32.gmra.mxu3 %vm382_vm0, %v10962_v34 }
 0x87f   : > { %v6422_v10 = vpop.f32.mrf.mxu2  ;;  %v6686_v5 = vpop.f32.mrf.mxu3 }
 0x880   : > { %v6500_v55 = vrot.slane %v6422_v10, 7  ;;  %v15848_v28 = vpop.f32.mrf.mxu1  ;;  %v15852_v38 = vpop.f32.mrf.mxu0 }
 0x881   : > { %18106 = vst [vmem:[#allocation83_spill] sm:$0xff] %v15852_v38  ;;  %v15958_v38 = vld [vmem:[#allocation3 + $0xd8] sm:$0xff] }
 0x882   : > { %v6524_v25 = vsel %vm738_vm2, %v6499_v48, %v6500_v55 }
 0x883   : > { %v15850_v44 = vadd.f32 %v6686_v5, %v6524_v25  ;;  %10442 = vmatmul.msk.f32.gmra.mxu1 %vm382_vm0, %v15858_v60  ;;  %10409 = vmatmul.msk.f32.gmra.mxu0 %vm382_vm0, %v15428_v21  ;;  %v15884_v25 = vld [vmem:[#allocation3 + $0xb8] sm:$0xff] }
 0x884   : > { %10475 = vmatmul.msk.f32.gmra.mxu2 %vm382_vm0, %v15439_v27  ;;  %10524 = vmatmul.msk.f32.gmra.mxu3 %vm382_vm0, %v15439_v27  ;;  %v15876_v27 = vld [vmem:[#allocation3 + $0xb0] sm:$0xff] }
 0x885   : > { %18105 = vst [vmem:[#allocation4_spill] sm:$0xff] %v15850_v44 }
 0x887   : > { %v6425_v6 = vpop.f32.mrf.mxu2  ;;  %v6689_v41 = vpop.f32.mrf.mxu3 }
 0x888   : > { %v6501_v62 = vrot.slane %v6425_v6, 7  ;;  %v15866_v35 = vpop.f32.mrf.mxu1  ;;  %v15870_v10 = vpop.f32.mrf.mxu0 }
 0x889   : > { %18108 = vst [vmem:[#allocation26_spill] sm:$0xff] %v15870_v10 }
 0x88a   : > { %v6523_v13 = vsel %vm738_vm2, %v6500_v55, %v6501_v62 }
 0x88b   : > { %v15868_v34 = vadd.f32 %v6689_v41, %v6523_v13  ;;  %10443 = vmatmul.msk.f32.gmra.mxu1 %vm382_vm0, %v15876_v27  ;;  %10410 = vmatmul.msk.f32.gmra.mxu0 %vm382_vm0, %v15448_v59 }
 0x88c   : > { %10476 = vmatmul.msk.f32.gmra.mxu2 %vm382_vm0, %v15466_v32  ;;  %10525 = vmatmul.msk.f32.gmra.mxu3 %vm382_vm0, %v15466_v32 }
 0x88d   : > { %18107 = vst [vmem:[#allocation32_spill] sm:$0xff] %v15868_v34 }
 0x88f   : > { %v6428_v5 = vpop.f32.mrf.mxu2  ;;  %v6692_v48 = vpop.f32.mrf.mxu3 }
 0x890   : > { %v15882_v55 = vpop.f32.mrf.mxu1  ;;  %v15886_v6 = vpop.f32.mrf.mxu0  ;;  %v6502_v62 = vrot.slane %v6428_v5, 7 }
 0x891   : > { %18109 = vst [vmem:[#allocation62_spill] sm:$0xff] %v15886_v6 }
 0x893   : > { %10444 = vmatmul.msk.f32.gmra.mxu1 %vm382_vm0, %v15884_v25  ;;  %10411 = vmatmul.msk.f32.gmra.mxu0 %vm382_vm0, %v15487_v53 }
 0x894   : > { %10477 = vmatmul.msk.f32.gmra.mxu2 %vm382_vm0, %v15496_v0  ;;  %10526 = vmatmul.msk.f32.gmra.mxu3 %vm382_vm0, %v15496_v0  ;;  %v15908_v0 = vld [vmem:[#allocation3 + $0xc0] sm:$0xff] }
 0x897   : > { %v6431_v32 = vpop.f32.mrf.mxu2  ;;  %v6694_v41 = vpop.f32.mrf.mxu3 }
 0x898   : > { %v6503_v13 = vrot.slane %v6431_v32, 7  ;;  %v15898_v34 = vpop.f32.mrf.mxu1  ;;  %v15902_v49 = vpop.f32.mrf.mxu0 }
 0x899   : > { %18111 = vst [vmem:[#allocation16_spill] sm:$0xff] %v15902_v49 }
 0x89a   : > { %v6522_v48 = vsel %vm738_vm2, %v6502_v62, %v6503_v13 }
 0x89b   : > { %v15900_v44 = vadd.f32 %v6694_v41, %v6522_v48  ;;  %10445 = vmatmul.msk.f32.gmra.mxu1 %vm382_vm0, %v15908_v0  ;;  %10412 = vmatmul.msk.f32.gmra.mxu0 %vm382_vm0, %v15513_v51 }
 0x89c   : > { %10478 = vmatmul.msk.f32.gmra.mxu2 %vm382_vm0, %v15524_v17  ;;  %10527 = vmatmul.msk.f32.gmra.mxu3 %vm382_vm0, %v15524_v17  ;;  %v15926_v17 = vld [vmem:[#allocation3 + $0xc8] sm:$0xff] }
 0x89d   : > { %18110 = vst [vmem:[#allocation63_spill] sm:$0xff] %v15900_v44 }
 0x89f   : > { %v6434_v5 = vpop.f32.mrf.mxu2  ;;  %v6697_v32 = vpop.f32.mrf.mxu3 }
 0x8a0   : > { %v6504_v41 = vrot.slane %v6434_v5, 7  ;;  %v15916_v48 = vpop.f32.mrf.mxu1  ;;  %v15920_v29 = vpop.f32.mrf.mxu0 }
 0x8a1   : > { %18113 = vst [vmem:[#allocation34_spill] sm:$0xff] %v15920_v29 }
 0x8a2   : > { %v6521_v62 = vsel %vm738_vm2, %v6503_v13, %v6504_v41 }
 0x8a3   : > { %v15918_v44 = vadd.f32 %v6697_v32, %v6521_v62  ;;  %10446 = vmatmul.msk.f32.gmra.mxu1 %vm382_vm0, %v15926_v17  ;;  %10413 = vmatmul.msk.f32.gmra.mxu0 %vm382_vm0, %v15533_v18 }
 0x8a4   : > { %10479 = vmatmul.msk.f32.gmra.mxu2 %vm382_vm0, %v15551_v52  ;;  %10528 = vmatmul.msk.f32.gmra.mxu3 %vm382_vm0, %v15551_v52  ;;  %v15940_v52 = vld [vmem:[#allocation3 + $0xd0] sm:$0xff] }
 0x8a5   : > { %18112 = vst [vmem:[#allocation87_spill] sm:$0xff] %v15918_v44 }
 0x8a7   : > { %v6437_v13 = vpop.f32.mrf.mxu2  ;;  %v6700_v5 = vpop.f32.mrf.mxu3 }
 0x8a8   : > { %v15932_v32 = vpop.f32.mrf.mxu1  ;;  %v15934_v41 = vpop.f32.mrf.mxu0  ;;  %v6505_v44 = vrot.slane %v6437_v13, 7 }
 0x8a9   : > { %18114 = vst [vmem:[#allocation64_spill] sm:$0xff] %v15934_v41 }
 0x8ab   : > { %10447 = vmatmul.msk.f32.gmra.mxu1 %vm382_vm0, %v15940_v52  ;;  %10414 = vmatmul.msk.f32.gmra.mxu0 %vm382_vm0, %v15572_v7 }
 0x8ac   : > { %10480 = vmatmul.msk.f32.gmra.mxu2 %vm382_vm0, %v15581_v26  ;;  %10529 = vmatmul.msk.f32.gmra.mxu3 %vm382_vm0, %v15581_v26 }
 0x8af   : > { %v6440_v62 = vpop.f32.mrf.mxu2  ;;  %v6702_v5 = vpop.f32.mrf.mxu3 }
 0x8b0   : > { %v6506_v49 = vrot.slane %v6440_v62, 7  ;;  %v15948_v29 = vpop.f32.mrf.mxu1  ;;  %v15952_v26 = vpop.f32.mrf.mxu0 }
 0x8b1   : > { %18116 = vst [vmem:[#allocation28_spill] sm:$0xff] %v15952_v26 }
 0x8b2   : > { %v6520_v41 = vsel %vm738_vm2, %v6505_v44, %v6506_v49 }
 0x8b3   : > { %v15950_v6 = vadd.f32 %v6702_v5, %v6520_v41  ;;  %10448 = vmatmul.msk.f32.gmra.mxu1 %vm382_vm0, %v15958_v38  ;;  %10415 = vmatmul.msk.f32.gmra.mxu0 %vm382_vm0, %v15598_v31 }
 0x8b4   : > { %10481 = vmatmul.msk.f32.gmra.mxu2 %vm382_vm0, %v15609_v14  ;;  %10530 = vmatmul.msk.f32.gmra.mxu3 %vm382_vm0, %v15609_v14  ;;  %v15976_v14 = vld [vmem:[#allocation3 + $0xe0] sm:$0xff] }
 0x8b5   : > { %18115 = vst [vmem:[#allocation65_spill] sm:$0xff] %v15950_v6 }
 0x8b7   : > { %v6443_v44 = vpop.f32.mrf.mxu2  ;;  %v6705_v13 = vpop.f32.mrf.mxu3 }
 0x8b8   : > { %v6507_v41 = vrot.slane %v6443_v44, 7  ;;  %v15966_v5 = vpop.f32.mrf.mxu1  ;;  %v15970_v26 = vpop.f32.mrf.mxu0 }
 0x8b9   : > { %18118 = vst [vmem:[#allocation37_spill] sm:$0xff] %v15970_v26 }
 0x8ba   : > { %v6519_v62 = vsel %vm738_vm2, %v6506_v49, %v6507_v41 }
 0x8bb   : > { %v15968_v6 = vadd.f32 %v6705_v13, %v6519_v62  ;;  %10449 = vmatmul.msk.f32.gmra.mxu1 %vm382_vm0, %v15976_v14  ;;  %10416 = vmatmul.msk.f32.gmra.mxu0 %vm382_vm0, %v15618_v45  ;;  %v15990_v62 = vld [vmem:[#allocation3 + $0xe8] sm:$0xff] }
 0x8bc   : > { %10482 = vmatmul.msk.f32.gmra.mxu2 %vm382_vm0, %v15634_v23  ;;  %10531 = vmatmul.msk.f32.gmra.mxu3 %vm382_vm0, %v15634_v23 }
 0x8bd   : > { %18117 = vst [vmem:[#allocation22_spill] sm:$0xff] %v15968_v6 }
 0x8bf   : > { %v6446_v49 = vpop.f32.mrf.mxu2  ;;  %v6708_v44 = vpop.f32.mrf.mxu3 }
 0x8c0   : > { %v15982_v13 = vpop.f32.mrf.mxu1  ;;  %v15984_v41 = vpop.f32.mrf.mxu0  ;;  %v6508_v26 = vrot.slane %v6446_v49, 7 }
 0x8c1   : > { %18119 = vst [vmem:[#allocation31_spill] sm:$0xff] %v15984_v41 }
 0x8c3   : > { %10450 = vmatmul.msk.f32.gmra.mxu1 %vm382_vm0, %v15990_v62  ;;  %10417 = vmatmul.msk.f32.gmra.mxu0 %vm382_vm0, %v15657_v4 }
 0x8c4   : > { %10483 = vmatmul.msk.f32.gmra.mxu2 %vm382_vm0, %v15665_v36  ;;  %10532 = vmatmul.msk.f32.gmra.mxu3 %vm382_vm0, %v15665_v36 }
 0x8c7   : > { %v6449_v6 = vpop.f32.mrf.mxu2  ;;  %v6710_v44 = vpop.f32.mrf.mxu3 }
 0x8c8   : > { %v6509_v10 = vrot.slane %v6449_v6, 7  ;;  %v15998_v8 = vpop.f32.mrf.mxu1  ;;  %v16002_v12 = vpop.f32.mrf.mxu0 }
 0x8c9   : > { %18120 = vst [vmem:[#allocation67_spill] sm:$0xff] %v15998_v8  ;;  %v16026_v8 = vld [vmem:[#allocation3 + $0xf8] sm:$0xff] }
 0x8ca   : > { %v6518_v41 = vsel %vm738_vm2, %v6508_v26, %v6509_v10  ;;  %18122 = vst [vmem:[#allocation66_spill] sm:$0xff] %v16002_v12 }
 0x8cb   : > { %v16000_v20 = vadd.f32 %v6710_v44, %v6518_v41  ;;  %10451 = vmatmul.msk.f32.gmra.mxu1 %vm382_vm0, %v16008_v39  ;;  %10418 = vmatmul.msk.f32.gmra.mxu0 %vm382_vm0, %v15685_v19  ;;  %18127 = vst [vmem:[#allocation23_spill] sm:$0xff] %v16026_v8 }
 0x8cc   : > { %10484 = vmatmul.msk.f32.gmra.mxu2 %vm382_vm0, %v15679_v9  ;;  %10533 = vmatmul.msk.f32.gmra.mxu3 %vm382_vm0, %v15679_v9 }
 0x8cd   : > { %18121 = vst [vmem:[#allocation68_spill] sm:$0xff] %v16000_v20 }
 0x8cf   : > { %v6452_v6 = vpop.f32.mrf.mxu2  ;;  %v6713_v26 = vpop.f32.mrf.mxu3 }
 0x8d0   : > { %v6510_v49 = vrot.slane %v6452_v6, 7  ;;  %v16016_v44 = vpop.f32.mrf.mxu1  ;;  %v16020_v12 = vpop.f32.mrf.mxu0 }
 0x8d1   : > { %18124 = vst [vmem:[#allocation69_spill] sm:$0xff] %v16016_v44 }
 0x8d2   : > { %v6517_v41 = vsel %vm738_vm2, %v6509_v10, %v6510_v49  ;;  %18126 = vst [vmem:[#allocation33_spill] sm:$0xff] %v16020_v12 }
 0x8d3   : > { %v16018_v20 = vadd.f32 %v6713_v26, %v6517_v41  ;;  %10452 = vmatmul.msk.f32.gmra.mxu1 %vm382_vm0, %v16026_v8  ;;  %10419 = vmatmul.msk.f32.gmra.mxu0 %vm382_vm0, %v15703_v46  ;;  %v16040_v41 = vld [vmem:[#allocation3 + $0x100] sm:$0xff] }
 0x8d4   : > { %10485 = vmatmul.msk.f32.gmra.mxu2 %vm382_vm0, %v15719_v40  ;;  %10534 = vmatmul.msk.f32.gmra.mxu3 %vm382_vm0, %v15719_v40  ;;  %18130 = vst [vmem:[#allocation72_spill] sm:$0xff] %v16040_v41 }
 0x8d5   : > { %18125 = vst [vmem:[#allocation70_spill] sm:$0xff] %v16018_v20 }
 0x8d7   : > { %v6455_v10 = vpop.f32.mrf.mxu2  ;;  %v6716_v6 = vpop.f32.mrf.mxu3 }
 0x8d8   : > { %v16032_v26 = vpop.f32.mrf.mxu1  ;;  %v16034_v49 = vpop.f32.mrf.mxu0  ;;  %v6511_v12 = vrot.slane %v6455_v10, 7 }
 0x8d9   : > { %18128 = vst [vmem:[#allocation41_spill] sm:$0xff] %v16032_v26 }
 0x8da   : > { %18129 = vst [vmem:[#allocation35_spill] sm:$0xff] %v16034_v49 }
 0x8db   : > { %10453 = vmatmul.msk.f32.gmra.mxu1 %vm382_vm0, %v16040_v41  ;;  %10420 = vmatmul.msk.f32.gmra.mxu0 %vm382_vm0, %v15745_v63  ;;  %v16058_v41 = vld [vmem:[#allocation3 + $0x108] sm:$0xff] }
 0x8dc   : > { %10486 = vmatmul.msk.f32.gmra.mxu2 %vm382_vm0, %v15753_v50  ;;  %10535 = vmatmul.msk.f32.gmra.mxu3 %vm382_vm0, %v15753_v50  ;;  %18134 = vst [vmem:[#allocation74_spill] sm:$0xff] %v16058_v41 }
 0x8df   : > { %v6458_v20 = vpop.f32.mrf.mxu2  ;;  %v6718_v6 = vpop.f32.mrf.mxu3 }
 0x8e0   : > { %v6512_v26 = vrot.slane %v6458_v20, 7  ;;  %v16048_v8 = vpop.f32.mrf.mxu1  ;;  %v16052_v39 = vpop.f32.mrf.mxu0 }
 0x8e1   : > { %18131 = vst [vmem:[#allocation73_spill] sm:$0xff] %v16048_v8  ;;  %v7389_v8 = vrot.slane %v15834_v24, 7  ;;  %v16135_v24 = vld [vmem:[#allocation3 + $0x40] sm:$0xff] }
 0x8e2   : > { %v6516_v49 = vsel %vm738_vm2, %v6511_v12, %v6512_v26  ;;  %18133 = vst [vmem:[#allocation42_spill] sm:$0xff] %v16052_v39 }
 0x8e3   : > { %v16050_v44 = vadd.f32 %v6718_v6, %v6516_v49  ;;  %10454 = vmatmul.msk.f32.gmra.mxu1 %vm382_vm0, %v16058_v41  ;;  %10421 = vmatmul.msk.f32.gmra.mxu0 %vm382_vm0, %v15773_v47 }
 0x8e4   : > { %10487 = vmatmul.msk.f32.gmra.mxu2 %vm382_vm0, %v15767_v1  ;;  %10536 = vmatmul.msk.f32.gmra.mxu3 %vm382_vm0, %v15767_v1 }
 0x8e5   : > { %18132 = vst [vmem:[#allocation71_spill] sm:$0xff] %v16050_v44 }
 0x8e7   : > { %v6461_v20 = vpop.f32.mrf.mxu2  ;;  %v6721_v12 = vpop.f32.mrf.mxu3 }
 0x8e8   : > { %v6513_v10 = vrot.slane %v6461_v20, 7  ;;  %v16066_v6 = vpop.f32.mrf.mxu1  ;;  %v16070_v39 = vpop.f32.mrf.mxu0 }
 0x8e9   : > { %18135 = vst [vmem:[#allocation75_spill] sm:$0xff] %v16066_v6 }
 0x8ea   : > { %v6515_v49 = vsel %vm738_vm2, %v6512_v26, %v6513_v10  ;;  %18137 = vst [vmem:[#allocation38_spill] sm:$0xff] %v16070_v39  ;;  %v18145_v39 = vld [vmem:[#allocation21_spill] sm:$0xff] }
 0x8eb   : > { %v16068_v44 = vadd.f32 %v6721_v12, %v6515_v49  ;;  %10455 = vmatmul.msk.f32.gmra.mxu1 %vm382_vm0, %v15428_v21  ;;  %10422 = vmatmul.msk.f32.gmra.mxu0 %vm382_vm0, %v15794_v15  ;;  %v16092_v21 = vld [vmem:[#allocation3 + $0x30] sm:$0xff] }
 0x8ec   : > { %10488 = vmatmul.msk.f32.gmra.mxu2 %vm382_vm0, %v15808_v3  ;;  %10537 = vmatmul.msk.f32.gmra.mxu3 %vm382_vm0, %v15808_v3  ;;  %18141 = vst [vmem:[#allocation89_spill] sm:$0xff] %v16092_v21 }
 0x8ed   : > { %18136 = vst [vmem:[#allocation97_spill] sm:$0xff] %v16068_v44 }
 0x8ef   : > { %v16080_v20 = vpop.f32.mrf.mxu2  ;;  %v6724_v26 = vpop.f32.mrf.mxu3 }
 0x8f0   : > { %18138 = vst [vmem:[#allocation48_spill] sm:$0xff] %v16080_v20  ;;  %v16082_v10 = vpop.f32.mrf.mxu1  ;;  %v16084_v12 = vpop.f32.mrf.mxu0 }
 0x8f1   : > { %18139 = vst [vmem:[#allocation96_spill] sm:$0xff] %v16082_v10  ;;  %v6468_v10 = vrot.slane %v18145_v39, 7 }
 0x8f2   : > { %18140 = vst [vmem:[#allocation47_spill] sm:$0xff] %v16084_v12  ;;  %v18144_v12 = vld [vmem:[#allocation95_spill] sm:$0xff] }
 0x8f3   : > { %10456 = vmatmul.msk.f32.gmra.mxu1 %vm382_vm0, %v15448_v59  ;;  %10571 = vmatmul.msk.f32.vlgmr.msra.gmra.mxu0 %vm382_vm0, %v16092_v21  ;;  %v17723_v20 = vrot.slane %v18144_v12, 7  ;;  %v16110_v59 = vld [vmem:[#allocation3 + $0x38] sm:$0xff]  ;;  %v17728_v21 = vrot.slane %v15402_v2, 1 }
 0x8f4   : > { %10489 = vmatmul.msk.f32.gmra.mxu2 %vm382_vm0, %v15828_v30  ;;  %10538 = vmatmul.msk.f32.gmra.mxu3 %vm382_vm0, %v15828_v30  ;;  %18147 = vst [vmem:[#allocation77_spill] sm:$0xff] %v16110_v59 }
 0x8f5   : > { %v6545_v39 = vsel %vm738_vm2, %v17723_v20, %v6468_v10  ;;  %v18149_v20 = vld [vmem:[#allocation94_spill] sm:$0xff] }
 0x8f6   : > { %v6727_v41 = vadd.f32 %v18149_v20, %v6545_v39  ;;  %v6924_v20 = vrot.slane %v15456_v11, 1 }
 0x8f7   : > { %v16096_v49 = vpop.f32.mrf.mxu2  ;;  %v7698_v26 = vpop.f32.mrf.mxu3 }
 0x8f8   : > { %18142 = vst [vmem:[#allocation88_spill] sm:$0xff] %v16096_v49  ;;  %v16098_v44 = vpop.f32.mrf.mxu1  ;;  %v16102_v6 = vpop.f32.mrf.mxu0  ;;  %v6923_v49 = vrot.slane %v15426_v58, 1 }
 0x8f9   : > { %18143 = vst [vmem:[#allocation43_spill] sm:$0xff] %v16098_v44 }
 0x8fa   : > { %18146 = vst [vmem:[#allocation52_spill] sm:$0xff] %v16102_v6  ;;  %v6999_v58 = vsel %vm1193_vm1, %v17728_v21, %v6923_v49 }
 0x8fb   : > { %10457 = vmatmul.msk.f32.gmra.mxu1 %vm382_vm0, %v15487_v53  ;;  %10572 = vmatmul.msk.f32.gmra.mxu0 %vm382_vm0, %v16110_v59  ;;  %v17727_v59 = vrot.slane %v15819_v56, 7  ;;  %v7002_v49 = vadd.f32 %v6999_v58, %v6727_v41 }
 0x8fc   : > { %10490 = vmatmul.msk.f32.gmra.mxu2 %vm382_vm0, %v15836_v22  ;;  %10539 = vmatmul.msk.f32.gmra.mxu3 %vm382_vm0, %v15836_v22  ;;  %v7842_v22 = vrot.slane %v7698_v26, 1  ;;  %v7390_v26 = vrot.slane %v15848_v28, 7 }
 0x8ff   : > { %v7522_v6 = vpop.f32.mrf.mxu2  ;;  %v7701_v44 = vpop.f32.mrf.mxu3 }
 0x900   : > { %v7843_v53 = vrot.slane %v7701_v44, 1  ;;  %v16130_v10 = vpop.f32.mrf.mxu1  ;;  %v16133_v30 = vpop.f32.mrf.mxu0  ;;  %v7466_v44 = vsel %vm738_vm2, %v17727_v59, %v7389_v8  ;;  %v7391_v8 = vrot.slane %v15866_v35, 7  ;;  %v18152_v35 = vld [vmem:[#allocation6_spill] sm:$0xff] }
 0x901   : > { %18150 = vst [vmem:[#allocation76_spill] sm:$0xff] %v16133_v30  ;;  %v7469_v39 = vadd.f32 %v7466_v44, %v7002_v49 }
 0x902   : > { %v16128_v12 = vsel %vm1193_vm1, %v7842_v22, %v7843_v53  ;;  %v6925_v22 = vrot.slane %v15485_v54, 1  ;;  %v7465_v11 = vsel %vm738_vm2, %v7390_v26, %v7391_v8 }
 0x903   : > { %18148 = vst [vmem:[#allocation78_spill] sm:$0xff] %v16128_v12  ;;  %10458 = vmatmul.msk.f32.gmra.mxu1 %vm382_vm0, %v15513_v51  ;;  %10573 = vmatmul.msk.f32.gmra.mxu0 %vm382_vm0, %v16135_v24  ;;  %v7648_v41 = vadd.f32 %v7522_v6, %v7469_v39 }
 0x904   : > { %10491 = vmatmul.msk.f32.gmra.mxu2 %vm382_vm0, %v15858_v60  ;;  %10540 = vmatmul.msk.f32.gmra.mxu3 %vm382_vm0, %v15858_v60  ;;  %v6998_v54 = vsel %vm1193_vm1, %v6924_v20, %v6925_v22 }
 0x905   : > { %v7003_v6 = vadd.f32 %v6998_v54, %v18152_v35 }
 0x907   : > { %v7525_v59 = vpop.f32.mrf.mxu2  ;;  %v7704_v21 = vpop.f32.mrf.mxu3 }
 0x908   : > { %v7844_v30 = vrot.slane %v7704_v21, 1  ;;  %v16157_v58 = vpop.f32.mrf.mxu1  ;;  %v16159_v12 = vpop.f32.mrf.mxu0  ;;  %v6926_v21 = vrot.slane %v15511_v16, 1  ;;  %v7470_v59 = vadd.f32 %v7465_v11, %v7003_v6 }
 0x90a   : > { %v7920_v51 = vsel %vm1193_vm1, %v7843_v53, %v7844_v30  ;;  %v16173_v30 = vld [vmem:[#allocation3 + $0x48] sm:$0xff]  ;;  %v7392_v53 = vrot.slane %v15882_v55, 7  ;;  %v6997_v26 = vsel %vm1193_vm1, %v6925_v22, %v6926_v21  ;;  %v18153_v55 = vld [vmem:[#allocation30_spill] sm:$0xff] }
 0x90b   : > { %v16163_v28 = vadd.f32 %v7920_v51, %v7648_v41  ;;  %10459 = vmatmul.msk.f32.gmra.mxu1 %vm382_vm0, %v15533_v18  ;;  %10574 = vmatmul.msk.f32.gmra.mxu0 %vm382_vm0, %v16173_v30  ;;  %v7004_v54 = vadd.f32 %v6997_v26, %v18153_v55  ;;  %v16193_v41 = vld [vmem:[#allocation3 + $0x50] sm:$0xff]  ;;  %v6927_v26 = vrot.slane %v15541_v33, 1 }
 0x90c   : > { %10492 = vmatmul.msk.f32.gmra.mxu2 %vm382_vm0, %v15876_v27  ;;  %10541 = vmatmul.msk.f32.gmra.mxu3 %vm382_vm0, %v15876_v27  ;;  %v7464_v18 = vsel %vm738_vm2, %v7391_v8, %v7392_v53 }
 0x90d   : > { %18151 = vst [vmem:[#allocation90_spill] sm:$0xff] %v16163_v28  ;;  %v7471_v22 = vadd.f32 %v7464_v18, %v7004_v54  ;;  %v7393_v18 = vrot.slane %v15898_v34, 7  ;;  %v18156_v34 = vld [vmem:[#allocation8_spill] sm:$0xff] }
 0x90e   : > { %v10981_v28 = vld [vmem:[#allocation3 + $0x150] sm:$0xff] }
 0x90f   : > { %v7527_v44 = vpop.f32.mrf.mxu2  ;;  %v7707_v49 = vpop.f32.mrf.mxu3 }
 0x910   : > { %v7649_v20 = vadd.f32 %v7527_v44, %v7470_v59  ;;  %v16180_v39 = vpop.f32.mrf.mxu1  ;;  %v16182_v16 = vpop.f32.mrf.mxu0  ;;  %v7845_v8 = vrot.slane %v7707_v49, 1  ;;  %v16203_v44 = vld [vmem:[#allocation3 + $0x58] sm:$0xff]  ;;  %v6928_v49 = vrot.slane %v15570_v57, 1 }
 0x913   : > { %10460 = vmatmul.msk.f32.gmra.mxu1 %vm382_vm0, %v15572_v7  ;;  %10575 = vmatmul.msk.f32.gmra.mxu0 %vm382_vm0, %v16193_v41 }
 0x914   : > { %10493 = vmatmul.msk.f32.gmra.mxu2 %vm382_vm0, %v15884_v25  ;;  %10542 = vmatmul.msk.f32.gmra.mxu3 %vm382_vm0, %v15884_v25 }
 0x917   : > { %v7530_v51 = vpop.f32.mrf.mxu2  ;;  %v7710_v11 = vpop.f32.mrf.mxu3 }
 0x918   : > { %v7650_v35 = vadd.f32 %v7530_v51, %v7471_v22  ;;  %v7846_v6 = vrot.slane %v7710_v11, 1  ;;  %v16199_v59 = vpop.f32.mrf.mxu1  ;;  %v16201_v53 = vpop.f32.mrf.mxu0  ;;  %v6996_v51 = vsel %vm1193_vm1, %v6927_v26, %v6928_v49 }
 0x91a   : > { %v7919_v21 = vsel %vm1193_vm1, %v7845_v8, %v7846_v6 }
 0x91b   : > { %v16205_v7 = vadd.f32 %v7919_v21, %v7649_v20  ;;  %10461 = vmatmul.msk.f32.gmra.mxu1 %vm382_vm0, %v15598_v31  ;;  %10576 = vmatmul.msk.f32.gmra.mxu0 %vm382_vm0, %v16203_v44  ;;  %v7394_v20 = vrot.slane %v15916_v48, 7  ;;  %v7005_v48 = vadd.f32 %v6996_v51, %v18156_v34  ;;  %v6929_v21 = vrot.slane %v15596_v61, 1 }
 0x91c   : > { %10494 = vmatmul.msk.f32.gmra.mxu2 %vm382_vm0, %v15908_v0  ;;  %10543 = vmatmul.msk.f32.gmra.mxu3 %vm382_vm0, %v15908_v0 }
 0x91d   : > { %18154 = vst [vmem:[#allocation44_spill] sm:$0xff] %v16205_v7  ;;  %v7463_v33 = vsel %vm738_vm2, %v7393_v18, %v7394_v20 }
 0x91f   : > { %v7533_v55 = vpop.f32.mrf.mxu2  ;;  %v7713_v54 = vpop.f32.mrf.mxu3 }
 0x920   : > { %v7847_v22 = vrot.slane %v7713_v54, 1  ;;  %v16223_v11 = vpop.f32.mrf.mxu1  ;;  %v16225_v31 = vpop.f32.mrf.mxu0  ;;  %v6995_v54 = vsel %vm1193_vm1, %v6928_v49, %v6929_v21 }
 0x922   : > { %v7918_v57 = vsel %vm1193_vm1, %v7846_v6, %v7847_v22  ;;  %v7472_v6 = vadd.f32 %v7463_v33, %v7005_v48 }
 0x923   : > { %v16229_v8 = vadd.f32 %v7918_v57, %v7650_v35  ;;  %10462 = vmatmul.msk.f32.gmra.mxu1 %vm382_vm0, %v15618_v45  ;;  %10577 = vmatmul.msk.f32.gmra.mxu0 %vm382_vm0, %v15634_v23  ;;  %v7395_v35 = vrot.slane %v15932_v32, 7  ;;  %v18157_v45 = vld [vmem:[#allocation13_spill] sm:$0xff] }
 0x924   : > { %10495 = vmatmul.msk.f32.gmra.mxu2 %vm382_vm0, %v15926_v17  ;;  %10544 = vmatmul.msk.f32.gmra.mxu3 %vm382_vm0, %v15926_v17  ;;  %v7006_v23 = vadd.f32 %v6995_v54, %v18157_v45 }
 0x925   : > { %18155 = vst [vmem:[#allocation79_spill] sm:$0xff] %v16229_v8  ;;  %v7462_v61 = vsel %vm738_vm2, %v7394_v20, %v7395_v35  ;;  %v7397_v35 = vrot.slane %v15966_v5, 7  ;;  %v10977_v8 = vld [vmem:[#allocation3 + $0x138] sm:$0xff] }
 0x926   : > { %v7473_v32 = vadd.f32 %v7462_v61, %v7006_v23  ;;  %v18161_v61 = vld [vmem:[#allocation12_spill] sm:$0xff] }
 0x927   : > { %v7535_v26 = vpop.f32.mrf.mxu2  ;;  %v7716_v18 = vpop.f32.mrf.mxu3  ;;  %v6932_v45 = vrot.slane %v18161_v61, 1 }
 0x928   : > { %v7651_v55 = vadd.f32 %v7535_v26, %v7472_v6  ;;  %v16244_v17 = vpop.f32.mrf.mxu1  ;;  %v16246_v22 = vpop.f32.mrf.mxu0  ;;  %v7848_v57 = vrot.slane %v7716_v18, 1  ;;  %v7396_v6 = vrot.slane %v15948_v29, 7  ;;  %v18160_v29 = vld [vmem:[#allocation14_spill] sm:$0xff] }
 0x92b   : > { %10463 = vmatmul.msk.f32.gmra.mxu1 %vm382_vm0, %v15657_v4  ;;  %10578 = vmatmul.msk.f32.gmra.mxu0 %vm382_vm0, %v15665_v36  ;;  %v6931_v4 = vrot.slane %v15655_v42, 1  ;;  %v6930_v36 = vrot.slane %v15626_v43, 1  ;;  %v7461_v43 = vsel %vm738_vm2, %v7396_v6, %v7397_v35 }
 0x92c   : > { %10496 = vmatmul.msk.f32.gmra.mxu2 %vm382_vm0, %v15940_v52  ;;  %10545 = vmatmul.msk.f32.gmra.mxu3 %vm382_vm0, %v15940_v52 }
 0x92f   : > { %v7538_v49 = vpop.f32.mrf.mxu2  ;;  %v7719_v51 = vpop.f32.mrf.mxu3 }
 0x930   : > { %v7652_v33 = vadd.f32 %v7538_v49, %v7473_v32  ;;  %v7849_v20 = vrot.slane %v7719_v51, 1  ;;  %v16261_v48 = vpop.f32.mrf.mxu1  ;;  %v16263_v52 = vpop.f32.mrf.mxu0  ;;  %v7398_v32 = vrot.slane %v15982_v13, 7 }
 0x932   : > { %v7917_v34 = vsel %vm1193_vm1, %v7848_v57, %v7849_v20 }
 0x933   : > { %v16265_v21 = vadd.f32 %v7917_v34, %v7651_v55  ;;  %10464 = vmatmul.msk.f32.gmra.mxu1 %vm382_vm0, %v15685_v19  ;;  %10579 = vmatmul.msk.f32.gmra.mxu0 %vm382_vm0, %v15679_v9  ;;  %v7460_v34 = vsel %vm738_vm2, %v7397_v35, %v7398_v32 }
 0x934   : > { %10497 = vmatmul.msk.f32.gmra.mxu2 %vm382_vm0, %v15958_v38  ;;  %10546 = vmatmul.msk.f32.gmra.mxu3 %vm382_vm0, %v15958_v38  ;;  %v6994_v38 = vsel %vm1193_vm1, %v6930_v36, %v6931_v4 }
 0x935   : > { %18158 = vst [vmem:[#allocation80_spill] sm:$0xff] %v16265_v21  ;;  %v7007_v5 = vadd.f32 %v6994_v38, %v18160_v29 }
 0x937   : > { %v7541_v26 = vpop.f32.mrf.mxu2  ;;  %v7722_v18 = vpop.f32.mrf.mxu3  ;;  %v7474_v23 = vadd.f32 %v7461_v43, %v7007_v5  ;;  %v18166_v43 = vld [vmem:[#allocation56_spill] sm:$0xff]  ;;  %v18167_v5 = vld [vmem:[#allocation67_spill] sm:$0xff] }
 0x938   : > { %v7850_v55 = vrot.slane %v7722_v18, 1  ;;  %v16283_v54 = vpop.f32.mrf.mxu1  ;;  %v16285_v19 = vpop.f32.mrf.mxu0  ;;  %v6933_v29 = vrot.slane %v18166_v43, 1  ;;  %v7399_v61 = vrot.slane %v18167_v5, 7 }
 0x93a   : > { %v7916_v42 = vsel %vm1193_vm1, %v7849_v20, %v7850_v55 }
 0x93b   : > { %v16289_v9 = vadd.f32 %v7916_v42, %v7652_v33  ;;  %10465 = vmatmul.msk.f32.gmra.mxu1 %vm382_vm0, %v15703_v46  ;;  %10580 = vmatmul.msk.f32.gmra.mxu0 %vm382_vm0, %v15719_v40  ;;  %v6993_v33 = vsel %vm1193_vm1, %v6931_v4, %v6932_v45  ;;  %v18162_v46 = vld [vmem:[#allocation9_spill] sm:$0xff]  ;;  %v18164_v42 = vld [vmem:[#allocation39_spill] sm:$0xff] }
 0x93c   : > { %10498 = vmatmul.msk.f32.gmra.mxu2 %vm382_vm0, %v15976_v14  ;;  %10547 = vmatmul.msk.f32.gmra.mxu3 %vm382_vm0, %v15976_v14  ;;  %v7008_v40 = vadd.f32 %v6993_v33, %v18162_v46  ;;  %v18168_v45 = vld [vmem:[#allocation69_spill] sm:$0xff] }
 0x93d   : > { %18159 = vst [vmem:[#allocation55_spill] sm:$0xff] %v16289_v9 }
 0x93e   : > { %v7475_v13 = vadd.f32 %v7460_v34, %v7008_v40  ;;  %v18171_v40 = vld [vmem:[#allocation23_spill] sm:$0xff] }
 0x93f   : > { %v7543_v49 = vpop.f32.mrf.mxu2  ;;  %v7725_v51 = vpop.f32.mrf.mxu3 }
 0x940   : > { %v7653_v57 = vadd.f32 %v7543_v49, %v7474_v23  ;;  %v16304_v14 = vpop.f32.mrf.mxu1  ;;  %v16306_v20 = vpop.f32.mrf.mxu0  ;;  %v7851_v6 = vrot.slane %v7725_v51, 1  ;;  %v7400_v23 = vrot.slane %v18168_v45, 7 }
 0x943   : > { %10466 = vmatmul.msk.f32.gmra.mxu1 %vm382_vm0, %v15745_v63  ;;  %10581 = vmatmul.msk.f32.gmra.mxu0 %vm382_vm0, %v15753_v50  ;;  %v18165_v63 = vld [vmem:[#allocation19_spill] sm:$0xff] }
 0x944   : > { %10499 = vmatmul.msk.f32.gmra.mxu2 %vm382_vm0, %v15990_v62  ;;  %10548 = vmatmul.msk.f32.gmra.mxu3 %vm382_vm0, %v15990_v62  ;;  %v6934_v50 = vrot.slane %v18165_v63, 1 }
 0x947   : > { %v7546_v4 = vpop.f32.mrf.mxu2  ;;  %v7728_v36 = vpop.f32.mrf.mxu3 }
 0x948   : > { %v7654_v26 = vadd.f32 %v7546_v4, %v7475_v13  ;;  %v7852_v35 = vrot.slane %v7728_v36, 1  ;;  %v16321_v55 = vpop.f32.mrf.mxu1  ;;  %v16323_v62 = vpop.f32.mrf.mxu0  ;;  %v18172_v13 = vld [vmem:[#allocation5_spill] sm:$0xff]  ;;  %v18173_v36 = vld [vmem:[#allocation27_spill] sm:$0xff] }
 0x94a   : > { %v7915_v18 = vsel %vm1193_vm1, %v7851_v6, %v7852_v35  ;;  %v6935_v6 = vrot.slane %v18173_v36, 1  ;;  %v8944_v36 = vld [vmem:[%s17666_s7] sm:$0xff] }
 0x94b   : > { %v16325_v38 = vadd.f32 %v7915_v18, %v7653_v57  ;;  %10467 = vmatmul.msk.f32.gmra.mxu1 %vm382_vm0, %v15773_v47  ;;  %10582 = vmatmul.msk.f32.gmra.mxu0 %vm382_vm0, %v15767_v1  ;;  %v6992_v57 = vsel %vm1193_vm1, %v6933_v29, %v6934_v50  ;;  %v7459_v1 = vsel %vm738_vm2, %v7399_v61, %v7400_v23  ;;  %v18174_v18 = vld [vmem:[#allocation41_spill] sm:$0xff] }
 0x94c   : > { %10500 = vmatmul.msk.f32.gmra.mxu2 %vm382_vm0, %v18164_v42  ;;  %10549 = vmatmul.msk.f32.gmra.mxu3 %vm382_vm0, %v18164_v42  ;;  %v7009_v4 = vadd.f32 %v6992_v57, %v18172_v13  ;;  %v6991_v29 = vsel %vm1193_vm1, %v6934_v50, %v6935_v6  ;;  %v18178_v50 = vld [vmem:[#allocation29_spill] sm:$0xff] }
 0x94d   : > { %18163 = vst [vmem:[#allocation57_spill] sm:$0xff] %v16325_v38  ;;  %9056 = vmatpush.msrb.mxu3 %v8944_v36 }
 0x94f   : > { %v7549_v32 = vpop.f32.mrf.mxu2  ;;  %v7731_v49 = vpop.f32.mrf.mxu3 }
 0x950   : > { %v7853_v51 = vrot.slane %v7731_v49, 1  ;;  %v16343_v34 = vpop.f32.mrf.mxu1  ;;  %v16345_v47 = vpop.f32.mrf.mxu0  ;;  %v18177_v32 = vld [vmem:[#allocation49_spill] sm:$0xff] }
 0x951   : > { %18169 = vst [vmem:[#allocation93_spill] sm:$0xff] %v16345_v47  ;;  %v7010_v49 = vadd.f32 %v6991_v29, %v18177_v32  ;;  %v18184_v29 = vld [vmem:[#allocation61_spill] sm:$0xff]  ;;  %v10989_v47 = vld [vmem:[#allocation3 + $0x170] sm:$0xff] }
 0x952   : > { %v7914_v33 = vsel %vm1193_vm1, %v7852_v35, %v7853_v51  ;;  %v7476_v35 = vadd.f32 %v7459_v1, %v7009_v4 }
 0x953   : > { %v16349_v46 = vadd.f32 %v7914_v33, %v7654_v26  ;;  %10468 = vmatmul.msk.f32.gmra.mxu1 %vm382_vm0, %v15794_v15  ;;  %10583 = vmatmul.msk.f32.gmra.mxu0 %vm382_vm0, %v15808_v3  ;;  %v7401_v26 = vrot.slane %v18174_v18, 7  ;;  %v18176_v15 = vld [vmem:[#allocation72_spill] sm:$0xff]  ;;  %v16374_v3 = vld [vmem:[#allocation3 + $0x180] sm:$0xff] }
 0x954   : > { %10501 = vmatmul.msk.f32.gmra.mxu2 %vm382_vm0, %v18171_v40  ;;  %10550 = vmatmul.msk.f32.gmra.mxu3 %vm382_vm0, %v18171_v40  ;;  %v18181_v18 = vld [vmem:[#allocation74_spill] sm:$0xff] }
 0x955   : > { %18170 = vst [vmem:[#allocation91_spill] sm:$0xff] %v16349_v46  ;;  %v7458_v45 = vsel %vm738_vm2, %v7400_v23, %v7401_v26  ;;  %v16396_v26 = vld [vmem:[#allocation3 + $0x188] sm:$0xff] }
 0x956   : > { %v7477_v51 = vadd.f32 %v7458_v45, %v7010_v49  ;;  %18182 = vst [vmem:[#allocation84_spill] sm:$0xff] %v16396_v26  ;;  %v18185_v45 = vld [vmem:[#allocation59_spill] sm:$0xff] }
 0x957   : > { %v7551_v42 = vpop.f32.mrf.mxu2  ;;  %v7734_v63 = vpop.f32.mrf.mxu3  ;;  %v18187_v49 = vld [vmem:[#allocation75_spill] sm:$0xff] }
 0x958   : > { %v7655_v43 = vadd.f32 %v7551_v42, %v7476_v35  ;;  %v16364_v5 = vpop.f32.mrf.mxu1  ;;  %v16366_v61 = vpop.f32.mrf.mxu0  ;;  %v7854_v23 = vrot.slane %v7734_v63, 1  ;;  %v18183_v42 = vld [vmem:[#allocation58_spill] sm:$0xff] }
 0x959   : > { %18175 = vst [vmem:[#allocation45_spill] sm:$0xff] %v16366_v61  ;;  %v6937_v63 = vrot.slane %v18183_v42, 1 }
 0x95b   : > { %10469 = vmatmul.msk.f32.gmra.mxu1 %vm382_vm0, %v16374_v3  ;;  %10584 = vmatmul.msk.f32.gmra.mxu0 %vm382_vm0, %v18178_v50  ;;  %v7403_v50 = vrot.slane %v18187_v49, 7 }
 0x95c   : > { %10502 = vmatmul.msk.f32.gmra.mxu2 %vm382_vm0, %v18176_v15  ;;  %10551 = vmatmul.msk.f32.gmra.mxu3 %vm382_vm0, %v18176_v15  ;;  %v6936_v15 = vrot.slane %v18185_v45, 1 }
 0x95f   : > { %v7554_v57 = vpop.f32.mrf.mxu2  ;;  %v7737_v33 = vpop.f32.mrf.mxu3 }
 0x960   : > { %v7656_v1 = vadd.f32 %v7554_v57, %v7477_v51  ;;  %v7855_v40 = vrot.slane %v7737_v33, 1  ;;  %v16383_v4 = vpop.f32.mrf.mxu1  ;;  %v16388_v6 = vpop.f32.mrf.mxu0 }
 0x961   : > { %18179 = vst [vmem:[#allocation60_spill] sm:$0xff] %v16388_v6 }
 0x962   : > { %v7913_v13 = vsel %vm1193_vm1, %v7854_v23, %v7855_v40  ;;  %v6990_v23 = vsel %vm1193_vm1, %v6936_v15, %v6937_v63  ;;  %v18190_v15 = vld [vmem:[#allocation11_spill] sm:$0xff] }
 0x963   : > { %v16390_v35 = vadd.f32 %v7913_v13, %v7655_v43  ;;  %10470 = vmatmul.msk.f32.gmra.mxu1 %vm382_vm0, %v16396_v26  ;;  %10585 = vmatmul.msk.f32.gmra.mxu0 %vm382_vm0, %v18184_v29  ;;  %v18186_v43 = vld [vmem:[#allocation73_spill] sm:$0xff]  ;;  %v7011_v49 = vadd.f32 %v6990_v23, %v18190_v15 }
 0x964   : > { %10503 = vmatmul.msk.f32.gmra.mxu2 %vm382_vm0, %v18181_v18  ;;  %10552 = vmatmul.msk.f32.gmra.mxu3 %vm382_vm0, %v18181_v18  ;;  %v7402_v32 = vrot.slane %v18186_v43, 7  ;;  %v16412_v18 = vld [vmem:[#allocation3 + $0x190] sm:$0xff] }
 0x965   : > { %18180 = vst [vmem:[#allocation82_spill] sm:$0xff] %v16390_v35  ;;  %v10972_v43 = vld [vmem:[#allocation3 + $0x110] sm:$0xff] }
 0x966   : > { %v7457_v29 = vsel %vm738_vm2, %v7402_v32, %v7403_v50 }
 0x967   : > { %v7557_v51 = vpop.f32.mrf.mxu2  ;;  %v7740_v57 = vpop.f32.mrf.mxu3 }
 0x968   : > { %v7856_v33 = vrot.slane %v7740_v57, 1  ;;  %v16410_v36 = vpop.f32.mrf.mxu1  ;;  %v16414_v42 = vpop.f32.mrf.mxu0  ;;  %v18191_v51 = vld [vmem:[#allocation15_spill] sm:$0xff]  ;;  %v7478_v57 = vadd.f32 %v7457_v29, %v7011_v49  ;;  %v18195_v49 = vld [vmem:[#allocation89_spill] sm:$0xff] }
 0x969   : > { %18188 = vst [vmem:[#allocation81_spill] sm:$0xff] %v16414_v42  ;;  %v16600_v42 = vld [vmem:[#allocation3 + $0x70] sm:$0xff] }
 0x96a   : > { %v7912_v13 = vsel %vm1193_vm1, %v7855_v40, %v7856_v33  ;;  %v6938_v40 = vrot.slane %v18191_v51, 1  ;;  %v18192_v33 = vld [vmem:[#allocation96_spill] sm:$0xff]  ;;  %v10973_v51 = vld [vmem:[#allocation3 + $0x118] sm:$0xff] }
 0x96b   : > { %v16418_v45 = vadd.f32 %v7912_v13, %v7656_v1  ;;  %10471 = vmatmul.msk.f32.gmra.mxu1 %vm382_vm0, %v16412_v18  ;;  %10586 = vmatmul.msk.f32.gmra.mxu0 %vm382_vm0, %v15858_v60  ;;  %v7404_v32 = vrot.slane %v18192_v33, 7  ;;  %v18194_v60 = vld [vmem:[#allocation18_spill] sm:$0xff] }
 0x96c   : > { %10504 = vmatmul.msk.f32.gmra.mxu2 %vm382_vm0, %v10972_v43  ;;  %10553 = vmatmul.msk.f32.gmra.mxu3 %vm382_vm0, %v10972_v43  ;;  %v6989_v35 = vsel %vm1193_vm1, %v6937_v63, %v6938_v40 }
 0x96d   : > { %18189 = vst [vmem:[#allocation20_spill] sm:$0xff] %v16418_v45  ;;  %v7456_v15 = vsel %vm738_vm2, %v7403_v50, %v7404_v32  ;;  %v7012_v29 = vadd.f32 %v6989_v35, %v18194_v60  ;;  %v10974_v60 = vld [vmem:[#allocation3 + $0x120] sm:$0xff] }
 0x96f   : > { %v7559_v1 = vpop.f32.mrf.mxu2  ;;  %v7743_v13 = vpop.f32.mrf.mxu3  ;;  %v7479_v63 = vadd.f32 %v7456_v15, %v7012_v29  ;;  %v18199_v29 = vld [vmem:[#allocation77_spill] sm:$0xff] }
 0x970   : > { %v7657_v45 = vadd.f32 %v7559_v1, %v7478_v57  ;;  %v16431_v43 = vpop.f32.mrf.mxu1  ;;  %v16433_v23 = vpop.f32.mrf.mxu0  ;;  %v7857_v33 = vrot.slane %v7743_v13, 1  ;;  %v18200_v13 = vld [vmem:[#allocation83_spill] sm:$0xff] }
 0x971   : > { %18193 = vst [vmem:[#allocation46_spill] sm:$0xff] %v16433_v23 }
 0x973   : > { %10620 = vmatmul.msk.f32.vlgmr.msra.gmra.mxu1 %vm382_vm0, %v18195_v49  ;;  %10587 = vmatmul.msk.f32.gmra.mxu0 %vm382_vm0, %v15876_v27  ;;  %v18198_v27 = vld [vmem:[#allocation26_spill] sm:$0xff] }
 0x974   : > { %10505 = vmatmul.msk.f32.gmra.mxu2 %vm382_vm0, %v10973_v51  ;;  %10554 = vmatmul.msk.f32.gmra.mxu3 %vm382_vm0, %v10973_v51  ;;  %v6940_v15 = vrot.slane %v18198_v27, 1 }
 0x977   : > { %v7562_v40 = vpop.f32.mrf.mxu2  ;;  %v7746_v57 = vpop.f32.mrf.mxu3 }
 0x978   : > { %v7658_v1 = vadd.f32 %v7562_v40, %v7479_v63  ;;  %v7858_v46 = vrot.slane %v7746_v57, 1  ;;  %v16446_v32 = vpop.f32.mrf.mxu1  ;;  %v16448_v51 = vpop.f32.mrf.mxu0  ;;  %v6939_v63 = vrot.slane %v18200_v13, 1  ;;  %v18201_v40 = vld [vmem:[#allocation43_spill] sm:$0xff] }
 0x979   : > { %18196 = vst [vmem:[#allocation85_spill] sm:$0xff] %v16448_v51  ;;  %v7405_v57 = vrot.slane %v18201_v40, 7  ;;  %v10975_v40 = vld [vmem:[#allocation3 + $0x128] sm:$0xff] }
 0x97a   : > { %v7911_v50 = vsel %vm1193_vm1, %v7857_v33, %v7858_v46 }
 0x97b   : > { %v16450_v35 = vadd.f32 %v7911_v50, %v7657_v45  ;;  %10621 = vmatmul.msk.f32.gmra.mxu1 %vm382_vm0, %v18199_v29  ;;  %10588 = vmatmul.msk.f32.gmra.mxu0 %vm382_vm0, %v15884_v25  ;;  %v7406_v45 = vrot.slane %v16130_v10, 7  ;;  %v18204_v10 = vld [vmem:[#allocation24_spill] sm:$0xff] }
 0x97c   : > { %10506 = vmatmul.msk.f32.gmra.mxu2 %vm382_vm0, %v10974_v60  ;;  %10555 = vmatmul.msk.f32.gmra.mxu3 %vm382_vm0, %v10974_v60  ;;  %v6988_v60 = vsel %vm1193_vm1, %v6939_v63, %v6940_v15  ;;  %v18205_v63 = vld [vmem:[#allocation62_spill] sm:$0xff] }
 0x97d   : > { %18197 = vst [vmem:[#allocation86_spill] sm:$0xff] %v16450_v35  ;;  %v7455_v25 = vsel %vm738_vm2, %v7405_v57, %v7406_v45 }
 0x97f   : > { %v7565_v33 = vpop.f32.mrf.mxu2  ;;  %v7749_v50 = vpop.f32.mrf.mxu3 }
 0x980   : > { %v7859_v35 = vrot.slane %v7749_v50, 1  ;;  %v16466_v38 = vpop.f32.mrf.mxu1  ;;  %v16468_v9 = vpop.f32.mrf.mxu0  ;;  %v7013_v33 = vadd.f32 %v6988_v60, %v18204_v10  ;;  %v6941_v50 = vrot.slane %v18205_v63, 1  ;;  %v10976_v63 = vld [vmem:[#allocation3 + $0x130] sm:$0xff] }
 0x981   : > { %18202 = vst [vmem:[#allocation21_spill] sm:$0xff] %v16468_v9 }
 0x982   : > { %v7910_v27 = vsel %vm1193_vm1, %v7858_v46, %v7859_v35  ;;  %v7480_v46 = vadd.f32 %v7455_v25, %v7013_v33  ;;  %v7407_v35 = vrot.slane %v16157_v58, 7  ;;  %v16496_v25 = vld [vmem:[#allocation3 + $0xc8] sm:$0xff] }
 0x983   : > { %v16472_v13 = vadd.f32 %v7910_v27, %v7658_v1  ;;  %10622 = vmatmul.msk.f32.gmra.mxu1 %vm382_vm0, %v16135_v24  ;;  %10589 = vmatmul.msk.f32.gmra.mxu0 %vm382_vm0, %v15908_v0  ;;  %v18207_v0 = vld [vmem:[#allocation7_spill] sm:$0xff] }
 0x984   : > { %10507 = vmatmul.msk.f32.gmra.mxu2 %vm382_vm0, %v10975_v40  ;;  %10556 = vmatmul.msk.f32.gmra.mxu3 %vm382_vm0, %v10975_v40  ;;  %v7454_v10 = vsel %vm738_vm2, %v7406_v45, %v7407_v35 }
 0x985   : > { %18203 = vst [vmem:[#allocation94_spill] sm:$0xff] %v16472_v13  ;;  %v6987_v13 = vsel %vm1193_vm1, %v6940_v15, %v6941_v50 }
 0x986   : > { %v7014_v58 = vadd.f32 %v6987_v13, %v18207_v0  ;;  %v16506_v0 = vld [vmem:[#allocation3 + $0xd0] sm:$0xff] }
 0x987   : > { %v7567_v1 = vpop.f32.mrf.mxu2  ;;  %v7752_v57 = vpop.f32.mrf.mxu3 }
 0x988   : > { %v7659_v27 = vadd.f32 %v7567_v1, %v7480_v46  ;;  %v16485_v40 = vpop.f32.mrf.mxu1  ;;  %v16487_v60 = vpop.f32.mrf.mxu0  ;;  %v7481_v15 = vadd.f32 %v7454_v10, %v7014_v58  ;;  %v7860_v46 = vrot.slane %v7752_v57, 1  ;;  %v18210_v10 = vld [vmem:[#allocation34_spill] sm:$0xff]  ;;  %v18211_v58 = vld [vmem:[#allocation16_spill] sm:$0xff] }
 0x989   : > { %18206 = vst [vmem:[#allocation6_spill] sm:$0xff] %v16487_v60  ;;  %v6943_v57 = vrot.slane %v18210_v10, 1  ;;  %v16568_v60 = vld [vmem:[#allocation3 + $0xe8] sm:$0xff] }
 0x98b   : > { %10623 = vmatmul.msk.f32.gmra.mxu1 %vm382_vm0, %v16173_v30  ;;  %10590 = vmatmul.msk.f32.gmra.mxu0 %vm382_vm0, %v16496_v25 }
 0x98c   : > { %10508 = vmatmul.msk.f32.gmra.mxu2 %vm382_vm0, %v10976_v63  ;;  %10557 = vmatmul.msk.f32.gmra.mxu3 %vm382_vm0, %v10976_v63 }
 0x98f   : > { %v7570_v33 = vpop.f32.mrf.mxu2  ;;  %v7755_v50 = vpop.f32.mrf.mxu3 }
 0x990   : > { %v7660_v45 = vadd.f32 %v7570_v33, %v7481_v15  ;;  %v7861_v35 = vrot.slane %v7755_v50, 1  ;;  %v16502_v63 = vpop.f32.mrf.mxu1  ;;  %v16504_v13 = vpop.f32.mrf.mxu0  ;;  %v6942_v15 = vrot.slane %v18211_v58, 1  ;;  %v7408_v33 = vrot.slane %v16180_v39, 7  ;;  %v10978_v39 = vld [vmem:[#allocation3 + $0x140] sm:$0xff] }
 0x991   : > { %18208 = vst [vmem:[#allocation30_spill] sm:$0xff] %v16504_v13 }
 0x992   : > { %v7909_v1 = vsel %vm1193_vm1, %v7860_v46, %v7861_v35 }
 0x993   : > { %v16508_v21 = vadd.f32 %v7909_v1, %v7659_v27  ;;  %10624 = vmatmul.msk.f32.gmra.mxu1 %vm382_vm0, %v16193_v41  ;;  %10591 = vmatmul.msk.f32.gmra.mxu0 %vm382_vm0, %v16506_v0  ;;  %v7409_v27 = vrot.slane %v16199_v59, 7  ;;  %v18214_v59 = vld [vmem:[#allocation40_spill] sm:$0xff] }
 0x994   : > { %10509 = vmatmul.msk.f32.gmra.mxu2 %vm382_vm0, %v10977_v8  ;;  %10558 = vmatmul.msk.f32.gmra.mxu3 %vm382_vm0, %v10977_v8  ;;  %v6986_v8 = vsel %vm1193_vm1, %v6942_v15, %v6943_v57  ;;  %v18215_v15 = vld [vmem:[#allocation64_spill] sm:$0xff] }
 0x995   : > { %18209 = vst [vmem:[#allocation8_spill] sm:$0xff] %v16508_v21  ;;  %v7453_v58 = vsel %vm738_vm2, %v7408_v33, %v7409_v27 }
 0x997   : > { %v7573_v50 = vpop.f32.mrf.mxu2  ;;  %v7758_v46 = vpop.f32.mrf.mxu3 }
 0x998   : > { %v7862_v1 = vrot.slane %v7758_v46, 1  ;;  %v16524_v21 = vpop.f32.mrf.mxu1  ;;  %v16526_v13 = vpop.f32.mrf.mxu0  ;;  %v7015_v50 = vadd.f32 %v6986_v8, %v18214_v59  ;;  %v6944_v46 = vrot.slane %v18215_v15, 1 }
 0x999   : > { %18212 = vst [vmem:[#allocation13_spill] sm:$0xff] %v16526_v13  ;;  %v10979_v13 = vld [vmem:[#allocation3 + $0x148] sm:$0xff] }
 0x99a   : > { %v7908_v10 = vsel %vm1193_vm1, %v7861_v35, %v7862_v1  ;;  %v16538_v35 = vld [vmem:[#allocation3 + $0xd8] sm:$0xff]  ;;  %v7482_v33 = vadd.f32 %v7453_v58, %v7015_v50  ;;  %v18217_v58 = vld [vmem:[#allocation51_spill] sm:$0xff]  ;;  %v16554_v50 = vld [vmem:[#allocation3 + $0x60] sm:$0xff] }
 0x99b   : > { %v16530_v7 = vadd.f32 %v7908_v10, %v7660_v45  ;;  %10625 = vmatmul.msk.f32.gmra.mxu1 %vm382_vm0, %v16203_v44  ;;  %10592 = vmatmul.msk.f32.gmra.mxu0 %vm382_vm0, %v16538_v35  ;;  %v7410_v45 = vrot.slane %v16223_v11, 7 }
 0x99c   : > { %10510 = vmatmul.msk.f32.gmra.mxu2 %vm382_vm0, %v10978_v39  ;;  %10559 = vmatmul.msk.f32.gmra.mxu3 %vm382_vm0, %v10978_v39  ;;  %v6985_v39 = vsel %vm1193_vm1, %v6943_v57, %v6944_v46  ;;  %v16558_v57 = vld [vmem:[#allocation3 + $0xe0] sm:$0xff] }
 0x99d   : > { %18213 = vst [vmem:[#allocation14_spill] sm:$0xff] %v16530_v7  ;;  %v7452_v15 = vsel %vm738_vm2, %v7409_v27, %v7410_v45  ;;  %v7016_v11 = vadd.f32 %v6985_v39, %v18217_v58 }
 0x99f   : > { %v7575_v1 = vpop.f32.mrf.mxu2  ;;  %v7761_v10 = vpop.f32.mrf.mxu3  ;;  %v7483_v46 = vadd.f32 %v7452_v15, %v7016_v11  ;;  %v18220_v15 = vld [vmem:[#allocation37_spill] sm:$0xff]  ;;  %v16575_v11 = vld [vmem:[#allocation3 + $0x68] sm:$0xff] }
 0x9a0   : > { %v7661_v7 = vadd.f32 %v7575_v1, %v7482_v33  ;;  %v16545_v8 = vpop.f32.mrf.mxu1  ;;  %v16547_v59 = vpop.f32.mrf.mxu0  ;;  %v7863_v45 = vrot.slane %v7761_v10, 1  ;;  %v6946_v10 = vrot.slane %v18220_v15, 1 }
 0x9a1   : > { %18216 = vst [vmem:[#allocation12_spill] sm:$0xff] %v16547_v59 }
 0x9a3   : > { %10626 = vmatmul.msk.f32.gmra.mxu1 %vm382_vm0, %v16554_v50  ;;  %10593 = vmatmul.msk.f32.gmra.mxu0 %vm382_vm0, %v16558_v57 }
 0x9a4   : > { %10511 = vmatmul.msk.f32.gmra.mxu2 %vm382_vm0, %v10979_v13  ;;  %10560 = vmatmul.msk.f32.gmra.mxu3 %vm382_vm0, %v10979_v13 }
 0x9a7   : > { %v7578_v33 = vpop.f32.mrf.mxu2  ;;  %v7764_v27 = vpop.f32.mrf.mxu3 }
 0x9a8   : > { %v7662_v1 = vadd.f32 %v7578_v33, %v7483_v46  ;;  %v7864_v59 = vrot.slane %v7764_v27, 1  ;;  %v16564_v39 = vpop.f32.mrf.mxu1  ;;  %v16566_v58 = vpop.f32.mrf.mxu0  ;;  %v18221_v46 = vld [vmem:[#allocation28_spill] sm:$0xff]  ;;  %v7412_v27 = vrot.slane %v16261_v48, 7  ;;  %v18224_v48 = vld [vmem:[#allocation53_spill] sm:$0xff] }
 0x9a9   : > { %18218 = vst [vmem:[#allocation9_spill] sm:$0xff] %v16566_v58  ;;  %v6945_v33 = vrot.slane %v18221_v46, 1 }
 0x9aa   : > { %v7907_v13 = vsel %vm1193_vm1, %v7863_v45, %v7864_v59 }
 0x9ab   : > { %v16570_v9 = vadd.f32 %v7907_v13, %v7661_v7  ;;  %10627 = vmatmul.msk.f32.gmra.mxu1 %vm382_vm0, %v16575_v11  ;;  %10594 = vmatmul.msk.f32.gmra.mxu0 %vm382_vm0, %v16568_v60  ;;  %v7411_v7 = vrot.slane %v16244_v17, 7  ;;  %v10983_v17 = vld [vmem:[#allocation3 + $0x158] sm:$0xff] }
 0x9ac   : > { %10512 = vmatmul.msk.f32.gmra.mxu2 %vm382_vm0, %v10981_v28  ;;  %10561 = vmatmul.msk.f32.gmra.mxu3 %vm382_vm0, %v10981_v28  ;;  %v6984_v28 = vsel %vm1193_vm1, %v6945_v33, %v6946_v10  ;;  %v18225_v33 = vld [vmem:[#allocation31_spill] sm:$0xff] }
 0x9ad   : > { %18219 = vst [vmem:[#allocation39_spill] sm:$0xff] %v16570_v9  ;;  %v7451_v46 = vsel %vm738_vm2, %v7411_v7, %v7412_v27 }
 0x9af   : > { %v7581_v45 = vpop.f32.mrf.mxu2  ;;  %v7767_v13 = vpop.f32.mrf.mxu3 }
 0x9b0   : > { %v7865_v9 = vrot.slane %v7767_v13, 1  ;;  %v16588_v58 = vpop.f32.mrf.mxu1  ;;  %v16590_v23 = vpop.f32.mrf.mxu0  ;;  %v7017_v45 = vadd.f32 %v6984_v28, %v18224_v48  ;;  %v6947_v13 = vrot.slane %v18225_v33, 1 }
 0x9b1   : > { %18222 = vst [vmem:[#allocation19_spill] sm:$0xff] %v16590_v23  ;;  %v16641_v23 = vld [vmem:[#allocation3 + $0x80] sm:$0xff] }
 0x9b2   : > { %v7906_v15 = vsel %vm1193_vm1, %v7864_v59, %v7865_v9  ;;  %v16604_v9 = vld [vmem:[#allocation3 + $0xf0] sm:$0xff]  ;;  %v7484_v59 = vadd.f32 %v7451_v46, %v7017_v45  ;;  %v6983_v28 = vsel %vm1193_vm1, %v6946_v10, %v6947_v13  ;;  %v18227_v46 = vld [vmem:[#allocation50_spill] sm:$0xff]  ;;  %v16622_v45 = vld [vmem:[#allocation3 + $0x78] sm:$0xff]  ;;  %18231 = vst [vmem:[#allocation5_spill] sm:$0xff] %v16641_v23 }
 0x9b3   : > { %v16594_v51 = vadd.f32 %v7906_v15, %v7662_v1  ;;  %10628 = vmatmul.msk.f32.gmra.mxu1 %vm382_vm0, %v16600_v42  ;;  %10595 = vmatmul.msk.f32.gmra.mxu0 %vm382_vm0, %v16604_v9  ;;  %v7413_v1 = vrot.slane %v16283_v54, 7  ;;  %v7018_v54 = vadd.f32 %v6983_v28, %v18227_v46  ;;  %v16626_v10 = vld [vmem:[#allocation3 + $0xf8] sm:$0xff]  ;;  %v10987_v28 = vld [vmem:[#allocation3 + $0x168] sm:$0xff] }
 0x9b4   : > { %10513 = vmatmul.msk.f32.gmra.mxu2 %vm382_vm0, %v10983_v17  ;;  %10562 = vmatmul.msk.f32.gmra.mxu3 %vm382_vm0, %v10983_v17  ;;  %v18230_v46 = vld [vmem:[#allocation33_spill] sm:$0xff] }
 0x9b5   : > { %18223 = vst [vmem:[#allocation56_spill] sm:$0xff] %v16594_v51  ;;  %v7450_v33 = vsel %vm738_vm2, %v7412_v27, %v7413_v1  ;;  %v10985_v51 = vld [vmem:[#allocation3 + $0x160] sm:$0xff] }
 0x9b6   : > { %v7485_v13 = vadd.f32 %v7450_v33, %v7018_v54  ;;  %v18232_v33 = vld [vmem:[#allocation66_spill] sm:$0xff] }
 0x9b7   : > { %v7583_v7 = vpop.f32.mrf.mxu2  ;;  %v6948_v54 = vrot.slane %v18232_v33, 1  ;;  %v18235_v33 = vld [vmem:[#allocation54_spill] sm:$0xff] }
 0x9b8   : > { %v16609_v15 = vadd.f32 %v7583_v7, %v7484_v59  ;;  %v16613_v17 = vpop.f32.mrf.mxu1  ;;  %v16615_v48 = vpop.f32.mrf.mxu0 }
 0x9b9   : > { %18226 = vst [vmem:[#allocation67_spill] sm:$0xff] %v16615_v48  ;;  %v6949_v48 = vrot.slane %v18230_v46, 1 }
 0x9bb   : > { %10629 = vmatmul.msk.f32.gmra.mxu1 %vm382_vm0, %v16622_v45  ;;  %10596 = vmatmul.msk.f32.gmra.mxu0 %vm382_vm0, %v16626_v10 }
 0x9bc   : > { %10514 = vmatmul.msk.f32.gmra.mxu2 %vm382_vm0, %v10985_v51  ;;  %10563 = vmatmul.msk.f32.gmra.mxu3 %vm382_vm0, %v10985_v51  ;;  %v16636_v51 = vld [vmem:[#allocation3 + $0x100] sm:$0xff] }
 0x9bd   : > { %18229 = vst [vmem:[#allocation23_spill] sm:$0xff] %v16636_v51 }
 0x9bf   : > { %v7586_v59 = vpop.f32.mrf.mxu2 }
 0x9c0   : > { %v16630_v27 = vadd.f32 %v7586_v59, %v7485_v13  ;;  %v16632_v1 = vpop.f32.mrf.mxu1  ;;  %v16634_v7 = vpop.f32.mrf.mxu0  ;;  %v7414_v13 = vrot.slane %v16304_v14, 7  ;;  %v7415_v59 = vrot.slane %v16321_v55, 7 }
 0x9c1   : > { %18228 = vst [vmem:[#allocation69_spill] sm:$0xff] %v16634_v7 }
 0x9c2   : > { %v7449_v6 = vsel %vm738_vm2, %v7414_v13, %v7415_v59 }
 0x9c3   : > { %10630 = vmatmul.msk.f32.gmra.mxu1 %vm382_vm0, %v16641_v23  ;;  %10597 = vmatmul.msk.f32.gmra.mxu0 %vm382_vm0, %v16636_v51  ;;  %v18236_v51 = vld [vmem:[#allocation35_spill] sm:$0xff] }
 0x9c4   : > { %10515 = vmatmul.msk.f32.gmra.mxu2 %vm382_vm0, %v10987_v28  ;;  %10564 = vmatmul.msk.f32.gmra.mxu3 %vm382_vm0, %v10987_v28  ;;  %v6982_v28 = vsel %vm1193_vm1, %v6948_v54, %v6949_v48  ;;  %v6950_v55 = vrot.slane %v18236_v51, 1  ;;  %v16666_v54 = vld [vmem:[#allocation3 + $0x108] sm:$0xff] }
 0x9c5   : > { %v7019_v14 = vadd.f32 %v6982_v28, %v18235_v33  ;;  %18238 = vst [vmem:[#allocation49_spill] sm:$0xff] %v16666_v54 }
 0x9c7   : > { %v7589_v7 = vpop.f32.mrf.mxu2  ;;  %v7486_v13 = vadd.f32 %v7449_v6, %v7019_v14  ;;  %v18242_v6 = vld [vmem:[#allocation25_spill] sm:$0xff]  ;;  %v16684_v14 = vld [vmem:[#allocation3 + $0x90] sm:$0xff] }
 0x9c8   : > { %v16652_v61 = vpop.f32.mrf.mxu1  ;;  %v16654_v46 = vpop.f32.mrf.mxu0  ;;  %v16662_v7 = vld [vmem:[#allocation3 + $0x88] sm:$0xff]  ;;  %18243 = vst [vmem:[#allocation61_spill] sm:$0xff] %v16684_v14 }
 0x9c9   : > { %18233 = vst [vmem:[#allocation27_spill] sm:$0xff] %v16652_v61 }
 0x9ca   : > { %18234 = vst [vmem:[#allocation41_spill] sm:$0xff] %v16654_v46  ;;  %v7416_v46 = vrot.slane %v16343_v34, 7 }
 0x9cb   : > { %18237 = vst [vmem:[#allocation72_spill] sm:$0xff] %v16662_v7  ;;  %10631 = vmatmul.msk.f32.gmra.mxu1 %vm382_vm0, %v16662_v7  ;;  %10598 = vmatmul.msk.f32.gmra.mxu0 %vm382_vm0, %v16666_v54  ;;  %v10991_v7 = vld [vmem:[#allocation3 + $0x178] sm:$0xff] }
 0x9cc   : > { %10516 = vmatmul.msk.f32.gmra.mxu2 %vm382_vm0, %v10989_v47  ;;  %10565 = vmatmul.msk.f32.gmra.mxu3 %vm382_vm0, %v10989_v47  ;;  %v6981_v47 = vsel %vm1193_vm1, %v6949_v48, %v6950_v55  ;;  %v7448_v33 = vsel %vm738_vm2, %v7415_v59, %v7416_v46 }
 0x9cd   : > { %v7020_v34 = vadd.f32 %v6981_v47, %v18242_v6  ;;  %v18249_v47 = vld [vmem:[#allocation38_spill] sm:$0xff] }
 0x9ce   : > { %v6952_v6 = vrot.slane %v18249_v47, 1 }
 0x9cf   : > { %v7591_v61 = vpop.f32.mrf.mxu2  ;;  %v7487_v48 = vadd.f32 %v7448_v33, %v7020_v34  ;;  %v18251_v33 = vld [vmem:[#allocation42_spill] sm:$0xff] }
 0x9d0   : > { %v16671_v23 = vadd.f32 %v7591_v61, %v7486_v13  ;;  %v16675_v51 = vpop.f32.mrf.mxu1  ;;  %v16677_v28 = vpop.f32.mrf.mxu0  ;;  %v16688_v61 = vld [vmem:[#allocation3 + $0x110] sm:$0xff]  ;;  %v6951_v34 = vrot.slane %v18251_v33, 1 }
 0x9d1   : > { %18240 = vst [vmem:[#allocation74_spill] sm:$0xff] %v16675_v51  ;;  %v18252_v51 = vld [vmem:[#allocation48_spill] sm:$0xff] }
 0x9d2   : > { %18239 = vst [vmem:[#allocation29_spill] sm:$0xff] %v16671_v23  ;;  %v6514_v47 = vrot.slane %v18252_v51, 7 }
 0x9d3   : > { %18241 = vst [vmem:[#allocation58_spill] sm:$0xff] %v16677_v28  ;;  %10632 = vmatmul.msk.f32.gmra.mxu1 %vm382_vm0, %v16684_v14  ;;  %10599 = vmatmul.msk.f32.gmra.mxu0 %vm382_vm0, %v16688_v61  ;;  %v16705_v28 = vld [vmem:[#allocation3 + $0x98] sm:$0xff]  ;;  %v18261_v14 = vld [vmem:[#allocation36_spill] sm:$0xff] }
 0x9d4   : > { %10517 = vmatmul.msk.f32.gmra.mxu2 %vm382_vm0, %v10991_v7  ;;  %10566 = vmatmul.msk.f32.gmra.mxu3 %vm382_vm0, %v10991_v7  ;;  %18244 = vst [vmem:[#allocation59_spill] sm:$0xff] %v16688_v61  ;;  %v16698_v7 = vld [vmem:[#allocation3 + $0x118] sm:$0xff] }
 0x9d5   : > { %18248 = vst [vmem:[#allocation15_spill] sm:$0xff] %v16698_v7 }
 0x9d6   : > { %18250 = vst [vmem:[#allocation96_spill] sm:$0xff] %v16705_v28 }
 0x9d7   : > { %v7594_v55 = vpop.f32.mrf.mxu2 }
 0x9d8   : > { %v16692_v59 = vadd.f32 %v7594_v55, %v7487_v48  ;;  %v16694_v46 = vpop.f32.mrf.mxu1  ;;  %v16696_v13 = vpop.f32.mrf.mxu0  ;;  %v7417_v48 = vrot.slane %v16364_v5, 7  ;;  %v7418_v55 = vrot.slane %v16383_v4, 7  ;;  %v18255_v5 = vld [vmem:[#allocation10_spill] sm:$0xff] }
 0x9d9   : > { %18246 = vst [vmem:[#allocation75_spill] sm:$0xff] %v16694_v46  ;;  %v6980_v46 = vsel %vm1193_vm1, %v6951_v34, %v6952_v6  ;;  %v18258_v34 = vld [vmem:[#allocation47_spill] sm:$0xff] }
 0x9da   : > { %18245 = vst [vmem:[#allocation73_spill] sm:$0xff] %v16692_v59  ;;  %v7021_v4 = vadd.f32 %v6980_v46, %v18255_v5  ;;  %v6921_v46 = vrot.slane %v18261_v14, 1  ;;  %v7419_v5 = vrot.slane %v16410_v36, 7 }
 0x9db   : > { %18247 = vst [vmem:[#allocation11_spill] sm:$0xff] %v16696_v13  ;;  %10633 = vmatmul.msk.f32.gmra.mxu1 %vm382_vm0, %v16705_v28  ;;  %10600 = vmatmul.msk.f32.gmra.mxu0 %vm382_vm0, %v16698_v7  ;;  %v7447_v28 = vsel %vm738_vm2, %v7417_v48, %v7418_v55  ;;  %v16733_v7 = vld [vmem:[#allocation3 + $0xa0] sm:$0xff] }
 0x9dc   : > { %10518 = vmatmul.msk.f32.gmra.mxu2 %vm382_vm0, %v16374_v3  ;;  %10567 = vmatmul.msk.f32.gmra.mxu3 %vm382_vm0, %v16374_v3  ;;  %18259 = vst [vmem:[#allocation26_spill] sm:$0xff] %v16733_v7  ;;  %v16737_v48 = vld [vmem:[#allocation3 + $0x120] sm:$0xff]  ;;  %v7446_v36 = vsel %vm738_vm2, %v7418_v55, %v7419_v5 }
 0x9dd   : > { %18260 = vst [vmem:[#allocation77_spill] sm:$0xff] %v16737_v48 }
 0x9df   : > { %v7597_v13 = vpop.f32.mrf.mxu2 }
 0x9e0   : > { %v16717_v59 = vpop.f32.mrf.mxu1  ;;  %v16719_v61 = vpop.f32.mrf.mxu0  ;;  %v18256_v13 = vld [vmem:[#allocation95_spill] sm:$0xff] }
 0x9e1   : > { %18253 = vst [vmem:[#allocation18_spill] sm:$0xff] %v16717_v59  ;;  %v18257_v33 = vrot.slane %v18256_v13, 7  ;;  %v6953_v59 = vrot.slane %v18258_v34, 1 }
 0x9e2   : > { %18254 = vst [vmem:[#allocation89_spill] sm:$0xff] %v16719_v61  ;;  %v7488_v61 = vadd.f32 %v7447_v28, %v7021_v4 }
 0x9e3   : > { %v6546_v51 = vsel %vm738_vm2, %v6514_v47, %v18257_v33  ;;  %10634 = vmatmul.msk.f32.gmra.mxu1 %vm382_vm0, %v16733_v7  ;;  %10601 = vmatmul.msk.f32.gmra.mxu0 %vm382_vm0, %v16737_v48  ;;  %v6979_v34 = vsel %vm1193_vm1, %v6952_v6, %v6953_v59  ;;  %v18263_v7 = vrot.slane %v15402_v2, 1  ;;  %v18266_v2 = vrot.slane %v15819_v56, 7 }
 0x9e4   : > { %10519 = vmatmul.msk.f32.gmra.mxu2 %vm382_vm0, %v16396_v26  ;;  %10568 = vmatmul.msk.f32.gmra.mxu3 %vm382_vm0, %v16396_v26  ;;  %v18262_v26 = vld [vmem:[#allocation92_spill] sm:$0xff] }
 0x9e5   : > { %v6726_v47 = vadd.f32 %v18262_v26, %v6546_v51  ;;  %v7000_v54 = vsel %vm1193_vm1, %v6921_v46, %v18263_v7  ;;  %v18265_v26 = vld [vmem:[#allocation17_spill] sm:$0xff]  ;;  %v16769_v7 = vld [vmem:[#allocation3 + $0x128] sm:$0xff]  ;;  %v18267_v51 = vld [vmem:[#allocation88_spill] sm:$0xff] }
 0x9e7   : > { %v7599_v13 = vpop.f32.mrf.mxu2  ;;  %v7001_v14 = vadd.f32 %v7000_v54, %v6726_v47  ;;  %v16783_v47 = vld [vmem:[#allocation3 + $0x130] sm:$0xff] }
 0x9e8   : > { %v16744_v33 = vadd.f32 %v7599_v13, %v7488_v61  ;;  %v7385_v23 = vpop.f32.mrf.mxu1  ;;  %v16752_v28 = vpop.f32.mrf.mxu0  ;;  %v7022_v61 = vadd.f32 %v6979_v34, %v18265_v26  ;;  %v18272_v34 = vld [vmem:[#allocation76_spill] sm:$0xff] }
 0x9e9   : > { %v7435_v48 = vrot.slane %v7385_v23, 7  ;;  %18264 = vst [vmem:[#allocation83_spill] sm:$0xff] %v16752_v28  ;;  %v16765_v23 = vld [vmem:[#allocation3 + $0xa8] sm:$0xff]  ;;  %v16790_v26 = vld [vmem:[#allocation3 + $0xb0] sm:$0xff] }
 0x9ea   : > { %v7489_v6 = vadd.f32 %v7446_v36, %v7022_v61  ;;  %v16788_v36 = vpop.f32.mrf.mxu3  ;;  %v18273_v61 = vld [vmem:[#allocation52_spill] sm:$0xff]  ;;  %v18284_v28 = vld [vmem:[#allocation87_spill] sm:$0xff] }
 0x9eb   : > { %v7467_v59 = vsel %vm738_vm2, %v7435_v48, %v18266_v2  ;;  %10635 = vmatmul.msk.f32.gmra.mxu1 %vm382_vm0, %v16765_v23  ;;  %10602 = vmatmul.msk.f32.gmra.mxu0 %vm382_vm0, %v16769_v7  ;;  %v18269_v48 = vld [vmem:[#allocation78_spill] sm:$0xff]  ;;  %v6954_v2 = vrot.slane %v18273_v61, 1  ;;  %v16811_v61 = vld [vmem:[#allocation3 + $0xb8] sm:$0xff] }
 0x9ec   : > { %10520 = vmatmul.msk.f32.gmra.mxu2 %vm382_vm0, %v16412_v18  ;;  %10569 = vmatmul.msk.f32.gmra.mxu3 %vm382_vm0, %v16412_v18  ;;  %v7468_v54 = vadd.f32 %v7467_v59, %v7001_v14  ;;  %v6955_v14 = vrot.slane %v18272_v34, 1  ;;  %v7420_v59 = vrot.slane %v16431_v43, 7  ;;  %v6956_v43 = vrot.slane %v16159_v12, 1 }
 0x9ee   : > { %v7647_v56 = vadd.f32 %v18267_v51, %v7468_v54  ;;  %v7421_v54 = vrot.slane %v16446_v32, 7  ;;  %v16815_v32 = vld [vmem:[#allocation3 + $0x138] sm:$0xff]  ;;  %v6977_v12 = vsel %vm1193_vm1, %v6955_v14, %v6956_v43 }
 0x9ef   : > { %v7602_v55 = vpop.f32.mrf.mxu2  ;;  %18276 = vst [vmem:[#allocation34_spill] sm:$0xff] %v16815_v32 }
 0x9f0   : > { %v16773_v4 = vadd.f32 %v7602_v55, %v7489_v6  ;;  %v16776_v46 = vpop.f32.mrf.mxu1  ;;  %v16779_v5 = vadd.f32 %v18269_v48, %v7647_v56  ;;  %v16781_v13 = vpop.f32.mrf.mxu0  ;;  %v7445_v56 = vsel %vm738_vm2, %v7420_v59, %v7421_v54  ;;  %v18275_v48 = vld [vmem:[#allocation4_spill] sm:$0xff]  ;;  %v7422_v59 = vrot.slane %v16466_v38, 7  ;;  %v16833_v38 = vld [vmem:[#allocation3 + $0xc0] sm:$0xff] }
 0x9f1   : > { %18268 = vst [vmem:[#allocation43_spill] sm:$0xff] %v16776_v46 }
 0x9f2   : > { %18270 = vst [vmem:[#allocation24_spill] sm:$0xff] %v16779_v5 }
 0x9f3   : > { %18271 = vst [vmem:[#allocation62_spill] sm:$0xff] %v16781_v13  ;;  %10636 = vmatmul.msk.f32.gmra.mxu1 %vm382_vm0, %v16790_v26  ;;  %10603 = vmatmul.msk.f32.gmra.mxu0 %vm382_vm0, %v16783_v47  ;;  %v7444_v13 = vsel %vm738_vm2, %v7421_v54, %v7422_v59 }
 0x9f4   : > { %10669 = vmatmul.msk.f32.vlgmr.msra.gmra.mxu2 %vm382_vm0, %v18195_v49  ;;  %v6978_v49 = vsel %vm1193_vm1, %v6954_v2, %v6955_v14 }
 0x9f5   : > { %v7023_v34 = vadd.f32 %v6978_v49, %v18275_v48 }
 0x9f7   : > { %v7605_v6 = vpop.f32.mrf.mxu2  ;;  %v7490_v2 = vadd.f32 %v7445_v56, %v7023_v34  ;;  %v18278_v56 = vld [vmem:[#allocation32_spill] sm:$0xff] }
 0x9f8   : > { %v16801_v55 = vpop.f32.mrf.mxu1  ;;  %v16803_v51 = vpop.f32.mrf.mxu0  ;;  %v7024_v34 = vadd.f32 %v6977_v12, %v18278_v56  ;;  %v16849_v12 = vld [vmem:[#allocation3 + $0x148] sm:$0xff]  ;;  %v7423_v56 = vrot.slane %v16485_v40, 7 }
 0x9f9   : > { %18274 = vst [vmem:[#allocation7_spill] sm:$0xff] %v16803_v51  ;;  %v16820_v6 = vpop.f32.mrf.mxu3 }
 0x9fa   : > { %v7491_v14 = vadd.f32 %v7444_v13, %v7024_v34  ;;  %v6957_v13 = vrot.slane %v16182_v16, 1  ;;  %v7424_v34 = vrot.slane %v16502_v63, 7  ;;  %v18281_v16 = vld [vmem:[#allocation63_spill] sm:$0xff]  ;;  %v6959_v63 = vrot.slane %v16225_v31, 1 }
 0x9fb   : > { %10637 = vmatmul.msk.f32.gmra.mxu1 %vm382_vm0, %v16811_v61  ;;  %10604 = vmatmul.msk.f32.gmra.mxu0 %vm382_vm0, %v16815_v32 }
 0x9fc   : > { %10670 = vmatmul.msk.f32.gmra.mxu2 %vm382_vm0, %v18199_v29 }
 0x9ff   : > { %v7607_v29 = vpop.f32.mrf.mxu2 }
 0xa00   : > { %v16822_v51 = vadd.f32 %v7607_v29, %v7490_v2  ;;  %v8447_v49 = vpop.f32.mrf.mxu1  ;;  %v16826_v48 = vpop.f32.mrf.mxu0  ;;  %v16837_v2 = vld [vmem:[#allocation3 + $0x140] sm:$0xff] }
 0xa01   : > { %18277 = vst [vmem:[#allocation16_spill] sm:$0xff] %v16826_v48  ;;  %v16843_v54 = vpop.f32.mrf.mxu3  ;;  %v6958_v49 = vrot.slane %v16201_v53, 1  ;;  %v7443_v48 = vsel %vm738_vm2, %v7423_v56, %v7424_v34 }
 0xa03   : > { %10638 = vmatmul.msk.f32.gmra.mxu1 %vm382_vm0, %v16833_v38  ;;  %10605 = vmatmul.msk.f32.gmra.mxu0 %vm382_vm0, %v16837_v2 }
 0xa04   : > { %10671 = vmatmul.msk.f32.gmra.mxu2 %vm382_vm0, %v16135_v24 }
 0xa07   : > { %v7610_v43 = vpop.f32.mrf.mxu2 }
 0xa08   : > { %v16841_v29 = vadd.f32 %v7610_v43, %v7491_v14  ;;  %v16845_v59 = vpop.f32.mrf.mxu1  ;;  %v16847_v24 = vpop.f32.mrf.mxu0  ;;  %v6976_v43 = vsel %vm1193_vm1, %v6957_v13, %v6958_v49  ;;  %v16877_v13 = vld [vmem:[#allocation3 + $0x150] sm:$0xff] }
 0xa09   : > { %18279 = vst [vmem:[#allocation40_spill] sm:$0xff] %v16847_v24  ;;  %v7025_v40 = vadd.f32 %v6976_v43, %v18281_v16 }
 0xa0a   : > { %18282 = vst [vmem:[#allocation51_spill] sm:$0xff] %v16877_v13 }
 0xa0b   : > { %10639 = vmatmul.msk.f32.gmra.mxu1 %vm382_vm0, %v16496_v25  ;;  %10606 = vmatmul.msk.f32.gmra.mxu0 %vm382_vm0, %v16849_v12 }
 0xa0c   : > { %10672 = vmatmul.msk.f32.gmra.mxu2 %vm382_vm0, %v16173_v30  ;;  %v16865_v30 = vpop.f32.mrf.mxu3 }
 0xa0f   : > { %v7613_v14 = vpop.f32.mrf.mxu2 }
 0xa10   : > { %v16863_v24 = vpop.f32.mrf.mxu1  ;;  %v16867_v53 = vpop.f32.mrf.mxu0  ;;  %v7492_v14 = vadd.f32 %v7443_v48, %v7025_v40 }
 0xa11   : > { %18280 = vst [vmem:[#allocation64_spill] sm:$0xff] %v16867_v53  ;;  %v7425_v53 = vrot.slane %v16524_v21, 7  ;;  %v16897_v21 = vld [vmem:[#allocation3 + $0x158] sm:$0xff] }
 0xa13   : > { %10640 = vmatmul.msk.f32.gmra.mxu1 %vm382_vm0, %v16506_v0  ;;  %10607 = vmatmul.msk.f32.gmra.mxu0 %vm382_vm0, %v16877_v13  ;;  %v7442_v31 = vsel %vm738_vm2, %v7424_v34, %v7425_v53 }
 0xa14   : > { %10673 = vmatmul.msk.f32.gmra.mxu2 %vm382_vm0, %v16193_v41  ;;  %v6975_v41 = vsel %vm1193_vm1, %v6958_v49, %v6959_v63  ;;  %v16893_v48 = vpop.f32.mrf.mxu3  ;;  %v7426_v63 = vrot.slane %v16545_v8, 7  ;;  %v6962_v8 = vrot.slane %v16285_v19, 1 }
 0xa15   : > { %v7026_v5 = vadd.f32 %v6975_v41, %v18284_v28  ;;  %v6961_v28 = vrot.slane %v16263_v52, 1 }
 0xa17   : > { %v7615_v46 = vpop.f32.mrf.mxu2  ;;  %v6973_v19 = vsel %vm1193_vm1, %v6961_v28, %v6962_v8 }
 0xa18   : > { %v16882_v56 = vadd.f32 %v7615_v46, %v7492_v14  ;;  %v8455_v43 = vpop.f32.mrf.mxu1  ;;  %v16886_v16 = vpop.f32.mrf.mxu0  ;;  %v7493_v46 = vadd.f32 %v7442_v31, %v7026_v5  ;;  %v6960_v5 = vrot.slane %v16246_v22, 1  ;;  %v7427_v14 = vrot.slane %v16564_v39, 7  ;;  %v18288_v22 = vld [vmem:[#allocation65_spill] sm:$0xff]  ;;  %v16933_v39 = vld [vmem:[#allocation3 + $0x168] sm:$0xff] }
 0xa19   : > { %18283 = vst [vmem:[#allocation37_spill] sm:$0xff] %v16886_v16 }
 0xa1b   : > { %10641 = vmatmul.msk.f32.gmra.mxu1 %vm382_vm0, %v16538_v35  ;;  %10608 = vmatmul.msk.f32.gmra.mxu0 %vm382_vm0, %v16897_v21 }
 0xa1c   : > { %10674 = vmatmul.msk.f32.gmra.mxu2 %vm382_vm0, %v16203_v44  ;;  %v16907_v44 = vld [vmem:[#allocation3 + $0x160] sm:$0xff]  ;;  %v16919_v41 = vpop.f32.mrf.mxu3 }
 0xa1f   : > { %v7618_v49 = vpop.f32.mrf.mxu2 }
 0xa20   : > { %v16901_v40 = vadd.f32 %v7618_v49, %v7493_v46  ;;  %v16903_v34 = vpop.f32.mrf.mxu1  ;;  %v16905_v53 = vpop.f32.mrf.mxu0  ;;  %v7441_v46 = vsel %vm738_vm2, %v7426_v63, %v7427_v14  ;;  %v7428_v63 = vrot.slane %v16588_v58, 7 }
 0xa21   : > { %18285 = vst [vmem:[#allocation28_spill] sm:$0xff] %v16903_v34 }
 0xa22   : > { %18286 = vst [vmem:[#allocation53_spill] sm:$0xff] %v16905_v53 }
 0xa23   : > { %10642 = vmatmul.msk.f32.gmra.mxu1 %vm382_vm0, %v16558_v57  ;;  %10609 = vmatmul.msk.f32.gmra.mxu0 %vm382_vm0, %v16907_v44 }
 0xa24   : > { %10675 = vmatmul.msk.f32.gmra.mxu2 %vm382_vm0, %v16554_v50  ;;  %v6974_v50 = vsel %vm1193_vm1, %v6960_v5, %v6961_v28  ;;  %v7867_v5 = vrot.slane %v16820_v6, 1  ;;  %v16955_v28 = vld [vmem:[#allocation3 + $0x170] sm:$0xff] }
 0xa25   : > { %v7027_v49 = vadd.f32 %v6974_v50, %v18288_v22  ;;  %v16944_v50 = vpop.f32.mrf.mxu3 }
 0xa27   : > { %v7621_v43 = vpop.f32.mrf.mxu2 }
 0xa28   : > { %v16923_v31 = vpop.f32.mrf.mxu1  ;;  %v8235_v52 = vpop.f32.mrf.mxu0  ;;  %v7494_v43 = vadd.f32 %v7441_v46, %v7027_v49  ;;  %v7440_v46 = vsel %vm738_vm2, %v7427_v14, %v7428_v63 }
 0xa29   : > { %18287 = vst [vmem:[#allocation31_spill] sm:$0xff] %v16923_v31  ;;  %v8333_v22 = vrot.slane %v8235_v52, 7  ;;  %v7868_v52 = vrot.slane %v16843_v54, 1 }
 0xa2b   : > { %10643 = vmatmul.msk.f32.gmra.mxu1 %vm382_vm0, %v16568_v60  ;;  %10610 = vmatmul.msk.f32.gmra.mxu0 %vm382_vm0, %v16933_v39  ;;  %v7904_v63 = vsel %vm1193_vm1, %v7867_v5, %v7868_v52 }
 0xa2c   : > { %10676 = vmatmul.msk.f32.gmra.mxu2 %vm382_vm0, %v16575_v11  ;;  %v7866_v11 = vrot.slane %v16788_v36, 1  ;;  %v18289_v36 = vld [vmem:[#allocation22_spill] sm:$0xff] }
 0xa2e   : > { %v7905_v6 = vsel %vm1193_vm1, %v7866_v11, %v7867_v5  ;;  %v16973_v11 = vld [vmem:[#allocation3 + $0x178] sm:$0xff] }
 0xa2f   : > { %v7623_v53 = vpop.f32.mrf.mxu2 }
 0xa30   : > { %v16940_v16 = vadd.f32 %v7623_v53, %v7494_v43  ;;  %v8463_v31 = vpop.f32.mrf.mxu1  ;;  %v8238_v34 = vpop.f32.mrf.mxu0  ;;  %v7028_v53 = vadd.f32 %v6973_v19, %v18289_v36  ;;  %v7429_v36 = vrot.slane %v16613_v17, 7  ;;  %v18293_v17 = vld [vmem:[#allocation93_spill] sm:$0xff] }
 0xa31   : > { %v8334_v58 = vrot.slane %v8238_v34, 7  ;;  %v7938_v31 = vadd.f32 %v7905_v6, %v16609_v15  ;;  %v16971_v15 = vpop.f32.mrf.mxu3  ;;  %v7939_v6 = vadd.f32 %v7904_v63, %v16630_v27  ;;  %v18294_v63 = vld [vmem:[#allocation23_spill] sm:$0xff] }
 0xa32   : > { %v7495_v49 = vadd.f32 %v7440_v46, %v7028_v53  ;;  %v6963_v46 = vrot.slane %v16306_v20, 1  ;;  %v7430_v53 = vrot.slane %v16632_v1, 7  ;;  %v18292_v20 = vld [vmem:[#allocation68_spill] sm:$0xff] }
 0xa33   : > { %10644 = vmatmul.msk.f32.gmra.mxu1 %vm382_vm0, %v16604_v9  ;;  %10611 = vmatmul.msk.f32.gmra.mxu0 %vm382_vm0, %v16955_v28  ;;  %v8373_v34 = vsel %vm738_vm2, %v8333_v22, %v8334_v58  ;;  %v6964_v22 = vrot.slane %v16323_v62, 1 }
 0xa34   : > { %10677 = vmatmul.msk.f32.gmra.mxu2 %vm382_vm0, %v16600_v42  ;;  %v16963_v42 = vadd.f32 %v8373_v34, %v7938_v31  ;;  %v18291_v34 = vld [vmem:[#allocation5_spill] sm:$0xff] }
 0xa35   : > { %v6972_v62 = vsel %vm1193_vm1, %v6963_v46, %v6964_v22 }
 0xa37   : > { %v7626_v14 = vpop.f32.mrf.mxu2 }
 0xa38   : > { %v16965_v8 = vadd.f32 %v7626_v14, %v7495_v49  ;;  %v16967_v43 = vpop.f32.mrf.mxu1  ;;  %v8241_v54 = vpop.f32.mrf.mxu0  ;;  %v7439_v49 = vsel %vm738_vm2, %v7429_v36, %v7430_v53  ;;  %v6965_v14 = vrot.slane %v18293_v17, 1  ;;  %v7869_v36 = vrot.slane %v16865_v30, 1 }
 0xa39   : > { %v8335_v19 = vrot.slane %v8241_v54, 7  ;;  %v17000_v1 = vpop.f32.mrf.mxu3  ;;  %v7870_v54 = vrot.slane %v16893_v48, 1 }
 0xa3b   : > { %10645 = vmatmul.msk.f32.gmra.mxu1 %vm382_vm0, %v16626_v10  ;;  %10612 = vmatmul.msk.f32.gmra.mxu0 %vm382_vm0, %v16973_v11  ;;  %v8372_v5 = vsel %vm738_vm2, %v8334_v58, %v8335_v19  ;;  %v7029_v58 = vadd.f32 %v6972_v62, %v18292_v20  ;;  %v6971_v62 = vsel %vm1193_vm1, %v6964_v22, %v6965_v14  ;;  %v18300_v14 = vld [vmem:[#allocation84_spill] sm:$0xff] }
 0xa3c   : > { %10678 = vmatmul.msk.f32.gmra.mxu2 %vm382_vm0, %v16622_v45  ;;  %v16988_v31 = vadd.f32 %v8372_v5, %v7939_v6  ;;  %v18295_v6 = vld [vmem:[#allocation27_spill] sm:$0xff]  ;;  %v7903_v17 = vsel %vm1193_vm1, %v7869_v36, %v7870_v54 }
 0xa3d   : > { %v7496_v19 = vadd.f32 %v7439_v49, %v7029_v58  ;;  %v7431_v5 = vrot.slane %v18295_v6, 7  ;;  %v18296_v58 = vld [vmem:[#allocation72_spill] sm:$0xff]  ;;  %v18297_v6 = vld [vmem:[#allocation70_spill] sm:$0xff] }
 0xa3e   : > { %v7030_v30 = vadd.f32 %v6971_v62, %v18297_v6 }
 0xa3f   : > { %v7629_v45 = vpop.f32.mrf.mxu2 }
 0xa40   : > { %v16992_v52 = vpop.f32.mrf.mxu1  ;;  %v8244_v27 = vpop.f32.mrf.mxu0 }
 0xa41   : > { %18290 = vst [vmem:[#allocation50_spill] sm:$0xff] %v16992_v52 }
 0xa43   : > { %10646 = vmatmul.msk.f32.gmra.mxu1 %vm382_vm0, %v18294_v63  ;;  %10613 = vmatmul.msk.f32.gmra.mxu0 %vm382_vm0, %v16374_v3  ;;  %v7438_v3 = vsel %vm738_vm2, %v7430_v53, %v7431_v5  ;;  %v17028_v5 = vpop.f32.mrf.mxu3 }
 0xa44   : > { %10679 = vmatmul.msk.f32.gmra.mxu2 %vm382_vm0, %v18291_v34  ;;  %v8336_v34 = vrot.slane %v8244_v27, 7  ;;  %v7871_v27 = vrot.slane %v16919_v41, 1  ;;  %v7497_v36 = vadd.f32 %v7438_v3, %v7030_v30  ;;  %v18305_v3 = vld [vmem:[#allocation60_spill] sm:$0xff] }
 0xa45   : > { %v6967_v30 = vrot.slane %v18305_v3, 1 }
 0xa47   : > { %v7631_v46 = vpop.f32.mrf.mxu2 }
 0xa48   : > { %v17009_v45 = vadd.f32 %v7631_v46, %v7496_v19  ;;  %v8471_v20 = vpop.f32.mrf.mxu1  ;;  %v8247_v48 = vpop.f32.mrf.mxu0  ;;  %v18298_v19 = vld [vmem:[#allocation49_spill] sm:$0xff] }
 0xa49   : > { %v8337_v49 = vrot.slane %v8247_v48, 7  ;;  %v18299_v46 = vld [vmem:[#allocation29_spill] sm:$0xff] }
 0xa4a   : > { %v7940_v22 = vadd.f32 %v7903_v17, %v18299_v46  ;;  %v7902_v17 = vsel %vm1193_vm1, %v7870_v54, %v7871_v27  ;;  %v18304_v46 = vld [vmem:[#allocation61_spill] sm:$0xff]  ;;  %v18309_v27 = vld [vmem:[#allocation74_spill] sm:$0xff] }
 0xa4b   : > { %10647 = vmatmul.msk.f32.gmra.mxu1 %vm382_vm0, %v18298_v19  ;;  %10614 = vmatmul.msk.f32.gmra.mxu0 %vm382_vm0, %v18300_v14  ;;  %v8371_v53 = vsel %vm738_vm2, %v8336_v34, %v8337_v49  ;;  %v18306_v34 = vld [vmem:[#allocation59_spill] sm:$0xff]  ;;  %v18307_v14 = vld [vmem:[#allocation73_spill] sm:$0xff] }
 0xa4c   : > { %10680 = vmatmul.msk.f32.gmra.mxu2 %vm382_vm0, %v18296_v58  ;;  %v17030_v48 = vadd.f32 %v8371_v53, %v7940_v22  ;;  %v7941_v22 = vadd.f32 %v7902_v17, %v18307_v14  ;;  %v18308_v53 = vld [vmem:[#allocation45_spill] sm:$0xff] }
 0xa4d   : > { %v6966_v54 = vrot.slane %v18308_v53, 1  ;;  %v17059_v14 = vld [vmem:[#allocation3 + $0x198] sm:$0xff]  ;;  %v18314_v53 = vld [vmem:[#allocation71_spill] sm:$0xff] }
 0xa4e   : > { %18301 = vst [vmem:[#allocation33_spill] sm:$0xff] %v17030_v48  ;;  %v17080_v48 = vld [vmem:[#allocation3 + $0x1a0] sm:$0xff] }
 0xa4f   : > { %v7634_v20 = vpop.f32.mrf.mxu2  ;;  %v6970_v3 = vsel %vm1193_vm1, %v6966_v54, %v6967_v30  ;;  %v7873_v54 = vrot.slane %v16971_v15, 1 }
 0xa50   : > { %v17032_v62 = vadd.f32 %v7634_v20, %v7497_v36  ;;  %v17034_v58 = vpop.f32.mrf.mxu1  ;;  %v8250_v41 = vpop.f32.mrf.mxu0  ;;  %v7432_v20 = vrot.slane %v18309_v27, 7  ;;  %v7031_v27 = vadd.f32 %v6970_v3, %v18314_v53 }
 0xa51   : > { %18303 = vst [vmem:[#allocation54_spill] sm:$0xff] %v17034_v58  ;;  %v8338_v6 = vrot.slane %v8250_v41, 7  ;;  %v18310_v41 = vld [vmem:[#allocation75_spill] sm:$0xff] }
 0xa52   : > { %18302 = vst [vmem:[#allocation66_spill] sm:$0xff] %v17032_v62  ;;  %v7433_v58 = vrot.slane %v18310_v41, 7  ;;  %v18316_v41 = vld [vmem:[#allocation15_spill] sm:$0xff] }
 0xa53   : > { %10648 = vmatmul.msk.f32.gmra.mxu1 %vm382_vm0, %v18306_v34  ;;  %10615 = vmatmul.msk.f32.gmra.mxu0 %vm382_vm0, %v16412_v18  ;;  %v8370_v36 = vsel %vm738_vm2, %v8337_v49, %v8338_v6  ;;  %v17055_v34 = vpop.f32.mrf.mxu3  ;;  %v18313_v6 = vld [vmem:[#allocation96_spill] sm:$0xff] }
 0xa54   : > { %10681 = vmatmul.msk.f32.gmra.mxu2 %vm382_vm0, %v18304_v46  ;;  %v17051_v52 = vadd.f32 %v8370_v36, %v7941_v22  ;;  %v7437_v49 = vsel %vm738_vm2, %v7432_v20, %v7433_v58  ;;  %v18315_v22 = vld [vmem:[#allocation81_spill] sm:$0xff]  ;;  %v7872_v20 = vrot.slane %v16944_v50, 1 }
 0xa55   : > { %v6968_v36 = vrot.slane %v18315_v22, 1  ;;  %v18319_v50 = vld [vmem:[#allocation97_spill] sm:$0xff] }
 0xa56   : > { %18311 = vst [vmem:[#allocation35_spill] sm:$0xff] %v17051_v52  ;;  %v7901_v22 = vsel %vm1193_vm1, %v7872_v20, %v7873_v54 }
 0xa57   : > { %v7637_v46 = vpop.f32.mrf.mxu2  ;;  %v6969_v3 = vsel %vm1193_vm1, %v6967_v30, %v6968_v36  ;;  %v7942_v30 = vadd.f32 %v7901_v22, %v16744_v33  ;;  %v17103_v22 = vld [vmem:[#allocation3 + $0x1a8] sm:$0xff] }
 0xa58   : > { %v17057_v17 = vpop.f32.mrf.mxu1  ;;  %v8253_v18 = vpop.f32.mrf.mxu0  ;;  %v7498_v46 = vadd.f32 %v7437_v49, %v7031_v27  ;;  %v18318_v27 = vld [vmem:[#allocation26_spill] sm:$0xff] }
 0xa59   : > { %18312 = vst [vmem:[#allocation25_spill] sm:$0xff] %v17057_v17  ;;  %v18317_v17 = vld [vmem:[#allocation18_spill] sm:$0xff] }
 0xa5a   : > { %v7434_v52 = vrot.slane %v18317_v17, 7 }
 0xa5b   : > { %10649 = vmatmul.msk.f32.gmra.mxu1 %vm382_vm0, %v18316_v41  ;;  %10616 = vmatmul.msk.f32.gmra.mxu0 %vm382_vm0, %v17059_v14  ;;  %v7803_v15 = vpop.f32.mrf.mxu3 }
 0xa5c   : > { %10682 = vmatmul.msk.f32.gmra.mxu2 %vm382_vm0, %v18313_v6  ;;  %v8339_v6 = vrot.slane %v8253_v18, 7  ;;  %v7436_v17 = vsel %vm738_vm2, %v7433_v58, %v7434_v52  ;;  %v7874_v18 = vrot.slane %v17000_v1, 1 }
 0xa5f   : > { %v7639_v62 = vpop.f32.mrf.mxu2 }
 0xa60   : > { %v17074_v19 = vadd.f32 %v7639_v62, %v7498_v46  ;;  %v8479_v53 = vpop.f32.mrf.mxu1  ;;  %v8256_v41 = vpop.f32.mrf.mxu0  ;;  %v7032_v62 = vadd.f32 %v6969_v3, %v18319_v50  ;;  %v18320_v46 = vld [vmem:[#allocation77_spill] sm:$0xff] }
 0xa61   : > { %v8340_v49 = vrot.slane %v8256_v41, 7  ;;  %v7900_v53 = vsel %vm1193_vm1, %v7873_v54, %v7874_v18 }
 0xa62   : > { %v7499_v36 = vadd.f32 %v7436_v17, %v7032_v62 }
 0xa63   : > { %10650 = vmatmul.msk.f32.gmra.mxu1 %vm382_vm0, %v18320_v46  ;;  %10617 = vmatmul.msk.f32.gmra.mxu0 %vm382_vm0, %v17080_v48  ;;  %v8369_v52 = vsel %vm738_vm2, %v8339_v6, %v8340_v49  ;;  %v17107_v17 = vpop.f32.mrf.mxu3  ;;  %v7943_v6 = vadd.f32 %v7900_v53, %v16773_v4 }
 0xa64   : > { %10683 = vmatmul.msk.f32.gmra.mxu2 %vm382_vm0, %v18318_v27  ;;  %v17095_v41 = vadd.f32 %v8369_v52, %v7942_v30 }
 0xa67   : > { %v7642_v58 = vpop.f32.mrf.mxu2 }
 0xa68   : > { %v17097_v20 = vadd.f32 %v7642_v58, %v7499_v36  ;;  %v17099_v3 = vpop.f32.mrf.mxu1  ;;  %v8259_v33 = vpop.f32.mrf.mxu0  ;;  %v7875_v36 = vrot.slane %v17028_v5, 1 }
 0xa69   : > { %v8341_v1 = vrot.slane %v8259_v33, 7 }
 0xa6b   : > { %10651 = vmatmul.msk.f32.gmra.mxu1 %vm382_vm0, %v16769_v7  ;;  %10618 = vmatmul.msk.f32.gmra.mxu0 %vm382_vm0, %v17103_v22  ;;  %v8368_v54 = vsel %vm738_vm2, %v8340_v49, %v8341_v1  ;;  %v17125_v4 = vpop.f32.mrf.mxu3 }
 0xa6c   : > { %10684 = vmatmul.msk.f32.gmra.mxu2 %vm382_vm0, %v16765_v23  ;;  %v17116_v50 = vadd.f32 %v8368_v54, %v7943_v6  ;;  %v7876_v23 = vrot.slane %v17055_v34, 1  ;;  %v7877_v34 = vrot.slane %v7803_v15, 1  ;;  %v18322_v54 = vld [vmem:[#allocation85_spill] sm:$0xff] }
 0xa6e   : > { %v7899_v58 = vsel %vm1193_vm1, %v7875_v36, %v7876_v23 }
 0xa6f   : > { %v7645_v27 = vpop.f32.mrf.mxu2 }
 0xa70   : > { %v17118_v62 = vpop.f32.mrf.mxu1  ;;  %v8262_v30 = vpop.f32.mrf.mxu0  ;;  %v8311_v27 = vrot.slane %v18322_v54, 7 }
 0xa71   : > { %18321 = vst [vmem:[#allocation38_spill] sm:$0xff] %v17118_v62  ;;  %v8342_v49 = vrot.slane %v8262_v30, 7 }
 0xa73   : > { %10652 = vmatmul.msk.f32.gmra.mxu1 %vm382_vm0, %v16783_v47 }
 0xa74   : > { %10685 = vmatmul.msk.f32.gmra.mxu2 %vm382_vm0, %v16790_v26  ;;  %v7944_v26 = vadd.f32 %v7899_v58, %v16822_v51  ;;  %v7898_v51 = vsel %vm1193_vm1, %v7876_v23, %v7877_v34 }
 0xa75   : > { %v7945_v58 = vadd.f32 %v7898_v51, %v16841_v29 }
 0xa77   : > { %v8620_v18 = vpop.f32.mrf.mxu2 }
 0xa78   : > { %v8487_v52 = vpop.f32.mrf.mxu1  ;;  %v8265_v53 = vpop.f32.mrf.mxu0  ;;  %v8764_v30 = vrot.slane %v8620_v18, 1 }
 0xa79   : > { %v8343_v33 = vrot.slane %v8265_v53, 7  ;;  %v7812_v52 = vpop.f32.mrf.mxu3  ;;  %v18323_v53 = vld [vmem:[#allocation46_spill] sm:$0xff] }
 0xa7a   : > { %v17748_v62 = vrot.slane %v18323_v53, 7 }
 0xa7b   : > { %10653 = vmatmul.msk.f32.gmra.mxu1 %vm382_vm0, %v16815_v32  ;;  %v8367_v1 = vsel %vm738_vm2, %v8342_v49, %v8343_v33 }
 0xa7c   : > { %10686 = vmatmul.msk.f32.gmra.mxu2 %vm382_vm0, %v16811_v61  ;;  %v17137_v6 = vadd.f32 %v8367_v1, %v7944_v26  ;;  %v8388_v49 = vsel %vm738_vm2, %v17748_v62, %v8311_v27  ;;  %v18325_v1 = vld [vmem:[#allocation90_spill] sm:$0xff] }
 0xa7d   : > { %v8391_v23 = vadd.f32 %v8388_v49, %v18325_v1  ;;  %v18327_v49 = vld [vmem:[#allocation21_spill] sm:$0xff] }
 0xa7f   : > { %v8623_v5 = vpop.f32.mrf.mxu2  ;;  %v8570_v27 = vadd.f32 %v16801_v55, %v8391_v23  ;;  %v8312_v55 = vrot.slane %v18327_v49, 7 }
 0xa80   : > { %v8765_v36 = vrot.slane %v8623_v5, 1  ;;  %v17145_v32 = vpop.f32.mrf.mxu1  ;;  %v8268_v15 = vpop.f32.mrf.mxu0 }
 0xa81   : > { %18324 = vst [vmem:[#allocation42_spill] sm:$0xff] %v17145_v32  ;;  %v8344_v18 = vrot.slane %v8268_v15, 7  ;;  %v7815_v15 = vpop.f32.mrf.mxu3 }
 0xa82   : > { %v17143_v61 = vsel %vm1193_vm1, %v8764_v30, %v8765_v36 }
 0xa83   : > { %10654 = vmatmul.msk.f32.gmra.mxu1 %vm382_vm0, %v16837_v2  ;;  %v8366_v26 = vsel %vm738_vm2, %v8343_v33, %v8344_v18  ;;  %v7879_v33 = vrot.slane %v17125_v4, 1  ;;  %v18328_v18 = vld [vmem:[#allocation6_spill] sm:$0xff] }
 0xa84   : > { %10687 = vmatmul.msk.f32.gmra.mxu2 %vm382_vm0, %v16833_v38  ;;  %v17161_v5 = vadd.f32 %v8366_v26, %v7945_v58  ;;  %v8313_v58 = vrot.slane %v18328_v18, 7 }
 0xa87   : > { %v8626_v34 = vpop.f32.mrf.mxu2 }
 0xa88   : > { %v8766_v54 = vrot.slane %v8626_v34, 1  ;;  %v17166_v38 = vpop.f32.mrf.mxu1  ;;  %v8271_v29 = vpop.f32.mrf.mxu0 }
 0xa89   : > { %18326 = vst [vmem:[#allocation48_spill] sm:$0xff] %v17166_v38  ;;  %v8345_v26 = vrot.slane %v8271_v29, 7  ;;  %v17184_v4 = vpop.f32.mrf.mxu3  ;;  %v18329_v29 = vld [vmem:[#allocation44_spill] sm:$0xff] }
 0xa8a   : > { %v8842_v30 = vsel %vm1193_vm1, %v8765_v36, %v8766_v54  ;;  %v7878_v36 = vrot.slane %v17107_v17, 1 }
 0xa8b   : > { %v17168_v62 = vadd.f32 %v8842_v30, %v8570_v27  ;;  %10655 = vmatmul.msk.f32.gmra.mxu1 %vm382_vm0, %v16849_v12  ;;  %v7880_v27 = vrot.slane %v7812_v52, 1 }
 0xa8c   : > { %10688 = vmatmul.msk.f32.gmra.mxu2 %vm382_vm0, %v16496_v25  ;;  %v7897_v23 = vsel %vm1193_vm1, %v7878_v36, %v7879_v33  ;;  %v8387_v25 = vsel %vm738_vm2, %v8312_v55, %v8313_v58  ;;  %v18330_v55 = vld [vmem:[#allocation30_spill] sm:$0xff] }
 0xa8d   : > { %v7946_v17 = vadd.f32 %v7897_v23, %v16882_v56  ;;  %v8392_v49 = vadd.f32 %v8387_v25, %v18329_v29  ;;  %v7896_v56 = vsel %vm1193_vm1, %v7879_v33, %v7880_v27 }
 0xa8f   : > { %v8629_v51 = vpop.f32.mrf.mxu2  ;;  %v8571_v38 = vadd.f32 %v16845_v59, %v8392_v49  ;;  %v7947_v59 = vadd.f32 %v7896_v56, %v16901_v40  ;;  %v7881_v56 = vrot.slane %v7815_v15, 1 }
 0xa90   : > { %v8495_v1 = vpop.f32.mrf.mxu1  ;;  %v8274_v34 = vpop.f32.mrf.mxu0 }
 0xa91   : > { %v8346_v54 = vrot.slane %v8274_v34, 7  ;;  %v8314_v1 = vrot.slane %v18330_v55, 7  ;;  %v8767_v34 = vrot.slane %v8629_v51, 1  ;;  %v18332_v55 = vld [vmem:[#allocation13_spill] sm:$0xff] }
 0xa93   : > { %10656 = vmatmul.msk.f32.gmra.mxu1 %vm382_vm0, %v16877_v13  ;;  %v8365_v30 = vsel %vm738_vm2, %v8345_v26, %v8346_v54  ;;  %v8386_v23 = vsel %vm738_vm2, %v8313_v58, %v8314_v1  ;;  %v8315_v1 = vrot.slane %v18332_v55, 7 }
 0xa94   : > { %10689 = vmatmul.msk.f32.gmra.mxu2 %vm382_vm0, %v16506_v0  ;;  %v17192_v36 = vadd.f32 %v8365_v30, %v7946_v17  ;;  %v18331_v17 = vld [vmem:[#allocation79_spill] sm:$0xff] }
 0xa95   : > { %v8393_v33 = vadd.f32 %v8386_v23, %v18331_v17 }
 0xa97   : > { %v8632_v18 = vpop.f32.mrf.mxu2  ;;  %v8572_v58 = vadd.f32 %v16863_v24, %v8393_v33  ;;  %v18333_v24 = vld [vmem:[#allocation12_spill] sm:$0xff] }
 0xa98   : > { %v8768_v0 = vrot.slane %v8632_v18, 1  ;;  %v17198_v32 = vpop.f32.mrf.mxu1  ;;  %v8277_v26 = vpop.f32.mrf.mxu0  ;;  %v18334_v33 = vld [vmem:[#allocation80_spill] sm:$0xff] }
 0xa99   : > { %v8347_v25 = vrot.slane %v8277_v26, 7 }
 0xa9a   : > { %v8841_v13 = vsel %vm1193_vm1, %v8767_v34, %v8768_v0  ;;  %v8316_v34 = vrot.slane %v18333_v24, 7  ;;  %v18336_v24 = vld [vmem:[#allocation28_spill] sm:$0xff] }
 0xa9b   : > { %v17202_v52 = vadd.f32 %v8841_v13, %v8571_v38  ;;  %10657 = vmatmul.msk.f32.gmra.mxu1 %vm382_vm0, %v16897_v21  ;;  %v8364_v51 = vsel %vm738_vm2, %v8346_v54, %v8347_v25  ;;  %v7821_v13 = vpop.f32.mrf.mxu3  ;;  %v7882_v54 = vrot.slane %v17184_v4, 1 }
 0xa9c   : > { %10690 = vmatmul.msk.f32.gmra.mxu2 %vm382_vm0, %v16538_v35  ;;  %v17214_v27 = vadd.f32 %v8364_v51, %v7947_v59  ;;  %v7883_v15 = vrot.slane %v7821_v13, 1 }
 0xa9d   : > { %v7895_v25 = vsel %vm1193_vm1, %v7881_v56, %v7882_v54 }
 0xa9e   : > { %v7948_v4 = vadd.f32 %v7895_v25, %v16940_v16  ;;  %v7894_v16 = vsel %vm1193_vm1, %v7882_v54, %v7883_v15  ;;  %v18338_v15 = vld [vmem:[#allocation55_spill] sm:$0xff] }
 0xa9f   : > { %v8635_v38 = vpop.f32.mrf.mxu2 }
 0xaa0   : > { %v8769_v30 = vrot.slane %v8635_v38, 1  ;;  %v17219_v29 = vpop.f32.mrf.mxu1  ;;  %v8280_v40 = vpop.f32.mrf.mxu0 }
 0xaa1   : > { %v8348_v26 = vrot.slane %v8280_v40, 7 }
 0xaa2   : > { %v8840_v35 = vsel %vm1193_vm1, %v8768_v0, %v8769_v30 }
 0xaa3   : > { %v17221_v49 = vadd.f32 %v8840_v35, %v8572_v58  ;;  %10658 = vmatmul.msk.f32.gmra.mxu1 %vm382_vm0, %v16907_v44  ;;  %v7824_v0 = vpop.f32.mrf.mxu3  ;;  %v18335_v35 = vld [vmem:[#allocation9_spill] sm:$0xff] }
 0xaa4   : > { %10691 = vmatmul.msk.f32.gmra.mxu2 %vm382_vm0, %v16558_v57  ;;  %v8385_v57 = vsel %vm738_vm2, %v8315_v1, %v8316_v34  ;;  %v8317_v40 = vrot.slane %v18335_v35, 7 }
 0xaa5   : > { %v8394_v38 = vadd.f32 %v8385_v57, %v18334_v33 }
 0xaa7   : > { %v8638_v18 = vpop.f32.mrf.mxu2 }
 0xaa8   : > { %v8503_v23 = vpop.f32.mrf.mxu1  ;;  %v8283_v59 = vpop.f32.mrf.mxu0  ;;  %v8770_v55 = vrot.slane %v8638_v18, 1  ;;  %v8384_v18 = vsel %vm738_vm2, %v8316_v34, %v8317_v40 }
 0xaa9   : > { %v8349_v51 = vrot.slane %v8283_v59, 7 }
 0xaab   : > { %10659 = vmatmul.msk.f32.gmra.mxu1 %vm382_vm0, %v16933_v39  ;;  %v8363_v17 = vsel %vm738_vm2, %v8348_v26, %v8349_v51  ;;  %v7827_v13 = vpop.f32.mrf.mxu3 }
 0xaac   : > { %10692 = vmatmul.msk.f32.gmra.mxu2 %vm382_vm0, %v16568_v60  ;;  %v17242_v58 = vadd.f32 %v8363_v17, %v7948_v4  ;;  %v8573_v60 = vadd.f32 %v18336_v24, %v8394_v38  ;;  %v7949_v4 = vadd.f32 %v7894_v16, %v16965_v8  ;;  %v8395_v17 = vadd.f32 %v8384_v18, %v18338_v15  ;;  %v18342_v16 = vld [vmem:[#allocation67_spill] sm:$0xff] }
 0xaad   : > { %v7885_v24 = vrot.slane %v7827_v13, 1  ;;  %v17287_v13 = vld [vmem:[#allocation3 + $0x180] sm:$0xff] }
 0xaaf   : > { %v8641_v30 = vpop.f32.mrf.mxu2 }
 0xab0   : > { %v8771_v1 = vrot.slane %v8641_v30, 1  ;;  %v8505_v23 = vpop.f32.mrf.mxu1  ;;  %v8286_v59 = vpop.f32.mrf.mxu0  ;;  %v18339_v30 = vld [vmem:[#allocation31_spill] sm:$0xff] }
 0xab1   : > { %v17253_v25 = vadd.f32 %v8505_v23, %v16963_v42  ;;  %v8350_v57 = vrot.slane %v8286_v59, 7  ;;  %v8574_v34 = vadd.f32 %v18339_v30, %v8395_v17  ;;  %v7884_v59 = vrot.slane %v7824_v0, 1 }
 0xab2   : > { %v8839_v56 = vsel %vm1193_vm1, %v8770_v55, %v8771_v1 }
 0xab3   : > { %v17250_v26 = vadd.f32 %v8839_v56, %v8573_v60  ;;  %18337 = vst [vmem:[#allocation10_spill] sm:$0xff] %v17253_v25  ;;  %10660 = vmatmul.msk.f32.gmra.mxu1 %vm382_vm0, %v16955_v28  ;;  %v8362_v54 = vsel %vm738_vm2, %v8349_v51, %v8350_v57  ;;  %v7830_v51 = vpop.f32.mrf.mxu3  ;;  %v18341_v56 = vld [vmem:[#allocation19_spill] sm:$0xff] }
 0xab4   : > { %10693 = vmatmul.msk.f32.gmra.mxu2 %vm382_vm0, %v16604_v9  ;;  %v17265_v33 = vadd.f32 %v8362_v54, %v7949_v4  ;;  %v8318_v23 = vrot.slane %v18341_v56, 7  ;;  %v7886_v15 = vrot.slane %v7830_v51, 1 }
 0xab6   : > { %v7892_v51 = vsel %vm1193_vm1, %v7885_v24, %v7886_v15 }
 0xab7   : > { %v8644_v42 = vpop.f32.mrf.mxu2 }
 0xab8   : > { %v8772_v38 = vrot.slane %v8644_v42, 1  ;;  %v8508_v9 = vpop.f32.mrf.mxu1  ;;  %v8289_v8 = vpop.f32.mrf.mxu0  ;;  %v18343_v42 = vld [vmem:[#allocation57_spill] sm:$0xff] }
 0xab9   : > { %v17273_v55 = vadd.f32 %v8508_v9, %v16988_v31  ;;  %v8351_v18 = vrot.slane %v8289_v8, 7  ;;  %v7893_v31 = vsel %vm1193_vm1, %v7884_v59, %v7885_v24  ;;  %v18344_v9 = vld [vmem:[#allocation69_spill] sm:$0xff] }
 0xaba   : > { %v8838_v35 = vsel %vm1193_vm1, %v8771_v1, %v8772_v38  ;;  %v8319_v1 = vrot.slane %v18342_v16, 7  ;;  %v7950_v0 = vadd.f32 %v7893_v31, %v17009_v45  ;;  %v8320_v8 = vrot.slane %v18344_v9, 7  ;;  %v18350_v9 = vld [vmem:[#allocation50_spill] sm:$0xff] }
 0xabb   : > { %v17270_v40 = vadd.f32 %v8838_v35, %v8574_v34  ;;  %18340 = vst [vmem:[#allocation95_spill] sm:$0xff] %v17273_v55  ;;  %10661 = vmatmul.msk.f32.gmra.mxu1 %vm382_vm0, %v16973_v11  ;;  %v7833_v30 = vpop.f32.mrf.mxu3 }
 0xabc   : > { %10694 = vmatmul.msk.f32.gmra.mxu2 %vm382_vm0, %v16626_v10  ;;  %v8383_v10 = vsel %vm738_vm2, %v8318_v23, %v8319_v1 }
 0xabd   : > { %v8396_v38 = vadd.f32 %v8383_v10, %v18343_v42  ;;  %v18347_v10 = vld [vmem:[#allocation49_spill] sm:$0xff] }
 0xabf   : > { %v8647_v60 = vpop.f32.mrf.mxu2  ;;  %v8575_v23 = vadd.f32 %v16967_v43, %v8396_v38  ;;  %v17312_v43 = vld [vmem:[#allocation3 + $0x188] sm:$0xff] }
 0xac0   : > { %v8511_v57 = vpop.f32.mrf.mxu1  ;;  %v8292_v4 = vpop.f32.mrf.mxu0 }
 0xac1   : > { %v8352_v54 = vrot.slane %v8292_v4, 7  ;;  %v8382_v4 = vsel %vm738_vm2, %v8319_v1, %v8320_v8 }
 0xac3   : > { %10662 = vmatmul.msk.f32.gmra.mxu1 %vm382_vm0, %v17287_v13  ;;  %v8361_v17 = vsel %vm738_vm2, %v8351_v18, %v8352_v54  ;;  %v18345_v18 = vld [vmem:[#allocation33_spill] sm:$0xff] }
 0xac4   : > { %10695 = vmatmul.msk.f32.gmra.mxu2 %vm382_vm0, %v18294_v63  ;;  %v17295_v35 = vadd.f32 %v8361_v17, %v7950_v0  ;;  %v8773_v63 = vrot.slane %v8647_v60, 1  ;;  %v18348_v0 = vld [vmem:[#allocation66_spill] sm:$0xff]  ;;  %v18349_v17 = vld [vmem:[#allocation91_spill] sm:$0xff] }
 0xac5   : > { %v7951_v24 = vadd.f32 %v7892_v51, %v18348_v0  ;;  %v8397_v42 = vadd.f32 %v8382_v4, %v18349_v17  ;;  %v17332_v4 = vld [vmem:[#allocation3 + $0x190] sm:$0xff]  ;;  %v18354_v0 = vld [vmem:[#allocation41_spill] sm:$0xff]  ;;  %v7887_v17 = vrot.slane %v7833_v30, 1 }
 0xac7   : > { %v8650_v34 = vpop.f32.mrf.mxu2  ;;  %v8576_v8 = vadd.f32 %v18350_v9, %v8397_v42 }
 0xac8   : > { %v8774_v56 = vrot.slane %v8650_v34, 1  ;;  %v8513_v45 = vpop.f32.mrf.mxu1  ;;  %v8295_v31 = vpop.f32.mrf.mxu0 }
 0xac9   : > { %v17306_v57 = vadd.f32 %v8513_v45, %v18345_v18  ;;  %v8353_v60 = vrot.slane %v8295_v31, 7  ;;  %v18351_v18 = vld [vmem:[#allocation35_spill] sm:$0xff] }
 0xaca   : > { %v8837_v16 = vsel %vm1193_vm1, %v8773_v63, %v8774_v56  ;;  %v7836_v63 = vpop.f32.mrf.mxu3 }
 0xacb   : > { %v17303_v59 = vadd.f32 %v8837_v16, %v8575_v23  ;;  %18346 = vst [vmem:[#allocation47_spill] sm:$0xff] %v17306_v57  ;;  %10663 = vmatmul.msk.f32.gmra.mxu1 %vm382_vm0, %v17312_v43  ;;  %v8360_v15 = vsel %vm738_vm2, %v8352_v54, %v8353_v60  ;;  %v18353_v54 = vld [vmem:[#allocation59_spill] sm:$0xff]  ;;  %v7888_v60 = vrot.slane %v7836_v63, 1  ;;  %v18359_v57 = vld [vmem:[#allocation54_spill] sm:$0xff] }
 0xacc   : > { %10696 = vmatmul.msk.f32.gmra.mxu2 %vm382_vm0, %v18347_v10  ;;  %v17320_v34 = vadd.f32 %v8360_v15, %v7951_v24  ;;  %v8321_v24 = vrot.slane %v18354_v0, 7 }
 0xacf   : > { %v8653_v38 = vpop.f32.mrf.mxu2 }
 0xad0   : > { %v8775_v1 = vrot.slane %v8653_v38, 1  ;;  %v8516_v16 = vpop.f32.mrf.mxu1  ;;  %v8298_v31 = vpop.f32.mrf.mxu0 }
 0xad1   : > { %v17328_v51 = vadd.f32 %v8516_v16, %v18351_v18  ;;  %v8354_v42 = vrot.slane %v8298_v31, 7  ;;  %v18356_v18 = vld [vmem:[#allocation15_spill] sm:$0xff] }
 0xad2   : > { %v8836_v23 = vsel %vm1193_vm1, %v8774_v56, %v8775_v1  ;;  %v18355_v56 = vld [vmem:[#allocation58_spill] sm:$0xff]  ;;  %v7891_v1 = vsel %vm1193_vm1, %v7887_v17, %v7888_v60  ;;  %v7839_v9 = vpop.f32.mrf.mxu3 }
 0xad3   : > { %v17325_v45 = vadd.f32 %v8836_v23, %v8576_v8  ;;  %18352 = vst [vmem:[#allocation36_spill] sm:$0xff] %v17328_v51  ;;  %10664 = vmatmul.msk.f32.gmra.mxu1 %vm382_vm0, %v17332_v4  ;;  %v8322_v15 = vrot.slane %v18355_v56, 7  ;;  %v7952_v63 = vadd.f32 %v7891_v1, %v17074_v19  ;;  %v7889_v30 = vrot.slane %v7839_v9, 1 }
 0xad4   : > { %10697 = vmatmul.msk.f32.gmra.mxu2 %vm382_vm0, %v18353_v54  ;;  %v18357_v54 = vld [vmem:[#allocation82_spill] sm:$0xff] }
 0xad5   : > { %v8381_v23 = vsel %vm738_vm2, %v8321_v24, %v8322_v15  ;;  %v7890_v19 = vsel %vm1193_vm1, %v7888_v60, %v7889_v30  ;;  %v18360_v60 = vld [vmem:[#allocation20_spill] sm:$0xff] }
 0xad6   : > { %v8398_v0 = vadd.f32 %v8381_v23, %v18357_v54 }
 0xad7   : > { %v8656_v10 = vpop.f32.mrf.mxu2 }
 0xad8   : > { %v8519_v38 = vpop.f32.mrf.mxu1  ;;  %v8301_v8 = vpop.f32.mrf.mxu0 }
 0xad9   : > { %v8355_v16 = vrot.slane %v8301_v8, 7  ;;  %v18358_v38 = vld [vmem:[#allocation11_spill] sm:$0xff]  ;;  %v8776_v8 = vrot.slane %v8656_v10, 1 }
 0xada   : > { %v8323_v24 = vrot.slane %v18358_v38, 7 }
 0xadb   : > { %10665 = vmatmul.msk.f32.gmra.mxu1 %vm382_vm0, %v17059_v14  ;;  %v8359_v31 = vsel %vm738_vm2, %v8354_v42, %v8355_v16 }
 0xadc   : > { %10698 = vmatmul.msk.f32.gmra.mxu2 %vm382_vm0, %v18356_v18  ;;  %v17350_v17 = vadd.f32 %v8359_v31, %v7952_v63  ;;  %v8577_v18 = vadd.f32 %v18359_v57, %v8398_v0  ;;  %v8380_v23 = vsel %vm738_vm2, %v8322_v15, %v8323_v24  ;;  %v7953_v57 = vadd.f32 %v7890_v19, %v17097_v20  ;;  %v18361_v31 = vld [vmem:[#allocation25_spill] sm:$0xff] }
 0xadd   : > { %v8399_v63 = vadd.f32 %v8380_v23, %v18360_v60  ;;  %v18364_v19 = vld [vmem:[#allocation89_spill] sm:$0xff]  ;;  %v17399_v60 = vld [vmem:[%s17665_s6] ss:$0 sm:$0xff] }
 0xadf   : > { %v8659_v56 = vpop.f32.mrf.mxu2  ;;  %v8578_v15 = vadd.f32 %v18361_v31, %v8399_v63 }
 0xae0   : > { %v8777_v51 = vrot.slane %v8659_v56, 1  ;;  %v8521_v25 = vpop.f32.mrf.mxu1  ;;  %v8304_v9 = vpop.f32.mrf.mxu0 }
 0xae1   : > { %v17361_v42 = vadd.f32 %v8521_v25, %v17095_v41  ;;  %v8356_v10 = vrot.slane %v8304_v9, 7  ;;  %v8324_v9 = vrot.slane %v18364_v19, 7  ;;  %v18369_v19 = vld [vmem:[#allocation34_spill] sm:$0xff] }
 0xae2   : > { %v8835_v55 = vsel %vm1193_vm1, %v8776_v8, %v8777_v51 }
 0xae3   : > { %v17358_v1 = vadd.f32 %v8835_v55, %v8577_v18  ;;  %10666 = vmatmul.msk.f32.gmra.mxu1 %vm382_vm0, %v17080_v48  ;;  %v8358_v55 = vsel %vm738_vm2, %v8355_v16, %v8356_v10  ;;  %v18362_v16 = vrot.slane %v18323_v53, 7  ;;  %v18366_v10 = vld [vmem:[#allocation43_spill] sm:$0xff] }
 0xae4   : > { %10699 = vmatmul.msk.f32.gmra.mxu2 %vm382_vm0, %v18320_v46  ;;  %v17373_v25 = vadd.f32 %v8358_v55, %v7953_v57 }
 0xae7   : > { %v8662_v41 = vpop.f32.mrf.mxu2 }
 0xae8   : > { %v8778_v30 = vrot.slane %v8662_v41, 1  ;;  %v8524_v46 = vpop.f32.mrf.mxu1  ;;  %v8307_v20 = vpop.f32.mrf.mxu0  ;;  %v18367_v41 = vld [vmem:[#allocation86_spill] sm:$0xff] }
 0xae9   : > { %v17381_v56 = vadd.f32 %v8524_v46, %v17116_v50  ;;  %v8357_v38 = vrot.slane %v8307_v20, 7  ;;  %v18365_v50 = vld [vmem:[#allocation83_spill] sm:$0xff] }
 0xaea   : > { %v8834_v54 = vsel %vm1193_vm1, %v8777_v51, %v8778_v30  ;;  %v18363_v51 = vld [vmem:[#allocation24_spill] sm:$0xff]  ;;  %v8325_v23 = vrot.slane %v18365_v50, 7 }
 0xaeb   : > { %v17378_v0 = vadd.f32 %v8834_v54, %v8578_v15  ;;  %10667 = vmatmul.msk.f32.gmra.mxu1 %vm382_vm0, %v17103_v22  ;;  %v8389_v24 = vsel %vm738_vm2, %v8357_v38, %v18362_v16  ;;  %v18368_v54 = vld [vmem:[#allocation62_spill] sm:$0xff] }
 0xaec   : > { %10700 = vmatmul.msk.f32.gmra.mxu2 %vm382_vm0, %v16769_v7  ;;  %v8390_v8 = vadd.f32 %v8389_v24, %v18363_v51  ;;  %v8379_v53 = vsel %vm738_vm2, %v8324_v9, %v8325_v23  ;;  %v8326_v46 = vrot.slane %v18368_v54, 7  ;;  %v18373_v54 = vld [vmem:[#allocation16_spill] sm:$0xff] }
 0xaed   : > { %v8400_v30 = vadd.f32 %v8379_v53, %v18367_v41 }
 0xaee   : > { %v8569_v57 = vadd.f32 %v18366_v10, %v8390_v8  ;;  %v8881_v8 = vadd.f32 %v17399_v60, %v17168_v62 }
 0xaef   : > { %v8665_v18 = vpop.f32.mrf.mxu2  ;;  %v8579_v38 = vadd.f32 %v17099_v3, %v8400_v30  ;;  %v18370_v3 = vld [vmem:[#allocation94_spill] sm:$0xff] }
 0xaf0   : > { %v8527_v55 = vpop.f32.mrf.mxu1  ;;  %v8844_v7 = vadd.f32 %v17143_v61, %v8569_v57  ;;  %v8779_v61 = vrot.slane %v8665_v18, 1  ;;  %v8378_v18 = vsel %vm738_vm2, %v8325_v23, %v8326_v46  ;;  %v8913_v10 = vmax.f32 %v8881_v8, 0.0 }
 0xaf1   : > { %v8401_v9 = vadd.f32 %v8378_v18, %v18370_v3  ;;  %v18371_v55 = vld [vmem:[#allocation38_spill] sm:$0xff]  ;;  %v8328_v46 = vrot.slane %v18373_v54, 7 }
 0xaf2   : > { %v8880_v63 = vadd.f32 %v17399_v60, %v8844_v7  ;;  %v18376_v3 = vld [vmem:[#allocation42_spill] sm:$0xff] }
 0xaf3   : > { %v8580_v7 = vadd.f32 %v18371_v55, %v8401_v9 }
 0xaf4   : > { %10701 = vmatmul.msk.f32.gmra.mxu2 %vm382_vm0, %v16783_v47  ;;  %v8912_v31 = vmax.f32 %v8880_v63, 0.0  ;;  %v8882_v63 = vadd.f32 %v17399_v60, %v17202_v52  ;;  %v18374_v52 = vld [vmem:[#allocation8_spill] sm:$0xff] }
 0xaf6   : > { %10717 = vmatmul.msk.f32.vlgmr.msrb.gmra.mxu3 %vm382_vm0, %v8912_v31  ;;  %v8914_v30 = vmax.f32 %v8882_v63, 0.0  ;;  %v18372_v31 = vld [vmem:[#allocation7_spill] sm:$0xff] }
 0xaf7   : > { %v8668_v15 = vpop.f32.mrf.mxu2 }
 0xaf8   : > { %v8780_v20 = vrot.slane %v8668_v15, 1  ;;  %v8529_v24 = vpop.f32.mrf.mxu1  ;;  %v8327_v15 = vrot.slane %v18372_v31, 7  ;;  %v18379_v31 = vld [vmem:[#allocation48_spill] sm:$0xff] }
 0xaf9   : > { %v17415_v47 = vadd.f32 %v8529_v24, %v17137_v6  ;;  %v18375_v24 = vld [vmem:[#allocation40_spill] sm:$0xff] }
 0xafa   : > { %v8833_v16 = vsel %vm1193_vm1, %v8779_v61, %v8780_v20  ;;  %v8329_v8 = vrot.slane %v18375_v24, 7 }
 0xafb   : > { %v17412_v51 = vadd.f32 %v8833_v16, %v8579_v38 }
 0xafc   : > { %10702 = vmatmul.msk.f32.gmra.mxu2 %vm382_vm0, %v18369_v19  ;;  %v8376_v55 = vsel %vm738_vm2, %v8328_v46, %v8329_v8  ;;  %v8886_v8 = vadd.f32 %v17399_v60, %v17303_v59 }
 0xafe   : > { %10718 = vmatmul.msk.f32.gmra.mxu3 %vm382_vm0, %v8913_v10 }
 0xaff   : > { %v8671_v50 = vpop.f32.mrf.mxu2 }
 0xb00   : > { %v8781_v57 = vrot.slane %v8671_v50, 1  ;;  %v8532_v53 = vpop.f32.mrf.mxu1 }
 0xb01   : > { %v17431_v23 = vadd.f32 %v8532_v53, %v17161_v5  ;;  %v8377_v5 = vsel %vm738_vm2, %v8327_v15, %v8328_v46 }
 0xb02   : > { %v8832_v6 = vsel %vm1193_vm1, %v8780_v20, %v8781_v57  ;;  %v8883_v20 = vadd.f32 %v17399_v60, %v17221_v49  ;;  %v8884_v57 = vadd.f32 %v17399_v60, %v17250_v26 }
 0xb03   : > { %v17428_v62 = vadd.f32 %v8832_v6, %v8580_v7  ;;  %v18377_v7 = vld [vmem:[#allocation51_spill] sm:$0xff]  ;;  %v18378_v6 = vld [vmem:[#allocation14_spill] sm:$0xff] }
 0xb04   : > { %10703 = vmatmul.msk.f32.gmra.mxu2 %vm382_vm0, %v16837_v2  ;;  %v8402_v2 = vadd.f32 %v8377_v5, %v18374_v52  ;;  %v8915_v16 = vmax.f32 %v8883_v20, 0.0  ;;  %v8403_v53 = vadd.f32 %v8376_v55, %v18378_v6  ;;  %v18380_v52 = vld [vmem:[#allocation64_spill] sm:$0xff] }
 0xb06   : > { %10719 = vmatmul.msk.f32.gmra.mxu3 %vm382_vm0, %v8914_v30  ;;  %v8581_v9 = vadd.f32 %v18376_v3, %v8402_v2  ;;  %v8582_v15 = vadd.f32 %v18379_v31, %v8403_v53  ;;  %v8330_v2 = vrot.slane %v18380_v52, 7  ;;  %v18383_v52 = vld [vmem:[#allocation53_spill] sm:$0xff] }
 0xb07   : > { %v8674_v41 = vpop.f32.mrf.mxu2 }
 0xb08   : > { %v8535_v61 = vpop.f32.mrf.mxu1  ;;  %v8782_v18 = vrot.slane %v8674_v41, 1  ;;  %v8916_v41 = vmax.f32 %v8884_v57, 0.0 }
 0xb09   : > { %v8885_v61 = vadd.f32 %v17399_v60, %v17270_v40 }
 0xb0b   : > { %v8917_v5 = vmax.f32 %v8885_v61, 0.0 }
 0xb0c   : > { %10704 = vmatmul.msk.f32.gmra.mxu2 %vm382_vm0, %v16849_v12 }
 0xb0e   : > { %10720 = vmatmul.msk.f32.gmra.mxu3 %vm382_vm0, %v8915_v16 }
 0xb0f   : > { %v8677_v38 = vpop.f32.mrf.mxu2 }
 0xb10   : > { %v8783_v19 = vrot.slane %v8677_v38, 1  ;;  %v8537_v50 = vpop.f32.mrf.mxu1  ;;  %v18381_v38 = vld [vmem:[#allocation37_spill] sm:$0xff] }
 0xb11   : > { %v17455_v12 = vadd.f32 %v8537_v50, %v17192_v36  ;;  %v8331_v16 = vrot.slane %v18381_v38, 7 }
 0xb12   : > { %v8831_v49 = vsel %vm1193_vm1, %v8782_v18, %v8783_v19 }
 0xb13   : > { %v17452_v10 = vadd.f32 %v8831_v49, %v8581_v9 }
 0xb14   : > { %10705 = vmatmul.msk.f32.gmra.mxu2 %vm382_vm0, %v18377_v7 }
 0xb16   : > { %10721 = vmatmul.msk.f32.gmra.mxu3 %vm382_vm0, %v8916_v41 }
 0xb17   : > { %v8680_v63 = vpop.f32.mrf.mxu2 }
 0xb18   : > { %v8784_v30 = vrot.slane %v8680_v63, 1  ;;  %v8540_v54 = vpop.f32.mrf.mxu1  ;;  %v8888_v63 = vadd.f32 %v17399_v60, %v17358_v1 }
 0xb19   : > { %v17471_v46 = vadd.f32 %v8540_v54, %v17214_v27  ;;  %v8375_v27 = vsel %vm738_vm2, %v8330_v2, %v8331_v16  ;;  %v8891_v54 = vadd.f32 %v17399_v60, %v17428_v62  ;;  %v8332_v2 = vrot.slane %v18383_v52, 7 }
 0xb1a   : > { %v8830_v36 = vsel %vm1193_vm1, %v8783_v19, %v8784_v30  ;;  %v8918_v19 = vmax.f32 %v8886_v8, 0.0  ;;  %v8920_v41 = vmax.f32 %v8888_v63, 0.0 }
 0xb1b   : > { %v17468_v26 = vadd.f32 %v8830_v36, %v8582_v15  ;;  %v8923_v61 = vmax.f32 %v8891_v54, 0.0 }
 0xb1c   : > { %10706 = vmatmul.msk.f32.gmra.mxu2 %vm382_vm0, %v16897_v21  ;;  %v18382_v21 = vld [vmem:[#allocation39_spill] sm:$0xff] }
 0xb1d   : > { %v8404_v40 = vadd.f32 %v8375_v27, %v18382_v21  ;;  %v18384_v27 = vld [vmem:[#allocation56_spill] sm:$0xff] }
 0xb1e   : > { %10722 = vmatmul.msk.f32.gmra.mxu3 %vm382_vm0, %v8917_v5 }
 0xb1f   : > { %v8683_v20 = vpop.f32.mrf.mxu2  ;;  %v8583_v49 = vadd.f32 %v17198_v32, %v8404_v40 }
 0xb20   : > { %v8543_v24 = vpop.f32.mrf.mxu1  ;;  %v8785_v3 = vrot.slane %v8683_v20, 1 }
 0xb24   : > { %10707 = vmatmul.msk.f32.gmra.mxu2 %vm382_vm0, %v16907_v44  ;;  %v8887_v44 = vadd.f32 %v17399_v60, %v17325_v45 }
 0xb26   : > { %10723 = vmatmul.msk.f32.gmra.mxu3 %vm382_vm0, %v8918_v19  ;;  %v8919_v6 = vmax.f32 %v8887_v44, 0.0 }
 0xb27   : > { %v17489_v18 = vpop.f32.mrf.mxu2 }
 0xb28   : > { %v8786_v9 = vrot.slane %v17489_v18, 1  ;;  %v8545_v50 = vpop.f32.mrf.mxu1 }
 0xb29   : > { %v17497_v55 = vadd.f32 %v8545_v50, %v17242_v58 }
 0xb2a   : > { %v8829_v59 = vsel %vm1193_vm1, %v8785_v3, %v8786_v9 }
 0xb2b   : > { %v8858_v57 = vadd.f32 %v8829_v59, %v8583_v49 }
 0xb2c   : > { %10708 = vmatmul.msk.f32.gmra.mxu2 %vm382_vm0, %v16933_v39  ;;  %v8889_v39 = vadd.f32 %v17399_v60, %v17378_v0 }
 0xb2d   : > { %v8894_v40 = vadd.f32 %v17399_v60, %v8858_v57 }
 0xb2e   : > { %10724 = vmatmul.msk.f32.gmra.mxu3 %vm382_vm0, %v8919_v6 }
 0xb2f   : > { %v8689_v7 = vpop.f32.mrf.mxu2  ;;  %v8926_v19 = vmax.f32 %v8894_v40, 0.0 }
 0xb30   : > { %v8548_v32 = vpop.f32.mrf.mxu1  ;;  %v8787_v8 = vrot.slane %v8689_v7, 1 }
 0xb31   : > { %v17505_v53 = vadd.f32 %v8548_v32, %v17265_v33  ;;  %v8921_v33 = vmax.f32 %v8889_v39, 0.0  ;;  %v18386_v32 = vld [vmem:[#allocation95_spill] sm:$0xff] }
 0xb34   : > { %10709 = vmatmul.msk.f32.gmra.mxu2 %vm382_vm0, %v16955_v28  ;;  %v8890_v28 = vadd.f32 %v17399_v60, %v17412_v51 }
 0xb36   : > { %10725 = vmatmul.msk.f32.gmra.mxu3 %vm382_vm0, %v8920_v41  ;;  %v8922_v36 = vmax.f32 %v8890_v28, 0.0 }
 0xb37   : > { %v8692_v58 = vpop.f32.mrf.mxu2 }
 0xb38   : > { %v8551_v45 = vpop.f32.mrf.mxu1  ;;  %v8788_v49 = vrot.slane %v8692_v58, 1 }
 0xb3c   : > { %10710 = vmatmul.msk.f32.gmra.mxu2 %vm382_vm0, %v16973_v11 }
 0xb3e   : > { %10726 = vmatmul.msk.f32.gmra.mxu3 %vm382_vm0, %v8921_v33 }
 0xb3f   : > { %v8695_v30 = vpop.f32.mrf.mxu2 }
 0xb40   : > { %v8553_v31 = vpop.f32.mrf.mxu1  ;;  %v8789_v3 = vrot.slane %v8695_v30, 1 }
 0xb41   : > { %v17518_v1 = vadd.f32 %v8553_v31, %v17295_v35  ;;  %v18387_v31 = vld [vmem:[#allocation47_spill] sm:$0xff] }
 0xb42   : > { %v8827_v50 = vsel %vm1193_vm1, %v8788_v49, %v8789_v3 }
 0xb44   : > { %10711 = vmatmul.msk.f32.gmra.mxu2 %vm382_vm0, %v17287_v13  ;;  %v8892_v13 = vadd.f32 %v17399_v60, %v17452_v10 }
 0xb46   : > { %10727 = vmatmul.msk.f32.gmra.mxu3 %vm382_vm0, %v8922_v36 }
 0xb47   : > { %v8698_v15 = vpop.f32.mrf.mxu2 }
 0xb48   : > { %v8556_v0 = vpop.f32.mrf.mxu1  ;;  %v8790_v44 = vrot.slane %v8698_v15, 1 }
 0xb49   : > { %v17526_v11 = vadd.f32 %v8556_v0, %v17320_v34  ;;  %v8924_v34 = vmax.f32 %v8892_v13, 0.0 }
 0xb4a   : > { %v8826_v6 = vsel %vm1193_vm1, %v8789_v3, %v8790_v44 }
 0xb4b   : > { %v8861_v63 = vadd.f32 %v8826_v6, %v18386_v32 }
 0xb4c   : > { %10712 = vmatmul.msk.f32.gmra.mxu2 %vm382_vm0, %v17312_v43  ;;  %v8893_v43 = vadd.f32 %v17399_v60, %v17468_v26 }
 0xb4d   : > { %v8897_v39 = vadd.f32 %v17399_v60, %v8861_v63 }
 0xb4e   : > { %10728 = vmatmul.msk.f32.gmra.mxu3 %vm382_vm0, %v8923_v61  ;;  %v8925_v24 = vmax.f32 %v8893_v43, 0.0 }
 0xb4f   : > { %v8701_v35 = vpop.f32.mrf.mxu2  ;;  %v8929_v36 = vmax.f32 %v8897_v39, 0.0 }
 0xb50   : > { %v8559_v51 = vpop.f32.mrf.mxu1 }
 0xb51   : > { %v18388_v51 = vld [vmem:[#allocation36_spill] sm:$0xff] }
 0xb54   : > { %10713 = vmatmul.msk.f32.gmra.mxu2 %vm382_vm0, %v17332_v4  ;;  %v8374_v4 = vsel %vm738_vm2, %v8331_v16, %v8332_v2 }
 0xb55   : > { %v8405_v21 = vadd.f32 %v8374_v4, %v18384_v27 }
 0xb56   : > { %10729 = vmatmul.msk.f32.gmra.mxu3 %vm382_vm0, %v8924_v34 }
 0xb57   : > { %v8704_v20 = vpop.f32.mrf.mxu2  ;;  %v8584_v38 = vadd.f32 %v17219_v29, %v8405_v21 }
 0xb58   : > { %v8561_v5 = vpop.f32.mrf.mxu1  ;;  %v8792_v45 = vrot.slane %v8704_v20, 1 }
 0xb59   : > { %v17539_v62 = vadd.f32 %v8561_v5, %v17350_v17 }
 0xb5c   : > { %10714 = vmatmul.msk.f32.gmra.mxu2 %vm382_vm0, %v17059_v14  ;;  %v8828_v14 = vsel %vm1193_vm1, %v8786_v9, %v8787_v8  ;;  %v18385_v9 = vld [vmem:[#allocation10_spill] sm:$0xff] }
 0xb5d   : > { %v8859_v16 = vadd.f32 %v8828_v14, %v8584_v38 }
 0xb5e   : > { %10730 = vmatmul.msk.f32.gmra.mxu3 %vm382_vm0, %v8925_v24 }
 0xb5f   : > { %v8707_v10 = vpop.f32.mrf.mxu2 }
 0xb60   : > { %v8564_v17 = vpop.f32.mrf.mxu1  ;;  %v8793_v0 = vrot.slane %v8707_v10, 1 }
 0xb61   : > { %v17553_v26 = vadd.f32 %v8564_v17, %v17373_v25  ;;  %v8895_v25 = vadd.f32 %v17399_v60, %v8859_v16 }
 0xb62   : > { %v8824_v61 = vsel %vm1193_vm1, %v8792_v45, %v8793_v0 }
 0xb63   : > { %v8927_v29 = vmax.f32 %v8895_v25, 0.0  ;;  %v8863_v13 = vadd.f32 %v8824_v61, %v18388_v51 }
 0xb64   : > { %10715 = vmatmul.msk.f32.gmra.mxu2 %vm382_vm0, %v17080_v48  ;;  %v8860_v48 = vadd.f32 %v8827_v50, %v18385_v9 }
 0xb65   : > { %v8899_v52 = vadd.f32 %v17399_v60, %v8863_v13 }
 0xb66   : > { %10731 = vmatmul.msk.f32.gmra.mxu3 %vm382_vm0, %v8926_v19  ;;  %v8896_v7 = vadd.f32 %v17399_v60, %v8860_v48 }
 0xb67   : > { %v8710_v18 = vpop.f32.mrf.mxu2  ;;  %v8931_v8 = vmax.f32 %v8899_v52, 0.0 }
 0xb68   : > { %v8567_v59 = vpop.f32.mrf.mxu1  ;;  %v8928_v41 = vmax.f32 %v8896_v7, 0.0  ;;  %v8794_v43 = vrot.slane %v8710_v18, 1 }
 0xb6c   : > { %10716 = vmatmul.msk.f32.gmra.mxu2 %vm382_vm0, %v17103_v22  ;;  %v8791_v22 = vrot.slane %v8701_v35, 1 }
 0xb6e   : > { %10732 = vmatmul.msk.f32.gmra.mxu3 %vm382_vm0, %v8927_v29  ;;  %v8825_v30 = vsel %vm1193_vm1, %v8791_v22, %v8792_v45 }
 0xb6f   : > { %v8713_v57 = vpop.f32.mrf.mxu2  ;;  %v8862_v28 = vadd.f32 %v8825_v30, %v18387_v31 }
 0xb70   : > { %v8795_v5 = vrot.slane %v8713_v57, 1 }
 0xb71   : > { %v8898_v54 = vadd.f32 %v17399_v60, %v8862_v28 }
 0xb72   : > { %v8823_v2 = vsel %vm1193_vm1, %v8794_v43, %v8795_v5 }
 0xb73   : > { %v8930_v34 = vmax.f32 %v8898_v54, 0.0  ;;  %v8864_v24 = vadd.f32 %v8823_v2, %v17361_v42 }
 0xb75   : > { %v8900_v27 = vadd.f32 %v17399_v60, %v8864_v24 }
 0xb76   : > { %10733 = vmatmul.msk.f32.gmra.mxu3 %vm382_vm0, %v8928_v41 }
 0xb77   : > { %v8716_v58 = vpop.f32.mrf.mxu2  ;;  %v8932_v16 = vmax.f32 %v8900_v27, 0.0 }
 0xb78   : > { %v8796_v17 = vrot.slane %v8716_v58, 1 }
 0xb79   : > { %v9058_v33 = vpop.f32.mrf.mxu3 }
 0xb7a   : > { %9154 = vxpose.xlu0.b32.start [1/16] (narrow) %v9058_v33, 16  ;;  %v8822_v21 = vsel %vm1193_vm1, %v8795_v5, %v8796_v17 }
 0xb7b   : > { %v8865_v14 = vadd.f32 %v8822_v21, %v17381_v56 }
 0xb7d   : > { %v8901_v19 = vadd.f32 %v17399_v60, %v8865_v14 }
 0xb7e   : > { %10734 = vmatmul.msk.f32.gmra.mxu3 %vm382_vm0, %v8929_v36 }
 0xb7f   : > { %v8719_v15 = vpop.f32.mrf.mxu2  ;;  %v8933_v50 = vmax.f32 %v8901_v19, 0.0 }
 0xb80   : > { %v8797_v42 = vrot.slane %v8719_v15, 1 }
 0xb81   : > { %v9061_v35 = vpop.f32.mrf.mxu3 }
 0xb82   : > { %9155 = vxpose.xlu0.b32.cont [2/16] (narrow) %v9061_v35, 16 }
 0xb86   : > { %10735 = vmatmul.msk.f32.gmra.mxu3 %vm382_vm0, %v8930_v34 }
 0xb87   : > { %v8722_v20 = vpop.f32.mrf.mxu2 }
 0xb88   : > { %v8798_v18 = vrot.slane %v8722_v20, 1 }
 0xb89   : > { %v9064_v10 = vpop.f32.mrf.mxu3 }
 0xb8a   : > { %9156 = vxpose.xlu0.b32.cont [3/16] (narrow) %v9064_v10, 16  ;;  %v8821_v3 = vsel %vm1193_vm1, %v8797_v42, %v8798_v18 }
 0xb8b   : > { %v8866_v59 = vadd.f32 %v8821_v3, %v17415_v47 }
 0xb8d   : > { %v8902_v56 = vadd.f32 %v17399_v60, %v8866_v59 }
 0xb8e   : > { %10736 = vmatmul.msk.f32.gmra.mxu3 %vm382_vm0, %v8931_v8 }
 0xb8f   : > { %v8725_v4 = vpop.f32.mrf.mxu2  ;;  %v8934_v7 = vmax.f32 %v8902_v56, 0.0 }
 0xb90   : > { %v8799_v9 = vrot.slane %v8725_v4, 1 }
 0xb91   : > { %v9067_v40 = vpop.f32.mrf.mxu3 }
 0xb92   : > { %9157 = vxpose.xlu0.b32.cont [4/16] (narrow) %v9067_v40, 16  ;;  %v8820_v48 = vsel %vm1193_vm1, %v8798_v18, %v8799_v9 }
 0xb93   : > { %v8867_v29 = vadd.f32 %v8820_v48, %v17431_v23 }
 0xb95   : > { %v8903_v32 = vadd.f32 %v17399_v60, %v8867_v29 }
 0xb96   : > { %10737 = vmatmul.msk.f32.gmra.mxu3 %vm382_vm0, %v8932_v16 }
 0xb97   : > { %v8728_v38 = vpop.f32.mrf.mxu2  ;;  %v8935_v22 = vmax.f32 %v8903_v32, 0.0 }
 0xb98   : > { %v8800_v47 = vrot.slane %v8728_v38, 1 }
 0xb99   : > { %v9070_v49 = vpop.f32.mrf.mxu3 }
 0xb9a   : > { %9158 = vxpose.xlu0.b32.cont [5/16] (narrow) %v9070_v49, 16 }
 0xb9e   : > { %10738 = vmatmul.msk.f32.gmra.mxu3 %vm382_vm0, %v8933_v50 }
 0xb9f   : > { %v8731_v25 = vpop.f32.mrf.mxu2 }
 0xba0   : > { %v8801_v6 = vrot.slane %v8731_v25, 1 }
 0xba1   : > { %v9073_v57 = vpop.f32.mrf.mxu3 }
 0xba2   : > { %9159 = vxpose.xlu0.b32.cont [6/16] (narrow) %v9073_v57, 16  ;;  %v8819_v63 = vsel %vm1193_vm1, %v8800_v47, %v8801_v6 }
 0xba3   : > { %v8868_v41 = vadd.f32 %v8819_v63, %v17455_v12 }
 0xba5   : > { %v8904_v23 = vadd.f32 %v17399_v60, %v8868_v41 }
 0xba6   : > { %10739 = vmatmul.msk.f32.gmra.mxu3 %vm382_vm0, %v8934_v7 }
 0xba7   : > { %v8734_v44 = vpop.f32.mrf.mxu2  ;;  %v8936_v15 = vmax.f32 %v8904_v23, 0.0 }
 0xba8   : > { %v8802_v39 = vrot.slane %v8734_v44, 1 }
 0xba9   : > { %v9076_v58 = vpop.f32.mrf.mxu3 }
 0xbaa   : > { %9160 = vxpose.xlu0.b32.cont [7/16] (narrow) %v9076_v58, 16  ;;  %v8818_v30 = vsel %vm1193_vm1, %v8801_v6, %v8802_v39 }
 0xbab   : > { %v8869_v31 = vadd.f32 %v8818_v30, %v17471_v46  ;;  %v9219_v30 = vld [vmem:[%s17667_s8 + $0x8] sm:$0xf] }
 0xbad   : > { %v8905_v0 = vadd.f32 %v17399_v60, %v8869_v31 }
 0xbae   : > { %10740 = vmatmul.msk.f32.gmra.mxu3 %vm382_vm0, %v8935_v22 }
 0xbaf   : > { %v8737_v45 = vpop.f32.mrf.mxu2  ;;  %v8937_v13 = vmax.f32 %v8905_v0, 0.0 }
 0xbb0   : > { %v8803_v12 = vrot.slane %v8737_v45, 1 }
 0xbb1   : > { %v9079_v33 = vpop.f32.mrf.mxu3 }
 0xbb2   : > { %9161 = vxpose.xlu0.b32.cont [8/16] (narrow) %v9079_v33, 16 }
 0xbb6   : > { %10741 = vmatmul.msk.f32.gmra.mxu3 %vm382_vm0, %v8936_v15 }
 0xbb7   : > { %v8740_v28 = vpop.f32.mrf.mxu2 }
 0xbb8   : > { %v8804_v36 = vrot.slane %v8740_v28, 1 }
 0xbb9   : > { %v9082_v61 = vpop.f32.mrf.mxu3 }
 0xbba   : > { %v8817_v54 = vsel %vm1193_vm1, %v8803_v12, %v8804_v36  ;;  %9162 = vxpose.xlu0.b32.cont [9/16] (narrow) %v9082_v61, 16 }
 0xbbb   : > { %v8870_v35 = vadd.f32 %v8817_v54, %v17497_v55 }
 0xbbd   : > { %v8906_v46 = vadd.f32 %v17399_v60, %v8870_v35 }
 0xbbe   : > { %10742 = vmatmul.msk.f32.gmra.mxu3 %vm382_vm0, %v8937_v13 }
 0xbbf   : > { %v8743_v51 = vpop.f32.mrf.mxu2  ;;  %v8938_v2 = vmax.f32 %v8906_v46, 0.0 }
 0xbc0   : > { %v8805_v20 = vrot.slane %v8743_v51, 1 }
 0xbc1   : > { %v9085_v5 = vpop.f32.mrf.mxu3 }
 0xbc2   : > { %v8816_v34 = vsel %vm1193_vm1, %v8804_v36, %v8805_v20  ;;  %9163 = vxpose.xlu0.b32.cont [10/16] (narrow) %v9085_v5, 16 }
 0xbc3   : > { %v8871_v43 = vadd.f32 %v8816_v34, %v17505_v53 }
 0xbc5   : > { %v8907_v55 = vadd.f32 %v17399_v60, %v8871_v43 }
 0xbc6   : > { %10743 = vmatmul.msk.f32.gmra.mxu3 %vm382_vm0, %v8938_v2 }
 0xbc7   : > { %v8746_v52 = vpop.f32.mrf.mxu2  ;;  %v8939_v4 = vmax.f32 %v8907_v55, 0.0 }
 0xbc8   : > { %v8806_v8 = vrot.slane %v8746_v52, 1 }
 0xbc9   : > { %v9088_v10 = vpop.f32.mrf.mxu3 }
 0xbca   : > { %9164 = vxpose.xlu0.b32.cont [11/16] (narrow) %v9088_v10, 16 }
 0xbce   : > { %10744 = vmatmul.msk.f32.gmra.mxu3 %vm382_vm0, %v8939_v4 }
 0xbcf   : > { %v8749_v24 = vpop.f32.mrf.mxu2 }
 0xbd0   : > { %v8807_v17 = vrot.slane %v8749_v24, 1 }
 0xbd1   : > { %v9091_v53 = vpop.f32.mrf.mxu3 }
 0xbd2   : > { %v8815_v27 = vsel %vm1193_vm1, %v8806_v8, %v8807_v17  ;;  %9165 = vxpose.xlu0.b32.cont [12/16] (narrow) %v9091_v53, 16 }
 0xbd3   : > { %v8872_v21 = vadd.f32 %v8815_v27, %v17518_v1 }
 0xbd5   : > { %v8908_v40 = vadd.f32 %v17399_v60, %v8872_v21 }
 0xbd7   : > { %v8752_v14 = vpop.f32.mrf.mxu2  ;;  %v8940_v38 = vmax.f32 %v8908_v40, 0.0 }
 0xbd8   : > { %v8808_v16 = vrot.slane %v8752_v14, 1 }
 0xbd9   : > { %10745 = vmatmul.msk.f32.gmra.mxu3 %vm382_vm0, %v8940_v38  ;;  %v9094_v19 = vpop.f32.mrf.mxu3 }
 0xbda   : > { %v8814_v18 = vsel %vm1193_vm1, %v8807_v17, %v8808_v16  ;;  %9166 = vxpose.xlu0.b32.cont [13/16] (narrow) %v9094_v19, 16 }
 0xbdb   : > { %v8873_v42 = vadd.f32 %v8814_v18, %v17526_v11 }
 0xbdd   : > { %v8909_v3 = vadd.f32 %v17399_v60, %v8873_v42 }
 0xbdf   : > { %v8755_v49 = vpop.f32.mrf.mxu2  ;;  %v8941_v1 = vmax.f32 %v8909_v3, 0.0 }
 0xbe0   : > { %v8809_v50 = vrot.slane %v8755_v49, 1 }
 0xbe1   : > { %10746 = vmatmul.msk.f32.gmra.mxu3 %vm382_vm0, %v8941_v1  ;;  %v9097_v59 = vpop.f32.mrf.mxu3 }
 0xbe2   : > { %9167 = vxpose.xlu0.b32.cont [14/16] (narrow) %v9097_v59, 16 }
 0xbe7   : > { %v8758_v25 = vpop.f32.mrf.mxu2 }
 0xbe8   : > { %v8810_v9 = vrot.slane %v8758_v25, 1 }
 0xbe9   : > { %v9100_v57 = vpop.f32.mrf.mxu3 }
 0xbea   : > { %v8813_v56 = vsel %vm1193_vm1, %v8809_v50, %v8810_v9  ;;  %9168 = vxpose.xlu0.b32.cont [15/16] (narrow) %v9100_v57, 16 }
 0xbeb   : > { %v8874_v48 = vadd.f32 %v8813_v56, %v17539_v62 }
 0xbed   : > { %v8910_v11 = vadd.f32 %v17399_v60, %v8874_v48 }
 0xbef   : > { %v8761_v29 = vpop.f32.mrf.mxu2  ;;  %v8942_v44 = vmax.f32 %v8910_v11, 0.0 }
 0xbf0   : > { %v8811_v7 = vrot.slane %v8761_v29, 1 }
 0xbf1   : > { %10747 = vmatmul.msk.f32.gmra.mxu3 %vm382_vm0, %v8942_v44  ;;  %v9103_v32 = vpop.f32.mrf.mxu3 }
 0xbf2   : > { %v8812_v6 = vsel %vm1193_vm1, %v8810_v9, %v8811_v7  ;;  %9169 = vxpose.xlu0.b32.end [16/16] (narrow) %v9103_v32, 16 }
 0xbf3   : > { %v8875_v47 = vadd.f32 %v8812_v6, %v17553_v26  ;;  %v11011_v26 = vmov 0  }
 0xbf4   : > { %10766 = vset.pattern.permute.xlu2 %v11011_v26 }
 0xbf5   : > { %v8911_v63 = vadd.f32 %v17399_v60, %v8875_v47  ;;  %v9218_v60 = vld [vmem:[%s17667_s8] sm:$0xff] }
 0xbf6   : > { %9222 = vperm.xlu2 %10766, %v9218_v60  }
 0xbf7   : > { %v8943_v58 = vmax.f32 %v8911_v63, 0.0 }
 0xbf9   : > { %10748 = vmatmul.msk.f32.gmra.mxu3 %vm382_vm0, %v8943_v58  ;;  %v9106_v62 = vpop.f32.mrf.mxu3 }
 0xbfa   : > { %9186 = vxpose.xlu1.b32.start [1/16] (narrow) %v9106_v62, 16 }
 0xbfe   : > { %9227 = vperm.xlu2 %10766, %v9219_v30  }
 0xc01   : > { %v9109_v41 = vpop.f32.mrf.mxu3 }
 0xc02   : > { %9187 = vxpose.xlu1.b32.cont [2/16] (narrow) %v9109_v41, 16 }
 0xc09   : > { %v9112_v45 = vpop.f32.mrf.mxu3 }
 0xc0a   : > { %9188 = vxpose.xlu1.b32.cont [3/16] (narrow) %v9112_v45, 16 }
 0xc11   : > { %v9115_v22 = vpop.f32.mrf.mxu3 }
 0xc12   : > { %9189 = vxpose.xlu1.b32.cont [4/16] (narrow) %v9115_v22, 16 }
 0xc19   : > { %v9118_v39 = vpop.f32.mrf.mxu3 }
 0xc1a   : > { %9190 = vxpose.xlu1.b32.cont [5/16] (narrow) %v9118_v39, 16 }
 0xc1e   : > { %v9170_v35 = vpop.trf.xlu0 }
 0xc21   : > { %v9121_v37 = vpop.f32.mrf.mxu3 }
 0xc22   : > { %9191 = vxpose.xlu1.b32.cont [6/16] (narrow) %v9121_v37, 16 }
 0xc26   : > { %v9171_v20 = vpop.trf.xlu0 }
 0xc29   : > { %v9124_v23 = vpop.f32.mrf.mxu3 }
 0xc2a   : > { %9192 = vxpose.xlu1.b32.cont [7/16] (narrow) %v9124_v23, 16 }
 0xc31   : > { %v9127_v33 = vpop.f32.mrf.mxu3 }
 0xc32   : > { %9193 = vxpose.xlu1.b32.cont [8/16] (narrow) %v9127_v33, 16 }
 0xc39   : > { %v9130_v31 = vpop.f32.mrf.mxu3 }
 0xc3a   : > { %9194 = vxpose.xlu1.b32.cont [9/16] (narrow) %v9130_v31, 16 }
 0xc41   : > { %v9133_v28 = vpop.f32.mrf.mxu3 }
 0xc42   : > { %9195 = vxpose.xlu1.b32.cont [10/16] (narrow) %v9133_v28, 16 }
 0xc49   : > { %v9136_v15 = vpop.f32.mrf.mxu3 }
 0xc4a   : > { %9196 = vxpose.xlu1.b32.cont [11/16] (narrow) %v9136_v15, 16 }
 0xc50   : > { %v9223_v51 = vpop.permute.xlu2 %9222 }
 0xc51   : > { %v9139_v36 = vpop.f32.mrf.mxu3  ;;  %v9230_v13 = vadd.f32 %v9223_v51, %v9170_v35 }
 0xc52   : > { %9197 = vxpose.xlu1.b32.cont [12/16] (narrow) %v9139_v36, 16 }
 0xc53   : > { %9234 = vst [vmem:[%s332_s13] sm:$0xff] %v9230_v13 }
 0xc58   : > { %v9228_v46 = vpop.permute.xlu2 %9227 }
 0xc59   : > { %10767 = vset.pattern.permute.xlu0 %v11011_v26  ;;  %v9232_v34 = vadd.f32 %v9228_v46, %v9171_v20 }
 0xc5b   : > { %9236 = vst [vmem:[%s332_s13 + $0x10] sm:$0xf] %v9232_v34 }
 0xc5c   : > { %v9142_v12 = vpop.f32.mrf.mxu3 }
 0xc5d   : > { %9198 = vxpose.xlu1.b32.cont [13/16] (narrow) %v9142_v12, 16 }
 0xc64   : > { %v9145_v0 = vpop.f32.mrf.mxu3 }
 0xc65   : > { %9199 = vxpose.xlu1.b32.cont [14/16] (narrow) %v9145_v0, 16 }
 0xc74   : > { %v9148_v54 = vpop.f32.mrf.mxu3 }
 0xc75   : > { %9200 = vxpose.xlu1.b32.cont [15/16] (narrow) %v9148_v54, 16 }
 0xc7c   : > { %v9151_v61 = vpop.f32.mrf.mxu3 }
 0xc7d   : > { %9201 = vxpose.xlu1.b32.end [16/16] (narrow) %v9151_v61, 16 }
 0xca9   : > { %v9202_v5 = vpop.trf.xlu1 }
 0xcaa   : > { %v9231_v43 = vadd.f32 %v9223_v51, %v9202_v5 }
 0xcac   : > { %9235 = vst [vmem:[%s332_s13 + $0x8] sm:$0xff] %v9231_v43 }
 0xcb1   : > { %v9203_v52 = vpop.trf.xlu1 }
 0xcb2   : > { %v9233_v2 = vadd.f32 %v9228_v46, %v9203_v52 }
 0xcb4   : > { %9237 = vst [vmem:[%s332_s13 + $0x18] sm:$0xf] %v9233_v2 }
 0xcb5 PF: > { %s19_s30 = sadd.s32 1, %s11008_s30  }
 0xcb6   : > { %p16_p4 = scmp.ge.s32.totalorder %s19_s30, 4  }
 0xcb8   :  { %18 = sbr.rel (!%p16_p4) target bundleno = 1 (0x1), region = 118 }

</bundles_post_ra>
